<compile_context>
chip_gen: v7x
topology: tpu7x:2x2x1
jax: 0.10.0
libtpu: 0.0.40
codegen_flags: <defaults>
</compile_context>

<pallas_src>
import numpy as np

import jax
import jax.numpy as jnp
from jax import lax
from jax.experimental import pallas as pl
from jax.experimental.pallas import tpu as pltpu


# ----------------------------- fixed geometry ------------------------------
# Input spatial size is fixed at 32x32 by the architecture (FC1 expects 128).
H0, W0, C0 = 32, 32, 3
R0 = H0 * W0                 # 1024 flattened input rows
R0P = R0 + 8                 # padded so conv1 tap slices stay in bounds

K1, C1 = 3, 16               # Conv1: 3x3, 3 -> 16
H1, WB1 = 30, W0             # conv1 output: 30 valid rows, buffer width 32
R1 = H1 * WB1                # 960

WB1P = 16                    # pool1 output buffer width (valid 15x15)
R1P = 248                    # padded rows (>= max conv2 tap offset + R2)

K2, C2 = 4, 64               # Conv2: 4x4, 16 -> 64
H2, WB2 = 12, WB1P           # conv2 output: 12 valid rows, buffer width 16
R2 = H2 * WB2                # 192

WB2P = 8                     # pool2 output buffer width (valid 6x6)
R2P = 56                     # padded rows (>= max conv3 tap offset + R3)

K3, C3 = 3, 128              # Conv3: 3x3, 64 -> 128
H3, WB3 = 4, WB2P            # conv3 output: 4 valid rows, buffer width 8
R3 = H3 * WB3                # 32

N_CLASSES = 10
NCLS_PAD = 128               # lane-dense FC output width


# ----------------------------- fused kernel --------------------------------

def _m5_fused_kernel(x_ref, w1_ref, b1_ref, p1_ref, w2_ref, b2_ref, p2_ref,
                     w3_ref, b3_ref, p3_ref, wfc_ref, bfc_ref,
                     out_ref, a2_ref, a3_ref):
    f32 = jnp.float32

    def conv_taps(src_ref, w_ref, rows_out, wbuf, k, cin):
        # Sum of kh*kw shifted MXU dots, K = Cin per tap, f32 accumulation.
        acc = None
        for i in range(k):
            for j in range(k):
                t = i * k + j
                patch = src_ref[pl.ds(i * wbuf + j, rows_out), :]   # (rows, cin)
                wt = w_ref[pl.ds(t * cin, cin), :]                  # (cin, cout)
                d = jnp.dot(patch, wt, preferred_element_type=f32)
                acc = d if acc is None else acc + d
        return acc

    # Conv1 (3x3, 3->16) + bias + Square; buffer (30, 32) x 16 channels.
    a1 = conv_taps(x_ref, w1_ref, R1, W0, K1, C0) + b1_ref[...]
    a1 = a1 * a1
    # AvgPool1 as constant-matrix matmul -> scratch (248, 16).
    a2_ref[...] = jnp.dot(p1_ref[...], a1, preferred_element_type=f32)

    # Conv2 (4x4, 16->64) + bias + Square; buffer (12, 16) x 64 channels.
    a2 = conv_taps(a2_ref, w2_ref, R2, WB1P, K2, C1) + b2_ref[...]
    a2 = a2 * a2
    # AvgPool2 -> scratch (56, 64).
    a3_ref[...] = jnp.dot(p2_ref[...], a2, preferred_element_type=f32)

    # Conv3 (3x3, 64->128) + bias + Square; buffer (4, 8) x 128 channels.
    a3 = conv_taps(a3_ref, w3_ref, R3, WB2P, K3, C2) + b3_ref[...]
    a3 = a3 * a3
    # AvgPool3 (4x4 -> 1x1) as a (1, 32) matmul -> (1, 128) pooled features.
    pooled = jnp.dot(p3_ref[...], a3, preferred_element_type=f32)

    # FC1, padded to 128 output lanes (columns >= N_CLASSES are zero).
    out_ref[...] = (jnp.dot(pooled, wfc_ref[...], preferred_element_type=f32)
                    + bfc_ref[...])


def m5_forward(prep, x_nchw):
    b = x_nchw.shape[0]
    assert x_nchw.shape[1:] == (C0, H0, W0), x_nchw.shape

    # NCHW -> NHWC -> flattened (rows, channels) slab, zero-padded rows.
    x = jnp.transpose(x_nchw, (0, 2, 3, 1)).reshape(b, R0, C0)
    x = jnp.pad(x, ((0, 0), (0, R0P - R0), (0, 0)))

    def whole(arr):
        shape = arr.shape
        return pl.BlockSpec(shape, lambda i, _s=shape: (0,) * len(_s))

    in_specs = [
        pl.BlockSpec((None, R0P, C0), lambda i: (i, 0, 0)),
        whole(prep["w1"]), whole(prep["b1"]), whole(prep["p1"]),
        whole(prep["w2"]), whole(prep["b2"]), whole(prep["p2"]),
        whole(prep["w3"]), whole(prep["b3"]), whole(prep["p3"]),
        whole(prep["wfc"]), whole(prep["bfc"]),
    ]

    out = pl.pallas_call(
        _m5_fused_kernel,
        out_shape=jax.ShapeDtypeStruct((b, 1, NCLS_PAD), jnp.float32),
        grid=(b,),
        in_specs=in_specs,
        out_specs=pl.BlockSpec((None, 1, NCLS_PAD), lambda i: (i, 0, 0)),
        scratch_shapes=[pltpu.VMEM((R1P, C1), jnp.float32),
                        pltpu.VMEM((R2P, C2), jnp.float32)],
        compiler_params=pltpu.CompilerParams(
            dimension_semantics=("parallel",),
            vmem_limit_bytes=32 * 1024 * 1024),
    )(x, prep["w1"], prep["b1"], prep["p1"],
      prep["w2"], prep["b2"], prep["p2"],
      prep["w3"], prep["b3"], prep["p3"],
      prep["wfc"], prep["bfc"])

    return out[:, 0, :N_CLASSES]


# ----------------------------- parameter prep ------------------------------

def _pool_matrix(h_in, wbuf_in, h_out, w_out, wbuf_out, rows_out, k):
    # Sparse average-pooling matrix over the flattened (h_in, wbuf_in) slab.
    # Rows beyond the valid h_out x w_out region stay zero (padding / garbage).
    p = np.zeros((rows_out, h_in * wbuf_in), np.float32)
    scale = 1.0 / (k * k)
    for h in range(h_out):
        for w in range(w_out):
            r = h * wbuf_out + w
            for di in range(k):
                for dj in range(k):
                    p[r, (k * h + di) * wbuf_in + (k * w + dj)] = scale
    return jnp.asarray(p)


def prepare_params(params):
    # Hoist all weight re-layouts out of the traced forward.
    def conv_w(w_oihw):
        cout, cin, kh, kw = w_oihw.shape
        # OIHW -> (kh*kw*cin, cout): rows [t*cin, (t+1)*cin) hold tap t = i*kw+j.
        return jnp.transpose(w_oihw, (2, 3, 1, 0)).reshape(kh * kw * cin, cout)

    n_out = params["wfc"].shape[0]
    wfc_pad = jnp.zeros((128, NCLS_PAD), jnp.float32).at[:, :n_out].set(params["wfc"].T)
    bfc_pad = jnp.zeros((1, NCLS_PAD), jnp.float32).at[0, :n_out].set(params["bfc"])

    return {
        "w1": conv_w(params["w1"]), "b1": params["b1"].reshape(1, -1),
        "w2": conv_w(params["w2"]), "b2": params["b2"].reshape(1, -1),
        "w3": conv_w(params["w3"]), "b3": params["b3"].reshape(1, -1),
        "p1": _pool_matrix(H1, WB1, 15, 15, WB1P, R1P, 2),
        "p2": _pool_matrix(H2, WB2, 6, 6, WB2P, R2P, 2),
        "p3": _pool_matrix(H3, WB3, 1, 1, 1, 1, 4),
        "wfc": wfc_pad, "bfc": bfc_pad,
    }


# ----------------------------- reference (pure JAX) ------------------------

def m5_reference(params, x_nchw):
    def conv(x, w, bias):
        y = lax.conv_general_dilated(
            x, w, window_strides=(1, 1), padding="VALID",
            dimension_numbers=("NCHW", "OIHW", "NCHW"),
            precision=lax.Precision.HIGHEST)
        return y + bias[None, :, None, None]

    def pool(x, k):
        b_, c, h, w = x.shape
        return x.reshape(b_, c, h // k, k, w // k, k).mean(axis=(3, 5))

    out = conv(x_nchw, params["w1"], params["b1"]); out = out * out; out = pool(out, 2)
    out = conv(out, params["w2"], params["b2"]); out = out * out; out = pool(out, 2)
    out = conv(out, params["w3"], params["b3"]); out = out * out; out = pool(out, 4)
    flat = out.reshape(out.shape[0], -1)
    return (jnp.dot(flat, params["wfc"].T, precision=lax.Precision.HIGHEST)
            + params["bfc"])


# ----------------------------- parameter init ------------------------------

def init_params(key, output=10):
    ks = jax.random.split(key, 8)

    def conv_w(k, cout, cin, kh, kw):
        fan_in = cin * kh * kw
        return jax.random.normal(k, (cout, cin, kh, kw), jnp.float32) / jnp.sqrt(fan_in)

    return {
        "w1": conv_w(ks[0], 16, 3, 3, 3),
        "b1": 0.01 * jax.random.normal(ks[1], (16,), jnp.float32),
        "w2": conv_w(ks[2], 64, 16, 4, 4),
        "b2": 0.01 * jax.random.normal(ks[3], (64,), jnp.float32),
        "w3": conv_w(ks[4], 128, 64, 3, 3),
        "b3": 0.01 * jax.random.normal(ks[5], (128,), jnp.float32),
        "wfc": jax.random.normal(ks[6], (output, 128), jnp.float32) / jnp.sqrt(128.0),
        "bfc": 0.01 * jax.random.normal(ks[7], (output,), jnp.float32),
    }


if __name__ == "__main__":
    key = jax.random.PRNGKey(0)
    pkey, xkey = jax.random.split(key)
    params = init_params(pkey, output=N_CLASSES)
    # Spatial size fixed at 32x32 by the architecture (FC1 expects 1*1*128).
    x = jax.random.normal(xkey, (2, 3, 32, 32), jnp.float32)

    prep = prepare_params(params)            # one-time, outside the forward
    fwd = jax.jit(m5_forward)

    out = jax.block_until_ready(fwd(prep, x))
    assert out.shape == (2, N_CLASSES), out.shape

    ref = m5_reference(params, x)
    max_err = float(jnp.max(jnp.abs(out - ref)))
    assert jnp.allclose(out, ref, rtol=1e-2, atol=2e-3), max_err

    print("KERNEL_OK")
</pallas_src>

<mosaic_0001>
module attributes {stable_mosaic.version = 11 : i64} {
  func.func @_m5_fused_kernel(%arg0: i32, %arg1: memref<1x1032x3xf32, #tpu.memory_space<vmem>>, %arg2: memref<27x16xf32, #tpu.memory_space<vmem>>, %arg3: memref<1x16xf32, #tpu.memory_space<vmem>>, %arg4: memref<248x960xf32, #tpu.memory_space<vmem>>, %arg5: memref<256x64xf32, #tpu.memory_space<vmem>>, %arg6: memref<1x64xf32, #tpu.memory_space<vmem>>, %arg7: memref<56x192xf32, #tpu.memory_space<vmem>>, %arg8: memref<576x128xf32, #tpu.memory_space<vmem>>, %arg9: memref<1x128xf32, #tpu.memory_space<vmem>>, %arg10: memref<1x32xf32, #tpu.memory_space<vmem>>, %arg11: memref<128x128xf32, #tpu.memory_space<vmem>>, %arg12: memref<1x128xf32, #tpu.memory_space<vmem>>, %arg13: memref<1x1x128xf32, #tpu.memory_space<vmem>>, %arg14: memref<248x16xf32, #tpu.memory_space<vmem>>, %arg15: memref<56x64xf32, #tpu.memory_space<vmem>>) attributes {dimension_semantics = [#tpu.dimension_semantics<parallel>], iteration_bounds = array<i64: 2>, scalar_prefetch = 0 : i64, scratch_operands = 2 : i64, tpu.core_type = #tpu.core_type<tc>, window_params = [{transform_indices = @transform_0, window_bounds = array<i64: 1, 1032, 3>}, {pipeline_mode = #tpu.pipeline_mode<synchronous>, transform_indices = @transform_1, window_bounds = array<i64: 27, 16>}, {pipeline_mode = #tpu.pipeline_mode<synchronous>, transform_indices = @transform_2, window_bounds = array<i64: 1, 16>}, {pipeline_mode = #tpu.pipeline_mode<synchronous>, transform_indices = @transform_3, window_bounds = array<i64: 248, 960>}, {pipeline_mode = #tpu.pipeline_mode<synchronous>, transform_indices = @transform_4, window_bounds = array<i64: 256, 64>}, {pipeline_mode = #tpu.pipeline_mode<synchronous>, transform_indices = @transform_5, window_bounds = array<i64: 1, 64>}, {pipeline_mode = #tpu.pipeline_mode<synchronous>, transform_indices = @transform_6, window_bounds = array<i64: 56, 192>}, {pipeline_mode = #tpu.pipeline_mode<synchronous>, transform_indices = @transform_7, window_bounds = array<i64: 576, 128>}, {pipeline_mode = #tpu.pipeline_mode<synchronous>, transform_indices = @transform_8, window_bounds = array<i64: 1, 128>}, {pipeline_mode = #tpu.pipeline_mode<synchronous>, transform_indices = @transform_9, window_bounds = array<i64: 1, 32>}, {pipeline_mode = #tpu.pipeline_mode<synchronous>, transform_indices = @transform_10, window_bounds = array<i64: 128, 128>}, {pipeline_mode = #tpu.pipeline_mode<synchronous>, transform_indices = @transform_11, window_bounds = array<i64: 1, 128>}, {transform_indices = @transform_12, window_bounds = array<i64: 1, 1, 128>}]} {
    %c0 = arith.constant 0 : index
    %c0_0 = arith.constant 0 : index
    %c0_1 = arith.constant 0 : index
    %0 = vector.load %arg1[%c0, %c0_0, %c0_1] : memref<1x1032x3xf32, #tpu.memory_space<vmem>>, vector<1x960x3xf32>
    %1 = vector.shape_cast %0 : vector<1x960x3xf32> to vector<960x3xf32>
    %c0_2 = arith.constant 0 : index
    %c0_3 = arith.constant 0 : index
    %2 = vector.load %arg2[%c0_2, %c0_3] : memref<27x16xf32, #tpu.memory_space<vmem>>, vector<3x16xf32>
    %cst = arith.constant dense<0.000000e+00> : vector<960x16xf32>
    %3 = tpu.matmul %1, %2, %cst {dimension_numbers = #tpu.dot_dimension_numbers<[1], [0], [0], [1], [0, 0, 1, 1], [], []>} : vector<960x3xf32>, vector<3x16xf32>, vector<960x16xf32> -> vector<960x16xf32>
    %c0_4 = arith.constant 0 : index
    %c1 = arith.constant 1 : index
    %c0_5 = arith.constant 0 : index
    %4 = vector.load %arg1[%c0_4, %c1, %c0_5] : memref<1x1032x3xf32, #tpu.memory_space<vmem>>, vector<1x960x3xf32>
    %5 = vector.shape_cast %4 : vector<1x960x3xf32> to vector<960x3xf32>
    %c3 = arith.constant 3 : index
    %c0_6 = arith.constant 0 : index
    %6 = vector.load %arg2[%c3, %c0_6] : memref<27x16xf32, #tpu.memory_space<vmem>>, vector<3x16xf32>
    %cst_7 = arith.constant dense<0.000000e+00> : vector<960x16xf32>
    %7 = tpu.matmul %5, %6, %cst_7 {dimension_numbers = #tpu.dot_dimension_numbers<[1], [0], [0], [1], [0, 0, 1, 1], [], []>} : vector<960x3xf32>, vector<3x16xf32>, vector<960x16xf32> -> vector<960x16xf32>
    %8 = arith.addf %3, %7 : vector<960x16xf32>
    %c0_8 = arith.constant 0 : index
    %c2 = arith.constant 2 : index
    %c0_9 = arith.constant 0 : index
    %9 = vector.load %arg1[%c0_8, %c2, %c0_9] : memref<1x1032x3xf32, #tpu.memory_space<vmem>>, vector<1x960x3xf32>
    %10 = vector.shape_cast %9 : vector<1x960x3xf32> to vector<960x3xf32>
    %c6 = arith.constant 6 : index
    %c0_10 = arith.constant 0 : index
    %11 = vector.load %arg2[%c6, %c0_10] : memref<27x16xf32, #tpu.memory_space<vmem>>, vector<3x16xf32>
    %cst_11 = arith.constant dense<0.000000e+00> : vector<960x16xf32>
    %12 = tpu.matmul %10, %11, %cst_11 {dimension_numbers = #tpu.dot_dimension_numbers<[1], [0], [0], [1], [0, 0, 1, 1], [], []>} : vector<960x3xf32>, vector<3x16xf32>, vector<960x16xf32> -> vector<960x16xf32>
    %13 = arith.addf %8, %12 : vector<960x16xf32>
    %c0_12 = arith.constant 0 : index
    %c32 = arith.constant 32 : index
    %c0_13 = arith.constant 0 : index
    %14 = vector.load %arg1[%c0_12, %c32, %c0_13] : memref<1x1032x3xf32, #tpu.memory_space<vmem>>, vector<1x960x3xf32>
    %15 = vector.shape_cast %14 : vector<1x960x3xf32> to vector<960x3xf32>
    %c9 = arith.constant 9 : index
    %c0_14 = arith.constant 0 : index
    %16 = vector.load %arg2[%c9, %c0_14] : memref<27x16xf32, #tpu.memory_space<vmem>>, vector<3x16xf32>
    %cst_15 = arith.constant dense<0.000000e+00> : vector<960x16xf32>
    %17 = tpu.matmul %15, %16, %cst_15 {dimension_numbers = #tpu.dot_dimension_numbers<[1], [0], [0], [1], [0, 0, 1, 1], [], []>} : vector<960x3xf32>, vector<3x16xf32>, vector<960x16xf32> -> vector<960x16xf32>
    %18 = arith.addf %13, %17 : vector<960x16xf32>
    %c0_16 = arith.constant 0 : index
    %c33 = arith.constant 33 : index
    %c0_17 = arith.constant 0 : index
    %19 = vector.load %arg1[%c0_16, %c33, %c0_17] : memref<1x1032x3xf32, #tpu.memory_space<vmem>>, vector<1x960x3xf32>
    %20 = vector.shape_cast %19 : vector<1x960x3xf32> to vector<960x3xf32>
    %c12 = arith.constant 12 : index
    %c0_18 = arith.constant 0 : index
    %21 = vector.load %arg2[%c12, %c0_18] : memref<27x16xf32, #tpu.memory_space<vmem>>, vector<3x16xf32>
    %cst_19 = arith.constant dense<0.000000e+00> : vector<960x16xf32>
    %22 = tpu.matmul %20, %21, %cst_19 {dimension_numbers = #tpu.dot_dimension_numbers<[1], [0], [0], [1], [0, 0, 1, 1], [], []>} : vector<960x3xf32>, vector<3x16xf32>, vector<960x16xf32> -> vector<960x16xf32>
    %23 = arith.addf %18, %22 : vector<960x16xf32>
    %c0_20 = arith.constant 0 : index
    %c34 = arith.constant 34 : index
    %c0_21 = arith.constant 0 : index
    %24 = vector.load %arg1[%c0_20, %c34, %c0_21] : memref<1x1032x3xf32, #tpu.memory_space<vmem>>, vector<1x960x3xf32>
    %25 = vector.shape_cast %24 : vector<1x960x3xf32> to vector<960x3xf32>
    %c15 = arith.constant 15 : index
    %c0_22 = arith.constant 0 : index
    %26 = vector.load %arg2[%c15, %c0_22] : memref<27x16xf32, #tpu.memory_space<vmem>>, vector<3x16xf32>
    %cst_23 = arith.constant dense<0.000000e+00> : vector<960x16xf32>
    %27 = tpu.matmul %25, %26, %cst_23 {dimension_numbers = #tpu.dot_dimension_numbers<[1], [0], [0], [1], [0, 0, 1, 1], [], []>} : vector<960x3xf32>, vector<3x16xf32>, vector<960x16xf32> -> vector<960x16xf32>
    %28 = arith.addf %23, %27 : vector<960x16xf32>
    %c0_24 = arith.constant 0 : index
    %c64 = arith.constant 64 : index
    %c0_25 = arith.constant 0 : index
    %29 = vector.load %arg1[%c0_24, %c64, %c0_25] : memref<1x1032x3xf32, #tpu.memory_space<vmem>>, vector<1x960x3xf32>
    %30 = vector.shape_cast %29 : vector<1x960x3xf32> to vector<960x3xf32>
    %c18 = arith.constant 18 : index
    %c0_26 = arith.constant 0 : index
    %31 = vector.load %arg2[%c18, %c0_26] : memref<27x16xf32, #tpu.memory_space<vmem>>, vector<3x16xf32>
    %cst_27 = arith.constant dense<0.000000e+00> : vector<960x16xf32>
    %32 = tpu.matmul %30, %31, %cst_27 {dimension_numbers = #tpu.dot_dimension_numbers<[1], [0], [0], [1], [0, 0, 1, 1], [], []>} : vector<960x3xf32>, vector<3x16xf32>, vector<960x16xf32> -> vector<960x16xf32>
    %33 = arith.addf %28, %32 : vector<960x16xf32>
    %c0_28 = arith.constant 0 : index
    %c65 = arith.constant 65 : index
    %c0_29 = arith.constant 0 : index
    %34 = vector.load %arg1[%c0_28, %c65, %c0_29] : memref<1x1032x3xf32, #tpu.memory_space<vmem>>, vector<1x960x3xf32>
    %35 = vector.shape_cast %34 : vector<1x960x3xf32> to vector<960x3xf32>
    %c21 = arith.constant 21 : index
    %c0_30 = arith.constant 0 : index
    %36 = vector.load %arg2[%c21, %c0_30] : memref<27x16xf32, #tpu.memory_space<vmem>>, vector<3x16xf32>
    %cst_31 = arith.constant dense<0.000000e+00> : vector<960x16xf32>
    %37 = tpu.matmul %35, %36, %cst_31 {dimension_numbers = #tpu.dot_dimension_numbers<[1], [0], [0], [1], [0, 0, 1, 1], [], []>} : vector<960x3xf32>, vector<3x16xf32>, vector<960x16xf32> -> vector<960x16xf32>
    %38 = arith.addf %33, %37 : vector<960x16xf32>
    %c0_32 = arith.constant 0 : index
    %c66 = arith.constant 66 : index
    %c0_33 = arith.constant 0 : index
    %39 = vector.load %arg1[%c0_32, %c66, %c0_33] : memref<1x1032x3xf32, #tpu.memory_space<vmem>>, vector<1x960x3xf32>
    %40 = vector.shape_cast %39 : vector<1x960x3xf32> to vector<960x3xf32>
    %c24 = arith.constant 24 : index
    %c0_34 = arith.constant 0 : index
    %41 = vector.load %arg2[%c24, %c0_34] : memref<27x16xf32, #tpu.memory_space<vmem>>, vector<3x16xf32>
    %cst_35 = arith.constant dense<0.000000e+00> : vector<960x16xf32>
    %42 = tpu.matmul %40, %41, %cst_35 {dimension_numbers = #tpu.dot_dimension_numbers<[1], [0], [0], [1], [0, 0, 1, 1], [], []>} : vector<960x3xf32>, vector<3x16xf32>, vector<960x16xf32> -> vector<960x16xf32>
    %43 = arith.addf %38, %42 : vector<960x16xf32>
    %c0_36 = arith.constant 0 : index
    %c0_37 = arith.constant 0 : index
    %44 = vector.load %arg3[%c0_36, %c0_37] : memref<1x16xf32, #tpu.memory_space<vmem>>, vector<1x16xf32>
    %45 = vector.broadcast %44 : vector<1x16xf32> to vector<960x16xf32>
    %46 = arith.addf %43, %45 : vector<960x16xf32>
    %47 = arith.mulf %46, %46 : vector<960x16xf32>
    %c0_38 = arith.constant 0 : index
    %c0_39 = arith.constant 0 : index
    %48 = vector.load %arg4[%c0_38, %c0_39] : memref<248x960xf32, #tpu.memory_space<vmem>>, vector<248x960xf32>
    %cst_40 = arith.constant dense<0.000000e+00> : vector<248x16xf32>
    %49 = tpu.matmul %48, %47, %cst_40 {dimension_numbers = #tpu.dot_dimension_numbers<[1], [0], [0], [1], [0, 0, 1, 1], [], []>} : vector<248x960xf32>, vector<960x16xf32>, vector<248x16xf32> -> vector<248x16xf32>
    %c0_41 = arith.constant 0 : index
    %c0_42 = arith.constant 0 : index
    %50 = vector.load %arg14[%c0_41, %c0_42] : memref<248x16xf32, #tpu.memory_space<vmem>>, vector<248x16xf32>
    tpu.vector_store %arg14[%c0_41, %c0_42], %49 {strides = array<i32>} : memref<248x16xf32, #tpu.memory_space<vmem>>, vector<248x16xf32>,
    %c0_43 = arith.constant 0 : index
    %c0_44 = arith.constant 0 : index
    %51 = vector.load %arg14[%c0_43, %c0_44] : memref<248x16xf32, #tpu.memory_space<vmem>>, vector<192x16xf32>
    %c0_45 = arith.constant 0 : index
    %c0_46 = arith.constant 0 : index
    %52 = vector.load %arg5[%c0_45, %c0_46] : memref<256x64xf32, #tpu.memory_space<vmem>>, vector<16x64xf32>
    %cst_47 = arith.constant dense<0.000000e+00> : vector<192x64xf32>
    %53 = tpu.matmul %51, %52, %cst_47 {dimension_numbers = #tpu.dot_dimension_numbers<[1], [0], [0], [1], [0, 0, 1, 1], [], []>} : vector<192x16xf32>, vector<16x64xf32>, vector<192x64xf32> -> vector<192x64xf32>
    %c1_48 = arith.constant 1 : index
    %c0_49 = arith.constant 0 : index
    %54 = vector.load %arg14[%c1_48, %c0_49] : memref<248x16xf32, #tpu.memory_space<vmem>>, vector<192x16xf32>
    %c16 = arith.constant 16 : index
    %c0_50 = arith.constant 0 : index
    %55 = vector.load %arg5[%c16, %c0_50] : memref<256x64xf32, #tpu.memory_space<vmem>>, vector<16x64xf32>
    %cst_51 = arith.constant dense<0.000000e+00> : vector<192x64xf32>
    %56 = tpu.matmul %54, %55, %cst_51 {dimension_numbers = #tpu.dot_dimension_numbers<[1], [0], [0], [1], [0, 0, 1, 1], [], []>} : vector<192x16xf32>, vector<16x64xf32>, vector<192x64xf32> -> vector<192x64xf32>
    %57 = arith.addf %53, %56 : vector<192x64xf32>
    %c2_52 = arith.constant 2 : index
    %c0_53 = arith.constant 0 : index
    %58 = vector.load %arg14[%c2_52, %c0_53] : memref<248x16xf32, #tpu.memory_space<vmem>>, vector<192x16xf32>
    %c32_54 = arith.constant 32 : index
    %c0_55 = arith.constant 0 : index
    %59 = vector.load %arg5[%c32_54, %c0_55] : memref<256x64xf32, #tpu.memory_space<vmem>>, vector<16x64xf32>
    %cst_56 = arith.constant dense<0.000000e+00> : vector<192x64xf32>
    %60 = tpu.matmul %58, %59, %cst_56 {dimension_numbers = #tpu.dot_dimension_numbers<[1], [0], [0], [1], [0, 0, 1, 1], [], []>} : vector<192x16xf32>, vector<16x64xf32>, vector<192x64xf32> -> vector<192x64xf32>
    %61 = arith.addf %57, %60 : vector<192x64xf32>
    %c3_57 = arith.constant 3 : index
    %c0_58 = arith.constant 0 : index
    %62 = vector.load %arg14[%c3_57, %c0_58] : memref<248x16xf32, #tpu.memory_space<vmem>>, vector<192x16xf32>
    %c48 = arith.constant 48 : index
    %c0_59 = arith.constant 0 : index
    %63 = vector.load %arg5[%c48, %c0_59] : memref<256x64xf32, #tpu.memory_space<vmem>>, vector<16x64xf32>
    %cst_60 = arith.constant dense<0.000000e+00> : vector<192x64xf32>
    %64 = tpu.matmul %62, %63, %cst_60 {dimension_numbers = #tpu.dot_dimension_numbers<[1], [0], [0], [1], [0, 0, 1, 1], [], []>} : vector<192x16xf32>, vector<16x64xf32>, vector<192x64xf32> -> vector<192x64xf32>
    %65 = arith.addf %61, %64 : vector<192x64xf32>
    %c16_61 = arith.constant 16 : index
    %c0_62 = arith.constant 0 : index
    %66 = vector.load %arg14[%c16_61, %c0_62] : memref<248x16xf32, #tpu.memory_space<vmem>>, vector<192x16xf32>
    %c64_63 = arith.constant 64 : index
    %c0_64 = arith.constant 0 : index
    %67 = vector.load %arg5[%c64_63, %c0_64] : memref<256x64xf32, #tpu.memory_space<vmem>>, vector<16x64xf32>
    %cst_65 = arith.constant dense<0.000000e+00> : vector<192x64xf32>
    %68 = tpu.matmul %66, %67, %cst_65 {dimension_numbers = #tpu.dot_dimension_numbers<[1], [0], [0], [1], [0, 0, 1, 1], [], []>} : vector<192x16xf32>, vector<16x64xf32>, vector<192x64xf32> -> vector<192x64xf32>
    %69 = arith.addf %65, %68 : vector<192x64xf32>
    %c17 = arith.constant 17 : index
    %c0_66 = arith.constant 0 : index
    %70 = vector.load %arg14[%c17, %c0_66] : memref<248x16xf32, #tpu.memory_space<vmem>>, vector<192x16xf32>
    %c80 = arith.constant 80 : index
    %c0_67 = arith.constant 0 : index
    %71 = vector.load %arg5[%c80, %c0_67] : memref<256x64xf32, #tpu.memory_space<vmem>>, vector<16x64xf32>
    %cst_68 = arith.constant dense<0.000000e+00> : vector<192x64xf32>
    %72 = tpu.matmul %70, %71, %cst_68 {dimension_numbers = #tpu.dot_dimension_numbers<[1], [0], [0], [1], [0, 0, 1, 1], [], []>} : vector<192x16xf32>, vector<16x64xf32>, vector<192x64xf32> -> vector<192x64xf32>
    %73 = arith.addf %69, %72 : vector<192x64xf32>
    %c18_69 = arith.constant 18 : index
    %c0_70 = arith.constant 0 : index
    %74 = vector.load %arg14[%c18_69, %c0_70] : memref<248x16xf32, #tpu.memory_space<vmem>>, vector<192x16xf32>
    %c96 = arith.constant 96 : index
    %c0_71 = arith.constant 0 : index
    %75 = vector.load %arg5[%c96, %c0_71] : memref<256x64xf32, #tpu.memory_space<vmem>>, vector<16x64xf32>
    %cst_72 = arith.constant dense<0.000000e+00> : vector<192x64xf32>
    %76 = tpu.matmul %74, %75, %cst_72 {dimension_numbers = #tpu.dot_dimension_numbers<[1], [0], [0], [1], [0, 0, 1, 1], [], []>} : vector<192x16xf32>, vector<16x64xf32>, vector<192x64xf32> -> vector<192x64xf32>
    %77 = arith.addf %73, %76 : vector<192x64xf32>
    %c19 = arith.constant 19 : index
    %c0_73 = arith.constant 0 : index
    %78 = vector.load %arg14[%c19, %c0_73] : memref<248x16xf32, #tpu.memory_space<vmem>>, vector<192x16xf32>
    %c112 = arith.constant 112 : index
    %c0_74 = arith.constant 0 : index
    %79 = vector.load %arg5[%c112, %c0_74] : memref<256x64xf32, #tpu.memory_space<vmem>>, vector<16x64xf32>
    %cst_75 = arith.constant dense<0.000000e+00> : vector<192x64xf32>
    %80 = tpu.matmul %78, %79, %cst_75 {dimension_numbers = #tpu.dot_dimension_numbers<[1], [0], [0], [1], [0, 0, 1, 1], [], []>} : vector<192x16xf32>, vector<16x64xf32>, vector<192x64xf32> -> vector<192x64xf32>
    %81 = arith.addf %77, %80 : vector<192x64xf32>
    %c32_76 = arith.constant 32 : index
    %c0_77 = arith.constant 0 : index
    %82 = vector.load %arg14[%c32_76, %c0_77] : memref<248x16xf32, #tpu.memory_space<vmem>>, vector<192x16xf32>
    %c128 = arith.constant 128 : index
    %c0_78 = arith.constant 0 : index
    %83 = vector.load %arg5[%c128, %c0_78] : memref<256x64xf32, #tpu.memory_space<vmem>>, vector<16x64xf32>
    %cst_79 = arith.constant dense<0.000000e+00> : vector<192x64xf32>
    %84 = tpu.matmul %82, %83, %cst_79 {dimension_numbers = #tpu.dot_dimension_numbers<[1], [0], [0], [1], [0, 0, 1, 1], [], []>} : vector<192x16xf32>, vector<16x64xf32>, vector<192x64xf32> -> vector<192x64xf32>
    %85 = arith.addf %81, %84 : vector<192x64xf32>
    %c33_80 = arith.constant 33 : index
    %c0_81 = arith.constant 0 : index
    %86 = vector.load %arg14[%c33_80, %c0_81] : memref<248x16xf32, #tpu.memory_space<vmem>>, vector<192x16xf32>
    %c144 = arith.constant 144 : index
    %c0_82 = arith.constant 0 : index
    %87 = vector.load %arg5[%c144, %c0_82] : memref<256x64xf32, #tpu.memory_space<vmem>>, vector<16x64xf32>
    %cst_83 = arith.constant dense<0.000000e+00> : vector<192x64xf32>
    %88 = tpu.matmul %86, %87, %cst_83 {dimension_numbers = #tpu.dot_dimension_numbers<[1], [0], [0], [1], [0, 0, 1, 1], [], []>} : vector<192x16xf32>, vector<16x64xf32>, vector<192x64xf32> -> vector<192x64xf32>
    %89 = arith.addf %85, %88 : vector<192x64xf32>
    %c34_84 = arith.constant 34 : index
    %c0_85 = arith.constant 0 : index
    %90 = vector.load %arg14[%c34_84, %c0_85] : memref<248x16xf32, #tpu.memory_space<vmem>>, vector<192x16xf32>
    %c160 = arith.constant 160 : index
    %c0_86 = arith.constant 0 : index
    %91 = vector.load %arg5[%c160, %c0_86] : memref<256x64xf32, #tpu.memory_space<vmem>>, vector<16x64xf32>
    %cst_87 = arith.constant dense<0.000000e+00> : vector<192x64xf32>
    %92 = tpu.matmul %90, %91, %cst_87 {dimension_numbers = #tpu.dot_dimension_numbers<[1], [0], [0], [1], [0, 0, 1, 1], [], []>} : vector<192x16xf32>, vector<16x64xf32>, vector<192x64xf32> -> vector<192x64xf32>
    %93 = arith.addf %89, %92 : vector<192x64xf32>
    %c35 = arith.constant 35 : index
    %c0_88 = arith.constant 0 : index
    %94 = vector.load %arg14[%c35, %c0_88] : memref<248x16xf32, #tpu.memory_space<vmem>>, vector<192x16xf32>
    %c176 = arith.constant 176 : index
    %c0_89 = arith.constant 0 : index
    %95 = vector.load %arg5[%c176, %c0_89] : memref<256x64xf32, #tpu.memory_space<vmem>>, vector<16x64xf32>
    %cst_90 = arith.constant dense<0.000000e+00> : vector<192x64xf32>
    %96 = tpu.matmul %94, %95, %cst_90 {dimension_numbers = #tpu.dot_dimension_numbers<[1], [0], [0], [1], [0, 0, 1, 1], [], []>} : vector<192x16xf32>, vector<16x64xf32>, vector<192x64xf32> -> vector<192x64xf32>
    %97 = arith.addf %93, %96 : vector<192x64xf32>
    %c48_91 = arith.constant 48 : index
    %c0_92 = arith.constant 0 : index
    %98 = vector.load %arg14[%c48_91, %c0_92] : memref<248x16xf32, #tpu.memory_space<vmem>>, vector<192x16xf32>
    %c192 = arith.constant 192 : index
    %c0_93 = arith.constant 0 : index
    %99 = vector.load %arg5[%c192, %c0_93] : memref<256x64xf32, #tpu.memory_space<vmem>>, vector<16x64xf32>
    %cst_94 = arith.constant dense<0.000000e+00> : vector<192x64xf32>
    %100 = tpu.matmul %98, %99, %cst_94 {dimension_numbers = #tpu.dot_dimension_numbers<[1], [0], [0], [1], [0, 0, 1, 1], [], []>} : vector<192x16xf32>, vector<16x64xf32>, vector<192x64xf32> -> vector<192x64xf32>
    %101 = arith.addf %97, %100 : vector<192x64xf32>
    %c49 = arith.constant 49 : index
    %c0_95 = arith.constant 0 : index
    %102 = vector.load %arg14[%c49, %c0_95] : memref<248x16xf32, #tpu.memory_space<vmem>>, vector<192x16xf32>
    %c208 = arith.constant 208 : index
    %c0_96 = arith.constant 0 : index
    %103 = vector.load %arg5[%c208, %c0_96] : memref<256x64xf32, #tpu.memory_space<vmem>>, vector<16x64xf32>
    %cst_97 = arith.constant dense<0.000000e+00> : vector<192x64xf32>
    %104 = tpu.matmul %102, %103, %cst_97 {dimension_numbers = #tpu.dot_dimension_numbers<[1], [0], [0], [1], [0, 0, 1, 1], [], []>} : vector<192x16xf32>, vector<16x64xf32>, vector<192x64xf32> -> vector<192x64xf32>
    %105 = arith.addf %101, %104 : vector<192x64xf32>
    %c50 = arith.constant 50 : index
    %c0_98 = arith.constant 0 : index
    %106 = vector.load %arg14[%c50, %c0_98] : memref<248x16xf32, #tpu.memory_space<vmem>>, vector<192x16xf32>
    %c224 = arith.constant 224 : index
    %c0_99 = arith.constant 0 : index
    %107 = vector.load %arg5[%c224, %c0_99] : memref<256x64xf32, #tpu.memory_space<vmem>>, vector<16x64xf32>
    %cst_100 = arith.constant dense<0.000000e+00> : vector<192x64xf32>
    %108 = tpu.matmul %106, %107, %cst_100 {dimension_numbers = #tpu.dot_dimension_numbers<[1], [0], [0], [1], [0, 0, 1, 1], [], []>} : vector<192x16xf32>, vector<16x64xf32>, vector<192x64xf32> -> vector<192x64xf32>
    %109 = arith.addf %105, %108 : vector<192x64xf32>
    %c51 = arith.constant 51 : index
    %c0_101 = arith.constant 0 : index
    %110 = vector.load %arg14[%c51, %c0_101] : memref<248x16xf32, #tpu.memory_space<vmem>>, vector<192x16xf32>
    %c240 = arith.constant 240 : index
    %c0_102 = arith.constant 0 : index
    %111 = vector.load %arg5[%c240, %c0_102] : memref<256x64xf32, #tpu.memory_space<vmem>>, vector<16x64xf32>
    %cst_103 = arith.constant dense<0.000000e+00> : vector<192x64xf32>
    %112 = tpu.matmul %110, %111, %cst_103 {dimension_numbers = #tpu.dot_dimension_numbers<[1], [0], [0], [1], [0, 0, 1, 1], [], []>} : vector<192x16xf32>, vector<16x64xf32>, vector<192x64xf32> -> vector<192x64xf32>
    %113 = arith.addf %109, %112 : vector<192x64xf32>
    %c0_104 = arith.constant 0 : index
    %c0_105 = arith.constant 0 : index
    %114 = vector.load %arg6[%c0_104, %c0_105] : memref<1x64xf32, #tpu.memory_space<vmem>>, vector<1x64xf32>
    %115 = vector.broadcast %114 : vector<1x64xf32> to vector<192x64xf32>
    %116 = arith.addf %113, %115 : vector<192x64xf32>
    %117 = arith.mulf %116, %116 : vector<192x64xf32>
    %c0_106 = arith.constant 0 : index
    %c0_107 = arith.constant 0 : index
    %118 = vector.load %arg7[%c0_106, %c0_107] : memref<56x192xf32, #tpu.memory_space<vmem>>, vector<56x192xf32>
    %cst_108 = arith.constant dense<0.000000e+00> : vector<56x64xf32>
    %119 = tpu.matmul %118, %117, %cst_108 {dimension_numbers = #tpu.dot_dimension_numbers<[1], [0], [0], [1], [0, 0, 1, 1], [], []>} : vector<56x192xf32>, vector<192x64xf32>, vector<56x64xf32> -> vector<56x64xf32>
    %c0_109 = arith.constant 0 : index
    %c0_110 = arith.constant 0 : index
    %120 = vector.load %arg15[%c0_109, %c0_110] : memref<56x64xf32, #tpu.memory_space<vmem>>, vector<56x64xf32>
    tpu.vector_store %arg15[%c0_109, %c0_110], %119 {strides = array<i32>} : memref<56x64xf32, #tpu.memory_space<vmem>>, vector<56x64xf32>,
    %c0_111 = arith.constant 0 : index
    %c0_112 = arith.constant 0 : index
    %121 = vector.load %arg15[%c0_111, %c0_112] : memref<56x64xf32, #tpu.memory_space<vmem>>, vector<32x64xf32>
    %c0_113 = arith.constant 0 : index
    %c0_114 = arith.constant 0 : index
    %122 = vector.load %arg8[%c0_113, %c0_114] : memref<576x128xf32, #tpu.memory_space<vmem>>, vector<64x128xf32>
    %cst_115 = arith.constant dense<0.000000e+00> : vector<32x128xf32>
    %123 = tpu.matmul %121, %122, %cst_115 {dimension_numbers = #tpu.dot_dimension_numbers<[1], [0], [0], [1], [0, 0, 1, 1], [], []>} : vector<32x64xf32>, vector<64x128xf32>, vector<32x128xf32> -> vector<32x128xf32>
    %c1_116 = arith.constant 1 : index
    %c0_117 = arith.constant 0 : index
    %124 = vector.load %arg15[%c1_116, %c0_117] : memref<56x64xf32, #tpu.memory_space<vmem>>, vector<32x64xf32>
    %c64_118 = arith.constant 64 : index
    %c0_119 = arith.constant 0 : index
    %125 = vector.load %arg8[%c64_118, %c0_119] : memref<576x128xf32, #tpu.memory_space<vmem>>, vector<64x128xf32>
    %cst_120 = arith.constant dense<0.000000e+00> : vector<32x128xf32>
    %126 = tpu.matmul %124, %125, %cst_120 {dimension_numbers = #tpu.dot_dimension_numbers<[1], [0], [0], [1], [0, 0, 1, 1], [], []>} : vector<32x64xf32>, vector<64x128xf32>, vector<32x128xf32> -> vector<32x128xf32>
    %127 = arith.addf %123, %126 : vector<32x128xf32>
    %c2_121 = arith.constant 2 : index
    %c0_122 = arith.constant 0 : index
    %128 = vector.load %arg15[%c2_121, %c0_122] : memref<56x64xf32, #tpu.memory_space<vmem>>, vector<32x64xf32>
    %c128_123 = arith.constant 128 : index
    %c0_124 = arith.constant 0 : index
    %129 = vector.load %arg8[%c128_123, %c0_124] : memref<576x128xf32, #tpu.memory_space<vmem>>, vector<64x128xf32>
    %cst_125 = arith.constant dense<0.000000e+00> : vector<32x128xf32>
    %130 = tpu.matmul %128, %129, %cst_125 {dimension_numbers = #tpu.dot_dimension_numbers<[1], [0], [0], [1], [0, 0, 1, 1], [], []>} : vector<32x64xf32>, vector<64x128xf32>, vector<32x128xf32> -> vector<32x128xf32>
    %131 = arith.addf %127, %130 : vector<32x128xf32>
    %c8 = arith.constant 8 : index
    %c0_126 = arith.constant 0 : index
    %132 = vector.load %arg15[%c8, %c0_126] : memref<56x64xf32, #tpu.memory_space<vmem>>, vector<32x64xf32>
    %c192_127 = arith.constant 192 : index
    %c0_128 = arith.constant 0 : index
    %133 = vector.load %arg8[%c192_127, %c0_128] : memref<576x128xf32, #tpu.memory_space<vmem>>, vector<64x128xf32>
    %cst_129 = arith.constant dense<0.000000e+00> : vector<32x128xf32>
    %134 = tpu.matmul %132, %133, %cst_129 {dimension_numbers = #tpu.dot_dimension_numbers<[1], [0], [0], [1], [0, 0, 1, 1], [], []>} : vector<32x64xf32>, vector<64x128xf32>, vector<32x128xf32> -> vector<32x128xf32>
    %135 = arith.addf %131, %134 : vector<32x128xf32>
    %c9_130 = arith.constant 9 : index
    %c0_131 = arith.constant 0 : index
    %136 = vector.load %arg15[%c9_130, %c0_131] : memref<56x64xf32, #tpu.memory_space<vmem>>, vector<32x64xf32>
    %c256 = arith.constant 256 : index
    %c0_132 = arith.constant 0 : index
    %137 = vector.load %arg8[%c256, %c0_132] : memref<576x128xf32, #tpu.memory_space<vmem>>, vector<64x128xf32>
    %cst_133 = arith.constant dense<0.000000e+00> : vector<32x128xf32>
    %138 = tpu.matmul %136, %137, %cst_133 {dimension_numbers = #tpu.dot_dimension_numbers<[1], [0], [0], [1], [0, 0, 1, 1], [], []>} : vector<32x64xf32>, vector<64x128xf32>, vector<32x128xf32> -> vector<32x128xf32>
    %139 = arith.addf %135, %138 : vector<32x128xf32>
    %c10 = arith.constant 10 : index
    %c0_134 = arith.constant 0 : index
    %140 = vector.load %arg15[%c10, %c0_134] : memref<56x64xf32, #tpu.memory_space<vmem>>, vector<32x64xf32>
    %c320 = arith.constant 320 : index
    %c0_135 = arith.constant 0 : index
    %141 = vector.load %arg8[%c320, %c0_135] : memref<576x128xf32, #tpu.memory_space<vmem>>, vector<64x128xf32>
    %cst_136 = arith.constant dense<0.000000e+00> : vector<32x128xf32>
    %142 = tpu.matmul %140, %141, %cst_136 {dimension_numbers = #tpu.dot_dimension_numbers<[1], [0], [0], [1], [0, 0, 1, 1], [], []>} : vector<32x64xf32>, vector<64x128xf32>, vector<32x128xf32> -> vector<32x128xf32>
    %143 = arith.addf %139, %142 : vector<32x128xf32>
    %c16_137 = arith.constant 16 : index
    %c0_138 = arith.constant 0 : index
    %144 = vector.load %arg15[%c16_137, %c0_138] : memref<56x64xf32, #tpu.memory_space<vmem>>, vector<32x64xf32>
    %c384 = arith.constant 384 : index
    %c0_139 = arith.constant 0 : index
    %145 = vector.load %arg8[%c384, %c0_139] : memref<576x128xf32, #tpu.memory_space<vmem>>, vector<64x128xf32>
    %cst_140 = arith.constant dense<0.000000e+00> : vector<32x128xf32>
    %146 = tpu.matmul %144, %145, %cst_140 {dimension_numbers = #tpu.dot_dimension_numbers<[1], [0], [0], [1], [0, 0, 1, 1], [], []>} : vector<32x64xf32>, vector<64x128xf32>, vector<32x128xf32> -> vector<32x128xf32>
    %147 = arith.addf %143, %146 : vector<32x128xf32>
    %c17_141 = arith.constant 17 : index
    %c0_142 = arith.constant 0 : index
    %148 = vector.load %arg15[%c17_141, %c0_142] : memref<56x64xf32, #tpu.memory_space<vmem>>, vector<32x64xf32>
    %c448 = arith.constant 448 : index
    %c0_143 = arith.constant 0 : index
    %149 = vector.load %arg8[%c448, %c0_143] : memref<576x128xf32, #tpu.memory_space<vmem>>, vector<64x128xf32>
    %cst_144 = arith.constant dense<0.000000e+00> : vector<32x128xf32>
    %150 = tpu.matmul %148, %149, %cst_144 {dimension_numbers = #tpu.dot_dimension_numbers<[1], [0], [0], [1], [0, 0, 1, 1], [], []>} : vector<32x64xf32>, vector<64x128xf32>, vector<32x128xf32> -> vector<32x128xf32>
    %151 = arith.addf %147, %150 : vector<32x128xf32>
    %c18_145 = arith.constant 18 : index
    %c0_146 = arith.constant 0 : index
    %152 = vector.load %arg15[%c18_145, %c0_146] : memref<56x64xf32, #tpu.memory_space<vmem>>, vector<32x64xf32>
    %c512 = arith.constant 512 : index
    %c0_147 = arith.constant 0 : index
    %153 = vector.load %arg8[%c512, %c0_147] : memref<576x128xf32, #tpu.memory_space<vmem>>, vector<64x128xf32>
    %cst_148 = arith.constant dense<0.000000e+00> : vector<32x128xf32>
    %154 = tpu.matmul %152, %153, %cst_148 {dimension_numbers = #tpu.dot_dimension_numbers<[1], [0], [0], [1], [0, 0, 1, 1], [], []>} : vector<32x64xf32>, vector<64x128xf32>, vector<32x128xf32> -> vector<32x128xf32>
    %155 = arith.addf %151, %154 : vector<32x128xf32>
    %c0_149 = arith.constant 0 : index
    %c0_150 = arith.constant 0 : index
    %156 = vector.load %arg9[%c0_149, %c0_150] : memref<1x128xf32, #tpu.memory_space<vmem>>, vector<1x128xf32>
    %157 = vector.broadcast %156 : vector<1x128xf32> to vector<32x128xf32>
    %158 = arith.addf %155, %157 : vector<32x128xf32>
    %159 = arith.mulf %158, %158 : vector<32x128xf32>
    %c0_151 = arith.constant 0 : index
    %c0_152 = arith.constant 0 : index
    %160 = vector.load %arg10[%c0_151, %c0_152] : memref<1x32xf32, #tpu.memory_space<vmem>>, vector<1x32xf32>
    %cst_153 = arith.constant dense<0.000000e+00> : vector<1x128xf32>
    %161 = tpu.matmul %160, %159, %cst_153 {dimension_numbers = #tpu.dot_dimension_numbers<[1], [0], [0], [1], [0, 0, 1, 1], [], []>} : vector<1x32xf32>, vector<32x128xf32>, vector<1x128xf32> -> vector<1x128xf32>
    %c0_154 = arith.constant 0 : index
    %c0_155 = arith.constant 0 : index
    %162 = vector.load %arg11[%c0_154, %c0_155] : memref<128x128xf32, #tpu.memory_space<vmem>>, vector<128x128xf32>
    %cst_156 = arith.constant dense<0.000000e+00> : vector<1x128xf32>
    %163 = tpu.matmul %161, %162, %cst_156 {dimension_numbers = #tpu.dot_dimension_numbers<[1], [0], [0], [1], [0, 0, 1, 1], [], []>} : vector<1x128xf32>, vector<128x128xf32>, vector<1x128xf32> -> vector<1x128xf32>
    %c0_157 = arith.constant 0 : index
    %c0_158 = arith.constant 0 : index
    %164 = vector.load %arg12[%c0_157, %c0_158] : memref<1x128xf32, #tpu.memory_space<vmem>>, vector<1x128xf32>
    %165 = arith.addf %163, %164 : vector<1x128xf32>
    %c0_159 = arith.constant 0 : index
    %c0_160 = arith.constant 0 : index
    %c0_161 = arith.constant 0 : index
    %166 = vector.load %arg13[%c0_159, %c0_160, %c0_161] : memref<1x1x128xf32, #tpu.memory_space<vmem>>, vector<1x1x128xf32>
    %167 = vector.shape_cast %166 : vector<1x1x128xf32> to vector<1x128xf32>
    %168 = vector.shape_cast %165 : vector<1x128xf32> to vector<1x1x128xf32>
    tpu.vector_store %arg13[%c0_159, %c0_160, %c0_161], %168 {strides = array<i32>} : memref<1x1x128xf32, #tpu.memory_space<vmem>>, vector<1x1x128xf32>,
    return
  }
  func.func @transform_0(%arg0: i32) -> (i32, i32, i32) {
    %c0_i32 = arith.constant 0 : i32
    %c0_i32_0 = arith.constant 0 : i32
    %c0_i32_1 = arith.constant 0 : i32
    return %arg0, %c0_i32, %c0_i32_0 : i32, i32, i32
  }
  func.func @transform_1(%arg0: i32) -> (i32, i32) {
    %c0_i32 = arith.constant 0 : i32
    %c0_i32_0 = arith.constant 0 : i32
    %c0_i32_1 = arith.constant 0 : i32
    return %c0_i32, %c0_i32_0 : i32, i32
  }
  func.func @transform_2(%arg0: i32) -> (i32, i32) {
    %c0_i32 = arith.constant 0 : i32
    %c0_i32_0 = arith.constant 0 : i32
    %c0_i32_1 = arith.constant 0 : i32
    return %c0_i32, %c0_i32_0 : i32, i32
  }
  func.func @transform_3(%arg0: i32) -> (i32, i32) {
    %c0_i32 = arith.constant 0 : i32
    %c0_i32_0 = arith.constant 0 : i32
    %c0_i32_1 = arith.constant 0 : i32
    return %c0_i32, %c0_i32_0 : i32, i32
  }
  func.func @transform_4(%arg0: i32) -> (i32, i32) {
    %c0_i32 = arith.constant 0 : i32
    %c0_i32_0 = arith.constant 0 : i32
    %c0_i32_1 = arith.constant 0 : i32
    return %c0_i32, %c0_i32_0 : i32, i32
  }
  func.func @transform_5(%arg0: i32) -> (i32, i32) {
    %c0_i32 = arith.constant 0 : i32
    %c0_i32_0 = arith.constant 0 : i32
    %c0_i32_1 = arith.constant 0 : i32
    return %c0_i32, %c0_i32_0 : i32, i32
  }
  func.func @transform_6(%arg0: i32) -> (i32, i32) {
    %c0_i32 = arith.constant 0 : i32
    %c0_i32_0 = arith.constant 0 : i32
    %c0_i32_1 = arith.constant 0 : i32
    return %c0_i32, %c0_i32_0 : i32, i32
  }
  func.func @transform_7(%arg0: i32) -> (i32, i32) {
    %c0_i32 = arith.constant 0 : i32
    %c0_i32_0 = arith.constant 0 : i32
    %c0_i32_1 = arith.constant 0 : i32
    return %c0_i32, %c0_i32_0 : i32, i32
  }
  func.func @transform_8(%arg0: i32) -> (i32, i32) {
    %c0_i32 = arith.constant 0 : i32
    %c0_i32_0 = arith.constant 0 : i32
    %c0_i32_1 = arith.constant 0 : i32
    return %c0_i32, %c0_i32_0 : i32, i32
  }
  func.func @transform_9(%arg0: i32) -> (i32, i32) {
    %c0_i32 = arith.constant 0 : i32
    %c0_i32_0 = arith.constant 0 : i32
    %c0_i32_1 = arith.constant 0 : i32
    return %c0_i32, %c0_i32_0 : i32, i32
  }
  func.func @transform_10(%arg0: i32) -> (i32, i32) {
    %c0_i32 = arith.constant 0 : i32
    %c0_i32_0 = arith.constant 0 : i32
    %c0_i32_1 = arith.constant 0 : i32
    return %c0_i32, %c0_i32_0 : i32, i32
  }
  func.func @transform_11(%arg0: i32) -> (i32, i32) {
    %c0_i32 = arith.constant 0 : i32
    %c0_i32_0 = arith.constant 0 : i32
    %c0_i32_1 = arith.constant 0 : i32
    return %c0_i32, %c0_i32_0 : i32, i32
  }
  func.func @transform_12(%arg0: i32) -> (i32, i32, i32) {
    %c0_i32 = arith.constant 0 : i32
    %c0_i32_0 = arith.constant 0 : i32
    %c0_i32_1 = arith.constant 0 : i32
    return %arg0, %c0_i32, %c0_i32_0 : i32, i32, i32
  }
}

</mosaic_0001>

<bundles_post_ra>
// kernel: m5_forward.1
= control target key start
LH: loop header
LB: loop body
LE: loop exit
PB: predicated region body
PF: predicated region fallthrough
CT: control target
= control target key end

     0   :  { %s33244_s0 = inlined_call_operand.vmem [shape: f32[2,1032,3], index: 0, kind: input, shape index: {}]   ;;  %s33245_s1 = inlined_call_operand.vmem [shape: f32[27,16], index: 1, kind: input, shape index: {}]   ;;  %s33246_s2 = inlined_call_operand.vmem [shape: f32[1,16], index: 2, kind: input, shape index: {}]   ;;  %s33247_s3 = inlined_call_operand.vmem [shape: f32[248,960], index: 3, kind: input, shape index: {}]   ;;  %s33248_s4 = inlined_call_operand.vmem [shape: f32[256,64], index: 4, kind: input, shape index: {}]   ;;  %s33249_s5 = inlined_call_operand.vmem [shape: f32[1,64], index: 5, kind: input, shape index: {}]   ;;  %s33250_s6 = inlined_call_operand.vmem [shape: f32[56,192], index: 6, kind: input, shape index: {}]   ;;  %s33251_s7 = inlined_call_operand.vmem [shape: f32[576,128], index: 7, kind: input, shape index: {}]   ;;  %s33252_s8 = inlined_call_operand.vmem [shape: f32[1,128], index: 8, kind: input, shape index: {}]   ;;  %s33253_s9 = inlined_call_operand.vmem [shape: f32[1,32], index: 9, kind: input, shape index: {}]   ;;  %s33254_s10 = inlined_call_operand.vmem [shape: f32[128,128], index: 10, kind: input, shape index: {}]   ;;  %s33255_s11 = inlined_call_operand.vmem [shape: f32[1,128], index: 11, kind: input, shape index: {}]   ;;  %s33256_s12 = inlined_call_operand.hbm [shape: f32[2,1,128], index: 12, kind: output, shape index: {}]  }
   0x1   :  { %33331 = sst [smem:[#allocation59_spill]] %s33244_s0 }
   0x2   :  { %33332 = sst [smem:[#allocation60_spill]] %s33245_s1 }
   0x3   :  { %17 = vsyncpa [#allocation5], 0 }
   0x4   :  { %19 = vsyncpa [#allocation5 + $0x1], 0  ;;  %s27299_s21 = smov 0   ;;  %s27301_s22 = smov 0  }
   0x5   :  { %s27303_s23 = smov 0   ;;  %s27305_s24 = smov 0  }
   0x6 LB: > { %s27320_s25 = sadd.s32 4294967295, %s27228_s24   ;;  %s19411_s26 = sadd.s32 4294967294, %s27228_s24   ;;  %s27228_s24 = sphi %s27305_s24, %s33559_s24   ;;  %s27224_s23 = sphi %s27303_s23, %s33558_s23   ;;  %s27220_s22 = sphi %s27301_s22, %s33557_s22   ;;  %s27216_s21 = sphi %s27299_s21, %s33556_s21  }
   0x7   : > { %s27324_s27 = sadd.s32 1, %s27228_s24   ;;  %s289_s28 = sadd.s32 1, %s27224_s23 }
   0x8   : > { %s286_s29 = ssub.s32 %s27228_s24, %s27324_s27  ;;  %p299_p0 = scmp.ne.s32.totalorder %s27224_s23, %s27220_s22 }
   0x9   : > { %p287_p1 = scmp.eq.s32.totalorder %s286_s29, 0  ;;  %p300_p2 = scmp.eq.s32.totalorder %s27320_s25, 1 }
   0xa   : > { %p305_p3 = scmp.ne.s32.totalorder %s27220_s22, %s27216_s21  ;;  %p306_p4 = scmp.eq.s32.totalorder %s19411_s26, 1 }
   0xb   : > { %s27335_s30 = scalar_select %p287_p1, %s27224_s23, %s289_s28  }
   0xc   : > { %p27337_p5 = por %p300_p2, %p299_p0  ;;  %p27341_p6 = por %p306_p4, %p305_p3 }
   0xd   : > { %p19414_p7 = scmp.ge.s32.totalorder %s27228_s24, 1  ;;  %p365_p8 = scmp.lt.s32.totalorder %s27228_s24, 3 }
   0xf   : > { %p366_p9 = pnand %p19414_p7, %p365_p8 }
  0x11   : > { %369 = sbr.rel (%p366_p9) target bundleno = 4542 (0x11be), region = 68 }
  0x18   : > { %s33335_s1 = sld [smem:[#allocation60_spill]]  ;;  %vm1014_vm0 = vcmask 1042432   ;;  %p406_p10 = scmp.lt.s32.totalorder %s27320_s25, 1  ;;  %vm653_vm1 = vcmask 23552   ;;  %vm12089_vm2 = vcmask 523264   ;;  %vm13063_vm3 = vcmask 130048  }
  0x19   : > { %s33336_s0 = sld [smem:[#allocation59_spill]]  ;;  %vm27231_vm4 = vmmov 0   ;;  %vm19181_vm5 = vcmask 261120   ;;  %s20967_s28 = sshll.u32 %s27320_s25, 4 }
  0x1a   : > { %s407_s19 = scalar_select %p406_p10, %s27320_s25, 1 }
  0x1b   : > { %s27233_s25 = smov [#allocation4]  }
  0x1c   : > { %s27121_s20 = smul.u32 1032, %s407_s19 }
  0x1e   : > { %v531_v0 = vld [vmem:[%s33335_s1] sm:$0x7]  ;;  %v2831_v1 = vld [vmem:[%s33335_s1 + $0x6] sm:$0x7]  ;;  %v27488_v29 = vld [vmem:[%s33335_s1 + $0x9] sm:$0x7] }
  0x1f   : > { %22787 = vmatprep.subr.msk.mxu0 %vm1014_vm0, %v531_v0  ;;  %s27361_s29 = scalar_lea.vmem %s33336_s0, %s27121_s20  ;;  %s404_s20 = sand.u32 1, %s27220_s22  }
  0x20   : > { %22788 = vmatpush3.msk.msra.mxu0 %vm1014_vm0, %v531_v0  ;;  %v411_v2 = vld [vmem:[%s27361_s29] sm:$0xff]  ;;  %v412_v3 = vld [vmem:[%s27361_s29 + $0x8] sm:$0xff]  ;;  %v413_v4 = vld [vmem:[%s27361_s29 + $0x10] sm:$0xff]  ;;  %s405_s15 = scalar_lea.vmem [#allocation4], %s404_s20  ;;  %s19344_s19 = scalar_lea.sflag [#allocation5], %s404_s20 }
  0x21   : > { %22969 = vmatprep.subr.msk.mxu0 %vm1014_vm0, %v2831_v1  ;;  %22789 = vmatprep.mubr.msk.f32.mxu0 %vm653_vm1, %v411_v2  ;;  %v414_v5 = vld [vmem:[%s27361_s29 + $0x18] sm:$0xff]  ;;  %v27372_v6 = vld [vmem:[%s27361_s29 + $0x20] sm:$0xff]  ;;  %v27378_v7 = vld [vmem:[%s27361_s29 + $0x28] sm:$0xff]  ;;  %s19356_s16 = sshll.u32 %s405_s15, 4  ;;  %s27170_s0 = sshll.u32 %s27233_s25, 4  ;;  %s33204_s16 = int_to_ptr.vmem [resolvable:$true] %s19356_s16  ;;  %s27171_s0 = int_to_ptr.vmem [resolvable:$false] %s27170_s0 }
  0x22   : > { %22790 = vmatmul.mubr.msk.f32.vlgmr.msra.gmra.mrb[0].mxu0 %vm653_vm1, %v412_v3  ;;  %v27381_v8 = vld [vmem:[%s27361_s29 + $0x30] sm:$0xff]  ;;  %v27388_v9 = vld [vmem:[%s27361_s29 + $0x38] sm:$0xff]  ;;  %v27391_v10 = vld [vmem:[%s27361_s29 + $0x40] sm:$0xff]  ;;  %s27166_s26 = scalar_lea.vmem %s33204_s16, 16  ;;  %p27173_p0 = scmp.lt.s32.totalorder %s33204_s16, %s27171_s0 }
  0x23   : > { %22792 = vmatprep.mubr.msk.f32.mxu0 %vm653_vm1, %v413_v4  ;;  %22970 = vmatpush3.msk.msra.mxu0 %vm1014_vm0, %v2831_v1  ;;  %v27398_v11 = vld [vmem:[%s27361_s29 + $0x48] sm:$0xff]  ;;  %v27401_v12 = vld [vmem:[%s27361_s29 + $0x50] sm:$0xff]  ;;  %v27408_v13 = vld [vmem:[%s27361_s29 + $0x58] sm:$0xff]  ;;  %p27167_p11 = scmp.ne.s32.totalorder %s33204_s16, %s27166_s26 }
  0x24   : > { %v27411_v14 = vld [vmem:[%s27361_s29 + $0x60] sm:$0xff]  ;;  %v27418_v15 = vld [vmem:[%s27361_s29 + $0x68] sm:$0xff]  ;;  %v27421_v16 = vld [vmem:[%s27361_s29 + $0x70] sm:$0xff]  ;;  %23151 = vmatprep.subr.msk.mxu0 %vm1014_vm0, %v27488_v29 }
  0x25   : > { %v27428_v17 = vld [vmem:[%s27361_s29 + $0x78] sm:$0xff]  ;;  %v27431_v18 = vld [vmem:[%s27361_s29 + $0x80] sm:$0xff]  ;;  %v27438_v19 = vld [vmem:[%s27361_s29 + $0x88] sm:$0xff]  ;;  %p27168_p12 = pnand %p27167_p11, %p27337_p5 }
  0x26   : > { %22793 = vmatmul.mubr.msk.f32.gmra.mrb[2].mxu0 %vm653_vm1, %v414_v5  ;;  %v27441_v20 = vld [vmem:[%s27361_s29 + $0x90] sm:$0xff]  ;;  %v27448_v21 = vld [vmem:[%s27361_s29 + $0x98] sm:$0xff]  ;;  %v27451_v22 = vld [vmem:[%s27361_s29 + $0xa0] sm:$0xff] }
  0x27   : > { %22795 = vmatprep.mubr.msk.f32.mxu0 %vm653_vm1, %v27372_v6  ;;  %v27458_v23 = vld [vmem:[%s27361_s29 + $0xa8] sm:$0xff]  ;;  %v27461_v24 = vld [vmem:[%s27361_s29 + $0xb0] sm:$0xff]  ;;  %v27468_v25 = vld [vmem:[%s27361_s29 + $0xb8] sm:$0xff]  ;;  %p27169_p13 = pneg %p27168_p12 }
  0x28   : > { %v27471_v26 = vld [vmem:[%s27361_s29 + $0xc0] sm:$0xff]  ;;  %v27478_v27 = vld [vmem:[%s27361_s29 + $0xc8] sm:$0xff]  ;;  %v27481_v28 = vld [vmem:[%s27361_s29 + $0xd0] sm:$0xff] }
  0x29   : > { %v27493_v30 = vld [vmem:[%s27361_s29 + $0xd8] sm:$0xff]  ;;  %v27498_v31 = vld [vmem:[%s27361_s29 + $0xe0] sm:$0xff]  ;;  %v27505_v32 = vld [vmem:[%s27361_s29 + $0xe8] sm:$0xff] }
  0x2a   : > { %22796 = vmatmul.mubr.msk.f32.gmra.mrb[4].mxu0 %vm653_vm1, %v27378_v7  ;;  %v27508_v33 = vld [vmem:[%s27361_s29 + $0xf0] sm:$0xff]  ;;  %v27515_v34 = vld [vmem:[%s27361_s29 + $0xf8] sm:$0xff]  ;;  %v27518_v35 = vld [vmem:[%s27361_s29 + $0x100] sm:$0xff] }
  0x2b   : > { %22798 = vmatprep.mubr.msk.f32.mxu0 %vm653_vm1, %v27381_v8  ;;  %v27525_v36 = vld [vmem:[%s27361_s29 + $0x108] sm:$0xff]  ;;  %v27528_v37 = vld [vmem:[%s27361_s29 + $0x110] sm:$0xff]  ;;  %v27535_v38 = vld [vmem:[%s27361_s29 + $0x118] sm:$0xff] }
  0x2c   : > { %v27538_v39 = vld [vmem:[%s27361_s29 + $0x120] sm:$0xff]  ;;  %v27545_v40 = vld [vmem:[%s27361_s29 + $0x128] sm:$0xff]  ;;  %v27548_v41 = vld [vmem:[%s27361_s29 + $0x130] sm:$0xff] }
  0x2d   : > { %v27555_v42 = vld [vmem:[%s27361_s29 + $0x138] sm:$0xff]  ;;  %v27558_v43 = vld [vmem:[%s27361_s29 + $0x140] sm:$0xff]  ;;  %v27565_v44 = vld [vmem:[%s27361_s29 + $0x148] sm:$0xff] }
  0x2e   : > { %22799 = vmatmul.mubr.msk.f32.gmra.mrb[6].mxu0 %vm653_vm1, %v27388_v9  ;;  %v27568_v45 = vld [vmem:[%s27361_s29 + $0x150] sm:$0xff]  ;;  %v27575_v46 = vld [vmem:[%s27361_s29 + $0x158] sm:$0xff]  ;;  %v27578_v47 = vld [vmem:[%s27361_s29 + $0x160] sm:$0xff] }
  0x2f   : > { %22801 = vmatprep.mubr.msk.f32.mxu0 %vm653_vm1, %v27391_v10  ;;  %v27585_v48 = vld [vmem:[%s27361_s29 + $0x168] sm:$0xff]  ;;  %v27588_v49 = vld [vmem:[%s27361_s29 + $0x170] sm:$0xff]  ;;  %v27595_v50 = vld [vmem:[%s27361_s29 + $0x178] sm:$0xff] }
  0x30   : > { %v27598_v51 = vld [vmem:[%s27361_s29 + $0x180] sm:$0xff]  ;;  %v27605_v52 = vld [vmem:[%s27361_s29 + $0x188] sm:$0xff]  ;;  %v27608_v53 = vld [vmem:[%s27361_s29 + $0x190] sm:$0xff] }
  0x31   : > { %v27615_v54 = vld [vmem:[%s27361_s29 + $0x198] sm:$0xff]  ;;  %v27618_v55 = vld [vmem:[%s27361_s29 + $0x1a0] sm:$0xff]  ;;  %v27625_v56 = vld [vmem:[%s27361_s29 + $0x1a8] sm:$0xff] }
  0x32   : > { %22802 = vmatmul.mubr.msk.f32.gmra.mrb[8].mxu0 %vm653_vm1, %v27398_v11  ;;  %v27628_v57 = vld [vmem:[%s27361_s29 + $0x1b0] sm:$0xff]  ;;  %v27635_v58 = vld [vmem:[%s27361_s29 + $0x1b8] sm:$0xff]  ;;  %v27638_v59 = vld [vmem:[%s27361_s29 + $0x1c0] sm:$0xff] }
  0x33   : > { %22804 = vmatprep.mubr.msk.f32.mxu0 %vm653_vm1, %v27401_v12  ;;  %v27645_v60 = vld [vmem:[%s27361_s29 + $0x1c8] sm:$0xff]  ;;  %v27648_v61 = vld [vmem:[%s27361_s29 + $0x1d0] sm:$0xff]  ;;  %v27655_v62 = vld [vmem:[%s27361_s29 + $0x1d8] sm:$0xff] }
  0x34   : > { %33337 = vst [vmem:[#allocation7_spill] sm:$0xff] %v27655_v62  ;;  %v27658_v63 = vld [vmem:[%s27361_s29 + $0x1e0] sm:$0xff]  ;;  %v27665_v0 = vld [vmem:[%s27361_s29 + $0x1e8] sm:$0xff]  ;;  %v27668_v1 = vld [vmem:[%s27361_s29 + $0x1f0] sm:$0xff] }
  0x35   : > { %33338 = vst [vmem:[#allocation8_spill] sm:$0xff] %v27658_v63  ;;  %33339 = vst [vmem:[#allocation9_spill] sm:$0xff] %v27665_v0  ;;  %v27675_v2 = vld [vmem:[%s27361_s29 + $0x1f8] sm:$0xff]  ;;  %v27678_v3 = vld [vmem:[%s27361_s29 + $0x200] sm:$0xff] }
  0x36   : > { %22805 = vmatmul.mubr.msk.f32.gmra.mrb[10].mxu0 %vm653_vm1, %v27408_v13  ;;  %33340 = vst [vmem:[#allocation10_spill] sm:$0xff] %v27668_v1  ;;  %33341 = vst [vmem:[#allocation11_spill] sm:$0xff] %v27675_v2  ;;  %v27685_v4 = vld [vmem:[%s27361_s29 + $0x208] sm:$0xff] }
  0x37   : > { %22807 = vmatprep.mubr.msk.f32.mxu0 %vm653_vm1, %v27411_v14  ;;  %33342 = vst [vmem:[#allocation12_spill] sm:$0xff] %v27678_v3  ;;  %33343 = vst [vmem:[#allocation13_spill] sm:$0xff] %v27685_v4  ;;  %v2711_v5 = vld [vmem:[%s27361_s29 + $0x2] sm:$0xff] }
  0x3a   : > { %22808 = vmatmul.mubr.msk.f32.gmra.mrb[12].mxu0 %vm653_vm1, %v27418_v15 }
  0x3b   : > { %22810 = vmatprep.mubr.msk.f32.mxu0 %vm653_vm1, %v27421_v16 }
  0x3e   : > { %22811 = vmatmul.mubr.msk.f32.gmra.mrb[14].mxu0 %vm653_vm1, %v27428_v17 }
  0x3f   : > { %22813 = vmatprep.mubr.msk.f32.mxu0 %vm653_vm1, %v27431_v18 }
  0x42   : > { %22814 = vmatmul.mubr.msk.f32.gmra.mrb[16].mxu0 %vm653_vm1, %v27438_v19 }
  0x43   : > { %22816 = vmatprep.mubr.msk.f32.mxu0 %vm653_vm1, %v27441_v20 }
  0x46   : > { %22817 = vmatmul.mubr.msk.f32.gmra.mrb[18].mxu0 %vm653_vm1, %v27448_v21 }
  0x47   : > { %22819 = vmatprep.mubr.msk.f32.mxu0 %vm653_vm1, %v27451_v22 }
  0x4a   : > { %22820 = vmatmul.mubr.msk.f32.gmra.mrb[20].mxu0 %vm653_vm1, %v27458_v23 }
  0x4b   : > { %22822 = vmatprep.mubr.msk.f32.mxu0 %vm653_vm1, %v27461_v24 }
  0x4e   : > { %22823 = vmatmul.mubr.msk.f32.gmra.mrb[22].mxu0 %vm653_vm1, %v27468_v25 }
  0x4f   : > { %22825 = vmatprep.mubr.msk.f32.mxu0 %vm653_vm1, %v27471_v26 }
  0x52   : > { %22826 = vmatmul.mubr.msk.f32.gmra.mrb[24].mxu0 %vm653_vm1, %v27478_v27 }
  0x53   : > { %22828 = vmatprep.mubr.msk.f32.mxu0 %vm653_vm1, %v27481_v28 }
  0x56   : > { %22829 = vmatmul.mubr.msk.f32.gmra.mrb[26].mxu0 %vm653_vm1, %v27493_v30 }
  0x57   : > { %22831 = vmatprep.mubr.msk.f32.mxu0 %vm653_vm1, %v27498_v31 }
  0x5a   : > { %22832 = vmatmul.mubr.msk.f32.gmra.mrb[28].mxu0 %vm653_vm1, %v27505_v32 }
  0x5b   : > { %22834 = vmatprep.mubr.msk.f32.mxu0 %vm653_vm1, %v27508_v33 }
  0x5e   : > { %22835 = vmatmul.mubr.msk.f32.gmra.mrb[30].mxu0 %vm653_vm1, %v27515_v34 }
  0x5f   : > { %22837 = vmatprep.mubr.msk.f32.mxu0 %vm653_vm1, %v27518_v35 }
  0x62   : > { %22838 = vmatmul.mubr.msk.f32.gmra.mrb[32].mxu0 %vm653_vm1, %v27525_v36 }
  0x63   : > { %22840 = vmatprep.mubr.msk.f32.mxu0 %vm653_vm1, %v27528_v37 }
  0x66   : > { %22841 = vmatmul.mubr.msk.f32.gmra.mrb[34].mxu0 %vm653_vm1, %v27535_v38 }
  0x67   : > { %22843 = vmatprep.mubr.msk.f32.mxu0 %vm653_vm1, %v27538_v39 }
  0x6a   : > { %22844 = vmatmul.mubr.msk.f32.gmra.mrb[36].mxu0 %vm653_vm1, %v27545_v40 }
  0x6b   : > { %22846 = vmatprep.mubr.msk.f32.mxu0 %vm653_vm1, %v27548_v41 }
  0x6e   : > { %22847 = vmatmul.mubr.msk.f32.gmra.mrb[38].mxu0 %vm653_vm1, %v27555_v42 }
  0x6f   : > { %22849 = vmatprep.mubr.msk.f32.mxu0 %vm653_vm1, %v27558_v43 }
  0x72   : > { %22850 = vmatmul.mubr.msk.f32.gmra.mrb[40].mxu0 %vm653_vm1, %v27565_v44 }
  0x73   : > { %22852 = vmatprep.mubr.msk.f32.mxu0 %vm653_vm1, %v27568_v45 }
  0x76   : > { %22853 = vmatmul.mubr.msk.f32.gmra.mrb[42].mxu0 %vm653_vm1, %v27575_v46 }
  0x77   : > { %22855 = vmatprep.mubr.msk.f32.mxu0 %vm653_vm1, %v27578_v47 }
  0x7a   : > { %22856 = vmatmul.mubr.msk.f32.gmra.mrb[44].mxu0 %vm653_vm1, %v27585_v48 }
  0x7b   : > { %22858 = vmatprep.mubr.msk.f32.mxu0 %vm653_vm1, %v27588_v49 }
  0x7e   : > { %22859 = vmatmul.mubr.msk.f32.gmra.mrb[46].mxu0 %vm653_vm1, %v27595_v50 }
  0x7f   : > { %22861 = vmatprep.mubr.msk.f32.mxu0 %vm653_vm1, %v27598_v51 }
  0x82   : > { %22862 = vmatmul.mubr.msk.f32.gmra.mrb[48].mxu0 %vm653_vm1, %v27605_v52 }
  0x83   : > { %22864 = vmatprep.mubr.msk.f32.mxu0 %vm653_vm1, %v27608_v53 }
  0x86   : > { %22865 = vmatmul.mubr.msk.f32.gmra.mrb[50].mxu0 %vm653_vm1, %v27615_v54 }
  0x87   : > { %22867 = vmatprep.mubr.msk.f32.mxu0 %vm653_vm1, %v27618_v55 }
  0x8a   : > { %22868 = vmatmul.mubr.msk.f32.gmra.mrb[52].mxu0 %vm653_vm1, %v27625_v56 }
  0x8b   : > { %22870 = vmatprep.mubr.msk.f32.mxu0 %vm653_vm1, %v27628_v57 }
  0x8e   : > { %22871 = vmatmul.mubr.msk.f32.gmra.mrb[54].mxu0 %vm653_vm1, %v27635_v58 }
  0x8f   : > { %22873 = vmatprep.mubr.msk.f32.mxu0 %vm653_vm1, %v27638_v59 }
  0x92   : > { %22874 = vmatmul.mubr.msk.f32.gmra.mrb[56].mxu0 %vm653_vm1, %v27645_v60 }
  0x93   : > { %22876 = vmatprep.mubr.msk.f32.mxu0 %vm653_vm1, %v27648_v61 }
  0x96   : > { %22877 = vmatmul.mubr.msk.f32.gmra.mrb[58].mxu0 %vm653_vm1, %v27655_v62  ;;  %v2825_v62 = vld [vmem:[%s27361_s29 + $0x392] sm:$0xff] }
  0x97   : > { %22879 = vmatprep.mubr.msk.f32.mxu0 %vm653_vm1, %v27658_v63  ;;  %v2798_v63 = vld [vmem:[%s27361_s29 + $0x2ba] sm:$0xff] }
  0x9a   : > { %22880 = vmatmul.mubr.msk.f32.gmra.mrb[60].mxu0 %vm653_vm1, %v27665_v0  ;;  %v2713_v0 = vld [vmem:[%s27361_s29 + $0x12] sm:$0xff] }
  0x9b   : > { %22882 = vmatprep.mubr.msk.f32.mxu0 %vm653_vm1, %v27668_v1  ;;  %v2712_v1 = vld [vmem:[%s27361_s29 + $0xa] sm:$0xff] }
  0x9e   : > { %22883 = vmatmul.mubr.msk.f32.gmra.mrb[62].mxu0 %vm653_vm1, %v27675_v2  ;;  %v2714_v2 = vld [vmem:[%s27361_s29 + $0x1a] sm:$0xff] }
  0x9f   : > { %22885 = vmatprep.mubr.msk.f32.mxu0 %vm653_vm1, %v27678_v3  ;;  %v2715_v3 = vld [vmem:[%s27361_s29 + $0x22] sm:$0xff] }
  0xa2   : > { %22886 = vmatmul.mubr.msk.f32.gmra.mrb[64].mxu0 %vm653_vm1, %v27685_v4  ;;  %v2717_v4 = vld [vmem:[%s27361_s29 + $0x32] sm:$0xff] }
  0xa3   : > { %22971 = vmatprep.mubr.msk.f32.mxu0 %vm653_vm1, %v2711_v5  ;;  %v2716_v5 = vld [vmem:[%s27361_s29 + $0x2a] sm:$0xff] }
  0xa6   : > { %22972 = vmatmul.mubr.msk.f32.vlgmr.msra.gmra.mrb[0].mxu0 %vm653_vm1, %v2712_v1  ;;  %v2719_v1 = vld [vmem:[%s27361_s29 + $0x42] sm:$0xff] }
  0xa7   : > { %22974 = vmatprep.mubr.msk.f32.mxu0 %vm653_vm1, %v2713_v0  ;;  %23152 = vmatpush3.msk.msra.mxu0 %vm1014_vm0, %v27488_v29  ;;  %v2718_v0 = vld [vmem:[%s27361_s29 + $0x3a] sm:$0xff]  ;;  %v2720_v29 = vld [vmem:[%s27361_s29 + $0x4a] sm:$0xff] }
  0xaa   : > { %22975 = vmatmul.mubr.msk.f32.gmra.mrb[2].mxu0 %vm653_vm1, %v2714_v2  ;;  %v2721_v2 = vld [vmem:[%s27361_s29 + $0x52] sm:$0xff] }
  0xab   : > { %22977 = vmatprep.mubr.msk.f32.mxu0 %vm653_vm1, %v2715_v3  ;;  %v2722_v3 = vld [vmem:[%s27361_s29 + $0x5a] sm:$0xff] }
  0xae   : > { %22978 = vmatmul.mubr.msk.f32.gmra.mrb[4].mxu0 %vm653_vm1, %v2716_v5  ;;  %v2723_v5 = vld [vmem:[%s27361_s29 + $0x62] sm:$0xff] }
  0xaf   : > { %22980 = vmatprep.mubr.msk.f32.mxu0 %vm653_vm1, %v2717_v4  ;;  %v2724_v4 = vld [vmem:[%s27361_s29 + $0x6a] sm:$0xff] }
  0xb2   : > { %22981 = vmatmul.mubr.msk.f32.gmra.mrb[6].mxu0 %vm653_vm1, %v2718_v0  ;;  %v2725_v0 = vld [vmem:[%s27361_s29 + $0x72] sm:$0xff] }
  0xb3   : > { %22983 = vmatprep.mubr.msk.f32.mxu0 %vm653_vm1, %v2719_v1  ;;  %v2726_v1 = vld [vmem:[%s27361_s29 + $0x7a] sm:$0xff] }
  0xb6   : > { %22984 = vmatmul.mubr.msk.f32.gmra.mrb[8].mxu0 %vm653_vm1, %v2720_v29  ;;  %v2727_v29 = vld [vmem:[%s27361_s29 + $0x82] sm:$0xff] }
  0xb7   : > { %22986 = vmatprep.mubr.msk.f32.mxu0 %vm653_vm1, %v2721_v2  ;;  %v2728_v2 = vld [vmem:[%s27361_s29 + $0x8a] sm:$0xff] }
  0xba   : > { %22987 = vmatmul.mubr.msk.f32.gmra.mrb[10].mxu0 %vm653_vm1, %v2722_v3  ;;  %v2729_v3 = vld [vmem:[%s27361_s29 + $0x92] sm:$0xff] }
  0xbb   : > { %22989 = vmatprep.mubr.msk.f32.mxu0 %vm653_vm1, %v2723_v5  ;;  %v2730_v5 = vld [vmem:[%s27361_s29 + $0x9a] sm:$0xff] }
  0xbe   : > { %22990 = vmatmul.mubr.msk.f32.gmra.mrb[12].mxu0 %vm653_vm1, %v2724_v4  ;;  %v2731_v4 = vld [vmem:[%s27361_s29 + $0xa2] sm:$0xff] }
  0xbf   : > { %22992 = vmatprep.mubr.msk.f32.mxu0 %vm653_vm1, %v2725_v0  ;;  %v2732_v0 = vld [vmem:[%s27361_s29 + $0xaa] sm:$0xff] }
  0xc2   : > { %22993 = vmatmul.mubr.msk.f32.gmra.mrb[14].mxu0 %vm653_vm1, %v2726_v1  ;;  %v2733_v1 = vld [vmem:[%s27361_s29 + $0xb2] sm:$0xff] }
  0xc3   : > { %22995 = vmatprep.mubr.msk.f32.mxu0 %vm653_vm1, %v2727_v29  ;;  %v2734_v29 = vld [vmem:[%s27361_s29 + $0xba] sm:$0xff] }
  0xc6   : > { %22996 = vmatmul.mubr.msk.f32.gmra.mrb[16].mxu0 %vm653_vm1, %v2728_v2  ;;  %v2735_v2 = vld [vmem:[%s27361_s29 + $0xc2] sm:$0xff] }
  0xc7   : > { %22998 = vmatprep.mubr.msk.f32.mxu0 %vm653_vm1, %v2729_v3  ;;  %v2736_v3 = vld [vmem:[%s27361_s29 + $0xca] sm:$0xff] }
  0xca   : > { %22999 = vmatmul.mubr.msk.f32.gmra.mrb[18].mxu0 %vm653_vm1, %v2730_v5  ;;  %v2737_v5 = vld [vmem:[%s27361_s29 + $0xd2] sm:$0xff] }
  0xcb   : > { %23001 = vmatprep.mubr.msk.f32.mxu0 %vm653_vm1, %v2731_v4  ;;  %v2738_v4 = vld [vmem:[%s27361_s29 + $0xda] sm:$0xff] }
  0xce   : > { %23002 = vmatmul.mubr.msk.f32.gmra.mrb[20].mxu0 %vm653_vm1, %v2732_v0  ;;  %v2739_v0 = vld [vmem:[%s27361_s29 + $0xe2] sm:$0xff] }
  0xcf   : > { %23004 = vmatprep.mubr.msk.f32.mxu0 %vm653_vm1, %v2733_v1  ;;  %v2740_v1 = vld [vmem:[%s27361_s29 + $0xea] sm:$0xff] }
  0xd2   : > { %23005 = vmatmul.mubr.msk.f32.gmra.mrb[22].mxu0 %vm653_vm1, %v2734_v29  ;;  %v2741_v29 = vld [vmem:[%s27361_s29 + $0xf2] sm:$0xff] }
  0xd3   : > { %23007 = vmatprep.mubr.msk.f32.mxu0 %vm653_vm1, %v2735_v2  ;;  %v2742_v2 = vld [vmem:[%s27361_s29 + $0xfa] sm:$0xff] }
  0xd6   : > { %23008 = vmatmul.mubr.msk.f32.gmra.mrb[24].mxu0 %vm653_vm1, %v2736_v3  ;;  %v2743_v3 = vld [vmem:[%s27361_s29 + $0x102] sm:$0xff] }
  0xd7   : > { %23010 = vmatprep.mubr.msk.f32.mxu0 %vm653_vm1, %v2737_v5  ;;  %v2744_v5 = vld [vmem:[%s27361_s29 + $0x10a] sm:$0xff] }
  0xda   : > { %23011 = vmatmul.mubr.msk.f32.gmra.mrb[26].mxu0 %vm653_vm1, %v2738_v4  ;;  %v2745_v4 = vld [vmem:[%s27361_s29 + $0x112] sm:$0xff] }
  0xdb   : > { %23013 = vmatprep.mubr.msk.f32.mxu0 %vm653_vm1, %v2739_v0  ;;  %v2746_v0 = vld [vmem:[%s27361_s29 + $0x11a] sm:$0xff] }
  0xde   : > { %23014 = vmatmul.mubr.msk.f32.gmra.mrb[28].mxu0 %vm653_vm1, %v2740_v1  ;;  %v2747_v1 = vld [vmem:[%s27361_s29 + $0x122] sm:$0xff] }
  0xdf   : > { %23016 = vmatprep.mubr.msk.f32.mxu0 %vm653_vm1, %v2741_v29  ;;  %v2748_v29 = vld [vmem:[%s27361_s29 + $0x12a] sm:$0xff] }
  0xe2   : > { %23017 = vmatmul.mubr.msk.f32.gmra.mrb[30].mxu0 %vm653_vm1, %v2742_v2  ;;  %v2749_v2 = vld [vmem:[%s27361_s29 + $0x132] sm:$0xff] }
  0xe3   : > { %23019 = vmatprep.mubr.msk.f32.mxu0 %vm653_vm1, %v2743_v3  ;;  %v2750_v3 = vld [vmem:[%s27361_s29 + $0x13a] sm:$0xff] }
  0xe6   : > { %23020 = vmatmul.mubr.msk.f32.gmra.mrb[32].mxu0 %vm653_vm1, %v2744_v5  ;;  %v2751_v5 = vld [vmem:[%s27361_s29 + $0x142] sm:$0xff] }
  0xe7   : > { %23022 = vmatprep.mubr.msk.f32.mxu0 %vm653_vm1, %v2745_v4  ;;  %v2752_v4 = vld [vmem:[%s27361_s29 + $0x14a] sm:$0xff] }
  0xea   : > { %23023 = vmatmul.mubr.msk.f32.gmra.mrb[34].mxu0 %vm653_vm1, %v2746_v0  ;;  %v2753_v0 = vld [vmem:[%s27361_s29 + $0x152] sm:$0xff] }
  0xeb   : > { %23025 = vmatprep.mubr.msk.f32.mxu0 %vm653_vm1, %v2747_v1  ;;  %v2754_v1 = vld [vmem:[%s27361_s29 + $0x15a] sm:$0xff] }
  0xee   : > { %23026 = vmatmul.mubr.msk.f32.gmra.mrb[36].mxu0 %vm653_vm1, %v2748_v29  ;;  %v2755_v29 = vld [vmem:[%s27361_s29 + $0x162] sm:$0xff] }
  0xef   : > { %23028 = vmatprep.mubr.msk.f32.mxu0 %vm653_vm1, %v2749_v2  ;;  %v2756_v2 = vld [vmem:[%s27361_s29 + $0x16a] sm:$0xff] }
  0xf2   : > { %23029 = vmatmul.mubr.msk.f32.gmra.mrb[38].mxu0 %vm653_vm1, %v2750_v3  ;;  %v2757_v3 = vld [vmem:[%s27361_s29 + $0x172] sm:$0xff] }
  0xf3   : > { %23031 = vmatprep.mubr.msk.f32.mxu0 %vm653_vm1, %v2751_v5  ;;  %v2758_v5 = vld [vmem:[%s27361_s29 + $0x17a] sm:$0xff] }
  0xf6   : > { %23032 = vmatmul.mubr.msk.f32.gmra.mrb[40].mxu0 %vm653_vm1, %v2752_v4  ;;  %v2759_v4 = vld [vmem:[%s27361_s29 + $0x182] sm:$0xff] }
  0xf7   : > { %23034 = vmatprep.mubr.msk.f32.mxu0 %vm653_vm1, %v2753_v0  ;;  %v2760_v0 = vld [vmem:[%s27361_s29 + $0x18a] sm:$0xff] }
  0xfa   : > { %23035 = vmatmul.mubr.msk.f32.gmra.mrb[42].mxu0 %vm653_vm1, %v2754_v1  ;;  %v2761_v1 = vld [vmem:[%s27361_s29 + $0x192] sm:$0xff] }
  0xfb   : > { %23037 = vmatprep.mubr.msk.f32.mxu0 %vm653_vm1, %v2755_v29  ;;  %v2762_v29 = vld [vmem:[%s27361_s29 + $0x19a] sm:$0xff] }
  0xfe   : > { %23038 = vmatmul.mubr.msk.f32.gmra.mrb[44].mxu0 %vm653_vm1, %v2756_v2  ;;  %v2763_v2 = vld [vmem:[%s27361_s29 + $0x1a2] sm:$0xff] }
  0xff   : > { %23040 = vmatprep.mubr.msk.f32.mxu0 %vm653_vm1, %v2757_v3  ;;  %v2764_v3 = vld [vmem:[%s27361_s29 + $0x1aa] sm:$0xff] }
 0x102   : > { %23041 = vmatmul.mubr.msk.f32.gmra.mrb[46].mxu0 %vm653_vm1, %v2758_v5  ;;  %v2765_v5 = vld [vmem:[%s27361_s29 + $0x1b2] sm:$0xff] }
 0x103   : > { %23043 = vmatprep.mubr.msk.f32.mxu0 %vm653_vm1, %v2759_v4  ;;  %v2766_v4 = vld [vmem:[%s27361_s29 + $0x1ba] sm:$0xff] }
 0x106   : > { %23044 = vmatmul.mubr.msk.f32.gmra.mrb[48].mxu0 %vm653_vm1, %v2760_v0  ;;  %v2767_v0 = vld [vmem:[%s27361_s29 + $0x1c2] sm:$0xff] }
 0x107   : > { %23046 = vmatprep.mubr.msk.f32.mxu0 %vm653_vm1, %v2761_v1  ;;  %v2768_v1 = vld [vmem:[%s27361_s29 + $0x1ca] sm:$0xff] }
 0x10a   : > { %23047 = vmatmul.mubr.msk.f32.gmra.mrb[50].mxu0 %vm653_vm1, %v2762_v29  ;;  %v2769_v29 = vld [vmem:[%s27361_s29 + $0x1d2] sm:$0xff] }
 0x10b   : > { %23049 = vmatprep.mubr.msk.f32.mxu0 %vm653_vm1, %v2763_v2  ;;  %v2770_v2 = vld [vmem:[%s27361_s29 + $0x1da] sm:$0xff] }
 0x10e   : > { %23050 = vmatmul.mubr.msk.f32.gmra.mrb[52].mxu0 %vm653_vm1, %v2764_v3  ;;  %v2771_v3 = vld [vmem:[%s27361_s29 + $0x1e2] sm:$0xff] }
 0x10f   : > { %23052 = vmatprep.mubr.msk.f32.mxu0 %vm653_vm1, %v2765_v5  ;;  %v2772_v5 = vld [vmem:[%s27361_s29 + $0x1ea] sm:$0xff] }
 0x112   : > { %23053 = vmatmul.mubr.msk.f32.gmra.mrb[54].mxu0 %vm653_vm1, %v2766_v4  ;;  %v2773_v4 = vld [vmem:[%s27361_s29 + $0x1f2] sm:$0xff] }
 0x113   : > { %23055 = vmatprep.mubr.msk.f32.mxu0 %vm653_vm1, %v2767_v0  ;;  %v2774_v0 = vld [vmem:[%s27361_s29 + $0x1fa] sm:$0xff] }
 0x116   : > { %23056 = vmatmul.mubr.msk.f32.gmra.mrb[56].mxu0 %vm653_vm1, %v2768_v1  ;;  %v2775_v1 = vld [vmem:[%s27361_s29 + $0x202] sm:$0xff] }
 0x117   : > { %23058 = vmatprep.mubr.msk.f32.mxu0 %vm653_vm1, %v2769_v29  ;;  %v2776_v29 = vld [vmem:[%s27361_s29 + $0x20a] sm:$0xff] }
 0x11a   : > { %23059 = vmatmul.mubr.msk.f32.gmra.mrb[58].mxu0 %vm653_vm1, %v2770_v2  ;;  %v2777_v2 = vld [vmem:[%s27361_s29 + $0x212] sm:$0xff] }
 0x11b   : > { %23061 = vmatprep.mubr.msk.f32.mxu0 %vm653_vm1, %v2771_v3  ;;  %v2778_v3 = vld [vmem:[%s27361_s29 + $0x21a] sm:$0xff] }
 0x11e   : > { %23062 = vmatmul.mubr.msk.f32.gmra.mrb[60].mxu0 %vm653_vm1, %v2772_v5  ;;  %v2779_v5 = vld [vmem:[%s27361_s29 + $0x222] sm:$0xff] }
 0x11f   : > { %23064 = vmatprep.mubr.msk.f32.mxu0 %vm653_vm1, %v2773_v4  ;;  %v2780_v4 = vld [vmem:[%s27361_s29 + $0x22a] sm:$0xff] }
 0x122   : > { %23065 = vmatmul.mubr.msk.f32.gmra.mrb[62].mxu0 %vm653_vm1, %v2774_v0  ;;  %v2781_v0 = vld [vmem:[%s27361_s29 + $0x232] sm:$0xff] }
 0x123   : > { %23067 = vmatprep.mubr.msk.f32.mxu0 %vm653_vm1, %v2775_v1  ;;  %v2782_v1 = vld [vmem:[%s27361_s29 + $0x23a] sm:$0xff] }
 0x126   : > { %23068 = vmatmul.mubr.msk.f32.gmra.mrb[64].mxu0 %vm653_vm1, %v2776_v29  ;;  %v2783_v29 = vld [vmem:[%s27361_s29 + $0x242] sm:$0xff] }
 0x127   : > { %23070 = vmatprep.mubr.msk.f32.mxu0 %vm653_vm1, %v2777_v2  ;;  %v2784_v2 = vld [vmem:[%s27361_s29 + $0x24a] sm:$0xff] }
 0x12a   : > { %23071 = vmatmul.mubr.msk.f32.gmra.mrb[66].mxu0 %vm653_vm1, %v2778_v3  ;;  %v2785_v3 = vld [vmem:[%s27361_s29 + $0x252] sm:$0xff] }
 0x12b   : > { %23073 = vmatprep.mubr.msk.f32.mxu0 %vm653_vm1, %v2779_v5  ;;  %v2786_v5 = vld [vmem:[%s27361_s29 + $0x25a] sm:$0xff] }
 0x12e   : > { %23074 = vmatmul.mubr.msk.f32.gmra.mrb[68].mxu0 %vm653_vm1, %v2780_v4  ;;  %v2787_v4 = vld [vmem:[%s27361_s29 + $0x262] sm:$0xff] }
 0x12f   : > { %23076 = vmatprep.mubr.msk.f32.mxu0 %vm653_vm1, %v2781_v0  ;;  %v2788_v0 = vld [vmem:[%s27361_s29 + $0x26a] sm:$0xff] }
 0x132   : > { %23077 = vmatmul.mubr.msk.f32.gmra.mrb[70].mxu0 %vm653_vm1, %v2782_v1  ;;  %v2789_v1 = vld [vmem:[%s27361_s29 + $0x272] sm:$0xff] }
 0x133   : > { %23079 = vmatprep.mubr.msk.f32.mxu0 %vm653_vm1, %v2783_v29  ;;  %v2790_v29 = vld [vmem:[%s27361_s29 + $0x27a] sm:$0xff] }
 0x136   : > { %23080 = vmatmul.mubr.msk.f32.gmra.mrb[72].mxu0 %vm653_vm1, %v2784_v2  ;;  %v2791_v2 = vld [vmem:[%s27361_s29 + $0x282] sm:$0xff] }
 0x137   : > { %23082 = vmatprep.mubr.msk.f32.mxu0 %vm653_vm1, %v2785_v3  ;;  %v27855_v3 = vld [vmem:[%s33335_s1 + $0xc] sm:$0x7] }
 0x138   : > { %23333 = vmatprep.subr.msk.mxu0 %vm1014_vm0, %v27855_v3 }
 0x13a   : > { %23083 = vmatmul.mubr.msk.f32.gmra.mrb[74].mxu0 %vm653_vm1, %v2786_v5  ;;  %v2792_v5 = vld [vmem:[%s27361_s29 + $0x28a] sm:$0xff] }
 0x13b   : > { %23085 = vmatprep.mubr.msk.f32.mxu0 %vm653_vm1, %v2787_v4  ;;  %v2793_v4 = vld [vmem:[%s27361_s29 + $0x292] sm:$0xff] }
 0x13e   : > { %23086 = vmatmul.mubr.msk.f32.gmra.mrb[76].mxu0 %vm653_vm1, %v2788_v0  ;;  %v2794_v0 = vld [vmem:[%s27361_s29 + $0x29a] sm:$0xff] }
 0x13f   : > { %23088 = vmatprep.mubr.msk.f32.mxu0 %vm653_vm1, %v2789_v1  ;;  %v2795_v1 = vld [vmem:[%s27361_s29 + $0x2a2] sm:$0xff] }
 0x142   : > { %23089 = vmatmul.mubr.msk.f32.gmra.mrb[78].mxu0 %vm653_vm1, %v2790_v29  ;;  %v2796_v29 = vld [vmem:[%s27361_s29 + $0x2aa] sm:$0xff] }
 0x143   : > { %23091 = vmatprep.mubr.msk.f32.mxu0 %vm653_vm1, %v2791_v2  ;;  %v2797_v2 = vld [vmem:[%s27361_s29 + $0x2b2] sm:$0xff] }
 0x146   : > { %23092 = vmatmul.mubr.msk.f32.gmra.mrb[80].mxu0 %vm653_vm1, %v2792_v5  ;;  %v2799_v5 = vld [vmem:[%s27361_s29 + $0x2c2] sm:$0xff] }
 0x147   : > { %23094 = vmatprep.mubr.msk.f32.mxu0 %vm653_vm1, %v2793_v4  ;;  %v2800_v4 = vld [vmem:[%s27361_s29 + $0x2ca] sm:$0xff] }
 0x14a   : > { %23095 = vmatmul.mubr.msk.f32.gmra.mrb[82].mxu0 %vm653_vm1, %v2794_v0  ;;  %v2801_v0 = vld [vmem:[%s27361_s29 + $0x2d2] sm:$0xff] }
 0x14b   : > { %23097 = vmatprep.mubr.msk.f32.mxu0 %vm653_vm1, %v2795_v1  ;;  %v2802_v1 = vld [vmem:[%s27361_s29 + $0x2da] sm:$0xff] }
 0x14e   : > { %23098 = vmatmul.mubr.msk.f32.gmra.mrb[84].mxu0 %vm653_vm1, %v2796_v29  ;;  %v2803_v29 = vld [vmem:[%s27361_s29 + $0x2e2] sm:$0xff] }
 0x14f   : > { %23100 = vmatprep.mubr.msk.f32.mxu0 %vm653_vm1, %v2797_v2  ;;  %v2804_v2 = vld [vmem:[%s27361_s29 + $0x2ea] sm:$0xff] }
 0x152   : > { %23101 = vmatmul.mubr.msk.f32.gmra.mrb[86].mxu0 %vm653_vm1, %v2798_v63  ;;  %v2805_v63 = vld [vmem:[%s27361_s29 + $0x2f2] sm:$0xff] }
 0x153   : > { %23103 = vmatprep.mubr.msk.f32.mxu0 %vm653_vm1, %v2799_v5  ;;  %v2806_v5 = vld [vmem:[%s27361_s29 + $0x2fa] sm:$0xff] }
 0x156   : > { %23104 = vmatmul.mubr.msk.f32.gmra.mrb[88].mxu0 %vm653_vm1, %v2800_v4  ;;  %v2807_v4 = vld [vmem:[%s27361_s29 + $0x302] sm:$0xff] }
 0x157   : > { %23106 = vmatprep.mubr.msk.f32.mxu0 %vm653_vm1, %v2801_v0  ;;  %v2808_v0 = vld [vmem:[%s27361_s29 + $0x30a] sm:$0xff] }
 0x15a   : > { %23107 = vmatmul.mubr.msk.f32.gmra.mrb[90].mxu0 %vm653_vm1, %v2802_v1  ;;  %v2809_v1 = vld [vmem:[%s27361_s29 + $0x312] sm:$0xff] }
 0x15b   : > { %23109 = vmatprep.mubr.msk.f32.mxu0 %vm653_vm1, %v2803_v29  ;;  %v2810_v29 = vld [vmem:[%s27361_s29 + $0x31a] sm:$0xff] }
 0x15e   : > { %23110 = vmatmul.mubr.msk.f32.gmra.mrb[92].mxu0 %vm653_vm1, %v2804_v2  ;;  %v2811_v2 = vld [vmem:[%s27361_s29 + $0x322] sm:$0xff] }
 0x15f   : > { %23112 = vmatprep.mubr.msk.f32.mxu0 %vm653_vm1, %v2805_v63  ;;  %v2812_v63 = vld [vmem:[%s27361_s29 + $0x32a] sm:$0xff] }
 0x162   : > { %23113 = vmatmul.mubr.msk.f32.gmra.mrb[94].mxu0 %vm653_vm1, %v2806_v5  ;;  %v2813_v5 = vld [vmem:[%s27361_s29 + $0x332] sm:$0xff] }
 0x163   : > { %23115 = vmatprep.mubr.msk.f32.mxu0 %vm653_vm1, %v2807_v4  ;;  %v2814_v4 = vld [vmem:[%s27361_s29 + $0x33a] sm:$0xff] }
 0x166   : > { %23116 = vmatmul.mubr.msk.f32.gmra.mrb[96].mxu0 %vm653_vm1, %v2808_v0  ;;  %v2815_v0 = vld [vmem:[%s27361_s29 + $0x342] sm:$0xff] }
 0x167   : > { %23118 = vmatprep.mubr.msk.f32.mxu0 %vm653_vm1, %v2809_v1  ;;  %v2816_v1 = vld [vmem:[%s27361_s29 + $0x34a] sm:$0xff] }
 0x16a   : > { %23119 = vmatmul.mubr.msk.f32.gmra.mrb[98].mxu0 %vm653_vm1, %v2810_v29  ;;  %v2817_v29 = vld [vmem:[%s27361_s29 + $0x352] sm:$0xff] }
 0x16b   : > { %23121 = vmatprep.mubr.msk.f32.mxu0 %vm653_vm1, %v2811_v2  ;;  %v2818_v2 = vld [vmem:[%s27361_s29 + $0x35a] sm:$0xff] }
 0x16e   : > { %23122 = vmatmul.mubr.msk.f32.gmra.mrb[100].mxu0 %vm653_vm1, %v2812_v63  ;;  %v2819_v63 = vld [vmem:[%s27361_s29 + $0x362] sm:$0xff] }
 0x16f   : > { %23124 = vmatprep.mubr.msk.f32.mxu0 %vm653_vm1, %v2813_v5  ;;  %v2820_v5 = vld [vmem:[%s27361_s29 + $0x36a] sm:$0xff] }
 0x172   : > { %23125 = vmatmul.mubr.msk.f32.gmra.mrb[102].mxu0 %vm653_vm1, %v2814_v4  ;;  %v2821_v4 = vld [vmem:[%s27361_s29 + $0x372] sm:$0xff] }
 0x173   : > { %23127 = vmatprep.mubr.msk.f32.mxu0 %vm653_vm1, %v2815_v0  ;;  %v2822_v0 = vld [vmem:[%s27361_s29 + $0x37a] sm:$0xff] }
 0x176   : > { %23128 = vmatmul.mubr.msk.f32.gmra.mrb[104].mxu0 %vm653_vm1, %v2816_v1  ;;  %v2823_v1 = vld [vmem:[%s27361_s29 + $0x382] sm:$0xff] }
 0x177   : > { %23130 = vmatprep.mubr.msk.f32.mxu0 %vm653_vm1, %v2817_v29  ;;  %v2824_v29 = vld [vmem:[%s27361_s29 + $0x38a] sm:$0xff] }
 0x17a   : > { %23131 = vmatmul.mubr.msk.f32.gmra.mrb[106].mxu0 %vm653_vm1, %v2818_v2  ;;  %v2826_v2 = vld [vmem:[%s27361_s29 + $0x39a] sm:$0xff] }
 0x17b   : > { %23133 = vmatprep.mubr.msk.f32.mxu0 %vm653_vm1, %v2819_v63  ;;  %v2827_v63 = vld [vmem:[%s27361_s29 + $0x3a2] sm:$0xff] }
 0x17e   : > { %23134 = vmatmul.mubr.msk.f32.gmra.mrb[108].mxu0 %vm653_vm1, %v2820_v5  ;;  %v2828_v5 = vld [vmem:[%s27361_s29 + $0x3aa] sm:$0xff] }
 0x17f   : > { %23136 = vmatprep.mubr.msk.f32.mxu0 %vm653_vm1, %v2821_v4  ;;  %v2829_v4 = vld [vmem:[%s27361_s29 + $0x3b2] sm:$0xff] }
 0x182   : > { %23137 = vmatmul.mubr.msk.f32.gmra.mrb[110].mxu0 %vm653_vm1, %v2822_v0  ;;  %v2830_v0 = vld [vmem:[%s27361_s29 + $0x3ba] sm:$0xff] }
 0x183   : > { %23139 = vmatprep.mubr.msk.f32.mxu0 %vm653_vm1, %v2823_v1  ;;  %v4091_v1 = vld [vmem:[%s27361_s29 + $0x398] sm:$0xff] }
 0x186   : > { %23140 = vmatmul.mubr.msk.f32.gmra.mrb[112].mxu0 %vm653_vm1, %v2824_v29  ;;  %v4092_v29 = vld [vmem:[%s27361_s29 + $0x3a0] sm:$0xff] }
 0x187   : > { %23142 = vmatprep.mubr.msk.f32.mxu0 %vm653_vm1, %v2825_v62  ;;  %v4089_v62 = vld [vmem:[%s27361_s29 + $0x388] sm:$0xff] }
 0x18a   : > { %23143 = vmatmul.mubr.msk.f32.gmra.mrb[114].mxu0 %vm653_vm1, %v2826_v2  ;;  %v4093_v2 = vld [vmem:[%s27361_s29 + $0x3a8] sm:$0xff] }
 0x18b   : > { %23145 = vmatprep.mubr.msk.f32.mxu0 %vm653_vm1, %v2827_v63  ;;  %v4094_v63 = vld [vmem:[%s27361_s29 + $0x3b0] sm:$0xff] }
 0x18e   : > { %23146 = vmatmul.mubr.msk.f32.gmra.mrb[116].mxu0 %vm653_vm1, %v2828_v5  ;;  %v4095_v5 = vld [vmem:[%s27361_s29 + $0x3b8] sm:$0xff] }
 0x18f   : > { %23148 = vmatprep.mubr.msk.f32.mxu0 %vm653_vm1, %v2829_v4  ;;  %v4096_v4 = vld [vmem:[%s27361_s29 + $0x3c0] sm:$0xff] }
 0x192   : > { %23149 = vmatmul.mubr.msk.f32.gmra.mrb[118].mxu0 %vm653_vm1, %v2830_v0  ;;  %v4097_v0 = vld [vmem:[%s27361_s29 + $0x3c8] sm:$0xff] }
 0x193   : > { %23153 = vmatprep.mubr.msk.f32.mxu0 %vm653_vm1, %v27372_v6  ;;  %v33344_v6 = vld [vmem:[#allocation7_spill] sm:$0xff] }
 0x196   : > { %23154 = vmatmul.mubr.msk.f32.vlgmr.msra.gmra.mrb[0].mxu0 %vm653_vm1, %v27378_v7  ;;  %v33345_v7 = vld [vmem:[#allocation8_spill] sm:$0xff] }
 0x197   : > { %23156 = vmatprep.mubr.msk.f32.mxu0 %vm653_vm1, %v27381_v8  ;;  %23334 = vmatpush3.msk.msra.mxu0 %vm1014_vm0, %v27855_v3  ;;  %v33346_v8 = vld [vmem:[#allocation9_spill] sm:$0xff]  ;;  %v4090_v3 = vld [vmem:[%s27361_s29 + $0x390] sm:$0xff] }
 0x19a   : > { %23157 = vmatmul.mubr.msk.f32.gmra.mrb[2].mxu0 %vm653_vm1, %v27388_v9  ;;  %v33347_v9 = vld [vmem:[#allocation10_spill] sm:$0xff] }
 0x19b   : > { %23159 = vmatprep.mubr.msk.f32.mxu0 %vm653_vm1, %v27391_v10  ;;  %v33348_v10 = vld [vmem:[#allocation11_spill] sm:$0xff] }
 0x19e   : > { %23160 = vmatmul.mubr.msk.f32.gmra.mrb[4].mxu0 %vm653_vm1, %v27398_v11  ;;  %v33349_v11 = vld [vmem:[#allocation12_spill] sm:$0xff] }
 0x19f   : > { %23162 = vmatprep.mubr.msk.f32.mxu0 %vm653_vm1, %v27401_v12  ;;  %v4042_v12 = vld [vmem:[%s27361_s29 + $0x210] sm:$0xff] }
 0x1a2   : > { %23163 = vmatmul.mubr.msk.f32.gmra.mrb[6].mxu0 %vm653_vm1, %v27408_v13  ;;  %v33350_v13 = vld [vmem:[#allocation13_spill] sm:$0xff] }
 0x1a3   : > { %23165 = vmatprep.mubr.msk.f32.mxu0 %vm653_vm1, %v27411_v14  ;;  %v4043_v14 = vld [vmem:[%s27361_s29 + $0x218] sm:$0xff] }
 0x1a6   : > { %23166 = vmatmul.mubr.msk.f32.gmra.mrb[8].mxu0 %vm653_vm1, %v27418_v15  ;;  %v4044_v15 = vld [vmem:[%s27361_s29 + $0x220] sm:$0xff] }
 0x1a7   : > { %23168 = vmatprep.mubr.msk.f32.mxu0 %vm653_vm1, %v27421_v16  ;;  %v4045_v16 = vld [vmem:[%s27361_s29 + $0x228] sm:$0xff] }
 0x1aa   : > { %23169 = vmatmul.mubr.msk.f32.gmra.mrb[10].mxu0 %vm653_vm1, %v27428_v17  ;;  %v4046_v17 = vld [vmem:[%s27361_s29 + $0x230] sm:$0xff] }
 0x1ab   : > { %23171 = vmatprep.mubr.msk.f32.mxu0 %vm653_vm1, %v27431_v18  ;;  %v4047_v18 = vld [vmem:[%s27361_s29 + $0x238] sm:$0xff] }
 0x1ae   : > { %23172 = vmatmul.mubr.msk.f32.gmra.mrb[12].mxu0 %vm653_vm1, %v27438_v19  ;;  %v4048_v19 = vld [vmem:[%s27361_s29 + $0x240] sm:$0xff] }
 0x1af   : > { %23174 = vmatprep.mubr.msk.f32.mxu0 %vm653_vm1, %v27441_v20  ;;  %v4049_v20 = vld [vmem:[%s27361_s29 + $0x248] sm:$0xff] }
 0x1b2   : > { %23175 = vmatmul.mubr.msk.f32.gmra.mrb[14].mxu0 %vm653_vm1, %v27448_v21  ;;  %v4050_v21 = vld [vmem:[%s27361_s29 + $0x250] sm:$0xff] }
 0x1b3   : > { %23177 = vmatprep.mubr.msk.f32.mxu0 %vm653_vm1, %v27451_v22  ;;  %v4051_v22 = vld [vmem:[%s27361_s29 + $0x258] sm:$0xff] }
 0x1b6   : > { %23178 = vmatmul.mubr.msk.f32.gmra.mrb[16].mxu0 %vm653_vm1, %v27458_v23  ;;  %v4052_v23 = vld [vmem:[%s27361_s29 + $0x260] sm:$0xff] }
 0x1b7   : > { %23180 = vmatprep.mubr.msk.f32.mxu0 %vm653_vm1, %v27461_v24  ;;  %v4053_v24 = vld [vmem:[%s27361_s29 + $0x268] sm:$0xff] }
 0x1ba   : > { %23181 = vmatmul.mubr.msk.f32.gmra.mrb[18].mxu0 %vm653_vm1, %v27468_v25  ;;  %v4054_v25 = vld [vmem:[%s27361_s29 + $0x270] sm:$0xff] }
 0x1bb   : > { %23183 = vmatprep.mubr.msk.f32.mxu0 %vm653_vm1, %v27471_v26  ;;  %v4055_v26 = vld [vmem:[%s27361_s29 + $0x278] sm:$0xff] }
 0x1be   : > { %23184 = vmatmul.mubr.msk.f32.gmra.mrb[20].mxu0 %vm653_vm1, %v27478_v27  ;;  %v4056_v27 = vld [vmem:[%s27361_s29 + $0x280] sm:$0xff] }
 0x1bf   : > { %23186 = vmatprep.mubr.msk.f32.mxu0 %vm653_vm1, %v27481_v28  ;;  %v4057_v28 = vld [vmem:[%s27361_s29 + $0x288] sm:$0xff] }
 0x1c2   : > { %23187 = vmatmul.mubr.msk.f32.gmra.mrb[22].mxu0 %vm653_vm1, %v27493_v30  ;;  %v4058_v30 = vld [vmem:[%s27361_s29 + $0x290] sm:$0xff] }
 0x1c3   : > { %23189 = vmatprep.mubr.msk.f32.mxu0 %vm653_vm1, %v27498_v31  ;;  %v4059_v31 = vld [vmem:[%s27361_s29 + $0x298] sm:$0xff] }
 0x1c6   : > { %23190 = vmatmul.mubr.msk.f32.gmra.mrb[24].mxu0 %vm653_vm1, %v27505_v32  ;;  %v4060_v32 = vld [vmem:[%s27361_s29 + $0x2a0] sm:$0xff] }
 0x1c7   : > { %23192 = vmatprep.mubr.msk.f32.mxu0 %vm653_vm1, %v27508_v33  ;;  %v28104_v33 = vld [vmem:[%s33335_s1 + $0xf] sm:$0x7] }
 0x1c8   : > { %23515 = vmatprep.subr.msk.mxu0 %vm1014_vm0, %v28104_v33 }
 0x1ca   : > { %23193 = vmatmul.mubr.msk.f32.gmra.mrb[26].mxu0 %vm653_vm1, %v27515_v34  ;;  %v4061_v34 = vld [vmem:[%s27361_s29 + $0x2a8] sm:$0xff] }
 0x1cb   : > { %23195 = vmatprep.mubr.msk.f32.mxu0 %vm653_vm1, %v27518_v35  ;;  %v4062_v35 = vld [vmem:[%s27361_s29 + $0x2b0] sm:$0xff] }
 0x1ce   : > { %23196 = vmatmul.mubr.msk.f32.gmra.mrb[28].mxu0 %vm653_vm1, %v27525_v36  ;;  %v4063_v36 = vld [vmem:[%s27361_s29 + $0x2b8] sm:$0xff] }
 0x1cf   : > { %23198 = vmatprep.mubr.msk.f32.mxu0 %vm653_vm1, %v27528_v37  ;;  %v4064_v37 = vld [vmem:[%s27361_s29 + $0x2c0] sm:$0xff] }
 0x1d2   : > { %23199 = vmatmul.mubr.msk.f32.gmra.mrb[30].mxu0 %vm653_vm1, %v27535_v38  ;;  %v4065_v38 = vld [vmem:[%s27361_s29 + $0x2c8] sm:$0xff] }
 0x1d3   : > { %23201 = vmatprep.mubr.msk.f32.mxu0 %vm653_vm1, %v27538_v39  ;;  %v4066_v39 = vld [vmem:[%s27361_s29 + $0x2d0] sm:$0xff] }
 0x1d6   : > { %23202 = vmatmul.mubr.msk.f32.gmra.mrb[32].mxu0 %vm653_vm1, %v27545_v40  ;;  %v4067_v40 = vld [vmem:[%s27361_s29 + $0x2d8] sm:$0xff] }
 0x1d7   : > { %23204 = vmatprep.mubr.msk.f32.mxu0 %vm653_vm1, %v27548_v41  ;;  %v4068_v41 = vld [vmem:[%s27361_s29 + $0x2e0] sm:$0xff] }
 0x1da   : > { %23205 = vmatmul.mubr.msk.f32.gmra.mrb[34].mxu0 %vm653_vm1, %v27555_v42  ;;  %v4069_v42 = vld [vmem:[%s27361_s29 + $0x2e8] sm:$0xff] }
 0x1db   : > { %23207 = vmatprep.mubr.msk.f32.mxu0 %vm653_vm1, %v27558_v43  ;;  %v4070_v43 = vld [vmem:[%s27361_s29 + $0x2f0] sm:$0xff] }
 0x1de   : > { %23208 = vmatmul.mubr.msk.f32.gmra.mrb[36].mxu0 %vm653_vm1, %v27565_v44  ;;  %v4071_v44 = vld [vmem:[%s27361_s29 + $0x2f8] sm:$0xff] }
 0x1df   : > { %23210 = vmatprep.mubr.msk.f32.mxu0 %vm653_vm1, %v27568_v45  ;;  %v4072_v45 = vld [vmem:[%s27361_s29 + $0x300] sm:$0xff] }
 0x1e2   : > { %23211 = vmatmul.mubr.msk.f32.gmra.mrb[38].mxu0 %vm653_vm1, %v27575_v46  ;;  %v4073_v46 = vld [vmem:[%s27361_s29 + $0x308] sm:$0xff] }
 0x1e3   : > { %23213 = vmatprep.mubr.msk.f32.mxu0 %vm653_vm1, %v27578_v47  ;;  %v4074_v47 = vld [vmem:[%s27361_s29 + $0x310] sm:$0xff] }
 0x1e6   : > { %23214 = vmatmul.mubr.msk.f32.gmra.mrb[40].mxu0 %vm653_vm1, %v27585_v48  ;;  %v4075_v48 = vld [vmem:[%s27361_s29 + $0x318] sm:$0xff] }
 0x1e7   : > { %23216 = vmatprep.mubr.msk.f32.mxu0 %vm653_vm1, %v27588_v49  ;;  %v4076_v49 = vld [vmem:[%s27361_s29 + $0x320] sm:$0xff] }
 0x1ea   : > { %23217 = vmatmul.mubr.msk.f32.gmra.mrb[42].mxu0 %vm653_vm1, %v27595_v50  ;;  %v4077_v50 = vld [vmem:[%s27361_s29 + $0x328] sm:$0xff] }
 0x1eb   : > { %23219 = vmatprep.mubr.msk.f32.mxu0 %vm653_vm1, %v27598_v51  ;;  %v4078_v51 = vld [vmem:[%s27361_s29 + $0x330] sm:$0xff] }
 0x1ee   : > { %23220 = vmatmul.mubr.msk.f32.gmra.mrb[44].mxu0 %vm653_vm1, %v27605_v52  ;;  %v4079_v52 = vld [vmem:[%s27361_s29 + $0x338] sm:$0xff] }
 0x1ef   : > { %23222 = vmatprep.mubr.msk.f32.mxu0 %vm653_vm1, %v27608_v53  ;;  %v4080_v53 = vld [vmem:[%s27361_s29 + $0x340] sm:$0xff] }
 0x1f2   : > { %23223 = vmatmul.mubr.msk.f32.gmra.mrb[46].mxu0 %vm653_vm1, %v27615_v54  ;;  %v4081_v54 = vld [vmem:[%s27361_s29 + $0x348] sm:$0xff] }
 0x1f3   : > { %23225 = vmatprep.mubr.msk.f32.mxu0 %vm653_vm1, %v27618_v55  ;;  %v4082_v55 = vld [vmem:[%s27361_s29 + $0x350] sm:$0xff] }
 0x1f6   : > { %23226 = vmatmul.mubr.msk.f32.gmra.mrb[48].mxu0 %vm653_vm1, %v27625_v56  ;;  %v4083_v56 = vld [vmem:[%s27361_s29 + $0x358] sm:$0xff] }
 0x1f7   : > { %23228 = vmatprep.mubr.msk.f32.mxu0 %vm653_vm1, %v27628_v57  ;;  %v4084_v57 = vld [vmem:[%s27361_s29 + $0x360] sm:$0xff] }
 0x1fa   : > { %23229 = vmatmul.mubr.msk.f32.gmra.mrb[50].mxu0 %vm653_vm1, %v27635_v58  ;;  %v4085_v58 = vld [vmem:[%s27361_s29 + $0x368] sm:$0xff] }
 0x1fb   : > { %23231 = vmatprep.mubr.msk.f32.mxu0 %vm653_vm1, %v27638_v59  ;;  %v4086_v59 = vld [vmem:[%s27361_s29 + $0x370] sm:$0xff] }
 0x1fe   : > { %23232 = vmatmul.mubr.msk.f32.gmra.mrb[52].mxu0 %vm653_vm1, %v27645_v60  ;;  %v4087_v60 = vld [vmem:[%s27361_s29 + $0x378] sm:$0xff] }
 0x1ff   : > { %23234 = vmatprep.mubr.msk.f32.mxu0 %vm653_vm1, %v27648_v61  ;;  %v4088_v61 = vld [vmem:[%s27361_s29 + $0x380] sm:$0xff] }
 0x202   : > { %23235 = vmatmul.mubr.msk.f32.gmra.mrb[54].mxu0 %vm653_vm1, %v33344_v6  ;;  %v4098_v6 = vld [vmem:[%s27361_s29 + $0x3d0] sm:$0xff] }
 0x203   : > { %23237 = vmatprep.mubr.msk.f32.mxu0 %vm653_vm1, %v33345_v7  ;;  %v4099_v7 = vld [vmem:[%s27361_s29 + $0x3d8] sm:$0xff] }
 0x206   : > { %23238 = vmatmul.mubr.msk.f32.gmra.mrb[56].mxu0 %vm653_vm1, %v33346_v8  ;;  %v5249_v8 = vld [vmem:[%s27361_s29 + $0x21] sm:$0xff] }
 0x207   : > { %23240 = vmatprep.mubr.msk.f32.mxu0 %vm653_vm1, %v33347_v9  ;;  %v5250_v9 = vld [vmem:[%s27361_s29 + $0x29] sm:$0xff] }
 0x20a   : > { %23241 = vmatmul.mubr.msk.f32.gmra.mrb[58].mxu0 %vm653_vm1, %v33348_v10  ;;  %v5251_v10 = vld [vmem:[%s27361_s29 + $0x31] sm:$0xff] }
 0x20b   : > { %23243 = vmatprep.mubr.msk.f32.mxu0 %vm653_vm1, %v33349_v11  ;;  %v5252_v11 = vld [vmem:[%s27361_s29 + $0x39] sm:$0xff] }
 0x20e   : > { %23244 = vmatmul.mubr.msk.f32.gmra.mrb[60].mxu0 %vm653_vm1, %v33350_v13  ;;  %v5254_v13 = vld [vmem:[%s27361_s29 + $0x49] sm:$0xff] }
 0x20f   : > { %23246 = vmatprep.mubr.msk.f32.mxu0 %vm653_vm1, %v4042_v12  ;;  %v5253_v12 = vld [vmem:[%s27361_s29 + $0x41] sm:$0xff] }
 0x212   : > { %23247 = vmatmul.mubr.msk.f32.gmra.mrb[62].mxu0 %vm653_vm1, %v4043_v14  ;;  %v5255_v14 = vld [vmem:[%s27361_s29 + $0x51] sm:$0xff] }
 0x213   : > { %23249 = vmatprep.mubr.msk.f32.mxu0 %vm653_vm1, %v4044_v15  ;;  %v5256_v15 = vld [vmem:[%s27361_s29 + $0x59] sm:$0xff] }
 0x216   : > { %23250 = vmatmul.mubr.msk.f32.gmra.mrb[64].mxu0 %vm653_vm1, %v4045_v16  ;;  %v5257_v16 = vld [vmem:[%s27361_s29 + $0x61] sm:$0xff] }
 0x217   : > { %23252 = vmatprep.mubr.msk.f32.mxu0 %vm653_vm1, %v4046_v17  ;;  %v5258_v17 = vld [vmem:[%s27361_s29 + $0x69] sm:$0xff] }
 0x21a   : > { %23253 = vmatmul.mubr.msk.f32.gmra.mrb[66].mxu0 %vm653_vm1, %v4047_v18  ;;  %v5259_v18 = vld [vmem:[%s27361_s29 + $0x71] sm:$0xff] }
 0x21b   : > { %23255 = vmatprep.mubr.msk.f32.mxu0 %vm653_vm1, %v4048_v19  ;;  %v5260_v19 = vld [vmem:[%s27361_s29 + $0x79] sm:$0xff] }
 0x21e   : > { %23256 = vmatmul.mubr.msk.f32.gmra.mrb[68].mxu0 %vm653_vm1, %v4049_v20  ;;  %v5261_v20 = vld [vmem:[%s27361_s29 + $0x81] sm:$0xff] }
 0x21f   : > { %23258 = vmatprep.mubr.msk.f32.mxu0 %vm653_vm1, %v4050_v21  ;;  %v5262_v21 = vld [vmem:[%s27361_s29 + $0x89] sm:$0xff] }
 0x222   : > { %23259 = vmatmul.mubr.msk.f32.gmra.mrb[70].mxu0 %vm653_vm1, %v4051_v22  ;;  %v5263_v22 = vld [vmem:[%s27361_s29 + $0x91] sm:$0xff] }
 0x223   : > { %23261 = vmatprep.mubr.msk.f32.mxu0 %vm653_vm1, %v4052_v23  ;;  %v5264_v23 = vld [vmem:[%s27361_s29 + $0x99] sm:$0xff] }
 0x226   : > { %23262 = vmatmul.mubr.msk.f32.gmra.mrb[72].mxu0 %vm653_vm1, %v4053_v24  ;;  %v5265_v24 = vld [vmem:[%s27361_s29 + $0xa1] sm:$0xff] }
 0x227   : > { %23264 = vmatprep.mubr.msk.f32.mxu0 %vm653_vm1, %v4054_v25  ;;  %v5266_v25 = vld [vmem:[%s27361_s29 + $0xa9] sm:$0xff] }
 0x22a   : > { %23265 = vmatmul.mubr.msk.f32.gmra.mrb[74].mxu0 %vm653_vm1, %v4055_v26  ;;  %v5267_v26 = vld [vmem:[%s27361_s29 + $0xb1] sm:$0xff] }
 0x22b   : > { %23267 = vmatprep.mubr.msk.f32.mxu0 %vm653_vm1, %v4056_v27  ;;  %v5268_v27 = vld [vmem:[%s27361_s29 + $0xb9] sm:$0xff] }
 0x22e   : > { %23268 = vmatmul.mubr.msk.f32.gmra.mrb[76].mxu0 %vm653_vm1, %v4057_v28  ;;  %v5269_v28 = vld [vmem:[%s27361_s29 + $0xc1] sm:$0xff] }
 0x22f   : > { %23270 = vmatprep.mubr.msk.f32.mxu0 %vm653_vm1, %v4058_v30  ;;  %v5270_v30 = vld [vmem:[%s27361_s29 + $0xc9] sm:$0xff] }
 0x232   : > { %23271 = vmatmul.mubr.msk.f32.gmra.mrb[78].mxu0 %vm653_vm1, %v4059_v31  ;;  %v5271_v31 = vld [vmem:[%s27361_s29 + $0xd1] sm:$0xff] }
 0x233   : > { %23273 = vmatprep.mubr.msk.f32.mxu0 %vm653_vm1, %v4060_v32  ;;  %v5272_v32 = vld [vmem:[%s27361_s29 + $0xd9] sm:$0xff] }
 0x236   : > { %23274 = vmatmul.mubr.msk.f32.gmra.mrb[80].mxu0 %vm653_vm1, %v4061_v34  ;;  %v5274_v34 = vld [vmem:[%s27361_s29 + $0xe9] sm:$0xff] }
 0x237   : > { %23276 = vmatprep.mubr.msk.f32.mxu0 %vm653_vm1, %v4062_v35  ;;  %v5275_v35 = vld [vmem:[%s27361_s29 + $0xf1] sm:$0xff] }
 0x23a   : > { %23277 = vmatmul.mubr.msk.f32.gmra.mrb[82].mxu0 %vm653_vm1, %v4063_v36  ;;  %v5276_v36 = vld [vmem:[%s27361_s29 + $0xf9] sm:$0xff] }
 0x23b   : > { %23279 = vmatprep.mubr.msk.f32.mxu0 %vm653_vm1, %v4064_v37  ;;  %v5277_v37 = vld [vmem:[%s27361_s29 + $0x101] sm:$0xff] }
 0x23e   : > { %23280 = vmatmul.mubr.msk.f32.gmra.mrb[84].mxu0 %vm653_vm1, %v4065_v38  ;;  %v5278_v38 = vld [vmem:[%s27361_s29 + $0x109] sm:$0xff] }
 0x23f   : > { %23282 = vmatprep.mubr.msk.f32.mxu0 %vm653_vm1, %v4066_v39  ;;  %v5279_v39 = vld [vmem:[%s27361_s29 + $0x111] sm:$0xff] }
 0x242   : > { %23283 = vmatmul.mubr.msk.f32.gmra.mrb[86].mxu0 %vm653_vm1, %v4067_v40  ;;  %v5280_v40 = vld [vmem:[%s27361_s29 + $0x119] sm:$0xff] }
 0x243   : > { %23285 = vmatprep.mubr.msk.f32.mxu0 %vm653_vm1, %v4068_v41  ;;  %v5281_v41 = vld [vmem:[%s27361_s29 + $0x121] sm:$0xff] }
 0x246   : > { %23286 = vmatmul.mubr.msk.f32.gmra.mrb[88].mxu0 %vm653_vm1, %v4069_v42  ;;  %v5282_v42 = vld [vmem:[%s27361_s29 + $0x129] sm:$0xff] }
 0x247   : > { %23288 = vmatprep.mubr.msk.f32.mxu0 %vm653_vm1, %v4070_v43  ;;  %v5283_v43 = vld [vmem:[%s27361_s29 + $0x131] sm:$0xff] }
 0x24a   : > { %23289 = vmatmul.mubr.msk.f32.gmra.mrb[90].mxu0 %vm653_vm1, %v4071_v44  ;;  %v5284_v44 = vld [vmem:[%s27361_s29 + $0x139] sm:$0xff] }
 0x24b   : > { %23291 = vmatprep.mubr.msk.f32.mxu0 %vm653_vm1, %v4072_v45  ;;  %v5285_v45 = vld [vmem:[%s27361_s29 + $0x141] sm:$0xff] }
 0x24e   : > { %23292 = vmatmul.mubr.msk.f32.gmra.mrb[92].mxu0 %vm653_vm1, %v4073_v46  ;;  %v5286_v46 = vld [vmem:[%s27361_s29 + $0x149] sm:$0xff] }
 0x24f   : > { %23294 = vmatprep.mubr.msk.f32.mxu0 %vm653_vm1, %v4074_v47  ;;  %v5287_v47 = vld [vmem:[%s27361_s29 + $0x151] sm:$0xff] }
 0x252   : > { %23295 = vmatmul.mubr.msk.f32.gmra.mrb[94].mxu0 %vm653_vm1, %v4075_v48  ;;  %v5288_v48 = vld [vmem:[%s27361_s29 + $0x159] sm:$0xff] }
 0x253   : > { %23297 = vmatprep.mubr.msk.f32.mxu0 %vm653_vm1, %v4076_v49  ;;  %v5289_v49 = vld [vmem:[%s27361_s29 + $0x161] sm:$0xff] }
 0x256   : > { %23298 = vmatmul.mubr.msk.f32.gmra.mrb[96].mxu0 %vm653_vm1, %v4077_v50  ;;  %v5290_v50 = vld [vmem:[%s27361_s29 + $0x169] sm:$0xff] }
 0x257   : > { %23300 = vmatprep.mubr.msk.f32.mxu0 %vm653_vm1, %v4078_v51  ;;  %v5291_v51 = vld [vmem:[%s27361_s29 + $0x171] sm:$0xff] }
 0x25a   : > { %23301 = vmatmul.mubr.msk.f32.gmra.mrb[98].mxu0 %vm653_vm1, %v4079_v52  ;;  %v5292_v52 = vld [vmem:[%s27361_s29 + $0x179] sm:$0xff] }
 0x25b   : > { %23303 = vmatprep.mubr.msk.f32.mxu0 %vm653_vm1, %v4080_v53  ;;  %v5293_v53 = vld [vmem:[%s27361_s29 + $0x181] sm:$0xff] }
 0x25e   : > { %23304 = vmatmul.mubr.msk.f32.gmra.mrb[100].mxu0 %vm653_vm1, %v4081_v54  ;;  %v5294_v54 = vld [vmem:[%s27361_s29 + $0x189] sm:$0xff] }
 0x25f   : > { %23306 = vmatprep.mubr.msk.f32.mxu0 %vm653_vm1, %v4082_v55  ;;  %v5295_v55 = vld [vmem:[%s27361_s29 + $0x191] sm:$0xff] }
 0x262   : > { %23307 = vmatmul.mubr.msk.f32.gmra.mrb[102].mxu0 %vm653_vm1, %v4083_v56  ;;  %v5296_v56 = vld [vmem:[%s27361_s29 + $0x199] sm:$0xff] }
 0x263   : > { %23309 = vmatprep.mubr.msk.f32.mxu0 %vm653_vm1, %v4084_v57  ;;  %v5297_v57 = vld [vmem:[%s27361_s29 + $0x1a1] sm:$0xff] }
 0x266   : > { %23310 = vmatmul.mubr.msk.f32.gmra.mrb[104].mxu0 %vm653_vm1, %v4085_v58  ;;  %v5298_v58 = vld [vmem:[%s27361_s29 + $0x1a9] sm:$0xff] }
 0x267   : > { %23312 = vmatprep.mubr.msk.f32.mxu0 %vm653_vm1, %v4086_v59  ;;  %v5299_v59 = vld [vmem:[%s27361_s29 + $0x1b1] sm:$0xff] }
 0x26a   : > { %23313 = vmatmul.mubr.msk.f32.gmra.mrb[106].mxu0 %vm653_vm1, %v4087_v60  ;;  %v5300_v60 = vld [vmem:[%s27361_s29 + $0x1b9] sm:$0xff] }
 0x26b   : > { %23315 = vmatprep.mubr.msk.f32.mxu0 %vm653_vm1, %v4088_v61  ;;  %v5301_v61 = vld [vmem:[%s27361_s29 + $0x1c1] sm:$0xff] }
 0x26e   : > { %23316 = vmatmul.mubr.msk.f32.gmra.mrb[108].mxu0 %vm653_vm1, %v4089_v62  ;;  %v5302_v62 = vld [vmem:[%s27361_s29 + $0x1c9] sm:$0xff] }
 0x26f   : > { %23318 = vmatprep.mubr.msk.f32.mxu0 %vm653_vm1, %v4090_v3  ;;  %v5303_v3 = vld [vmem:[%s27361_s29 + $0x1d1] sm:$0xff] }
 0x272   : > { %23319 = vmatmul.mubr.msk.f32.gmra.mrb[110].mxu0 %vm653_vm1, %v4091_v1  ;;  %v5304_v1 = vld [vmem:[%s27361_s29 + $0x1d9] sm:$0xff] }
 0x273   : > { %23321 = vmatprep.mubr.msk.f32.mxu0 %vm653_vm1, %v4092_v29  ;;  %v5305_v29 = vld [vmem:[%s27361_s29 + $0x1e1] sm:$0xff] }
 0x276   : > { %23322 = vmatmul.mubr.msk.f32.gmra.mrb[112].mxu0 %vm653_vm1, %v4093_v2  ;;  %v5306_v2 = vld [vmem:[%s27361_s29 + $0x1e9] sm:$0xff] }
 0x277   : > { %23324 = vmatprep.mubr.msk.f32.mxu0 %vm653_vm1, %v4094_v63  ;;  %v5307_v63 = vld [vmem:[%s27361_s29 + $0x1f1] sm:$0xff] }
 0x27a   : > { %23325 = vmatmul.mubr.msk.f32.gmra.mrb[114].mxu0 %vm653_vm1, %v4095_v5  ;;  %v5308_v5 = vld [vmem:[%s27361_s29 + $0x1f9] sm:$0xff] }
 0x27b   : > { %23327 = vmatprep.mubr.msk.f32.mxu0 %vm653_vm1, %v4096_v4  ;;  %v5309_v4 = vld [vmem:[%s27361_s29 + $0x201] sm:$0xff] }
 0x27e   : > { %23328 = vmatmul.mubr.msk.f32.gmra.mrb[116].mxu0 %vm653_vm1, %v4097_v0  ;;  %v5310_v0 = vld [vmem:[%s27361_s29 + $0x209] sm:$0xff] }
 0x27f   : > { %23330 = vmatprep.mubr.msk.f32.mxu0 %vm653_vm1, %v4098_v6  ;;  %v5311_v6 = vld [vmem:[%s27361_s29 + $0x211] sm:$0xff] }
 0x282   : > { %23331 = vmatmul.mubr.msk.f32.gmra.mrb[118].mxu0 %vm653_vm1, %v4099_v7  ;;  %v5312_v7 = vld [vmem:[%s27361_s29 + $0x219] sm:$0xff] }
 0x283   : > { %23335 = vmatprep.mubr.msk.f32.mxu0 %vm653_vm1, %v5249_v8  ;;  %v5313_v8 = vld [vmem:[%s27361_s29 + $0x221] sm:$0xff] }
 0x286   : > { %23336 = vmatmul.mubr.msk.f32.vlgmr.msra.gmra.mrb[0].mxu0 %vm653_vm1, %v5250_v9  ;;  %v5314_v9 = vld [vmem:[%s27361_s29 + $0x229] sm:$0xff] }
 0x287   : > { %23338 = vmatprep.mubr.msk.f32.mxu0 %vm653_vm1, %v5251_v10  ;;  %23516 = vmatpush3.msk.msra.mxu0 %vm1014_vm0, %v28104_v33  ;;  %v5273_v33 = vld [vmem:[%s27361_s29 + $0xe1] sm:$0xff]  ;;  %v5315_v10 = vld [vmem:[%s27361_s29 + $0x231] sm:$0xff] }
 0x28a   : > { %23339 = vmatmul.mubr.msk.f32.gmra.mrb[2].mxu0 %vm653_vm1, %v5252_v11  ;;  %v5316_v11 = vld [vmem:[%s27361_s29 + $0x239] sm:$0xff] }
 0x28b   : > { %23341 = vmatprep.mubr.msk.f32.mxu0 %vm653_vm1, %v5253_v12  ;;  %v5317_v12 = vld [vmem:[%s27361_s29 + $0x241] sm:$0xff] }
 0x28e   : > { %23342 = vmatmul.mubr.msk.f32.gmra.mrb[4].mxu0 %vm653_vm1, %v5254_v13  ;;  %v5318_v13 = vld [vmem:[%s27361_s29 + $0x249] sm:$0xff] }
 0x28f   : > { %23344 = vmatprep.mubr.msk.f32.mxu0 %vm653_vm1, %v5255_v14  ;;  %v5319_v14 = vld [vmem:[%s27361_s29 + $0x251] sm:$0xff] }
 0x292   : > { %23345 = vmatmul.mubr.msk.f32.gmra.mrb[6].mxu0 %vm653_vm1, %v5256_v15  ;;  %v5320_v15 = vld [vmem:[%s27361_s29 + $0x259] sm:$0xff] }
 0x293   : > { %23347 = vmatprep.mubr.msk.f32.mxu0 %vm653_vm1, %v5257_v16  ;;  %v5321_v16 = vld [vmem:[%s27361_s29 + $0x261] sm:$0xff] }
 0x296   : > { %23348 = vmatmul.mubr.msk.f32.gmra.mrb[8].mxu0 %vm653_vm1, %v5258_v17  ;;  %v5322_v17 = vld [vmem:[%s27361_s29 + $0x269] sm:$0xff] }
 0x297   : > { %23350 = vmatprep.mubr.msk.f32.mxu0 %vm653_vm1, %v5259_v18  ;;  %v5323_v18 = vld [vmem:[%s27361_s29 + $0x271] sm:$0xff] }
 0x29a   : > { %23351 = vmatmul.mubr.msk.f32.gmra.mrb[10].mxu0 %vm653_vm1, %v5260_v19  ;;  %v5324_v19 = vld [vmem:[%s27361_s29 + $0x279] sm:$0xff] }
 0x29b   : > { %23353 = vmatprep.mubr.msk.f32.mxu0 %vm653_vm1, %v5261_v20  ;;  %v5325_v20 = vld [vmem:[%s27361_s29 + $0x281] sm:$0xff] }
 0x29e   : > { %23354 = vmatmul.mubr.msk.f32.gmra.mrb[12].mxu0 %vm653_vm1, %v5262_v21  ;;  %v5326_v21 = vld [vmem:[%s27361_s29 + $0x289] sm:$0xff] }
 0x29f   : > { %23356 = vmatprep.mubr.msk.f32.mxu0 %vm653_vm1, %v5263_v22  ;;  %v5327_v22 = vld [vmem:[%s27361_s29 + $0x291] sm:$0xff] }
 0x2a2   : > { %23357 = vmatmul.mubr.msk.f32.gmra.mrb[14].mxu0 %vm653_vm1, %v5264_v23  ;;  %v5328_v23 = vld [vmem:[%s27361_s29 + $0x299] sm:$0xff] }
 0x2a3   : > { %23359 = vmatprep.mubr.msk.f32.mxu0 %vm653_vm1, %v5265_v24  ;;  %v5329_v24 = vld [vmem:[%s27361_s29 + $0x2a1] sm:$0xff] }
 0x2a6   : > { %23360 = vmatmul.mubr.msk.f32.gmra.mrb[16].mxu0 %vm653_vm1, %v5266_v25  ;;  %v28353_v25 = vld [vmem:[%s33335_s1 + $0x12] sm:$0x7] }
 0x2a7   : > { %23362 = vmatprep.mubr.msk.f32.mxu0 %vm653_vm1, %v5267_v26  ;;  %v5330_v26 = vld [vmem:[%s27361_s29 + $0x2a9] sm:$0xff]  ;;  %23697 = vmatprep.subr.msk.mxu0 %vm1014_vm0, %v28353_v25 }
 0x2aa   : > { %23363 = vmatmul.mubr.msk.f32.gmra.mrb[18].mxu0 %vm653_vm1, %v5268_v27  ;;  %v5331_v27 = vld [vmem:[%s27361_s29 + $0x2b1] sm:$0xff] }
 0x2ab   : > { %23365 = vmatprep.mubr.msk.f32.mxu0 %vm653_vm1, %v5269_v28  ;;  %v5332_v28 = vld [vmem:[%s27361_s29 + $0x2b9] sm:$0xff] }
 0x2ae   : > { %23366 = vmatmul.mubr.msk.f32.gmra.mrb[20].mxu0 %vm653_vm1, %v5270_v30  ;;  %v5333_v30 = vld [vmem:[%s27361_s29 + $0x2c1] sm:$0xff] }
 0x2af   : > { %23368 = vmatprep.mubr.msk.f32.mxu0 %vm653_vm1, %v5271_v31  ;;  %v5334_v31 = vld [vmem:[%s27361_s29 + $0x2c9] sm:$0xff] }
 0x2b2   : > { %23369 = vmatmul.mubr.msk.f32.gmra.mrb[22].mxu0 %vm653_vm1, %v5272_v32  ;;  %v5335_v32 = vld [vmem:[%s27361_s29 + $0x2d1] sm:$0xff] }
 0x2b3   : > { %23371 = vmatprep.mubr.msk.f32.mxu0 %vm653_vm1, %v5273_v33  ;;  %v5336_v33 = vld [vmem:[%s27361_s29 + $0x2d9] sm:$0xff] }
 0x2b6   : > { %23372 = vmatmul.mubr.msk.f32.gmra.mrb[24].mxu0 %vm653_vm1, %v5274_v34  ;;  %v5337_v34 = vld [vmem:[%s27361_s29 + $0x2e1] sm:$0xff] }
 0x2b7   : > { %23374 = vmatprep.mubr.msk.f32.mxu0 %vm653_vm1, %v5275_v35  ;;  %v5338_v35 = vld [vmem:[%s27361_s29 + $0x2e9] sm:$0xff] }
 0x2ba   : > { %23375 = vmatmul.mubr.msk.f32.gmra.mrb[26].mxu0 %vm653_vm1, %v5276_v36  ;;  %v5339_v36 = vld [vmem:[%s27361_s29 + $0x2f1] sm:$0xff] }
 0x2bb   : > { %23377 = vmatprep.mubr.msk.f32.mxu0 %vm653_vm1, %v5277_v37  ;;  %v5340_v37 = vld [vmem:[%s27361_s29 + $0x2f9] sm:$0xff] }
 0x2be   : > { %23378 = vmatmul.mubr.msk.f32.gmra.mrb[28].mxu0 %vm653_vm1, %v5278_v38  ;;  %v5341_v38 = vld [vmem:[%s27361_s29 + $0x301] sm:$0xff] }
 0x2bf   : > { %23380 = vmatprep.mubr.msk.f32.mxu0 %vm653_vm1, %v5279_v39  ;;  %v5342_v39 = vld [vmem:[%s27361_s29 + $0x309] sm:$0xff] }
 0x2c2   : > { %23381 = vmatmul.mubr.msk.f32.gmra.mrb[30].mxu0 %vm653_vm1, %v5280_v40  ;;  %v5343_v40 = vld [vmem:[%s27361_s29 + $0x311] sm:$0xff] }
 0x2c3   : > { %23383 = vmatprep.mubr.msk.f32.mxu0 %vm653_vm1, %v5281_v41  ;;  %v5344_v41 = vld [vmem:[%s27361_s29 + $0x319] sm:$0xff] }
 0x2c6   : > { %23384 = vmatmul.mubr.msk.f32.gmra.mrb[32].mxu0 %vm653_vm1, %v5282_v42  ;;  %v5345_v42 = vld [vmem:[%s27361_s29 + $0x321] sm:$0xff] }
 0x2c7   : > { %23386 = vmatprep.mubr.msk.f32.mxu0 %vm653_vm1, %v5283_v43  ;;  %v5346_v43 = vld [vmem:[%s27361_s29 + $0x329] sm:$0xff] }
 0x2ca   : > { %23387 = vmatmul.mubr.msk.f32.gmra.mrb[34].mxu0 %vm653_vm1, %v5284_v44  ;;  %v5347_v44 = vld [vmem:[%s27361_s29 + $0x331] sm:$0xff] }
 0x2cb   : > { %23389 = vmatprep.mubr.msk.f32.mxu0 %vm653_vm1, %v5285_v45  ;;  %v5348_v45 = vld [vmem:[%s27361_s29 + $0x339] sm:$0xff] }
 0x2ce   : > { %23390 = vmatmul.mubr.msk.f32.gmra.mrb[36].mxu0 %vm653_vm1, %v5286_v46  ;;  %v5349_v46 = vld [vmem:[%s27361_s29 + $0x341] sm:$0xff] }
 0x2cf   : > { %23392 = vmatprep.mubr.msk.f32.mxu0 %vm653_vm1, %v5287_v47  ;;  %v5350_v47 = vld [vmem:[%s27361_s29 + $0x349] sm:$0xff] }
 0x2d2   : > { %23393 = vmatmul.mubr.msk.f32.gmra.mrb[38].mxu0 %vm653_vm1, %v5288_v48  ;;  %v5351_v48 = vld [vmem:[%s27361_s29 + $0x351] sm:$0xff] }
 0x2d3   : > { %23395 = vmatprep.mubr.msk.f32.mxu0 %vm653_vm1, %v5289_v49  ;;  %v5352_v49 = vld [vmem:[%s27361_s29 + $0x359] sm:$0xff] }
 0x2d6   : > { %23396 = vmatmul.mubr.msk.f32.gmra.mrb[40].mxu0 %vm653_vm1, %v5290_v50  ;;  %v5353_v50 = vld [vmem:[%s27361_s29 + $0x361] sm:$0xff] }
 0x2d7   : > { %23398 = vmatprep.mubr.msk.f32.mxu0 %vm653_vm1, %v5291_v51  ;;  %v5354_v51 = vld [vmem:[%s27361_s29 + $0x369] sm:$0xff] }
 0x2da   : > { %23399 = vmatmul.mubr.msk.f32.gmra.mrb[42].mxu0 %vm653_vm1, %v5292_v52  ;;  %v5355_v52 = vld [vmem:[%s27361_s29 + $0x371] sm:$0xff] }
 0x2db   : > { %23401 = vmatprep.mubr.msk.f32.mxu0 %vm653_vm1, %v5293_v53  ;;  %v5356_v53 = vld [vmem:[%s27361_s29 + $0x379] sm:$0xff] }
 0x2de   : > { %23402 = vmatmul.mubr.msk.f32.gmra.mrb[44].mxu0 %vm653_vm1, %v5294_v54  ;;  %v5357_v54 = vld [vmem:[%s27361_s29 + $0x381] sm:$0xff] }
 0x2df   : > { %23404 = vmatprep.mubr.msk.f32.mxu0 %vm653_vm1, %v5295_v55  ;;  %v5358_v55 = vld [vmem:[%s27361_s29 + $0x389] sm:$0xff] }
 0x2e2   : > { %23405 = vmatmul.mubr.msk.f32.gmra.mrb[46].mxu0 %vm653_vm1, %v5296_v56  ;;  %v5359_v56 = vld [vmem:[%s27361_s29 + $0x391] sm:$0xff] }
 0x2e3   : > { %23407 = vmatprep.mubr.msk.f32.mxu0 %vm653_vm1, %v5297_v57  ;;  %v5360_v57 = vld [vmem:[%s27361_s29 + $0x399] sm:$0xff] }
 0x2e6   : > { %23408 = vmatmul.mubr.msk.f32.gmra.mrb[48].mxu0 %vm653_vm1, %v5298_v58  ;;  %v5361_v58 = vld [vmem:[%s27361_s29 + $0x3a1] sm:$0xff] }
 0x2e7   : > { %23410 = vmatprep.mubr.msk.f32.mxu0 %vm653_vm1, %v5299_v59  ;;  %v5362_v59 = vld [vmem:[%s27361_s29 + $0x3a9] sm:$0xff] }
 0x2ea   : > { %23411 = vmatmul.mubr.msk.f32.gmra.mrb[50].mxu0 %vm653_vm1, %v5300_v60  ;;  %v5363_v60 = vld [vmem:[%s27361_s29 + $0x3b1] sm:$0xff] }
 0x2eb   : > { %23413 = vmatprep.mubr.msk.f32.mxu0 %vm653_vm1, %v5301_v61  ;;  %v5364_v61 = vld [vmem:[%s27361_s29 + $0x3b9] sm:$0xff] }
 0x2ee   : > { %23414 = vmatmul.mubr.msk.f32.gmra.mrb[52].mxu0 %vm653_vm1, %v5302_v62  ;;  %v5365_v62 = vld [vmem:[%s27361_s29 + $0x3c1] sm:$0xff] }
 0x2ef   : > { %23416 = vmatprep.mubr.msk.f32.mxu0 %vm653_vm1, %v5303_v3  ;;  %v5366_v3 = vld [vmem:[%s27361_s29 + $0x3c9] sm:$0xff] }
 0x2f2   : > { %23417 = vmatmul.mubr.msk.f32.gmra.mrb[54].mxu0 %vm653_vm1, %v5304_v1  ;;  %v5367_v1 = vld [vmem:[%s27361_s29 + $0x3d1] sm:$0xff] }
 0x2f3   : > { %23419 = vmatprep.mubr.msk.f32.mxu0 %vm653_vm1, %v5305_v29  ;;  %v5368_v29 = vld [vmem:[%s27361_s29 + $0x3d9] sm:$0xff] }
 0x2f6   : > { %23420 = vmatmul.mubr.msk.f32.gmra.mrb[56].mxu0 %vm653_vm1, %v5306_v2  ;;  %v6518_v2 = vld [vmem:[%s27361_s29 + $0x22] sm:$0xff] }
 0x2f7   : > { %23422 = vmatprep.mubr.msk.f32.mxu0 %vm653_vm1, %v5307_v63  ;;  %v6519_v63 = vld [vmem:[%s27361_s29 + $0x2a] sm:$0xff] }
 0x2fa   : > { %23423 = vmatmul.mubr.msk.f32.gmra.mrb[58].mxu0 %vm653_vm1, %v5308_v5  ;;  %v6520_v5 = vld [vmem:[%s27361_s29 + $0x32] sm:$0xff] }
 0x2fb   : > { %23425 = vmatprep.mubr.msk.f32.mxu0 %vm653_vm1, %v5309_v4  ;;  %v6521_v4 = vld [vmem:[%s27361_s29 + $0x3a] sm:$0xff] }
 0x2fe   : > { %23426 = vmatmul.mubr.msk.f32.gmra.mrb[60].mxu0 %vm653_vm1, %v5310_v0  ;;  %v6522_v0 = vld [vmem:[%s27361_s29 + $0x42] sm:$0xff] }
 0x2ff   : > { %23428 = vmatprep.mubr.msk.f32.mxu0 %vm653_vm1, %v5311_v6  ;;  %v6523_v6 = vld [vmem:[%s27361_s29 + $0x4a] sm:$0xff] }
 0x302   : > { %23429 = vmatmul.mubr.msk.f32.gmra.mrb[62].mxu0 %vm653_vm1, %v5312_v7  ;;  %v6524_v7 = vld [vmem:[%s27361_s29 + $0x52] sm:$0xff] }
 0x303   : > { %23431 = vmatprep.mubr.msk.f32.mxu0 %vm653_vm1, %v5313_v8  ;;  %v6525_v8 = vld [vmem:[%s27361_s29 + $0x5a] sm:$0xff] }
 0x306   : > { %23432 = vmatmul.mubr.msk.f32.gmra.mrb[64].mxu0 %vm653_vm1, %v5314_v9  ;;  %v6526_v9 = vld [vmem:[%s27361_s29 + $0x62] sm:$0xff] }
 0x307   : > { %23434 = vmatprep.mubr.msk.f32.mxu0 %vm653_vm1, %v5315_v10  ;;  %v6527_v10 = vld [vmem:[%s27361_s29 + $0x6a] sm:$0xff] }
 0x30a   : > { %23435 = vmatmul.mubr.msk.f32.gmra.mrb[66].mxu0 %vm653_vm1, %v5316_v11  ;;  %v6528_v11 = vld [vmem:[%s27361_s29 + $0x72] sm:$0xff] }
 0x30b   : > { %23437 = vmatprep.mubr.msk.f32.mxu0 %vm653_vm1, %v5317_v12  ;;  %v6529_v12 = vld [vmem:[%s27361_s29 + $0x7a] sm:$0xff] }
 0x30e   : > { %23438 = vmatmul.mubr.msk.f32.gmra.mrb[68].mxu0 %vm653_vm1, %v5318_v13  ;;  %v6530_v13 = vld [vmem:[%s27361_s29 + $0x82] sm:$0xff] }
 0x30f   : > { %23440 = vmatprep.mubr.msk.f32.mxu0 %vm653_vm1, %v5319_v14  ;;  %v6531_v14 = vld [vmem:[%s27361_s29 + $0x8a] sm:$0xff] }
 0x312   : > { %23441 = vmatmul.mubr.msk.f32.gmra.mrb[70].mxu0 %vm653_vm1, %v5320_v15  ;;  %v6532_v15 = vld [vmem:[%s27361_s29 + $0x92] sm:$0xff] }
 0x313   : > { %23443 = vmatprep.mubr.msk.f32.mxu0 %vm653_vm1, %v5321_v16  ;;  %v6533_v16 = vld [vmem:[%s27361_s29 + $0x9a] sm:$0xff] }
 0x316   : > { %23444 = vmatmul.mubr.msk.f32.gmra.mrb[72].mxu0 %vm653_vm1, %v5322_v17  ;;  %v6534_v17 = vld [vmem:[%s27361_s29 + $0xa2] sm:$0xff] }
 0x317   : > { %23446 = vmatprep.mubr.msk.f32.mxu0 %vm653_vm1, %v5323_v18  ;;  %v6535_v18 = vld [vmem:[%s27361_s29 + $0xaa] sm:$0xff] }
 0x31a   : > { %23447 = vmatmul.mubr.msk.f32.gmra.mrb[74].mxu0 %vm653_vm1, %v5324_v19  ;;  %v6536_v19 = vld [vmem:[%s27361_s29 + $0xb2] sm:$0xff] }
 0x31b   : > { %23449 = vmatprep.mubr.msk.f32.mxu0 %vm653_vm1, %v5325_v20  ;;  %v6537_v20 = vld [vmem:[%s27361_s29 + $0xba] sm:$0xff] }
 0x31e   : > { %23450 = vmatmul.mubr.msk.f32.gmra.mrb[76].mxu0 %vm653_vm1, %v5326_v21  ;;  %v6538_v21 = vld [vmem:[%s27361_s29 + $0xc2] sm:$0xff] }
 0x31f   : > { %23452 = vmatprep.mubr.msk.f32.mxu0 %vm653_vm1, %v5327_v22  ;;  %v6539_v22 = vld [vmem:[%s27361_s29 + $0xca] sm:$0xff] }
 0x322   : > { %23453 = vmatmul.mubr.msk.f32.gmra.mrb[78].mxu0 %vm653_vm1, %v5328_v23  ;;  %v6540_v23 = vld [vmem:[%s27361_s29 + $0xd2] sm:$0xff] }
 0x323   : > { %23455 = vmatprep.mubr.msk.f32.mxu0 %vm653_vm1, %v5329_v24  ;;  %v6541_v24 = vld [vmem:[%s27361_s29 + $0xda] sm:$0xff] }
 0x326   : > { %23456 = vmatmul.mubr.msk.f32.gmra.mrb[80].mxu0 %vm653_vm1, %v5330_v26  ;;  %v6543_v26 = vld [vmem:[%s27361_s29 + $0xea] sm:$0xff] }
 0x327   : > { %23458 = vmatprep.mubr.msk.f32.mxu0 %vm653_vm1, %v5331_v27  ;;  %v6544_v27 = vld [vmem:[%s27361_s29 + $0xf2] sm:$0xff] }
 0x32a   : > { %23459 = vmatmul.mubr.msk.f32.gmra.mrb[82].mxu0 %vm653_vm1, %v5332_v28  ;;  %v6545_v28 = vld [vmem:[%s27361_s29 + $0xfa] sm:$0xff] }
 0x32b   : > { %23461 = vmatprep.mubr.msk.f32.mxu0 %vm653_vm1, %v5333_v30  ;;  %v6546_v30 = vld [vmem:[%s27361_s29 + $0x102] sm:$0xff] }
 0x32e   : > { %23462 = vmatmul.mubr.msk.f32.gmra.mrb[84].mxu0 %vm653_vm1, %v5334_v31  ;;  %v6547_v31 = vld [vmem:[%s27361_s29 + $0x10a] sm:$0xff] }
 0x32f   : > { %23464 = vmatprep.mubr.msk.f32.mxu0 %vm653_vm1, %v5335_v32  ;;  %v6548_v32 = vld [vmem:[%s27361_s29 + $0x112] sm:$0xff] }
 0x332   : > { %23465 = vmatmul.mubr.msk.f32.gmra.mrb[86].mxu0 %vm653_vm1, %v5336_v33  ;;  %v6549_v33 = vld [vmem:[%s27361_s29 + $0x11a] sm:$0xff] }
 0x333   : > { %23467 = vmatprep.mubr.msk.f32.mxu0 %vm653_vm1, %v5337_v34  ;;  %v6550_v34 = vld [vmem:[%s27361_s29 + $0x122] sm:$0xff] }
 0x336   : > { %23468 = vmatmul.mubr.msk.f32.gmra.mrb[88].mxu0 %vm653_vm1, %v5338_v35  ;;  %v6551_v35 = vld [vmem:[%s27361_s29 + $0x12a] sm:$0xff] }
 0x337   : > { %23470 = vmatprep.mubr.msk.f32.mxu0 %vm653_vm1, %v5339_v36  ;;  %v6552_v36 = vld [vmem:[%s27361_s29 + $0x132] sm:$0xff] }
 0x33a   : > { %23471 = vmatmul.mubr.msk.f32.gmra.mrb[90].mxu0 %vm653_vm1, %v5340_v37  ;;  %v6553_v37 = vld [vmem:[%s27361_s29 + $0x13a] sm:$0xff] }
 0x33b   : > { %23473 = vmatprep.mubr.msk.f32.mxu0 %vm653_vm1, %v5341_v38  ;;  %v6554_v38 = vld [vmem:[%s27361_s29 + $0x142] sm:$0xff] }
 0x33e   : > { %23474 = vmatmul.mubr.msk.f32.gmra.mrb[92].mxu0 %vm653_vm1, %v5342_v39  ;;  %v6555_v39 = vld [vmem:[%s27361_s29 + $0x14a] sm:$0xff] }
 0x33f   : > { %23476 = vmatprep.mubr.msk.f32.mxu0 %vm653_vm1, %v5343_v40  ;;  %v6556_v40 = vld [vmem:[%s27361_s29 + $0x152] sm:$0xff] }
 0x342   : > { %23477 = vmatmul.mubr.msk.f32.gmra.mrb[94].mxu0 %vm653_vm1, %v5344_v41  ;;  %v6557_v41 = vld [vmem:[%s27361_s29 + $0x15a] sm:$0xff] }
 0x343   : > { %23479 = vmatprep.mubr.msk.f32.mxu0 %vm653_vm1, %v5345_v42  ;;  %v6558_v42 = vld [vmem:[%s27361_s29 + $0x162] sm:$0xff] }
 0x346   : > { %23480 = vmatmul.mubr.msk.f32.gmra.mrb[96].mxu0 %vm653_vm1, %v5346_v43  ;;  %v6559_v43 = vld [vmem:[%s27361_s29 + $0x16a] sm:$0xff] }
 0x347   : > { %23482 = vmatprep.mubr.msk.f32.mxu0 %vm653_vm1, %v5347_v44  ;;  %v6560_v44 = vld [vmem:[%s27361_s29 + $0x172] sm:$0xff] }
 0x34a   : > { %23483 = vmatmul.mubr.msk.f32.gmra.mrb[98].mxu0 %vm653_vm1, %v5348_v45  ;;  %v6561_v45 = vld [vmem:[%s27361_s29 + $0x17a] sm:$0xff] }
 0x34b   : > { %23485 = vmatprep.mubr.msk.f32.mxu0 %vm653_vm1, %v5349_v46  ;;  %v6562_v46 = vld [vmem:[%s27361_s29 + $0x182] sm:$0xff] }
 0x34e   : > { %23486 = vmatmul.mubr.msk.f32.gmra.mrb[100].mxu0 %vm653_vm1, %v5350_v47  ;;  %v6563_v47 = vld [vmem:[%s27361_s29 + $0x18a] sm:$0xff] }
 0x34f   : > { %23488 = vmatprep.mubr.msk.f32.mxu0 %vm653_vm1, %v5351_v48  ;;  %v6564_v48 = vld [vmem:[%s27361_s29 + $0x192] sm:$0xff] }
 0x352   : > { %23489 = vmatmul.mubr.msk.f32.gmra.mrb[102].mxu0 %vm653_vm1, %v5352_v49  ;;  %v6565_v49 = vld [vmem:[%s27361_s29 + $0x19a] sm:$0xff] }
 0x353   : > { %23491 = vmatprep.mubr.msk.f32.mxu0 %vm653_vm1, %v5353_v50  ;;  %v6566_v50 = vld [vmem:[%s27361_s29 + $0x1a2] sm:$0xff] }
 0x356   : > { %23492 = vmatmul.mubr.msk.f32.gmra.mrb[104].mxu0 %vm653_vm1, %v5354_v51  ;;  %v6567_v51 = vld [vmem:[%s27361_s29 + $0x1aa] sm:$0xff] }
 0x357   : > { %23494 = vmatprep.mubr.msk.f32.mxu0 %vm653_vm1, %v5355_v52  ;;  %v6568_v52 = vld [vmem:[%s27361_s29 + $0x1b2] sm:$0xff] }
 0x35a   : > { %23495 = vmatmul.mubr.msk.f32.gmra.mrb[106].mxu0 %vm653_vm1, %v5356_v53  ;;  %v6569_v53 = vld [vmem:[%s27361_s29 + $0x1ba] sm:$0xff] }
 0x35b   : > { %23497 = vmatprep.mubr.msk.f32.mxu0 %vm653_vm1, %v5357_v54  ;;  %v6570_v54 = vld [vmem:[%s27361_s29 + $0x1c2] sm:$0xff] }
 0x35e   : > { %23498 = vmatmul.mubr.msk.f32.gmra.mrb[108].mxu0 %vm653_vm1, %v5358_v55  ;;  %v6571_v55 = vld [vmem:[%s27361_s29 + $0x1ca] sm:$0xff] }
 0x35f   : > { %23500 = vmatprep.mubr.msk.f32.mxu0 %vm653_vm1, %v5359_v56  ;;  %v6572_v56 = vld [vmem:[%s27361_s29 + $0x1d2] sm:$0xff] }
 0x362   : > { %23501 = vmatmul.mubr.msk.f32.gmra.mrb[110].mxu0 %vm653_vm1, %v5360_v57  ;;  %v6573_v57 = vld [vmem:[%s27361_s29 + $0x1da] sm:$0xff] }
 0x363   : > { %23503 = vmatprep.mubr.msk.f32.mxu0 %vm653_vm1, %v5361_v58  ;;  %v6574_v58 = vld [vmem:[%s27361_s29 + $0x1e2] sm:$0xff] }
 0x366   : > { %23504 = vmatmul.mubr.msk.f32.gmra.mrb[112].mxu0 %vm653_vm1, %v5362_v59  ;;  %v6575_v59 = vld [vmem:[%s27361_s29 + $0x1ea] sm:$0xff] }
 0x367   : > { %23506 = vmatprep.mubr.msk.f32.mxu0 %vm653_vm1, %v5363_v60  ;;  %v6576_v60 = vld [vmem:[%s27361_s29 + $0x1f2] sm:$0xff] }
 0x36a   : > { %23507 = vmatmul.mubr.msk.f32.gmra.mrb[114].mxu0 %vm653_vm1, %v5364_v61  ;;  %v6577_v61 = vld [vmem:[%s27361_s29 + $0x1fa] sm:$0xff] }
 0x36b   : > { %23509 = vmatprep.mubr.msk.f32.mxu0 %vm653_vm1, %v5365_v62  ;;  %v6578_v62 = vld [vmem:[%s27361_s29 + $0x202] sm:$0xff] }
 0x36e   : > { %23510 = vmatmul.mubr.msk.f32.gmra.mrb[116].mxu0 %vm653_vm1, %v5366_v3  ;;  %v6579_v3 = vld [vmem:[%s27361_s29 + $0x20a] sm:$0xff] }
 0x36f   : > { %23512 = vmatprep.mubr.msk.f32.mxu0 %vm653_vm1, %v5367_v1  ;;  %v6580_v1 = vld [vmem:[%s27361_s29 + $0x212] sm:$0xff] }
 0x372   : > { %23513 = vmatmul.mubr.msk.f32.gmra.mrb[118].mxu0 %vm653_vm1, %v5368_v29  ;;  %v6581_v29 = vld [vmem:[%s27361_s29 + $0x21a] sm:$0xff] }
 0x373   : > { %23517 = vmatprep.mubr.msk.f32.mxu0 %vm653_vm1, %v6518_v2  ;;  %v6582_v2 = vld [vmem:[%s27361_s29 + $0x222] sm:$0xff] }
 0x376   : > { %23518 = vmatmul.mubr.msk.f32.vlgmr.msra.gmra.mrb[0].mxu0 %vm653_vm1, %v6519_v63  ;;  %v6583_v63 = vld [vmem:[%s27361_s29 + $0x22a] sm:$0xff] }
 0x377   : > { %23520 = vmatprep.mubr.msk.f32.mxu0 %vm653_vm1, %v6520_v5  ;;  %23698 = vmatpush3.msk.msra.mxu0 %vm1014_vm0, %v28353_v25  ;;  %v6542_v25 = vld [vmem:[%s27361_s29 + $0xe2] sm:$0xff]  ;;  %v6584_v5 = vld [vmem:[%s27361_s29 + $0x232] sm:$0xff] }
 0x37a   : > { %23521 = vmatmul.mubr.msk.f32.gmra.mrb[2].mxu0 %vm653_vm1, %v6521_v4  ;;  %v6585_v4 = vld [vmem:[%s27361_s29 + $0x23a] sm:$0xff] }
 0x37b   : > { %23523 = vmatprep.mubr.msk.f32.mxu0 %vm653_vm1, %v6522_v0  ;;  %v6586_v0 = vld [vmem:[%s27361_s29 + $0x242] sm:$0xff] }
 0x37e   : > { %23524 = vmatmul.mubr.msk.f32.gmra.mrb[4].mxu0 %vm653_vm1, %v6523_v6  ;;  %v6587_v6 = vld [vmem:[%s27361_s29 + $0x24a] sm:$0xff] }
 0x37f   : > { %23526 = vmatprep.mubr.msk.f32.mxu0 %vm653_vm1, %v6524_v7  ;;  %v6588_v7 = vld [vmem:[%s27361_s29 + $0x252] sm:$0xff] }
 0x382   : > { %23527 = vmatmul.mubr.msk.f32.gmra.mrb[6].mxu0 %vm653_vm1, %v6525_v8  ;;  %v6589_v8 = vld [vmem:[%s27361_s29 + $0x25a] sm:$0xff] }
 0x383   : > { %23529 = vmatprep.mubr.msk.f32.mxu0 %vm653_vm1, %v6526_v9  ;;  %v6590_v9 = vld [vmem:[%s27361_s29 + $0x262] sm:$0xff] }
 0x386   : > { %23530 = vmatmul.mubr.msk.f32.gmra.mrb[8].mxu0 %vm653_vm1, %v6527_v10  ;;  %v6591_v10 = vld [vmem:[%s27361_s29 + $0x26a] sm:$0xff] }
 0x387   : > { %23532 = vmatprep.mubr.msk.f32.mxu0 %vm653_vm1, %v6528_v11  ;;  %v6592_v11 = vld [vmem:[%s27361_s29 + $0x272] sm:$0xff] }
 0x38a   : > { %23533 = vmatmul.mubr.msk.f32.gmra.mrb[10].mxu0 %vm653_vm1, %v6529_v12  ;;  %v6593_v12 = vld [vmem:[%s27361_s29 + $0x27a] sm:$0xff] }
 0x38b   : > { %23535 = vmatprep.mubr.msk.f32.mxu0 %vm653_vm1, %v6530_v13  ;;  %v6594_v13 = vld [vmem:[%s27361_s29 + $0x282] sm:$0xff] }
 0x38e   : > { %23536 = vmatmul.mubr.msk.f32.gmra.mrb[12].mxu0 %vm653_vm1, %v6531_v14  ;;  %v6595_v14 = vld [vmem:[%s27361_s29 + $0x28a] sm:$0xff] }
 0x38f   : > { %23538 = vmatprep.mubr.msk.f32.mxu0 %vm653_vm1, %v6532_v15  ;;  %v6596_v15 = vld [vmem:[%s27361_s29 + $0x292] sm:$0xff] }
 0x392   : > { %23539 = vmatmul.mubr.msk.f32.gmra.mrb[14].mxu0 %vm653_vm1, %v6533_v16  ;;  %v6597_v16 = vld [vmem:[%s27361_s29 + $0x29a] sm:$0xff] }
 0x393   : > { %23541 = vmatprep.mubr.msk.f32.mxu0 %vm653_vm1, %v6534_v17  ;;  %v6598_v17 = vld [vmem:[%s27361_s29 + $0x2a2] sm:$0xff] }
 0x396   : > { %23542 = vmatmul.mubr.msk.f32.gmra.mrb[16].mxu0 %vm653_vm1, %v6535_v18  ;;  %v28602_v18 = vld [vmem:[%s33335_s1 + $0x15] sm:$0x7] }
 0x397   : > { %23544 = vmatprep.mubr.msk.f32.mxu0 %vm653_vm1, %v6536_v19  ;;  %v6599_v19 = vld [vmem:[%s27361_s29 + $0x2aa] sm:$0xff]  ;;  %23879 = vmatprep.subr.msk.mxu0 %vm1014_vm0, %v28602_v18 }
 0x39a   : > { %23545 = vmatmul.mubr.msk.f32.gmra.mrb[18].mxu0 %vm653_vm1, %v6537_v20  ;;  %v6600_v20 = vld [vmem:[%s27361_s29 + $0x2b2] sm:$0xff] }
 0x39b   : > { %23547 = vmatprep.mubr.msk.f32.mxu0 %vm653_vm1, %v6538_v21  ;;  %v6601_v21 = vld [vmem:[%s27361_s29 + $0x2ba] sm:$0xff] }
 0x39e   : > { %23548 = vmatmul.mubr.msk.f32.gmra.mrb[20].mxu0 %vm653_vm1, %v6539_v22  ;;  %v6602_v22 = vld [vmem:[%s27361_s29 + $0x2c2] sm:$0xff] }
 0x39f   : > { %23550 = vmatprep.mubr.msk.f32.mxu0 %vm653_vm1, %v6540_v23  ;;  %v6603_v23 = vld [vmem:[%s27361_s29 + $0x2ca] sm:$0xff] }
 0x3a2   : > { %23551 = vmatmul.mubr.msk.f32.gmra.mrb[22].mxu0 %vm653_vm1, %v6541_v24  ;;  %v6604_v24 = vld [vmem:[%s27361_s29 + $0x2d2] sm:$0xff] }
 0x3a3   : > { %23553 = vmatprep.mubr.msk.f32.mxu0 %vm653_vm1, %v6542_v25  ;;  %v6605_v25 = vld [vmem:[%s27361_s29 + $0x2da] sm:$0xff] }
 0x3a6   : > { %23554 = vmatmul.mubr.msk.f32.gmra.mrb[24].mxu0 %vm653_vm1, %v6543_v26  ;;  %v6606_v26 = vld [vmem:[%s27361_s29 + $0x2e2] sm:$0xff] }
 0x3a7   : > { %23556 = vmatprep.mubr.msk.f32.mxu0 %vm653_vm1, %v6544_v27  ;;  %v6607_v27 = vld [vmem:[%s27361_s29 + $0x2ea] sm:$0xff] }
 0x3aa   : > { %23557 = vmatmul.mubr.msk.f32.gmra.mrb[26].mxu0 %vm653_vm1, %v6545_v28  ;;  %v6608_v28 = vld [vmem:[%s27361_s29 + $0x2f2] sm:$0xff] }
 0x3ab   : > { %23559 = vmatprep.mubr.msk.f32.mxu0 %vm653_vm1, %v6546_v30  ;;  %v6609_v30 = vld [vmem:[%s27361_s29 + $0x2fa] sm:$0xff] }
 0x3ae   : > { %23560 = vmatmul.mubr.msk.f32.gmra.mrb[28].mxu0 %vm653_vm1, %v6547_v31  ;;  %v6610_v31 = vld [vmem:[%s27361_s29 + $0x302] sm:$0xff] }
 0x3af   : > { %23562 = vmatprep.mubr.msk.f32.mxu0 %vm653_vm1, %v6548_v32  ;;  %v6611_v32 = vld [vmem:[%s27361_s29 + $0x30a] sm:$0xff] }
 0x3b2   : > { %23563 = vmatmul.mubr.msk.f32.gmra.mrb[30].mxu0 %vm653_vm1, %v6549_v33  ;;  %v6612_v33 = vld [vmem:[%s27361_s29 + $0x312] sm:$0xff] }
 0x3b3   : > { %23565 = vmatprep.mubr.msk.f32.mxu0 %vm653_vm1, %v6550_v34  ;;  %v6613_v34 = vld [vmem:[%s27361_s29 + $0x31a] sm:$0xff] }
 0x3b6   : > { %23566 = vmatmul.mubr.msk.f32.gmra.mrb[32].mxu0 %vm653_vm1, %v6551_v35  ;;  %v6614_v35 = vld [vmem:[%s27361_s29 + $0x322] sm:$0xff] }
 0x3b7   : > { %23568 = vmatprep.mubr.msk.f32.mxu0 %vm653_vm1, %v6552_v36  ;;  %v6615_v36 = vld [vmem:[%s27361_s29 + $0x32a] sm:$0xff] }
 0x3ba   : > { %23569 = vmatmul.mubr.msk.f32.gmra.mrb[34].mxu0 %vm653_vm1, %v6553_v37  ;;  %v6616_v37 = vld [vmem:[%s27361_s29 + $0x332] sm:$0xff] }
 0x3bb   : > { %23571 = vmatprep.mubr.msk.f32.mxu0 %vm653_vm1, %v6554_v38  ;;  %v6617_v38 = vld [vmem:[%s27361_s29 + $0x33a] sm:$0xff] }
 0x3be   : > { %23572 = vmatmul.mubr.msk.f32.gmra.mrb[36].mxu0 %vm653_vm1, %v6555_v39  ;;  %v6618_v39 = vld [vmem:[%s27361_s29 + $0x342] sm:$0xff] }
 0x3bf   : > { %23574 = vmatprep.mubr.msk.f32.mxu0 %vm653_vm1, %v6556_v40  ;;  %v6619_v40 = vld [vmem:[%s27361_s29 + $0x34a] sm:$0xff] }
 0x3c2   : > { %23575 = vmatmul.mubr.msk.f32.gmra.mrb[38].mxu0 %vm653_vm1, %v6557_v41  ;;  %v6620_v41 = vld [vmem:[%s27361_s29 + $0x352] sm:$0xff] }
 0x3c3   : > { %23577 = vmatprep.mubr.msk.f32.mxu0 %vm653_vm1, %v6558_v42  ;;  %v6621_v42 = vld [vmem:[%s27361_s29 + $0x35a] sm:$0xff] }
 0x3c6   : > { %23578 = vmatmul.mubr.msk.f32.gmra.mrb[40].mxu0 %vm653_vm1, %v6559_v43  ;;  %v6622_v43 = vld [vmem:[%s27361_s29 + $0x362] sm:$0xff] }
 0x3c7   : > { %23580 = vmatprep.mubr.msk.f32.mxu0 %vm653_vm1, %v6560_v44  ;;  %v6623_v44 = vld [vmem:[%s27361_s29 + $0x36a] sm:$0xff] }
 0x3ca   : > { %23581 = vmatmul.mubr.msk.f32.gmra.mrb[42].mxu0 %vm653_vm1, %v6561_v45  ;;  %v6624_v45 = vld [vmem:[%s27361_s29 + $0x372] sm:$0xff] }
 0x3cb   : > { %23583 = vmatprep.mubr.msk.f32.mxu0 %vm653_vm1, %v6562_v46  ;;  %v6625_v46 = vld [vmem:[%s27361_s29 + $0x37a] sm:$0xff] }
 0x3ce   : > { %23584 = vmatmul.mubr.msk.f32.gmra.mrb[44].mxu0 %vm653_vm1, %v6563_v47  ;;  %v6626_v47 = vld [vmem:[%s27361_s29 + $0x382] sm:$0xff] }
 0x3cf   : > { %23586 = vmatprep.mubr.msk.f32.mxu0 %vm653_vm1, %v6564_v48  ;;  %v6627_v48 = vld [vmem:[%s27361_s29 + $0x38a] sm:$0xff] }
 0x3d2   : > { %23587 = vmatmul.mubr.msk.f32.gmra.mrb[46].mxu0 %vm653_vm1, %v6565_v49  ;;  %v6628_v49 = vld [vmem:[%s27361_s29 + $0x392] sm:$0xff] }
 0x3d3   : > { %23589 = vmatprep.mubr.msk.f32.mxu0 %vm653_vm1, %v6566_v50  ;;  %v6629_v50 = vld [vmem:[%s27361_s29 + $0x39a] sm:$0xff] }
 0x3d6   : > { %23590 = vmatmul.mubr.msk.f32.gmra.mrb[48].mxu0 %vm653_vm1, %v6567_v51  ;;  %v6630_v51 = vld [vmem:[%s27361_s29 + $0x3a2] sm:$0xff] }
 0x3d7   : > { %23592 = vmatprep.mubr.msk.f32.mxu0 %vm653_vm1, %v6568_v52  ;;  %v6631_v52 = vld [vmem:[%s27361_s29 + $0x3aa] sm:$0xff] }
 0x3da   : > { %23593 = vmatmul.mubr.msk.f32.gmra.mrb[50].mxu0 %vm653_vm1, %v6569_v53  ;;  %v6632_v53 = vld [vmem:[%s27361_s29 + $0x3b2] sm:$0xff] }
 0x3db   : > { %23595 = vmatprep.mubr.msk.f32.mxu0 %vm653_vm1, %v6570_v54  ;;  %v6633_v54 = vld [vmem:[%s27361_s29 + $0x3ba] sm:$0xff] }
 0x3de   : > { %23596 = vmatmul.mubr.msk.f32.gmra.mrb[52].mxu0 %vm653_vm1, %v6571_v55  ;;  %v6634_v55 = vld [vmem:[%s27361_s29 + $0x3c2] sm:$0xff] }
 0x3df   : > { %23598 = vmatprep.mubr.msk.f32.mxu0 %vm653_vm1, %v6572_v56  ;;  %v6635_v56 = vld [vmem:[%s27361_s29 + $0x3ca] sm:$0xff] }
 0x3e2   : > { %23599 = vmatmul.mubr.msk.f32.gmra.mrb[54].mxu0 %vm653_vm1, %v6573_v57  ;;  %v6636_v57 = vld [vmem:[%s27361_s29 + $0x3d2] sm:$0xff] }
 0x3e3   : > { %23601 = vmatprep.mubr.msk.f32.mxu0 %vm653_vm1, %v6574_v58  ;;  %v6637_v58 = vld [vmem:[%s27361_s29 + $0x3da] sm:$0xff] }
 0x3e6   : > { %23602 = vmatmul.mubr.msk.f32.gmra.mrb[56].mxu0 %vm653_vm1, %v6575_v59  ;;  %v7787_v59 = vld [vmem:[%s27361_s29 + $0x40] sm:$0xff] }
 0x3e7   : > { %23604 = vmatprep.mubr.msk.f32.mxu0 %vm653_vm1, %v6576_v60  ;;  %v7788_v60 = vld [vmem:[%s27361_s29 + $0x48] sm:$0xff] }
 0x3ea   : > { %23605 = vmatmul.mubr.msk.f32.gmra.mrb[58].mxu0 %vm653_vm1, %v6577_v61  ;;  %v7789_v61 = vld [vmem:[%s27361_s29 + $0x50] sm:$0xff] }
 0x3eb   : > { %23607 = vmatprep.mubr.msk.f32.mxu0 %vm653_vm1, %v6578_v62  ;;  %v7790_v62 = vld [vmem:[%s27361_s29 + $0x58] sm:$0xff] }
 0x3ee   : > { %23608 = vmatmul.mubr.msk.f32.gmra.mrb[60].mxu0 %vm653_vm1, %v6579_v3  ;;  %v7791_v3 = vld [vmem:[%s27361_s29 + $0x60] sm:$0xff] }
 0x3ef   : > { %23610 = vmatprep.mubr.msk.f32.mxu0 %vm653_vm1, %v6580_v1  ;;  %v7792_v1 = vld [vmem:[%s27361_s29 + $0x68] sm:$0xff] }
 0x3f2   : > { %23611 = vmatmul.mubr.msk.f32.gmra.mrb[62].mxu0 %vm653_vm1, %v6581_v29  ;;  %v7793_v29 = vld [vmem:[%s27361_s29 + $0x70] sm:$0xff] }
 0x3f3   : > { %23613 = vmatprep.mubr.msk.f32.mxu0 %vm653_vm1, %v6582_v2  ;;  %v7794_v2 = vld [vmem:[%s27361_s29 + $0x78] sm:$0xff] }
 0x3f6   : > { %23614 = vmatmul.mubr.msk.f32.gmra.mrb[64].mxu0 %vm653_vm1, %v6583_v63  ;;  %v7795_v63 = vld [vmem:[%s27361_s29 + $0x80] sm:$0xff] }
 0x3f7   : > { %23616 = vmatprep.mubr.msk.f32.mxu0 %vm653_vm1, %v6584_v5  ;;  %v7796_v5 = vld [vmem:[%s27361_s29 + $0x88] sm:$0xff] }
 0x3fa   : > { %23617 = vmatmul.mubr.msk.f32.gmra.mrb[66].mxu0 %vm653_vm1, %v6585_v4  ;;  %v7797_v4 = vld [vmem:[%s27361_s29 + $0x90] sm:$0xff] }
 0x3fb   : > { %23619 = vmatprep.mubr.msk.f32.mxu0 %vm653_vm1, %v6586_v0  ;;  %v7798_v0 = vld [vmem:[%s27361_s29 + $0x98] sm:$0xff] }
 0x3fe   : > { %23620 = vmatmul.mubr.msk.f32.gmra.mrb[68].mxu0 %vm653_vm1, %v6587_v6  ;;  %v7799_v6 = vld [vmem:[%s27361_s29 + $0xa0] sm:$0xff] }
 0x3ff   : > { %23622 = vmatprep.mubr.msk.f32.mxu0 %vm653_vm1, %v6588_v7  ;;  %v7800_v7 = vld [vmem:[%s27361_s29 + $0xa8] sm:$0xff] }
 0x402   : > { %23623 = vmatmul.mubr.msk.f32.gmra.mrb[70].mxu0 %vm653_vm1, %v6589_v8  ;;  %v7801_v8 = vld [vmem:[%s27361_s29 + $0xb0] sm:$0xff] }
 0x403   : > { %23625 = vmatprep.mubr.msk.f32.mxu0 %vm653_vm1, %v6590_v9  ;;  %v7802_v9 = vld [vmem:[%s27361_s29 + $0xb8] sm:$0xff] }
 0x406   : > { %23626 = vmatmul.mubr.msk.f32.gmra.mrb[72].mxu0 %vm653_vm1, %v6591_v10  ;;  %v7803_v10 = vld [vmem:[%s27361_s29 + $0xc0] sm:$0xff] }
 0x407   : > { %23628 = vmatprep.mubr.msk.f32.mxu0 %vm653_vm1, %v6592_v11  ;;  %v7804_v11 = vld [vmem:[%s27361_s29 + $0xc8] sm:$0xff] }
 0x40a   : > { %23629 = vmatmul.mubr.msk.f32.gmra.mrb[74].mxu0 %vm653_vm1, %v6593_v12  ;;  %v7805_v12 = vld [vmem:[%s27361_s29 + $0xd0] sm:$0xff] }
 0x40b   : > { %23631 = vmatprep.mubr.msk.f32.mxu0 %vm653_vm1, %v6594_v13  ;;  %v7806_v13 = vld [vmem:[%s27361_s29 + $0xd8] sm:$0xff] }
 0x40e   : > { %23632 = vmatmul.mubr.msk.f32.gmra.mrb[76].mxu0 %vm653_vm1, %v6595_v14  ;;  %v7807_v14 = vld [vmem:[%s27361_s29 + $0xe0] sm:$0xff] }
 0x40f   : > { %23634 = vmatprep.mubr.msk.f32.mxu0 %vm653_vm1, %v6596_v15  ;;  %v7808_v15 = vld [vmem:[%s27361_s29 + $0xe8] sm:$0xff] }
 0x412   : > { %23635 = vmatmul.mubr.msk.f32.gmra.mrb[78].mxu0 %vm653_vm1, %v6597_v16  ;;  %v7809_v16 = vld [vmem:[%s27361_s29 + $0xf0] sm:$0xff] }
 0x413   : > { %23637 = vmatprep.mubr.msk.f32.mxu0 %vm653_vm1, %v6598_v17  ;;  %v7810_v17 = vld [vmem:[%s27361_s29 + $0xf8] sm:$0xff] }
 0x416   : > { %23638 = vmatmul.mubr.msk.f32.gmra.mrb[80].mxu0 %vm653_vm1, %v6599_v19  ;;  %v7812_v19 = vld [vmem:[%s27361_s29 + $0x108] sm:$0xff] }
 0x417   : > { %23640 = vmatprep.mubr.msk.f32.mxu0 %vm653_vm1, %v6600_v20  ;;  %v7813_v20 = vld [vmem:[%s27361_s29 + $0x110] sm:$0xff] }
 0x41a   : > { %23641 = vmatmul.mubr.msk.f32.gmra.mrb[82].mxu0 %vm653_vm1, %v6601_v21  ;;  %v7814_v21 = vld [vmem:[%s27361_s29 + $0x118] sm:$0xff] }
 0x41b   : > { %23643 = vmatprep.mubr.msk.f32.mxu0 %vm653_vm1, %v6602_v22  ;;  %v7815_v22 = vld [vmem:[%s27361_s29 + $0x120] sm:$0xff] }
 0x41e   : > { %23644 = vmatmul.mubr.msk.f32.gmra.mrb[84].mxu0 %vm653_vm1, %v6603_v23  ;;  %v7816_v23 = vld [vmem:[%s27361_s29 + $0x128] sm:$0xff] }
 0x41f   : > { %23646 = vmatprep.mubr.msk.f32.mxu0 %vm653_vm1, %v6604_v24  ;;  %v7817_v24 = vld [vmem:[%s27361_s29 + $0x130] sm:$0xff] }
 0x422   : > { %23647 = vmatmul.mubr.msk.f32.gmra.mrb[86].mxu0 %vm653_vm1, %v6605_v25  ;;  %v7818_v25 = vld [vmem:[%s27361_s29 + $0x138] sm:$0xff] }
 0x423   : > { %23649 = vmatprep.mubr.msk.f32.mxu0 %vm653_vm1, %v6606_v26  ;;  %v7819_v26 = vld [vmem:[%s27361_s29 + $0x140] sm:$0xff] }
 0x426   : > { %23650 = vmatmul.mubr.msk.f32.gmra.mrb[88].mxu0 %vm653_vm1, %v6607_v27  ;;  %v7820_v27 = vld [vmem:[%s27361_s29 + $0x148] sm:$0xff] }
 0x427   : > { %23652 = vmatprep.mubr.msk.f32.mxu0 %vm653_vm1, %v6608_v28  ;;  %v7821_v28 = vld [vmem:[%s27361_s29 + $0x150] sm:$0xff] }
 0x42a   : > { %23653 = vmatmul.mubr.msk.f32.gmra.mrb[90].mxu0 %vm653_vm1, %v6609_v30  ;;  %v7822_v30 = vld [vmem:[%s27361_s29 + $0x158] sm:$0xff] }
 0x42b   : > { %23655 = vmatprep.mubr.msk.f32.mxu0 %vm653_vm1, %v6610_v31  ;;  %v7823_v31 = vld [vmem:[%s27361_s29 + $0x160] sm:$0xff] }
 0x42e   : > { %23656 = vmatmul.mubr.msk.f32.gmra.mrb[92].mxu0 %vm653_vm1, %v6611_v32  ;;  %v7824_v32 = vld [vmem:[%s27361_s29 + $0x168] sm:$0xff] }
 0x42f   : > { %23658 = vmatprep.mubr.msk.f32.mxu0 %vm653_vm1, %v6612_v33  ;;  %v7825_v33 = vld [vmem:[%s27361_s29 + $0x170] sm:$0xff] }
 0x432   : > { %23659 = vmatmul.mubr.msk.f32.gmra.mrb[94].mxu0 %vm653_vm1, %v6613_v34  ;;  %v7826_v34 = vld [vmem:[%s27361_s29 + $0x178] sm:$0xff] }
 0x433   : > { %23661 = vmatprep.mubr.msk.f32.mxu0 %vm653_vm1, %v6614_v35  ;;  %v7827_v35 = vld [vmem:[%s27361_s29 + $0x180] sm:$0xff] }
 0x436   : > { %23662 = vmatmul.mubr.msk.f32.gmra.mrb[96].mxu0 %vm653_vm1, %v6615_v36  ;;  %v7828_v36 = vld [vmem:[%s27361_s29 + $0x188] sm:$0xff] }
 0x437   : > { %23664 = vmatprep.mubr.msk.f32.mxu0 %vm653_vm1, %v6616_v37  ;;  %v7829_v37 = vld [vmem:[%s27361_s29 + $0x190] sm:$0xff] }
 0x43a   : > { %23665 = vmatmul.mubr.msk.f32.gmra.mrb[98].mxu0 %vm653_vm1, %v6617_v38  ;;  %v7830_v38 = vld [vmem:[%s27361_s29 + $0x198] sm:$0xff] }
 0x43b   : > { %23667 = vmatprep.mubr.msk.f32.mxu0 %vm653_vm1, %v6618_v39  ;;  %v7831_v39 = vld [vmem:[%s27361_s29 + $0x1a0] sm:$0xff] }
 0x43e   : > { %23668 = vmatmul.mubr.msk.f32.gmra.mrb[100].mxu0 %vm653_vm1, %v6619_v40  ;;  %v7832_v40 = vld [vmem:[%s27361_s29 + $0x1a8] sm:$0xff] }
 0x43f   : > { %23670 = vmatprep.mubr.msk.f32.mxu0 %vm653_vm1, %v6620_v41  ;;  %v7833_v41 = vld [vmem:[%s27361_s29 + $0x1b0] sm:$0xff] }
 0x442   : > { %23671 = vmatmul.mubr.msk.f32.gmra.mrb[102].mxu0 %vm653_vm1, %v6621_v42  ;;  %v7834_v42 = vld [vmem:[%s27361_s29 + $0x1b8] sm:$0xff] }
 0x443   : > { %23673 = vmatprep.mubr.msk.f32.mxu0 %vm653_vm1, %v6622_v43  ;;  %v7835_v43 = vld [vmem:[%s27361_s29 + $0x1c0] sm:$0xff] }
 0x446   : > { %23674 = vmatmul.mubr.msk.f32.gmra.mrb[104].mxu0 %vm653_vm1, %v6623_v44  ;;  %v7836_v44 = vld [vmem:[%s27361_s29 + $0x1c8] sm:$0xff] }
 0x447   : > { %23676 = vmatprep.mubr.msk.f32.mxu0 %vm653_vm1, %v6624_v45  ;;  %v7837_v45 = vld [vmem:[%s27361_s29 + $0x1d0] sm:$0xff] }
 0x44a   : > { %23677 = vmatmul.mubr.msk.f32.gmra.mrb[106].mxu0 %vm653_vm1, %v6625_v46  ;;  %v7838_v46 = vld [vmem:[%s27361_s29 + $0x1d8] sm:$0xff] }
 0x44b   : > { %23679 = vmatprep.mubr.msk.f32.mxu0 %vm653_vm1, %v6626_v47  ;;  %v7839_v47 = vld [vmem:[%s27361_s29 + $0x1e0] sm:$0xff] }
 0x44e   : > { %23680 = vmatmul.mubr.msk.f32.gmra.mrb[108].mxu0 %vm653_vm1, %v6627_v48  ;;  %v7840_v48 = vld [vmem:[%s27361_s29 + $0x1e8] sm:$0xff] }
 0x44f   : > { %23682 = vmatprep.mubr.msk.f32.mxu0 %vm653_vm1, %v6628_v49  ;;  %v7841_v49 = vld [vmem:[%s27361_s29 + $0x1f0] sm:$0xff] }
 0x452   : > { %23683 = vmatmul.mubr.msk.f32.gmra.mrb[110].mxu0 %vm653_vm1, %v6629_v50  ;;  %v7842_v50 = vld [vmem:[%s27361_s29 + $0x1f8] sm:$0xff] }
 0x453   : > { %23685 = vmatprep.mubr.msk.f32.mxu0 %vm653_vm1, %v6630_v51  ;;  %v7843_v51 = vld [vmem:[%s27361_s29 + $0x200] sm:$0xff] }
 0x456   : > { %23686 = vmatmul.mubr.msk.f32.gmra.mrb[112].mxu0 %vm653_vm1, %v6631_v52  ;;  %v7844_v52 = vld [vmem:[%s27361_s29 + $0x208] sm:$0xff] }
 0x457   : > { %23688 = vmatprep.mubr.msk.f32.mxu0 %vm653_vm1, %v6632_v53  ;;  %v7845_v53 = vld [vmem:[%s27361_s29 + $0x210] sm:$0xff] }
 0x45a   : > { %23689 = vmatmul.mubr.msk.f32.gmra.mrb[114].mxu0 %vm653_vm1, %v6633_v54  ;;  %v7846_v54 = vld [vmem:[%s27361_s29 + $0x218] sm:$0xff] }
 0x45b   : > { %23691 = vmatprep.mubr.msk.f32.mxu0 %vm653_vm1, %v6634_v55  ;;  %v7847_v55 = vld [vmem:[%s27361_s29 + $0x220] sm:$0xff] }
 0x45e   : > { %23692 = vmatmul.mubr.msk.f32.gmra.mrb[116].mxu0 %vm653_vm1, %v6635_v56  ;;  %v7848_v56 = vld [vmem:[%s27361_s29 + $0x228] sm:$0xff] }
 0x45f   : > { %23694 = vmatprep.mubr.msk.f32.mxu0 %vm653_vm1, %v6636_v57  ;;  %v7849_v57 = vld [vmem:[%s27361_s29 + $0x230] sm:$0xff] }
 0x462   : > { %23695 = vmatmul.mubr.msk.f32.gmra.mrb[118].mxu0 %vm653_vm1, %v6637_v58  ;;  %v7850_v58 = vld [vmem:[%s27361_s29 + $0x238] sm:$0xff] }
 0x463   : > { %23699 = vmatprep.mubr.msk.f32.mxu0 %vm653_vm1, %v7787_v59  ;;  %v7851_v59 = vld [vmem:[%s27361_s29 + $0x240] sm:$0xff] }
 0x466   : > { %23700 = vmatmul.mubr.msk.f32.vlgmr.msra.gmra.mrb[0].mxu0 %vm653_vm1, %v7788_v60  ;;  %v7852_v60 = vld [vmem:[%s27361_s29 + $0x248] sm:$0xff] }
 0x467   : > { %23702 = vmatprep.mubr.msk.f32.mxu0 %vm653_vm1, %v7789_v61  ;;  %23880 = vmatpush3.msk.msra.mxu0 %vm1014_vm0, %v28602_v18  ;;  %v7811_v18 = vld [vmem:[%s27361_s29 + $0x100] sm:$0xff]  ;;  %v7853_v61 = vld [vmem:[%s27361_s29 + $0x250] sm:$0xff] }
 0x46a   : > { %23703 = vmatmul.mubr.msk.f32.gmra.mrb[2].mxu0 %vm653_vm1, %v7790_v62  ;;  %v7854_v62 = vld [vmem:[%s27361_s29 + $0x258] sm:$0xff] }
 0x46b   : > { %23705 = vmatprep.mubr.msk.f32.mxu0 %vm653_vm1, %v7791_v3  ;;  %v7855_v3 = vld [vmem:[%s27361_s29 + $0x260] sm:$0xff] }
 0x46e   : > { %23706 = vmatmul.mubr.msk.f32.gmra.mrb[4].mxu0 %vm653_vm1, %v7792_v1  ;;  %v7856_v1 = vld [vmem:[%s27361_s29 + $0x268] sm:$0xff] }
 0x46f   : > { %23708 = vmatprep.mubr.msk.f32.mxu0 %vm653_vm1, %v7793_v29  ;;  %v7857_v29 = vld [vmem:[%s27361_s29 + $0x270] sm:$0xff] }
 0x472   : > { %23709 = vmatmul.mubr.msk.f32.gmra.mrb[6].mxu0 %vm653_vm1, %v7794_v2  ;;  %v7858_v2 = vld [vmem:[%s27361_s29 + $0x278] sm:$0xff] }
 0x473   : > { %23711 = vmatprep.mubr.msk.f32.mxu0 %vm653_vm1, %v7795_v63  ;;  %v7859_v63 = vld [vmem:[%s27361_s29 + $0x280] sm:$0xff] }
 0x476   : > { %23712 = vmatmul.mubr.msk.f32.gmra.mrb[8].mxu0 %vm653_vm1, %v7796_v5  ;;  %v7860_v5 = vld [vmem:[%s27361_s29 + $0x288] sm:$0xff] }
 0x477   : > { %23714 = vmatprep.mubr.msk.f32.mxu0 %vm653_vm1, %v7797_v4  ;;  %v7861_v4 = vld [vmem:[%s27361_s29 + $0x290] sm:$0xff] }
 0x47a   : > { %23715 = vmatmul.mubr.msk.f32.gmra.mrb[10].mxu0 %vm653_vm1, %v7798_v0  ;;  %v7862_v0 = vld [vmem:[%s27361_s29 + $0x298] sm:$0xff] }
 0x47b   : > { %23717 = vmatprep.mubr.msk.f32.mxu0 %vm653_vm1, %v7799_v6  ;;  %v7863_v6 = vld [vmem:[%s27361_s29 + $0x2a0] sm:$0xff] }
 0x47e   : > { %23718 = vmatmul.mubr.msk.f32.gmra.mrb[12].mxu0 %vm653_vm1, %v7800_v7  ;;  %v7864_v7 = vld [vmem:[%s27361_s29 + $0x2a8] sm:$0xff] }
 0x47f   : > { %23720 = vmatprep.mubr.msk.f32.mxu0 %vm653_vm1, %v7801_v8  ;;  %v7865_v8 = vld [vmem:[%s27361_s29 + $0x2b0] sm:$0xff] }
 0x482   : > { %23721 = vmatmul.mubr.msk.f32.gmra.mrb[14].mxu0 %vm653_vm1, %v7802_v9  ;;  %v7866_v9 = vld [vmem:[%s27361_s29 + $0x2b8] sm:$0xff] }
 0x483   : > { %23723 = vmatprep.mubr.msk.f32.mxu0 %vm653_vm1, %v7803_v10  ;;  %v7867_v10 = vld [vmem:[%s27361_s29 + $0x2c0] sm:$0xff] }
 0x486   : > { %23724 = vmatmul.mubr.msk.f32.gmra.mrb[16].mxu0 %vm653_vm1, %v7804_v11  ;;  %v28851_v11 = vld [vmem:[%s33335_s1 + $0x18] sm:$0x7] }
 0x487   : > { %23726 = vmatprep.mubr.msk.f32.mxu0 %vm653_vm1, %v7805_v12  ;;  %v7868_v12 = vld [vmem:[%s27361_s29 + $0x2c8] sm:$0xff]  ;;  %24061 = vmatprep.subr.msk.mxu0 %vm1014_vm0, %v28851_v11 }
 0x48a   : > { %23727 = vmatmul.mubr.msk.f32.gmra.mrb[18].mxu0 %vm653_vm1, %v7806_v13  ;;  %v7869_v13 = vld [vmem:[%s27361_s29 + $0x2d0] sm:$0xff] }
 0x48b   : > { %23729 = vmatprep.mubr.msk.f32.mxu0 %vm653_vm1, %v7807_v14  ;;  %v7870_v14 = vld [vmem:[%s27361_s29 + $0x2d8] sm:$0xff] }
 0x48e   : > { %23730 = vmatmul.mubr.msk.f32.gmra.mrb[20].mxu0 %vm653_vm1, %v7808_v15  ;;  %v7871_v15 = vld [vmem:[%s27361_s29 + $0x2e0] sm:$0xff] }
 0x48f   : > { %23732 = vmatprep.mubr.msk.f32.mxu0 %vm653_vm1, %v7809_v16  ;;  %v7872_v16 = vld [vmem:[%s27361_s29 + $0x2e8] sm:$0xff] }
 0x492   : > { %23733 = vmatmul.mubr.msk.f32.gmra.mrb[22].mxu0 %vm653_vm1, %v7810_v17  ;;  %v7873_v17 = vld [vmem:[%s27361_s29 + $0x2f0] sm:$0xff] }
 0x493   : > { %23735 = vmatprep.mubr.msk.f32.mxu0 %vm653_vm1, %v7811_v18  ;;  %v7874_v18 = vld [vmem:[%s27361_s29 + $0x2f8] sm:$0xff] }
 0x496   : > { %23736 = vmatmul.mubr.msk.f32.gmra.mrb[24].mxu0 %vm653_vm1, %v7812_v19  ;;  %v7875_v19 = vld [vmem:[%s27361_s29 + $0x300] sm:$0xff] }
 0x497   : > { %23738 = vmatprep.mubr.msk.f32.mxu0 %vm653_vm1, %v7813_v20  ;;  %v7876_v20 = vld [vmem:[%s27361_s29 + $0x308] sm:$0xff] }
 0x49a   : > { %23739 = vmatmul.mubr.msk.f32.gmra.mrb[26].mxu0 %vm653_vm1, %v7814_v21  ;;  %v7877_v21 = vld [vmem:[%s27361_s29 + $0x310] sm:$0xff] }
 0x49b   : > { %23741 = vmatprep.mubr.msk.f32.mxu0 %vm653_vm1, %v7815_v22  ;;  %v652_v22 = vld [vmem:[%s33335_s1 + $0x3] sm:$0x7] }
 0x49c   : > { %22605 = vmatprep.subr.msk.mxu1 %vm1014_vm0, %v652_v22 }
 0x49d   : > { %22606 = vmatpush3.msk.msra.mxu1 %vm1014_vm0, %v652_v22  ;;  %v29081_v22 = vld [vmem:[%s27361_s29 + $0x101] sm:$0xff] }
 0x49e   : > { %23742 = vmatmul.mubr.msk.f32.gmra.mrb[28].mxu0 %vm653_vm1, %v7816_v23  ;;  %v7878_v23 = vld [vmem:[%s27361_s29 + $0x318] sm:$0xff] }
 0x49f   : > { %23744 = vmatprep.mubr.msk.f32.mxu0 %vm653_vm1, %v7817_v24  ;;  %v532_v24 = vld [vmem:[%s27361_s29 + $0x1] sm:$0xff] }
 0x4a0   : > { %22607 = vmatprep.mubr.msk.f32.mxu1 %vm653_vm1, %v532_v24  ;;  %v29097_v24 = vld [vmem:[%s27361_s29 + $0x111] sm:$0xff] }
 0x4a2   : > { %23745 = vmatmul.mubr.msk.f32.gmra.mrb[30].mxu0 %vm653_vm1, %v7818_v25  ;;  %v7879_v25 = vld [vmem:[%s27361_s29 + $0x320] sm:$0xff] }
 0x4a3   : > { %23747 = vmatprep.mubr.msk.f32.mxu0 %vm653_vm1, %v7819_v26  ;;  %v533_v26 = vld [vmem:[%s27361_s29 + $0x9] sm:$0xff] }
 0x4a4   : > { %22608 = vmatmul.mubr.msk.f32.vlgmr.msra.gmra.mrb[0].mxu1 %vm653_vm1, %v533_v26  ;;  %v29122_v26 = vld [vmem:[%s27361_s29 + $0x129] sm:$0xff] }
 0x4a6   : > { %23748 = vmatmul.mubr.msk.f32.gmra.mrb[32].mxu0 %vm653_vm1, %v7820_v27  ;;  %v27164_v27 = vld [vmem:[%s33335_s1] sm:$0x7]  ;;  %s27172_s1 = scalar_lea.vmem %s27171_s0, 32 }
 0x4a7   : > { %23750 = vmatprep.mubr.msk.f32.mxu0 %vm653_vm1, %v7821_v28  ;;  %25581 = vmatprep.subr.msk.mxu1 %vm1014_vm0, %v27164_v27  ;;  %v7880_v28 = vld [vmem:[%s27361_s29 + $0x328] sm:$0xff]  ;;  %p27174_p1 = scmp.lt.s32.totalorder %s27172_s1, %s27166_s26 }
 0x4a8   : > { %25582 = vmatpush3.msk.msra.mxu1 %vm1014_vm0, %v27164_v27  ;;  %v29125_v27 = vld [vmem:[%s27361_s29 + $0x131] sm:$0xff] }
 0x4a9   : > { %p27175_p2 = por %p27174_p1, %p27173_p0 }
 0x4aa   : > { %23751 = vmatmul.mubr.msk.f32.gmra.mrb[34].mxu0 %vm653_vm1, %v7822_v30  ;;  %v534_v30 = vld [vmem:[%s27361_s29 + $0x11] sm:$0xff] }
 0x4ab   : > { %23753 = vmatprep.mubr.msk.f32.mxu0 %vm653_vm1, %v7823_v31  ;;  %v7881_v31 = vld [vmem:[%s27361_s29 + $0x330] sm:$0xff]  ;;  %22610 = vmatprep.mubr.msk.f32.mxu1 %vm653_vm1, %v534_v30  ;;  %v29139_v30 = vld [vmem:[%s27361_s29 + $0x141] sm:$0xff]  ;;  %p27176_p3 = pnand %p27175_p2, %p27169_p13 }
 0x4ae   : > { %23754 = vmatmul.mubr.msk.f32.gmra.mrb[36].mxu0 %vm653_vm1, %v7824_v32  ;;  %v535_v32 = vld [vmem:[%s27361_s29 + $0x19] sm:$0xff] }
 0x4af   : > { %23756 = vmatprep.mubr.msk.f32.mxu0 %vm653_vm1, %v7825_v33  ;;  %22611 = vmatmul.mubr.msk.f32.gmra.mrb[2].mxu1 %vm653_vm1, %v535_v32  ;;  %v7882_v33 = vld [vmem:[%s27361_s29 + $0x338] sm:$0xff] }
 0x4b0   : > { %v29153_v32 = vld [vmem:[%s27361_s29 + $0x151] sm:$0xff] }
 0x4b2   : > { %23757 = vmatmul.mubr.msk.f32.gmra.mrb[38].mxu0 %vm653_vm1, %v7826_v34  ;;  %v536_v34 = vld [vmem:[%s27361_s29 + $0x21] sm:$0xff] }
 0x4b3   : > { %23759 = vmatprep.mubr.msk.f32.mxu0 %vm653_vm1, %v7827_v35  ;;  %v7883_v35 = vld [vmem:[%s27361_s29 + $0x340] sm:$0xff]  ;;  %22613 = vmatprep.mubr.msk.f32.mxu1 %vm653_vm1, %v536_v34 }
 0x4b4   : > { %v29167_v34 = vld [vmem:[%s27361_s29 + $0x161] sm:$0xff] }
 0x4b6   : > { %23760 = vmatmul.mubr.msk.f32.gmra.mrb[40].mxu0 %vm653_vm1, %v7828_v36  ;;  %v537_v36 = vld [vmem:[%s27361_s29 + $0x29] sm:$0xff] }
 0x4b7   : > { %23762 = vmatprep.mubr.msk.f32.mxu0 %vm653_vm1, %v7829_v37  ;;  %22614 = vmatmul.mubr.msk.f32.gmra.mrb[4].mxu1 %vm653_vm1, %v537_v36  ;;  %v7884_v37 = vld [vmem:[%s27361_s29 + $0x348] sm:$0xff]  ;;  %v29181_v36 = vld [vmem:[%s27361_s29 + $0x171] sm:$0xff] }
 0x4ba   : > { %23763 = vmatmul.mubr.msk.f32.gmra.mrb[42].mxu0 %vm653_vm1, %v7830_v38  ;;  %v538_v38 = vld [vmem:[%s27361_s29 + $0x31] sm:$0xff] }
 0x4bb   : > { %23765 = vmatprep.mubr.msk.f32.mxu0 %vm653_vm1, %v7831_v39  ;;  %v7885_v39 = vld [vmem:[%s27361_s29 + $0x350] sm:$0xff]  ;;  %22616 = vmatprep.mubr.msk.f32.mxu1 %vm653_vm1, %v538_v38  ;;  %v29195_v38 = vld [vmem:[%s27361_s29 + $0x181] sm:$0xff] }
 0x4be   : > { %23766 = vmatmul.mubr.msk.f32.gmra.mrb[44].mxu0 %vm653_vm1, %v7832_v40  ;;  %v539_v40 = vld [vmem:[%s27361_s29 + $0x39] sm:$0xff] }
 0x4bf   : > { %23768 = vmatprep.mubr.msk.f32.mxu0 %vm653_vm1, %v7833_v41  ;;  %v28916_v41 = vld [vmem:[%s27361_s29 + $0x41] sm:$0xff]  ;;  %22617 = vmatmul.mubr.msk.f32.gmra.mrb[6].mxu1 %vm653_vm1, %v539_v40  ;;  %v29209_v40 = vld [vmem:[%s27361_s29 + $0x191] sm:$0xff] }
 0x4c0   : > { %22619 = vmatprep.mubr.msk.f32.mxu1 %vm653_vm1, %v28916_v41 }
 0x4c2   : > { %23769 = vmatmul.mubr.msk.f32.gmra.mrb[46].mxu0 %vm653_vm1, %v7834_v42  ;;  %v7886_v42 = vld [vmem:[%s27361_s29 + $0x358] sm:$0xff] }
 0x4c3   : > { %23771 = vmatprep.mubr.msk.f32.mxu0 %vm653_vm1, %v7835_v43  ;;  %v7887_v43 = vld [vmem:[%s27361_s29 + $0x360] sm:$0xff] }
 0x4c6   : > { %23772 = vmatmul.mubr.msk.f32.gmra.mrb[48].mxu0 %vm653_vm1, %v7836_v44  ;;  %v28926_v44 = vld [vmem:[%s27361_s29 + $0x49] sm:$0xff] }
 0x4c7   : > { %23774 = vmatprep.mubr.msk.f32.mxu0 %vm653_vm1, %v7837_v45  ;;  %v28929_v45 = vld [vmem:[%s27361_s29 + $0x51] sm:$0xff]  ;;  %22620 = vmatmul.mubr.msk.f32.gmra.mrb[8].mxu1 %vm653_vm1, %v28926_v44 }
 0x4c8   : > { %22622 = vmatprep.mubr.msk.f32.mxu1 %vm653_vm1, %v28929_v45 }
 0x4ca   : > { %23775 = vmatmul.mubr.msk.f32.gmra.mrb[50].mxu0 %vm653_vm1, %v7838_v46  ;;  %v7888_v46 = vld [vmem:[%s27361_s29 + $0x368] sm:$0xff] }
 0x4cb   : > { %23777 = vmatprep.mubr.msk.f32.mxu0 %vm653_vm1, %v7839_v47  ;;  %v7889_v47 = vld [vmem:[%s27361_s29 + $0x370] sm:$0xff] }
 0x4ce   : > { %23778 = vmatmul.mubr.msk.f32.gmra.mrb[52].mxu0 %vm653_vm1, %v7840_v48  ;;  %v28940_v48 = vld [vmem:[%s27361_s29 + $0x59] sm:$0xff] }
 0x4cf   : > { %23780 = vmatprep.mubr.msk.f32.mxu0 %vm653_vm1, %v7841_v49  ;;  %v28943_v49 = vld [vmem:[%s27361_s29 + $0x61] sm:$0xff]  ;;  %22623 = vmatmul.mubr.msk.f32.gmra.mrb[10].mxu1 %vm653_vm1, %v28940_v48 }
 0x4d0   : > { %22625 = vmatprep.mubr.msk.f32.mxu1 %vm653_vm1, %v28943_v49 }
 0x4d2   : > { %23781 = vmatmul.mubr.msk.f32.gmra.mrb[54].mxu0 %vm653_vm1, %v7842_v50  ;;  %v7890_v50 = vld [vmem:[%s27361_s29 + $0x378] sm:$0xff] }
 0x4d3   : > { %23783 = vmatprep.mubr.msk.f32.mxu0 %vm653_vm1, %v7843_v51  ;;  %v7891_v51 = vld [vmem:[%s27361_s29 + $0x380] sm:$0xff] }
 0x4d6   : > { %23784 = vmatmul.mubr.msk.f32.gmra.mrb[56].mxu0 %vm653_vm1, %v7844_v52  ;;  %v28954_v52 = vld [vmem:[%s27361_s29 + $0x69] sm:$0xff] }
 0x4d7   : > { %23786 = vmatprep.mubr.msk.f32.mxu0 %vm653_vm1, %v7845_v53  ;;  %v28957_v53 = vld [vmem:[%s27361_s29 + $0x71] sm:$0xff]  ;;  %22626 = vmatmul.mubr.msk.f32.gmra.mrb[12].mxu1 %vm653_vm1, %v28954_v52 }
 0x4d8   : > { %22628 = vmatprep.mubr.msk.f32.mxu1 %vm653_vm1, %v28957_v53 }
 0x4da   : > { %23787 = vmatmul.mubr.msk.f32.gmra.mrb[58].mxu0 %vm653_vm1, %v7846_v54  ;;  %v7892_v54 = vld [vmem:[%s27361_s29 + $0x388] sm:$0xff] }
 0x4db   : > { %23789 = vmatprep.mubr.msk.f32.mxu0 %vm653_vm1, %v7847_v55  ;;  %v7893_v55 = vld [vmem:[%s27361_s29 + $0x390] sm:$0xff] }
 0x4de   : > { %23790 = vmatmul.mubr.msk.f32.gmra.mrb[60].mxu0 %vm653_vm1, %v7848_v56  ;;  %v28968_v56 = vld [vmem:[%s27361_s29 + $0x79] sm:$0xff] }
 0x4df   : > { %23792 = vmatprep.mubr.msk.f32.mxu0 %vm653_vm1, %v7849_v57  ;;  %v28971_v57 = vld [vmem:[%s27361_s29 + $0x81] sm:$0xff]  ;;  %22629 = vmatmul.mubr.msk.f32.gmra.mrb[14].mxu1 %vm653_vm1, %v28968_v56 }
 0x4e0   : > { %22631 = vmatprep.mubr.msk.f32.mxu1 %vm653_vm1, %v28971_v57 }
 0x4e2   : > { %23793 = vmatmul.mubr.msk.f32.gmra.mrb[62].mxu0 %vm653_vm1, %v7850_v58  ;;  %v7894_v58 = vld [vmem:[%s27361_s29 + $0x398] sm:$0xff] }
 0x4e3   : > { %23795 = vmatprep.mubr.msk.f32.mxu0 %vm653_vm1, %v7851_v59  ;;  %v7895_v59 = vld [vmem:[%s27361_s29 + $0x3a0] sm:$0xff] }
 0x4e6   : > { %23796 = vmatmul.mubr.msk.f32.gmra.mrb[64].mxu0 %vm653_vm1, %v7852_v60  ;;  %v28982_v60 = vld [vmem:[%s27361_s29 + $0x89] sm:$0xff] }
 0x4e7   : > { %23798 = vmatprep.mubr.msk.f32.mxu0 %vm653_vm1, %v7853_v61  ;;  %v28985_v61 = vld [vmem:[%s27361_s29 + $0x91] sm:$0xff]  ;;  %22632 = vmatmul.mubr.msk.f32.gmra.mrb[16].mxu1 %vm653_vm1, %v28982_v60 }
 0x4e8   : > { %22634 = vmatprep.mubr.msk.f32.mxu1 %vm653_vm1, %v28985_v61 }
 0x4ea   : > { %23799 = vmatmul.mubr.msk.f32.gmra.mrb[66].mxu0 %vm653_vm1, %v7854_v62  ;;  %v7896_v62 = vld [vmem:[%s27361_s29 + $0x3a8] sm:$0xff] }
 0x4eb   : > { %23801 = vmatprep.mubr.msk.f32.mxu0 %vm653_vm1, %v7855_v3  ;;  %v7897_v3 = vld [vmem:[%s27361_s29 + $0x3b0] sm:$0xff] }
 0x4ee   : > { %23802 = vmatmul.mubr.msk.f32.gmra.mrb[68].mxu0 %vm653_vm1, %v7856_v1  ;;  %v28996_v1 = vld [vmem:[%s27361_s29 + $0x99] sm:$0xff] }
 0x4ef   : > { %23804 = vmatprep.mubr.msk.f32.mxu0 %vm653_vm1, %v7857_v29  ;;  %v28999_v29 = vld [vmem:[%s27361_s29 + $0xa1] sm:$0xff]  ;;  %22635 = vmatmul.mubr.msk.f32.gmra.mrb[18].mxu1 %vm653_vm1, %v28996_v1 }
 0x4f0   : > { %22637 = vmatprep.mubr.msk.f32.mxu1 %vm653_vm1, %v28999_v29 }
 0x4f2   : > { %23805 = vmatmul.mubr.msk.f32.gmra.mrb[70].mxu0 %vm653_vm1, %v7858_v2  ;;  %v7898_v2 = vld [vmem:[%s27361_s29 + $0x3b8] sm:$0xff] }
 0x4f3   : > { %23807 = vmatprep.mubr.msk.f32.mxu0 %vm653_vm1, %v7859_v63  ;;  %v7899_v63 = vld [vmem:[%s27361_s29 + $0x3c0] sm:$0xff] }
 0x4f6   : > { %23808 = vmatmul.mubr.msk.f32.gmra.mrb[72].mxu0 %vm653_vm1, %v7860_v5  ;;  %v29010_v5 = vld [vmem:[%s27361_s29 + $0xa9] sm:$0xff] }
 0x4f7   : > { %23810 = vmatprep.mubr.msk.f32.mxu0 %vm653_vm1, %v7861_v4  ;;  %v29013_v4 = vld [vmem:[%s27361_s29 + $0xb1] sm:$0xff]  ;;  %22638 = vmatmul.mubr.msk.f32.gmra.mrb[20].mxu1 %vm653_vm1, %v29010_v5 }
 0x4f8   : > { %22640 = vmatprep.mubr.msk.f32.mxu1 %vm653_vm1, %v29013_v4 }
 0x4fa   : > { %23811 = vmatmul.mubr.msk.f32.gmra.mrb[74].mxu0 %vm653_vm1, %v7862_v0  ;;  %v7900_v0 = vld [vmem:[%s27361_s29 + $0x3c8] sm:$0xff] }
 0x4fb   : > { %23813 = vmatprep.mubr.msk.f32.mxu0 %vm653_vm1, %v7863_v6  ;;  %v7901_v6 = vld [vmem:[%s27361_s29 + $0x3d0] sm:$0xff] }
 0x4fe   : > { %23814 = vmatmul.mubr.msk.f32.gmra.mrb[76].mxu0 %vm653_vm1, %v7864_v7  ;;  %v29024_v7 = vld [vmem:[%s27361_s29 + $0xb9] sm:$0xff] }
 0x4ff   : > { %23816 = vmatprep.mubr.msk.f32.mxu0 %vm653_vm1, %v7865_v8  ;;  %v29027_v8 = vld [vmem:[%s27361_s29 + $0xc1] sm:$0xff]  ;;  %22641 = vmatmul.mubr.msk.f32.gmra.mrb[22].mxu1 %vm653_vm1, %v29024_v7 }
 0x500   : > { %22643 = vmatprep.mubr.msk.f32.mxu1 %vm653_vm1, %v29027_v8 }
 0x502   : > { %23817 = vmatmul.mubr.msk.f32.gmra.mrb[78].mxu0 %vm653_vm1, %v7866_v9  ;;  %v7902_v9 = vld [vmem:[%s27361_s29 + $0x3d8] sm:$0xff] }
 0x503   : > { %23819 = vmatprep.mubr.msk.f32.mxu0 %vm653_vm1, %v7867_v10  ;;  %v7903_v10 = vld [vmem:[%s27361_s29 + $0x3e0] sm:$0xff] }
 0x506   : > { %23820 = vmatmul.mubr.msk.f32.gmra.mrb[80].mxu0 %vm653_vm1, %v7868_v12  ;;  %v29038_v12 = vld [vmem:[%s27361_s29 + $0xc9] sm:$0xff] }
 0x507   : > { %23822 = vmatprep.mubr.msk.f32.mxu0 %vm653_vm1, %v7869_v13  ;;  %v29041_v13 = vld [vmem:[%s27361_s29 + $0xd1] sm:$0xff]  ;;  %22644 = vmatmul.mubr.msk.f32.gmra.mrb[24].mxu1 %vm653_vm1, %v29038_v12 }
 0x508   : > { %22646 = vmatprep.mubr.msk.f32.mxu1 %vm653_vm1, %v29041_v13 }
 0x50a   : > { %23823 = vmatmul.mubr.msk.f32.gmra.mrb[82].mxu0 %vm653_vm1, %v7870_v14  ;;  %v7904_v14 = vld [vmem:[%s27361_s29 + $0x3e8] sm:$0xff] }
 0x50b   : > { %23825 = vmatprep.mubr.msk.f32.mxu0 %vm653_vm1, %v7871_v15  ;;  %v7905_v15 = vld [vmem:[%s27361_s29 + $0x3f0] sm:$0xff] }
 0x50e   : > { %23826 = vmatmul.mubr.msk.f32.gmra.mrb[84].mxu0 %vm653_vm1, %v7872_v16  ;;  %v29052_v16 = vld [vmem:[%s27361_s29 + $0xd9] sm:$0xff] }
 0x50f   : > { %23828 = vmatprep.mubr.msk.f32.mxu0 %vm653_vm1, %v7873_v17  ;;  %v29055_v17 = vld [vmem:[%s27361_s29 + $0xe1] sm:$0xff]  ;;  %22647 = vmatmul.mubr.msk.f32.gmra.mrb[26].mxu1 %vm653_vm1, %v29052_v16 }
 0x510   : > { %22649 = vmatprep.mubr.msk.f32.mxu1 %vm653_vm1, %v29055_v17 }
 0x512   : > { %23829 = vmatmul.mubr.msk.f32.gmra.mrb[86].mxu0 %vm653_vm1, %v7874_v18  ;;  %v7906_v18 = vld [vmem:[%s27361_s29 + $0x3f8] sm:$0xff] }
 0x513   : > { %23831 = vmatprep.mubr.msk.f32.mxu0 %vm653_vm1, %v7875_v19  ;;  %v29065_v19 = vld [vmem:[%s27361_s29 + $0xe9] sm:$0xff] }
 0x514   : > { %22650 = vmatmul.mubr.msk.f32.gmra.mrb[28].mxu1 %vm653_vm1, %v29065_v19 }
 0x516   : > { %23832 = vmatmul.mubr.msk.f32.gmra.mrb[88].mxu0 %vm653_vm1, %v7876_v20  ;;  %v29068_v20 = vld [vmem:[%s27361_s29 + $0xf1] sm:$0xff] }
 0x517   : > { %23834 = vmatprep.mubr.msk.f32.mxu0 %vm653_vm1, %v7877_v21  ;;  %22652 = vmatprep.mubr.msk.f32.mxu1 %vm653_vm1, %v29068_v20  ;;  %v29078_v21 = vld [vmem:[%s27361_s29 + $0xf9] sm:$0xff] }
 0x518   : > { %22653 = vmatmul.mubr.msk.f32.gmra.mrb[30].mxu1 %vm653_vm1, %v29078_v21 }
 0x519   : > { %22655 = vmatprep.mubr.msk.f32.mxu1 %vm653_vm1, %v29081_v22 }
 0x51a   : > { %23835 = vmatmul.mubr.msk.f32.gmra.mrb[90].mxu0 %vm653_vm1, %v7878_v23  ;;  %v29094_v23 = vld [vmem:[%s27361_s29 + $0x109] sm:$0xff] }
 0x51b   : > { %23837 = vmatprep.mubr.msk.f32.mxu0 %vm653_vm1, %v7879_v25  ;;  %v29108_v25 = vld [vmem:[%s27361_s29 + $0x119] sm:$0xff] }
 0x51c   : > { %22656 = vmatmul.mubr.msk.f32.gmra.mrb[32].mxu1 %vm653_vm1, %v29094_v23 }
 0x51d   : > { %22658 = vmatprep.mubr.msk.f32.mxu1 %vm653_vm1, %v29097_v24 }
 0x51e   : > { %23838 = vmatmul.mubr.msk.f32.gmra.mrb[92].mxu0 %vm653_vm1, %v7880_v28  ;;  %v29136_v28 = vld [vmem:[%s27361_s29 + $0x139] sm:$0xff] }
 0x51f   : > { %23840 = vmatprep.mubr.msk.f32.mxu0 %vm653_vm1, %v7881_v31  ;;  %v29150_v31 = vld [vmem:[%s27361_s29 + $0x149] sm:$0xff] }
 0x520   : > { %22659 = vmatmul.mubr.msk.f32.gmra.mrb[34].mxu1 %vm653_vm1, %v29108_v25 }
 0x522   : > { %23841 = vmatmul.mubr.msk.f32.gmra.mrb[94].mxu0 %vm653_vm1, %v7882_v33  ;;  %v29164_v33 = vld [vmem:[%s27361_s29 + $0x159] sm:$0xff] }
 0x523   : > { %23843 = vmatprep.mubr.msk.f32.mxu0 %vm653_vm1, %v7883_v35  ;;  %v29178_v35 = vld [vmem:[%s27361_s29 + $0x169] sm:$0xff] }
 0x526   : > { %23844 = vmatmul.mubr.msk.f32.gmra.mrb[96].mxu0 %vm653_vm1, %v7884_v37  ;;  %v29192_v37 = vld [vmem:[%s27361_s29 + $0x179] sm:$0xff] }
 0x527   : > { %23846 = vmatprep.mubr.msk.f32.mxu0 %vm653_vm1, %v7885_v39  ;;  %v29206_v39 = vld [vmem:[%s27361_s29 + $0x189] sm:$0xff] }
 0x52a   : > { %23847 = vmatmul.mubr.msk.f32.gmra.mrb[98].mxu0 %vm653_vm1, %v7886_v42  ;;  %v29223_v42 = vld [vmem:[%s27361_s29 + $0x1a1] sm:$0xff] }
 0x52b   : > { %23849 = vmatprep.mubr.msk.f32.mxu0 %vm653_vm1, %v7887_v43  ;;  %v29234_v43 = vld [vmem:[%s27361_s29 + $0x1a9] sm:$0xff] }
 0x52e   : > { %23850 = vmatmul.mubr.msk.f32.gmra.mrb[100].mxu0 %vm653_vm1, %v7888_v46  ;;  %v29251_v46 = vld [vmem:[%s27361_s29 + $0x1c1] sm:$0xff] }
 0x52f   : > { %23852 = vmatprep.mubr.msk.f32.mxu0 %vm653_vm1, %v7889_v47  ;;  %v29262_v47 = vld [vmem:[%s27361_s29 + $0x1c9] sm:$0xff] }
 0x532   : > { %23853 = vmatmul.mubr.msk.f32.gmra.mrb[102].mxu0 %vm653_vm1, %v7890_v50  ;;  %v29279_v50 = vld [vmem:[%s27361_s29 + $0x1e1] sm:$0xff] }
 0x533   : > { %23855 = vmatprep.mubr.msk.f32.mxu0 %vm653_vm1, %v7891_v51  ;;  %v29290_v51 = vld [vmem:[%s27361_s29 + $0x1e9] sm:$0xff] }
 0x536   : > { %23856 = vmatmul.mubr.msk.f32.gmra.mrb[104].mxu0 %vm653_vm1, %v7892_v54  ;;  %v29307_v54 = vld [vmem:[%s27361_s29 + $0x201] sm:$0xff] }
 0x537   : > { %23858 = vmatprep.mubr.msk.f32.mxu0 %vm653_vm1, %v7893_v55  ;;  %v29318_v55 = vld [vmem:[%s27361_s29 + $0x209] sm:$0xff] }
 0x53a   : > { %23859 = vmatmul.mubr.msk.f32.gmra.mrb[106].mxu0 %vm653_vm1, %v7894_v58  ;;  %v29335_v58 = vld [vmem:[%s27361_s29 + $0x221] sm:$0xff] }
 0x53b   : > { %23861 = vmatprep.mubr.msk.f32.mxu0 %vm653_vm1, %v7895_v59  ;;  %v29346_v59 = vld [vmem:[%s27361_s29 + $0x229] sm:$0xff] }
 0x53e   : > { %23862 = vmatmul.mubr.msk.f32.gmra.mrb[108].mxu0 %vm653_vm1, %v7896_v62  ;;  %v29363_v62 = vld [vmem:[%s27361_s29 + $0x241] sm:$0xff] }
 0x53f   : > { %23864 = vmatprep.mubr.msk.f32.mxu0 %vm653_vm1, %v7897_v3  ;;  %v29374_v3 = vld [vmem:[%s27361_s29 + $0x249] sm:$0xff] }
 0x542   : > { %23865 = vmatmul.mubr.msk.f32.gmra.mrb[110].mxu0 %vm653_vm1, %v7898_v2  ;;  %v29391_v2 = vld [vmem:[%s27361_s29 + $0x261] sm:$0xff] }
 0x543   : > { %23867 = vmatprep.mubr.msk.f32.mxu0 %vm653_vm1, %v7899_v63  ;;  %v29402_v63 = vld [vmem:[%s27361_s29 + $0x269] sm:$0xff] }
 0x546   : > { %23868 = vmatmul.mubr.msk.f32.gmra.mrb[112].mxu0 %vm653_vm1, %v7900_v0  ;;  %v29419_v0 = vld [vmem:[%s27361_s29 + $0x281] sm:$0xff] }
 0x547   : > { %23870 = vmatprep.mubr.msk.f32.mxu0 %vm653_vm1, %v7901_v6  ;;  %v29430_v6 = vld [vmem:[%s27361_s29 + $0x289] sm:$0xff] }
 0x54a   : > { %23871 = vmatmul.mubr.msk.f32.gmra.mrb[114].mxu0 %vm653_vm1, %v7902_v9  ;;  %v29447_v9 = vld [vmem:[%s27361_s29 + $0x2a1] sm:$0xff] }
 0x54b   : > { %23873 = vmatprep.mubr.msk.f32.mxu0 %vm653_vm1, %v7903_v10  ;;  %v29458_v10 = vld [vmem:[%s27361_s29 + $0x2a9] sm:$0xff] }
 0x54e   : > { %23874 = vmatmul.mubr.msk.f32.gmra.mrb[116].mxu0 %vm653_vm1, %v7904_v14  ;;  %v29475_v14 = vld [vmem:[%s27361_s29 + $0x2c1] sm:$0xff] }
 0x54f   : > { %23876 = vmatprep.mubr.msk.f32.mxu0 %vm653_vm1, %v7905_v15  ;;  %v29486_v15 = vld [vmem:[%s27361_s29 + $0x2c9] sm:$0xff] }
 0x552   : > { %23877 = vmatmul.mubr.msk.f32.gmra.mrb[118].mxu0 %vm653_vm1, %v7906_v18  ;;  %v29503_v18 = vld [vmem:[%s27361_s29 + $0x2e1] sm:$0xff] }
 0x553   : > { %23881 = vmatprep.mubr.msk.f32.mxu0 %vm653_vm1, %v28916_v41  ;;  %v29220_v41 = vld [vmem:[%s27361_s29 + $0x199] sm:$0xff] }
 0x556   : > { %23882 = vmatmul.mubr.msk.f32.vlgmr.msra.gmra.mrb[0].mxu0 %vm653_vm1, %v28926_v44  ;;  %v29237_v44 = vld [vmem:[%s27361_s29 + $0x1b1] sm:$0xff] }
 0x557   : > { %23884 = vmatprep.mubr.msk.f32.mxu0 %vm653_vm1, %v28929_v45  ;;  %24062 = vmatpush3.msk.msra.mxu0 %vm1014_vm0, %v28851_v11  ;;  %v29111_v11 = vld [vmem:[%s27361_s29 + $0x121] sm:$0xff]  ;;  %v29248_v45 = vld [vmem:[%s27361_s29 + $0x1b9] sm:$0xff] }
 0x558   : > { %22661 = vmatprep.mubr.msk.f32.mxu1 %vm653_vm1, %v29111_v11 }
 0x559   : > { %22662 = vmatmul.mubr.msk.f32.gmra.mrb[36].mxu1 %vm653_vm1, %v29122_v26 }
 0x55a   : > { %23885 = vmatmul.mubr.msk.f32.gmra.mrb[2].mxu0 %vm653_vm1, %v28940_v48  ;;  %22664 = vmatprep.mubr.msk.f32.mxu1 %vm653_vm1, %v29125_v27  ;;  %v29265_v48 = vld [vmem:[%s27361_s29 + $0x1d1] sm:$0xff] }
 0x55b   : > { %23887 = vmatprep.mubr.msk.f32.mxu0 %vm653_vm1, %v28943_v49  ;;  %v29276_v49 = vld [vmem:[%s27361_s29 + $0x1d9] sm:$0xff] }
 0x55d   : > { %22665 = vmatmul.mubr.msk.f32.gmra.mrb[38].mxu1 %vm653_vm1, %v29136_v28 }
 0x55e   : > { %23888 = vmatmul.mubr.msk.f32.gmra.mrb[4].mxu0 %vm653_vm1, %v28954_v52  ;;  %22667 = vmatprep.mubr.msk.f32.mxu1 %vm653_vm1, %v29139_v30  ;;  %v29293_v52 = vld [vmem:[%s27361_s29 + $0x1f1] sm:$0xff] }
 0x55f   : > { %23890 = vmatprep.mubr.msk.f32.mxu0 %vm653_vm1, %v28957_v53  ;;  %v29304_v53 = vld [vmem:[%s27361_s29 + $0x1f9] sm:$0xff] }
 0x561   : > { %22668 = vmatmul.mubr.msk.f32.gmra.mrb[40].mxu1 %vm653_vm1, %v29150_v31 }
 0x562   : > { %23891 = vmatmul.mubr.msk.f32.gmra.mrb[6].mxu0 %vm653_vm1, %v28968_v56  ;;  %22670 = vmatprep.mubr.msk.f32.mxu1 %vm653_vm1, %v29153_v32  ;;  %v29321_v56 = vld [vmem:[%s27361_s29 + $0x211] sm:$0xff] }
 0x563   : > { %23893 = vmatprep.mubr.msk.f32.mxu0 %vm653_vm1, %v28971_v57  ;;  %v29332_v57 = vld [vmem:[%s27361_s29 + $0x219] sm:$0xff] }
 0x565   : > { %22671 = vmatmul.mubr.msk.f32.gmra.mrb[42].mxu1 %vm653_vm1, %v29164_v33 }
 0x566   : > { %23894 = vmatmul.mubr.msk.f32.gmra.mrb[8].mxu0 %vm653_vm1, %v28982_v60  ;;  %22673 = vmatprep.mubr.msk.f32.mxu1 %vm653_vm1, %v29167_v34  ;;  %v29349_v60 = vld [vmem:[%s27361_s29 + $0x231] sm:$0xff] }
 0x567   : > { %23896 = vmatprep.mubr.msk.f32.mxu0 %vm653_vm1, %v28985_v61  ;;  %v29360_v61 = vld [vmem:[%s27361_s29 + $0x239] sm:$0xff] }
 0x569   : > { %22674 = vmatmul.mubr.msk.f32.gmra.mrb[44].mxu1 %vm653_vm1, %v29178_v35 }
 0x56a   : > { %23897 = vmatmul.mubr.msk.f32.gmra.mrb[10].mxu0 %vm653_vm1, %v28996_v1  ;;  %22676 = vmatprep.mubr.msk.f32.mxu1 %vm653_vm1, %v29181_v36  ;;  %v29377_v1 = vld [vmem:[%s27361_s29 + $0x251] sm:$0xff] }
 0x56b   : > { %23899 = vmatprep.mubr.msk.f32.mxu0 %vm653_vm1, %v28999_v29  ;;  %v29388_v29 = vld [vmem:[%s27361_s29 + $0x259] sm:$0xff] }
 0x56d   : > { %22677 = vmatmul.mubr.msk.f32.gmra.mrb[46].mxu1 %vm653_vm1, %v29192_v37 }
 0x56e   : > { %23900 = vmatmul.mubr.msk.f32.gmra.mrb[12].mxu0 %vm653_vm1, %v29010_v5  ;;  %22679 = vmatprep.mubr.msk.f32.mxu1 %vm653_vm1, %v29195_v38  ;;  %v29405_v5 = vld [vmem:[%s27361_s29 + $0x271] sm:$0xff] }
 0x56f   : > { %23902 = vmatprep.mubr.msk.f32.mxu0 %vm653_vm1, %v29013_v4  ;;  %v29416_v4 = vld [vmem:[%s27361_s29 + $0x279] sm:$0xff] }
 0x571   : > { %22680 = vmatmul.mubr.msk.f32.gmra.mrb[48].mxu1 %vm653_vm1, %v29206_v39 }
 0x572   : > { %23903 = vmatmul.mubr.msk.f32.gmra.mrb[14].mxu0 %vm653_vm1, %v29024_v7  ;;  %22682 = vmatprep.mubr.msk.f32.mxu1 %vm653_vm1, %v29209_v40  ;;  %v29433_v7 = vld [vmem:[%s27361_s29 + $0x291] sm:$0xff] }
 0x573   : > { %23905 = vmatprep.mubr.msk.f32.mxu0 %vm653_vm1, %v29027_v8  ;;  %v29444_v8 = vld [vmem:[%s27361_s29 + $0x299] sm:$0xff] }
 0x575   : > { %22683 = vmatmul.mubr.msk.f32.gmra.mrb[50].mxu1 %vm653_vm1, %v29220_v41 }
 0x576   : > { %23906 = vmatmul.mubr.msk.f32.gmra.mrb[16].mxu0 %vm653_vm1, %v29038_v12  ;;  %22685 = vmatprep.mubr.msk.f32.mxu1 %vm653_vm1, %v29223_v42  ;;  %v29461_v12 = vld [vmem:[%s27361_s29 + $0x2b1] sm:$0xff] }
 0x577   : > { %23908 = vmatprep.mubr.msk.f32.mxu0 %vm653_vm1, %v29041_v13  ;;  %v29472_v13 = vld [vmem:[%s27361_s29 + $0x2b9] sm:$0xff] }
 0x579   : > { %22686 = vmatmul.mubr.msk.f32.gmra.mrb[52].mxu1 %vm653_vm1, %v29234_v43 }
 0x57a   : > { %23909 = vmatmul.mubr.msk.f32.gmra.mrb[18].mxu0 %vm653_vm1, %v29052_v16  ;;  %22688 = vmatprep.mubr.msk.f32.mxu1 %vm653_vm1, %v29237_v44  ;;  %v29489_v16 = vld [vmem:[%s27361_s29 + $0x2d1] sm:$0xff] }
 0x57b   : > { %23911 = vmatprep.mubr.msk.f32.mxu0 %vm653_vm1, %v29055_v17  ;;  %v29500_v17 = vld [vmem:[%s27361_s29 + $0x2d9] sm:$0xff] }
 0x57d   : > { %22689 = vmatmul.mubr.msk.f32.gmra.mrb[54].mxu1 %vm653_vm1, %v29248_v45 }
 0x57e   : > { %23912 = vmatmul.mubr.msk.f32.gmra.mrb[20].mxu0 %vm653_vm1, %v29065_v19  ;;  %22691 = vmatprep.mubr.msk.f32.mxu1 %vm653_vm1, %v29251_v46  ;;  %v29514_v19 = vld [vmem:[%s27361_s29 + $0x2e9] sm:$0xff] }
 0x57f   : > { %23914 = vmatprep.mubr.msk.f32.mxu0 %vm653_vm1, %v29068_v20  ;;  %v29517_v20 = vld [vmem:[%s27361_s29 + $0x2f1] sm:$0xff] }
 0x581   : > { %22692 = vmatmul.mubr.msk.f32.gmra.mrb[56].mxu1 %vm653_vm1, %v29262_v47 }
 0x582   : > { %23915 = vmatmul.mubr.msk.f32.gmra.mrb[22].mxu0 %vm653_vm1, %v29078_v21  ;;  %22694 = vmatprep.mubr.msk.f32.mxu1 %vm653_vm1, %v29265_v48  ;;  %v29528_v21 = vld [vmem:[%s27361_s29 + $0x2f9] sm:$0xff] }
 0x583   : > { %23917 = vmatprep.mubr.msk.f32.mxu0 %vm653_vm1, %v29081_v22  ;;  %v29531_v22 = vld [vmem:[%s27361_s29 + $0x301] sm:$0xff] }
 0x585   : > { %22695 = vmatmul.mubr.msk.f32.gmra.mrb[58].mxu1 %vm653_vm1, %v29276_v49 }
 0x586   : > { %23918 = vmatmul.mubr.msk.f32.gmra.mrb[24].mxu0 %vm653_vm1, %v29094_v23  ;;  %22697 = vmatprep.mubr.msk.f32.mxu1 %vm653_vm1, %v29279_v50  ;;  %v29542_v23 = vld [vmem:[%s27361_s29 + $0x309] sm:$0xff] }
 0x587   : > { %23920 = vmatprep.mubr.msk.f32.mxu0 %vm653_vm1, %v29097_v24  ;;  %v29545_v24 = vld [vmem:[%s27361_s29 + $0x311] sm:$0xff] }
 0x589   : > { %22698 = vmatmul.mubr.msk.f32.gmra.mrb[60].mxu1 %vm653_vm1, %v29290_v51 }
 0x58a   : > { %23921 = vmatmul.mubr.msk.f32.gmra.mrb[26].mxu0 %vm653_vm1, %v29108_v25  ;;  %22700 = vmatprep.mubr.msk.f32.mxu1 %vm653_vm1, %v29293_v52  ;;  %v29556_v25 = vld [vmem:[%s27361_s29 + $0x319] sm:$0xff] }
 0x58b   : > { %23923 = vmatprep.mubr.msk.f32.mxu0 %vm653_vm1, %v29111_v11  ;;  %v29559_v11 = vld [vmem:[%s27361_s29 + $0x321] sm:$0xff] }
 0x58d   : > { %22701 = vmatmul.mubr.msk.f32.gmra.mrb[62].mxu1 %vm653_vm1, %v29304_v53 }
 0x58e   : > { %23924 = vmatmul.mubr.msk.f32.gmra.mrb[28].mxu0 %vm653_vm1, %v29122_v26  ;;  %22703 = vmatprep.mubr.msk.f32.mxu1 %vm653_vm1, %v29307_v54  ;;  %v29570_v26 = vld [vmem:[%s27361_s29 + $0x329] sm:$0xff] }
 0x58f   : > { %23926 = vmatprep.mubr.msk.f32.mxu0 %vm653_vm1, %v29125_v27  ;;  %v29573_v27 = vld [vmem:[%s27361_s29 + $0x331] sm:$0xff] }
 0x591   : > { %22704 = vmatmul.mubr.msk.f32.gmra.mrb[64].mxu1 %vm653_vm1, %v29318_v55 }
 0x592   : > { %23927 = vmatmul.mubr.msk.f32.gmra.mrb[30].mxu0 %vm653_vm1, %v29136_v28  ;;  %22706 = vmatprep.mubr.msk.f32.mxu1 %vm653_vm1, %v29321_v56  ;;  %v29584_v28 = vld [vmem:[%s27361_s29 + $0x339] sm:$0xff] }
 0x593   : > { %23929 = vmatprep.mubr.msk.f32.mxu0 %vm653_vm1, %v29139_v30  ;;  %v29587_v30 = vld [vmem:[%s27361_s29 + $0x341] sm:$0xff] }
 0x595   : > { %22707 = vmatmul.mubr.msk.f32.gmra.mrb[66].mxu1 %vm653_vm1, %v29332_v57 }
 0x596   : > { %23930 = vmatmul.mubr.msk.f32.gmra.mrb[32].mxu0 %vm653_vm1, %v29150_v31  ;;  %22709 = vmatprep.mubr.msk.f32.mxu1 %vm653_vm1, %v29335_v58  ;;  %v29598_v31 = vld [vmem:[%s27361_s29 + $0x349] sm:$0xff] }
 0x597   : > { %23932 = vmatprep.mubr.msk.f32.mxu0 %vm653_vm1, %v29153_v32  ;;  %v29601_v32 = vld [vmem:[%s27361_s29 + $0x351] sm:$0xff] }
 0x599   : > { %22710 = vmatmul.mubr.msk.f32.gmra.mrb[68].mxu1 %vm653_vm1, %v29346_v59 }
 0x59a   : > { %23933 = vmatmul.mubr.msk.f32.gmra.mrb[34].mxu0 %vm653_vm1, %v29164_v33  ;;  %22712 = vmatprep.mubr.msk.f32.mxu1 %vm653_vm1, %v29349_v60  ;;  %v29612_v33 = vld [vmem:[%s27361_s29 + $0x359] sm:$0xff] }
 0x59b   : > { %23935 = vmatprep.mubr.msk.f32.mxu0 %vm653_vm1, %v29167_v34  ;;  %v29615_v34 = vld [vmem:[%s27361_s29 + $0x361] sm:$0xff] }
 0x59d   : > { %22713 = vmatmul.mubr.msk.f32.gmra.mrb[70].mxu1 %vm653_vm1, %v29360_v61 }
 0x59e   : > { %23936 = vmatmul.mubr.msk.f32.gmra.mrb[36].mxu0 %vm653_vm1, %v29178_v35  ;;  %22715 = vmatprep.mubr.msk.f32.mxu1 %vm653_vm1, %v29363_v62  ;;  %v29626_v35 = vld [vmem:[%s27361_s29 + $0x369] sm:$0xff] }
 0x59f   : > { %23938 = vmatprep.mubr.msk.f32.mxu0 %vm653_vm1, %v29181_v36  ;;  %v29629_v36 = vld [vmem:[%s27361_s29 + $0x371] sm:$0xff] }
 0x5a1   : > { %22716 = vmatmul.mubr.msk.f32.gmra.mrb[72].mxu1 %vm653_vm1, %v29374_v3 }
 0x5a2   : > { %23939 = vmatmul.mubr.msk.f32.gmra.mrb[38].mxu0 %vm653_vm1, %v29192_v37  ;;  %22718 = vmatprep.mubr.msk.f32.mxu1 %vm653_vm1, %v29377_v1  ;;  %v29640_v37 = vld [vmem:[%s27361_s29 + $0x379] sm:$0xff] }
 0x5a3   : > { %23941 = vmatprep.mubr.msk.f32.mxu0 %vm653_vm1, %v29195_v38  ;;  %v29643_v38 = vld [vmem:[%s27361_s29 + $0x381] sm:$0xff] }
 0x5a5   : > { %22719 = vmatmul.mubr.msk.f32.gmra.mrb[74].mxu1 %vm653_vm1, %v29388_v29 }
 0x5a6   : > { %23942 = vmatmul.mubr.msk.f32.gmra.mrb[40].mxu0 %vm653_vm1, %v29206_v39  ;;  %22721 = vmatprep.mubr.msk.f32.mxu1 %vm653_vm1, %v29391_v2  ;;  %v29654_v39 = vld [vmem:[%s27361_s29 + $0x389] sm:$0xff] }
 0x5a7   : > { %23944 = vmatprep.mubr.msk.f32.mxu0 %vm653_vm1, %v29209_v40  ;;  %v29657_v40 = vld [vmem:[%s27361_s29 + $0x391] sm:$0xff] }
 0x5a9   : > { %22722 = vmatmul.mubr.msk.f32.gmra.mrb[76].mxu1 %vm653_vm1, %v29402_v63 }
 0x5aa   : > { %23945 = vmatmul.mubr.msk.f32.gmra.mrb[42].mxu0 %vm653_vm1, %v29220_v41  ;;  %22724 = vmatprep.mubr.msk.f32.mxu1 %vm653_vm1, %v29405_v5  ;;  %v29668_v41 = vld [vmem:[%s27361_s29 + $0x399] sm:$0xff] }
 0x5ab   : > { %23947 = vmatprep.mubr.msk.f32.mxu0 %vm653_vm1, %v29223_v42  ;;  %v29671_v42 = vld [vmem:[%s27361_s29 + $0x3a1] sm:$0xff] }
 0x5ad   : > { %22725 = vmatmul.mubr.msk.f32.gmra.mrb[78].mxu1 %vm653_vm1, %v29416_v4 }
 0x5ae   : > { %23948 = vmatmul.mubr.msk.f32.gmra.mrb[44].mxu0 %vm653_vm1, %v29234_v43  ;;  %22727 = vmatprep.mubr.msk.f32.mxu1 %vm653_vm1, %v29419_v0  ;;  %v29682_v43 = vld [vmem:[%s27361_s29 + $0x3a9] sm:$0xff] }
 0x5af   : > { %23950 = vmatprep.mubr.msk.f32.mxu0 %vm653_vm1, %v29237_v44  ;;  %v29685_v44 = vld [vmem:[%s27361_s29 + $0x3b1] sm:$0xff] }
 0x5b1   : > { %22728 = vmatmul.mubr.msk.f32.gmra.mrb[80].mxu1 %vm653_vm1, %v29430_v6 }
 0x5b2   : > { %23951 = vmatmul.mubr.msk.f32.gmra.mrb[46].mxu0 %vm653_vm1, %v29248_v45  ;;  %22730 = vmatprep.mubr.msk.f32.mxu1 %vm653_vm1, %v29433_v7  ;;  %v29696_v45 = vld [vmem:[%s27361_s29 + $0x3b9] sm:$0xff] }
 0x5b3   : > { %23953 = vmatprep.mubr.msk.f32.mxu0 %vm653_vm1, %v29251_v46  ;;  %v477_v46 = vld [vmem:[%s27361_s29 + $0x210] sm:$0xff] }
 0x5b5   : > { %22731 = vmatmul.mubr.msk.f32.gmra.mrb[82].mxu1 %vm653_vm1, %v29444_v8 }
 0x5b6   : > { %23954 = vmatmul.mubr.msk.f32.gmra.mrb[48].mxu0 %vm653_vm1, %v29262_v47  ;;  %22733 = vmatprep.mubr.msk.f32.mxu1 %vm653_vm1, %v29447_v9  ;;  %v478_v47 = vld [vmem:[%s27361_s29 + $0x218] sm:$0xff] }
 0x5b7   : > { %23956 = vmatprep.mubr.msk.f32.mxu0 %vm653_vm1, %v29265_v48  ;;  %v479_v48 = vld [vmem:[%s27361_s29 + $0x220] sm:$0xff] }
 0x5b9   : > { %22734 = vmatmul.mubr.msk.f32.gmra.mrb[84].mxu1 %vm653_vm1, %v29458_v10 }
 0x5ba   : > { %23957 = vmatmul.mubr.msk.f32.gmra.mrb[50].mxu0 %vm653_vm1, %v29276_v49  ;;  %22736 = vmatprep.mubr.msk.f32.mxu1 %vm653_vm1, %v29461_v12  ;;  %v480_v49 = vld [vmem:[%s27361_s29 + $0x228] sm:$0xff] }
 0x5bb   : > { %23959 = vmatprep.mubr.msk.f32.mxu0 %vm653_vm1, %v29279_v50  ;;  %v481_v50 = vld [vmem:[%s27361_s29 + $0x230] sm:$0xff] }
 0x5bd   : > { %22737 = vmatmul.mubr.msk.f32.gmra.mrb[86].mxu1 %vm653_vm1, %v29472_v13 }
 0x5be   : > { %23960 = vmatmul.mubr.msk.f32.gmra.mrb[52].mxu0 %vm653_vm1, %v29290_v51  ;;  %22739 = vmatprep.mubr.msk.f32.mxu1 %vm653_vm1, %v29475_v14  ;;  %v482_v51 = vld [vmem:[%s27361_s29 + $0x238] sm:$0xff] }
 0x5bf   : > { %23962 = vmatprep.mubr.msk.f32.mxu0 %vm653_vm1, %v29293_v52  ;;  %v483_v52 = vld [vmem:[%s27361_s29 + $0x240] sm:$0xff] }
 0x5c1   : > { %22740 = vmatmul.mubr.msk.f32.gmra.mrb[88].mxu1 %vm653_vm1, %v29486_v15 }
 0x5c2   : > { %23963 = vmatmul.mubr.msk.f32.gmra.mrb[54].mxu0 %vm653_vm1, %v29304_v53  ;;  %22742 = vmatprep.mubr.msk.f32.mxu1 %vm653_vm1, %v29489_v16  ;;  %v484_v53 = vld [vmem:[%s27361_s29 + $0x248] sm:$0xff] }
 0x5c3   : > { %23965 = vmatprep.mubr.msk.f32.mxu0 %vm653_vm1, %v29307_v54  ;;  %v485_v54 = vld [vmem:[%s27361_s29 + $0x250] sm:$0xff] }
 0x5c5   : > { %22743 = vmatmul.mubr.msk.f32.gmra.mrb[90].mxu1 %vm653_vm1, %v29500_v17 }
 0x5c6   : > { %23966 = vmatmul.mubr.msk.f32.gmra.mrb[56].mxu0 %vm653_vm1, %v29318_v55  ;;  %22745 = vmatprep.mubr.msk.f32.mxu1 %vm653_vm1, %v29503_v18  ;;  %v486_v55 = vld [vmem:[%s27361_s29 + $0x258] sm:$0xff] }
 0x5c7   : > { %23968 = vmatprep.mubr.msk.f32.mxu0 %vm653_vm1, %v29321_v56  ;;  %v487_v56 = vld [vmem:[%s27361_s29 + $0x260] sm:$0xff] }
 0x5c9   : > { %22746 = vmatmul.mubr.msk.f32.gmra.mrb[92].mxu1 %vm653_vm1, %v29514_v19 }
 0x5ca   : > { %23969 = vmatmul.mubr.msk.f32.gmra.mrb[58].mxu0 %vm653_vm1, %v29332_v57  ;;  %22748 = vmatprep.mubr.msk.f32.mxu1 %vm653_vm1, %v29517_v20  ;;  %v488_v57 = vld [vmem:[%s27361_s29 + $0x268] sm:$0xff] }
 0x5cb   : > { %23971 = vmatprep.mubr.msk.f32.mxu0 %vm653_vm1, %v29335_v58  ;;  %v489_v58 = vld [vmem:[%s27361_s29 + $0x270] sm:$0xff] }
 0x5cd   : > { %22749 = vmatmul.mubr.msk.f32.gmra.mrb[94].mxu1 %vm653_vm1, %v29528_v21 }
 0x5ce   : > { %23972 = vmatmul.mubr.msk.f32.gmra.mrb[60].mxu0 %vm653_vm1, %v29346_v59  ;;  %22751 = vmatprep.mubr.msk.f32.mxu1 %vm653_vm1, %v29531_v22  ;;  %v490_v59 = vld [vmem:[%s27361_s29 + $0x278] sm:$0xff] }
 0x5cf   : > { %23974 = vmatprep.mubr.msk.f32.mxu0 %vm653_vm1, %v29349_v60  ;;  %v491_v60 = vld [vmem:[%s27361_s29 + $0x280] sm:$0xff] }
 0x5d1   : > { %22752 = vmatmul.mubr.msk.f32.gmra.mrb[96].mxu1 %vm653_vm1, %v29542_v23 }
 0x5d2   : > { %23975 = vmatmul.mubr.msk.f32.gmra.mrb[62].mxu0 %vm653_vm1, %v29360_v61  ;;  %22754 = vmatprep.mubr.msk.f32.mxu1 %vm653_vm1, %v29545_v24  ;;  %v492_v61 = vld [vmem:[%s27361_s29 + $0x288] sm:$0xff] }
 0x5d3   : > { %23977 = vmatprep.mubr.msk.f32.mxu0 %vm653_vm1, %v29363_v62  ;;  %v493_v62 = vld [vmem:[%s27361_s29 + $0x290] sm:$0xff] }
 0x5d5   : > { %22755 = vmatmul.mubr.msk.f32.gmra.mrb[98].mxu1 %vm653_vm1, %v29556_v25 }
 0x5d6   : > { %23978 = vmatmul.mubr.msk.f32.gmra.mrb[64].mxu0 %vm653_vm1, %v29374_v3  ;;  %22757 = vmatprep.mubr.msk.f32.mxu1 %vm653_vm1, %v29559_v11  ;;  %v494_v3 = vld [vmem:[%s27361_s29 + $0x298] sm:$0xff] }
 0x5d7   : > { %23980 = vmatprep.mubr.msk.f32.mxu0 %vm653_vm1, %v29377_v1  ;;  %v495_v1 = vld [vmem:[%s27361_s29 + $0x2a0] sm:$0xff] }
 0x5d9   : > { %22758 = vmatmul.mubr.msk.f32.gmra.mrb[100].mxu1 %vm653_vm1, %v29570_v26 }
 0x5da   : > { %23981 = vmatmul.mubr.msk.f32.gmra.mrb[66].mxu0 %vm653_vm1, %v29388_v29  ;;  %22760 = vmatprep.mubr.msk.f32.mxu1 %vm653_vm1, %v29573_v27  ;;  %v496_v29 = vld [vmem:[%s27361_s29 + $0x2a8] sm:$0xff] }
 0x5db   : > { %23983 = vmatprep.mubr.msk.f32.mxu0 %vm653_vm1, %v29391_v2  ;;  %v497_v2 = vld [vmem:[%s27361_s29 + $0x2b0] sm:$0xff] }
 0x5dd   : > { %22761 = vmatmul.mubr.msk.f32.gmra.mrb[102].mxu1 %vm653_vm1, %v29584_v28 }
 0x5de   : > { %23984 = vmatmul.mubr.msk.f32.gmra.mrb[68].mxu0 %vm653_vm1, %v29402_v63  ;;  %22763 = vmatprep.mubr.msk.f32.mxu1 %vm653_vm1, %v29587_v30  ;;  %v9168_v63 = vld [vmem:[%s27361_s29 + $0x3c1] sm:$0xff] }
 0x5df   : > { %23986 = vmatprep.mubr.msk.f32.mxu0 %vm653_vm1, %v29405_v5  ;;  %v498_v5 = vld [vmem:[%s27361_s29 + $0x2b8] sm:$0xff] }
 0x5e1   : > { %22764 = vmatmul.mubr.msk.f32.gmra.mrb[104].mxu1 %vm653_vm1, %v29598_v31 }
 0x5e2   : > { %23987 = vmatmul.mubr.msk.f32.gmra.mrb[70].mxu0 %vm653_vm1, %v29416_v4  ;;  %22766 = vmatprep.mubr.msk.f32.mxu1 %vm653_vm1, %v29601_v32  ;;  %v9169_v4 = vld [vmem:[%s27361_s29 + $0x3c9] sm:$0xff] }
 0x5e3   : > { %23989 = vmatprep.mubr.msk.f32.mxu0 %vm653_vm1, %v29419_v0  ;;  %v499_v0 = vld [vmem:[%s27361_s29 + $0x2c0] sm:$0xff] }
 0x5e5   : > { %22767 = vmatmul.mubr.msk.f32.gmra.mrb[106].mxu1 %vm653_vm1, %v29612_v33 }
 0x5e6   : > { %23990 = vmatmul.mubr.msk.f32.gmra.mrb[72].mxu0 %vm653_vm1, %v29430_v6  ;;  %22769 = vmatprep.mubr.msk.f32.mxu1 %vm653_vm1, %v29615_v34  ;;  %v9170_v6 = vld [vmem:[%s27361_s29 + $0x3d1] sm:$0xff] }
 0x5e7   : > { %23992 = vmatprep.mubr.msk.f32.mxu0 %vm653_vm1, %v29433_v7  ;;  %v500_v7 = vld [vmem:[%s27361_s29 + $0x2c8] sm:$0xff] }
 0x5e9   : > { %22770 = vmatmul.mubr.msk.f32.gmra.mrb[108].mxu1 %vm653_vm1, %v29626_v35 }
 0x5ea   : > { %23993 = vmatmul.mubr.msk.f32.gmra.mrb[74].mxu0 %vm653_vm1, %v29444_v8  ;;  %22772 = vmatprep.mubr.msk.f32.mxu1 %vm653_vm1, %v29629_v36  ;;  %v9171_v8 = vld [vmem:[%s27361_s29 + $0x3d9] sm:$0xff] }
 0x5eb   : > { %23995 = vmatprep.mubr.msk.f32.mxu0 %vm653_vm1, %v29447_v9  ;;  %v501_v9 = vld [vmem:[%s27361_s29 + $0x2d0] sm:$0xff] }
 0x5ed   : > { %22773 = vmatmul.mubr.msk.f32.gmra.mrb[110].mxu1 %vm653_vm1, %v29640_v37 }
 0x5ee   : > { %23996 = vmatmul.mubr.msk.f32.gmra.mrb[76].mxu0 %vm653_vm1, %v29458_v10  ;;  %22775 = vmatprep.mubr.msk.f32.mxu1 %vm653_vm1, %v29643_v38  ;;  %v9172_v10 = vld [vmem:[%s27361_s29 + $0x3e1] sm:$0xff] }
 0x5ef   : > { %23998 = vmatprep.mubr.msk.f32.mxu0 %vm653_vm1, %v29461_v12  ;;  %v502_v12 = vld [vmem:[%s27361_s29 + $0x2d8] sm:$0xff] }
 0x5f1   : > { %22776 = vmatmul.mubr.msk.f32.gmra.mrb[112].mxu1 %vm653_vm1, %v29654_v39 }
 0x5f2   : > { %23999 = vmatmul.mubr.msk.f32.gmra.mrb[78].mxu0 %vm653_vm1, %v29472_v13  ;;  %22778 = vmatprep.mubr.msk.f32.mxu1 %vm653_vm1, %v29657_v40  ;;  %v9173_v13 = vld [vmem:[%s27361_s29 + $0x3e9] sm:$0xff] }
 0x5f3   : > { %24001 = vmatprep.mubr.msk.f32.mxu0 %vm653_vm1, %v29475_v14  ;;  %v503_v14 = vld [vmem:[%s27361_s29 + $0x2e0] sm:$0xff] }
 0x5f5   : > { %22779 = vmatmul.mubr.msk.f32.gmra.mrb[114].mxu1 %vm653_vm1, %v29668_v41 }
 0x5f6   : > { %24002 = vmatmul.mubr.msk.f32.gmra.mrb[80].mxu0 %vm653_vm1, %v29486_v15  ;;  %22781 = vmatprep.mubr.msk.f32.mxu1 %vm653_vm1, %v29671_v42  ;;  %v9174_v15 = vld [vmem:[%s27361_s29 + $0x3f1] sm:$0xff] }
 0x5f7   : > { %24004 = vmatprep.mubr.msk.f32.mxu0 %vm653_vm1, %v29489_v16  ;;  %v504_v16 = vld [vmem:[%s27361_s29 + $0x2e8] sm:$0xff] }
 0x5f9   : > { %22782 = vmatmul.mubr.msk.f32.gmra.mrb[116].mxu1 %vm653_vm1, %v29682_v43 }
 0x5fa   : > { %24005 = vmatmul.mubr.msk.f32.gmra.mrb[82].mxu0 %vm653_vm1, %v29500_v17  ;;  %22784 = vmatprep.mubr.msk.f32.mxu1 %vm653_vm1, %v29685_v44  ;;  %v9175_v17 = vld [vmem:[%s27361_s29 + $0x3f9] sm:$0xff] }
 0x5fb   : > { %24007 = vmatprep.mubr.msk.f32.mxu0 %vm653_vm1, %v29503_v18  ;;  %v505_v18 = vld [vmem:[%s27361_s29 + $0x2f0] sm:$0xff] }
 0x5fd   : > { %22785 = vmatmul.mubr.msk.f32.gmra.mrb[118].mxu1 %vm653_vm1, %v29696_v45 }
 0x5fe   : > { %24008 = vmatmul.mubr.msk.f32.gmra.mrb[84].mxu0 %vm653_vm1, %v29514_v19  ;;  %22888 = vmatprep.mubr.msk.f32.mxu1 %vm653_vm1, %v477_v46  ;;  %v10325_v19 = vld [vmem:[%s27361_s29 + $0x42] sm:$0xff] }
 0x5ff   : > { %24010 = vmatprep.mubr.msk.f32.mxu0 %vm653_vm1, %v29517_v20  ;;  %v506_v20 = vld [vmem:[%s27361_s29 + $0x2f8] sm:$0xff] }
 0x601   : > { %22889 = vmatmul.mubr.msk.f32.vlgmr.msra.gmra.mrb[66].mxu1 %vm653_vm1, %v478_v47  ;;  %v10338_v47 = vld [vmem:[%s27361_s29 + $0xaa] sm:$0xff] }
 0x602   : > { %24011 = vmatmul.mubr.msk.f32.gmra.mrb[86].mxu0 %vm653_vm1, %v29528_v21  ;;  %22891 = vmatprep.mubr.msk.f32.mxu1 %vm653_vm1, %v479_v48  ;;  %v10326_v21 = vld [vmem:[%s27361_s29 + $0x4a] sm:$0xff]  ;;  %v519_v48 = vld [vmem:[%s27361_s29 + $0x360] sm:$0xff] }
 0x603   : > { %24013 = vmatprep.mubr.msk.f32.mxu0 %vm653_vm1, %v29531_v22  ;;  %v507_v22 = vld [vmem:[%s27361_s29 + $0x300] sm:$0xff] }
 0x605   : > { %22892 = vmatmul.mubr.msk.f32.gmra.mrb[68].mxu1 %vm653_vm1, %v480_v49  ;;  %v10339_v49 = vld [vmem:[%s27361_s29 + $0xb2] sm:$0xff] }
 0x606   : > { %24014 = vmatmul.mubr.msk.f32.gmra.mrb[88].mxu0 %vm653_vm1, %v29542_v23  ;;  %22894 = vmatprep.mubr.msk.f32.mxu1 %vm653_vm1, %v481_v50  ;;  %v10327_v23 = vld [vmem:[%s27361_s29 + $0x52] sm:$0xff] }
 0x607   : > { %24016 = vmatprep.mubr.msk.f32.mxu0 %vm653_vm1, %v29545_v24  ;;  %v508_v24 = vld [vmem:[%s27361_s29 + $0x308] sm:$0xff] }
 0x609   : > { %22895 = vmatmul.mubr.msk.f32.gmra.mrb[70].mxu1 %vm653_vm1, %v482_v51  ;;  %v520_v51 = vld [vmem:[%s27361_s29 + $0x368] sm:$0xff] }
 0x60a   : > { %24017 = vmatmul.mubr.msk.f32.gmra.mrb[90].mxu0 %vm653_vm1, %v29556_v25  ;;  %22897 = vmatprep.mubr.msk.f32.mxu1 %vm653_vm1, %v483_v52  ;;  %v10328_v25 = vld [vmem:[%s27361_s29 + $0x5a] sm:$0xff] }
 0x60b   : > { %24019 = vmatprep.mubr.msk.f32.mxu0 %vm653_vm1, %v29559_v11  ;;  %v509_v11 = vld [vmem:[%s27361_s29 + $0x310] sm:$0xff] }
 0x60d   : > { %22898 = vmatmul.mubr.msk.f32.gmra.mrb[72].mxu1 %vm653_vm1, %v484_v53  ;;  %v10340_v53 = vld [vmem:[%s27361_s29 + $0xba] sm:$0xff] }
 0x60e   : > { %24020 = vmatmul.mubr.msk.f32.gmra.mrb[92].mxu0 %vm653_vm1, %v29570_v26  ;;  %22900 = vmatprep.mubr.msk.f32.mxu1 %vm653_vm1, %v485_v54  ;;  %v10329_v26 = vld [vmem:[%s27361_s29 + $0x62] sm:$0xff]  ;;  %v521_v54 = vld [vmem:[%s27361_s29 + $0x370] sm:$0xff] }
 0x60f   : > { %24022 = vmatprep.mubr.msk.f32.mxu0 %vm653_vm1, %v29573_v27  ;;  %v510_v27 = vld [vmem:[%s27361_s29 + $0x318] sm:$0xff] }
 0x611   : > { %22901 = vmatmul.mubr.msk.f32.gmra.mrb[74].mxu1 %vm653_vm1, %v486_v55  ;;  %v10341_v55 = vld [vmem:[%s27361_s29 + $0xc2] sm:$0xff] }
 0x612   : > { %24023 = vmatmul.mubr.msk.f32.gmra.mrb[94].mxu0 %vm653_vm1, %v29584_v28  ;;  %22903 = vmatprep.mubr.msk.f32.mxu1 %vm653_vm1, %v487_v56  ;;  %v10330_v28 = vld [vmem:[%s27361_s29 + $0x6a] sm:$0xff] }
 0x613   : > { %24025 = vmatprep.mubr.msk.f32.mxu0 %vm653_vm1, %v29587_v30  ;;  %v511_v30 = vld [vmem:[%s27361_s29 + $0x320] sm:$0xff] }
 0x615   : > { %22904 = vmatmul.mubr.msk.f32.gmra.mrb[76].mxu1 %vm653_vm1, %v488_v57  ;;  %v522_v57 = vld [vmem:[%s27361_s29 + $0x378] sm:$0xff] }
 0x616   : > { %24026 = vmatmul.mubr.msk.f32.gmra.mrb[96].mxu0 %vm653_vm1, %v29598_v31  ;;  %22906 = vmatprep.mubr.msk.f32.mxu1 %vm653_vm1, %v489_v58  ;;  %v10331_v31 = vld [vmem:[%s27361_s29 + $0x72] sm:$0xff] }
 0x617   : > { %24028 = vmatprep.mubr.msk.f32.mxu0 %vm653_vm1, %v29601_v32  ;;  %v512_v32 = vld [vmem:[%s27361_s29 + $0x328] sm:$0xff] }
 0x619   : > { %22907 = vmatmul.mubr.msk.f32.gmra.mrb[78].mxu1 %vm653_vm1, %v490_v59  ;;  %v10342_v59 = vld [vmem:[%s27361_s29 + $0xca] sm:$0xff] }
 0x61a   : > { %24029 = vmatmul.mubr.msk.f32.gmra.mrb[98].mxu0 %vm653_vm1, %v29612_v33  ;;  %22909 = vmatprep.mubr.msk.f32.mxu1 %vm653_vm1, %v491_v60  ;;  %v10332_v33 = vld [vmem:[%s27361_s29 + $0x7a] sm:$0xff] }
 0x61b   : > { %24031 = vmatprep.mubr.msk.f32.mxu0 %vm653_vm1, %v29615_v34  ;;  %v513_v34 = vld [vmem:[%s27361_s29 + $0x330] sm:$0xff]  ;;  %v523_v60 = vld [vmem:[%s27361_s29 + $0x380] sm:$0xff] }
 0x61d   : > { %22910 = vmatmul.mubr.msk.f32.gmra.mrb[80].mxu1 %vm653_vm1, %v492_v61  ;;  %v10343_v61 = vld [vmem:[%s27361_s29 + $0xd2] sm:$0xff] }
 0x61e   : > { %24032 = vmatmul.mubr.msk.f32.gmra.mrb[100].mxu0 %vm653_vm1, %v29626_v35  ;;  %22912 = vmatprep.mubr.msk.f32.mxu1 %vm653_vm1, %v493_v62  ;;  %v10333_v35 = vld [vmem:[%s27361_s29 + $0x82] sm:$0xff] }
 0x61f   : > { %24034 = vmatprep.mubr.msk.f32.mxu0 %vm653_vm1, %v29629_v36  ;;  %v514_v36 = vld [vmem:[%s27361_s29 + $0x338] sm:$0xff] }
 0x621   : > { %22913 = vmatmul.mubr.msk.f32.gmra.mrb[82].mxu1 %vm653_vm1, %v494_v3  ;;  %v524_v3 = vld [vmem:[%s27361_s29 + $0x388] sm:$0xff] }
 0x622   : > { %24035 = vmatmul.mubr.msk.f32.gmra.mrb[102].mxu0 %vm653_vm1, %v29640_v37  ;;  %22915 = vmatprep.mubr.msk.f32.mxu1 %vm653_vm1, %v495_v1  ;;  %v10334_v37 = vld [vmem:[%s27361_s29 + $0x8a] sm:$0xff] }
 0x623   : > { %24037 = vmatprep.mubr.msk.f32.mxu0 %vm653_vm1, %v29643_v38  ;;  %v515_v38 = vld [vmem:[%s27361_s29 + $0x340] sm:$0xff] }
 0x625   : > { %22916 = vmatmul.mubr.msk.f32.gmra.mrb[84].mxu1 %vm653_vm1, %v496_v29  ;;  %v10344_v29 = vld [vmem:[%s27361_s29 + $0xda] sm:$0xff] }
 0x626   : > { %24038 = vmatmul.mubr.msk.f32.gmra.mrb[104].mxu0 %vm653_vm1, %v29654_v39  ;;  %22918 = vmatprep.mubr.msk.f32.mxu1 %vm653_vm1, %v497_v2  ;;  %v10335_v39 = vld [vmem:[%s27361_s29 + $0x92] sm:$0xff] }
 0x627   : > { %24040 = vmatprep.mubr.msk.f32.mxu0 %vm653_vm1, %v29657_v40  ;;  %v516_v40 = vld [vmem:[%s27361_s29 + $0x348] sm:$0xff]  ;;  %v525_v2 = vld [vmem:[%s27361_s29 + $0x390] sm:$0xff] }
 0x629   : > { %22919 = vmatmul.mubr.msk.f32.gmra.mrb[86].mxu1 %vm653_vm1, %v498_v5 }
 0x62a   : > { %24041 = vmatmul.mubr.msk.f32.gmra.mrb[106].mxu0 %vm653_vm1, %v29668_v41  ;;  %22921 = vmatprep.mubr.msk.f32.mxu1 %vm653_vm1, %v499_v0  ;;  %v10336_v41 = vld [vmem:[%s27361_s29 + $0x9a] sm:$0xff] }
 0x62b   : > { %24043 = vmatprep.mubr.msk.f32.mxu0 %vm653_vm1, %v29671_v42  ;;  %v517_v42 = vld [vmem:[%s27361_s29 + $0x350] sm:$0xff] }
 0x62d   : > { %22922 = vmatmul.mubr.msk.f32.gmra.mrb[88].mxu1 %vm653_vm1, %v500_v7  ;;  %v527_v7 = vld [vmem:[%s27361_s29 + $0x3a0] sm:$0xff] }
 0x62e   : > { %24044 = vmatmul.mubr.msk.f32.gmra.mrb[108].mxu0 %vm653_vm1, %v29682_v43  ;;  %22924 = vmatprep.mubr.msk.f32.mxu1 %vm653_vm1, %v501_v9  ;;  %v10337_v43 = vld [vmem:[%s27361_s29 + $0xa2] sm:$0xff] }
 0x62f   : > { %24046 = vmatprep.mubr.msk.f32.mxu0 %vm653_vm1, %v29685_v44  ;;  %v29867_v44 = vpop.f32.mrb[0].mxu1 }
 0x630   : > { %v29871_v46 = vpop.f32.mrb[1].mxu1 }
 0x631   : > { %22925 = vmatmul.mubr.msk.f32.gmra.mrb[90].mxu1 %vm653_vm1, %v502_v12  ;;  %v29879_v50 = vpop.f32.mrb[2].mxu1 }
 0x632   : > { %24047 = vmatmul.mubr.msk.f32.gmra.mrb[110].mxu0 %vm653_vm1, %v29696_v45  ;;  %22927 = vmatprep.mubr.msk.f32.mxu1 %vm653_vm1, %v503_v14  ;;  %v518_v45 = vld [vmem:[%s27361_s29 + $0x358] sm:$0xff]  ;;  %v29883_v52 = vpop.f32.mrb[3].mxu1  ;;  %v529_v14 = vld [vmem:[%s27361_s29 + $0x3b0] sm:$0xff] }
 0x633   : > { %24049 = vmatprep.mubr.msk.f32.mxu0 %vm653_vm1, %v9168_v63  ;;  %v29891_v56 = vpop.f32.mrb[4].mxu1  ;;  %v10345_v63 = vld [vmem:[%s27361_s29 + $0xe2] sm:$0xff] }
 0x634   : > { %v29895_v58 = vpop.f32.mrb[5].mxu1 }
 0x635   : > { %22928 = vmatmul.mubr.msk.f32.gmra.mrb[92].mxu1 %vm653_vm1, %v504_v16  ;;  %v29903_v62 = vpop.f32.mrb[6].mxu1 }
 0x636   : > { %24050 = vmatmul.mubr.msk.f32.gmra.mrb[112].mxu0 %vm653_vm1, %v9169_v4  ;;  %22930 = vmatprep.mubr.msk.f32.mxu1 %vm653_vm1, %v505_v18  ;;  %v29907_v1 = vpop.f32.mrb[7].mxu1  ;;  %v526_v4 = vld [vmem:[%s27361_s29 + $0x398] sm:$0xff] }
 0x637   : > { %24052 = vmatprep.mubr.msk.f32.mxu0 %vm653_vm1, %v9170_v6  ;;  %v29915_v5 = vpop.f32.mrb[8].mxu1  ;;  %v10346_v6 = vld [vmem:[%s27361_s29 + $0xea] sm:$0xff] }
 0x638   : > { %v29919_v0 = vpop.f32.mrb[9].mxu1 }
 0x639   : > { %22931 = vmatmul.mubr.msk.f32.gmra.mrb[94].mxu1 %vm653_vm1, %v506_v20  ;;  %v29927_v9 = vpop.f32.mrb[10].mxu1  ;;  %v10351_v20 = vld [vmem:[%s27361_s29 + $0x112] sm:$0xff] }
 0x63a   : > { %24053 = vmatmul.mubr.msk.f32.gmra.mrb[114].mxu0 %vm653_vm1, %v9171_v8  ;;  %22933 = vmatprep.mubr.msk.f32.mxu1 %vm653_vm1, %v507_v22  ;;  %v10347_v8 = vld [vmem:[%s27361_s29 + $0xf2] sm:$0xff]  ;;  %v29931_v12 = vpop.f32.mrb[11].mxu1 }
 0x63b   : > { %24055 = vmatprep.mubr.msk.f32.mxu0 %vm653_vm1, %v9172_v10  ;;  %v528_v10 = vld [vmem:[%s27361_s29 + $0x3a8] sm:$0xff]  ;;  %v29939_v16 = vpop.f32.mrb[12].mxu1 }
 0x63c   : > { %v29943_v18 = vpop.f32.mrb[13].mxu1 }
 0x63d   : > { %22934 = vmatmul.mubr.msk.f32.gmra.mrb[96].mxu1 %vm653_vm1, %v508_v24  ;;  %v10353_v24 = vld [vmem:[%s27361_s29 + $0x122] sm:$0xff] }
 0x63e   : > { %24056 = vmatmul.mubr.msk.f32.gmra.mrb[116].mxu0 %vm653_vm1, %v9173_v13  ;;  %22936 = vmatprep.mubr.msk.f32.mxu1 %vm653_vm1, %v509_v11  ;;  %v10348_v13 = vld [vmem:[%s27361_s29 + $0xfa] sm:$0xff] }
 0x63f   : > { %24058 = vmatprep.mubr.msk.f32.mxu0 %vm653_vm1, %v9174_v15  ;;  %v10349_v15 = vld [vmem:[%s27361_s29 + $0x102] sm:$0xff] }
 0x641   : > { %22937 = vmatmul.mubr.msk.f32.gmra.mrb[98].mxu1 %vm653_vm1, %v510_v27  ;;  %v10355_v27 = vld [vmem:[%s27361_s29 + $0x132] sm:$0xff] }
 0x642   : > { %24059 = vmatmul.mubr.msk.f32.gmra.mrb[118].mxu0 %vm653_vm1, %v9175_v17  ;;  %22939 = vmatprep.mubr.msk.f32.mxu1 %vm653_vm1, %v511_v30  ;;  %v530_v17 = vld [vmem:[%s27361_s29 + $0x3b8] sm:$0xff] }
 0x643   : > { %24063 = vmatprep.mubr.msk.f32.mxu0 %vm653_vm1, %v10325_v19  ;;  %v10350_v19 = vld [vmem:[%s27361_s29 + $0x10a] sm:$0xff] }
 0x645   : > { %22940 = vmatmul.mubr.msk.f32.gmra.mrb[100].mxu1 %vm653_vm1, %v512_v32  ;;  %v10357_v32 = vld [vmem:[%s27361_s29 + $0x142] sm:$0xff] }
 0x646   : > { %24064 = vmatmul.mubr.msk.f32.vlgmr.msra.gmra.mrb[0].mxu0 %vm653_vm1, %v10326_v21  ;;  %22942 = vmatprep.mubr.msk.f32.mxu1 %vm653_vm1, %v513_v34  ;;  %v29950_v21 = vpop.f32.mrb[14].mxu1 }
 0x647   : > { %24066 = vmatprep.mubr.msk.f32.mxu0 %vm653_vm1, %v10327_v23  ;;  %v29952_v22 = vpop.f32.mrb[15].mxu1  ;;  %v10352_v23 = vld [vmem:[%s27361_s29 + $0x11a] sm:$0xff] }
 0x649   : > { %22943 = vmatmul.mubr.msk.f32.gmra.mrb[102].mxu1 %vm653_vm1, %v514_v36  ;;  %v10359_v36 = vld [vmem:[%s27361_s29 + $0x152] sm:$0xff] }
 0x64a   : > { %24067 = vmatmul.mubr.msk.f32.gmra.mrb[2].mxu0 %vm653_vm1, %v10328_v25  ;;  %22945 = vmatprep.mubr.msk.f32.mxu1 %vm653_vm1, %v515_v38  ;;  %v29958_v25 = vpop.f32.mrb[16].mxu1 }
 0x64b   : > { %24069 = vmatprep.mubr.msk.f32.mxu0 %vm653_vm1, %v10329_v26  ;;  %v29960_v11 = vpop.f32.mrb[17].mxu1  ;;  %v10354_v26 = vld [vmem:[%s27361_s29 + $0x12a] sm:$0xff] }
 0x64d   : > { %22946 = vmatmul.mubr.msk.f32.gmra.mrb[104].mxu1 %vm653_vm1, %v516_v40  ;;  %v10361_v40 = vld [vmem:[%s27361_s29 + $0x162] sm:$0xff] }
 0x64e   : > { %24070 = vmatmul.mubr.msk.f32.gmra.mrb[4].mxu0 %vm653_vm1, %v10330_v28  ;;  %22948 = vmatprep.mubr.msk.f32.mxu1 %vm653_vm1, %v517_v42  ;;  %v29966_v28 = vpop.f32.mrb[18].mxu1 }
 0x64f   : > { %24072 = vmatprep.mubr.msk.f32.mxu0 %vm653_vm1, %v10331_v31  ;;  %v29968_v30 = vpop.f32.mrb[19].mxu1  ;;  %v10356_v31 = vld [vmem:[%s27361_s29 + $0x13a] sm:$0xff] }
 0x651   : > { %22949 = vmatmul.mubr.msk.f32.gmra.mrb[106].mxu1 %vm653_vm1, %v518_v45  ;;  %v10363_v45 = vld [vmem:[%s27361_s29 + $0x172] sm:$0xff] }
 0x652   : > { %24073 = vmatmul.mubr.msk.f32.gmra.mrb[6].mxu0 %vm653_vm1, %v10332_v33  ;;  %22951 = vmatprep.mubr.msk.f32.mxu1 %vm653_vm1, %v519_v48  ;;  %v29974_v33 = vpop.f32.mrb[20].mxu1 }
 0x653   : > { %24075 = vmatprep.mubr.msk.f32.mxu0 %vm653_vm1, %v10333_v35  ;;  %v29976_v34 = vpop.f32.mrb[21].mxu1  ;;  %v10358_v35 = vld [vmem:[%s27361_s29 + $0x14a] sm:$0xff] }
 0x655   : > { %22952 = vmatmul.mubr.msk.f32.gmra.mrb[108].mxu1 %vm653_vm1, %v520_v51  ;;  %v10365_v51 = vld [vmem:[%s27361_s29 + $0x182] sm:$0xff] }
 0x656   : > { %24076 = vmatmul.mubr.msk.f32.gmra.mrb[8].mxu0 %vm653_vm1, %v10334_v37  ;;  %22954 = vmatprep.mubr.msk.f32.mxu1 %vm653_vm1, %v521_v54  ;;  %v29982_v37 = vpop.f32.mrb[22].mxu1 }
 0x657   : > { %24078 = vmatprep.mubr.msk.f32.mxu0 %vm653_vm1, %v10335_v39  ;;  %v29984_v38 = vpop.f32.mrb[23].mxu1  ;;  %v10360_v39 = vld [vmem:[%s27361_s29 + $0x15a] sm:$0xff] }
 0x659   : > { %22955 = vmatmul.mubr.msk.f32.gmra.mrb[110].mxu1 %vm653_vm1, %v522_v57  ;;  %v10367_v57 = vld [vmem:[%s27361_s29 + $0x192] sm:$0xff] }
 0x65a   : > { %24079 = vmatmul.mubr.msk.f32.gmra.mrb[10].mxu0 %vm653_vm1, %v10336_v41  ;;  %22957 = vmatprep.mubr.msk.f32.mxu1 %vm653_vm1, %v523_v60  ;;  %v29990_v41 = vpop.f32.mrb[24].mxu1 }
 0x65b   : > { %24081 = vmatprep.mubr.msk.f32.mxu0 %vm653_vm1, %v10337_v43  ;;  %v29992_v42 = vpop.f32.mrb[25].mxu1  ;;  %v10362_v43 = vld [vmem:[%s27361_s29 + $0x16a] sm:$0xff] }
 0x65d   : > { %22958 = vmatmul.mubr.msk.f32.gmra.mrb[112].mxu1 %vm653_vm1, %v524_v3  ;;  %v10369_v3 = vld [vmem:[%s27361_s29 + $0x1a2] sm:$0xff] }
 0x65e   : > { %24082 = vmatmul.mubr.msk.f32.gmra.mrb[12].mxu0 %vm653_vm1, %v10338_v47  ;;  %22960 = vmatprep.mubr.msk.f32.mxu1 %vm653_vm1, %v525_v2  ;;  %v29998_v47 = vpop.f32.mrb[26].mxu1 }
 0x65f   : > { %24084 = vmatprep.mubr.msk.f32.mxu0 %vm653_vm1, %v10339_v49  ;;  %v30000_v48 = vpop.f32.mrb[27].mxu1  ;;  %v10364_v49 = vld [vmem:[%s27361_s29 + $0x17a] sm:$0xff] }
 0x661   : > { %22961 = vmatmul.mubr.msk.f32.gmra.mrb[114].mxu1 %vm653_vm1, %v526_v4  ;;  %v10371_v4 = vld [vmem:[%s27361_s29 + $0x1b2] sm:$0xff] }
 0x662   : > { %24085 = vmatmul.mubr.msk.f32.gmra.mrb[14].mxu0 %vm653_vm1, %v10340_v53  ;;  %22963 = vmatprep.mubr.msk.f32.mxu1 %vm653_vm1, %v527_v7  ;;  %v30006_v53 = vpop.f32.mrb[28].mxu1 }
 0x663   : > { %24087 = vmatprep.mubr.msk.f32.mxu0 %vm653_vm1, %v10341_v55  ;;  %v30008_v54 = vpop.f32.mrb[29].mxu1  ;;  %v10366_v55 = vld [vmem:[%s27361_s29 + $0x18a] sm:$0xff] }
 0x665   : > { %22964 = vmatmul.mubr.msk.f32.gmra.mrb[116].mxu1 %vm653_vm1, %v528_v10  ;;  %v10373_v10 = vld [vmem:[%s27361_s29 + $0x1c2] sm:$0xff] }
 0x666   : > { %24088 = vmatmul.mubr.msk.f32.gmra.mrb[16].mxu0 %vm653_vm1, %v10342_v59  ;;  %22966 = vmatprep.mubr.msk.f32.mxu1 %vm653_vm1, %v529_v14  ;;  %v30014_v59 = vpop.f32.mrb[30].mxu1 }
 0x667   : > { %24090 = vmatprep.mubr.msk.f32.mxu0 %vm653_vm1, %v10343_v61  ;;  %v30016_v60 = vpop.f32.mrb[31].mxu1  ;;  %v10368_v61 = vld [vmem:[%s27361_s29 + $0x19a] sm:$0xff] }
 0x669   : > { %22967 = vmatmul.mubr.msk.f32.gmra.mrb[118].mxu1 %vm653_vm1, %v530_v17  ;;  %v10374_v17 = vld [vmem:[%s27361_s29 + $0x1ca] sm:$0xff] }
 0x66a   : > { %24091 = vmatmul.mubr.msk.f32.gmra.mrb[18].mxu0 %vm653_vm1, %v10344_v29  ;;  %v30022_v29 = vpop.f32.mrb[32].mxu1 }
 0x66b   : > { %24093 = vmatprep.mubr.msk.f32.mxu0 %vm653_vm1, %v10345_v63  ;;  %v30024_v2 = vpop.f32.mrb[33].mxu1  ;;  %v10370_v63 = vld [vmem:[%s27361_s29 + $0x1aa] sm:$0xff] }
 0x66e   : > { %24094 = vmatmul.mubr.msk.f32.gmra.mrb[20].mxu0 %vm653_vm1, %v10346_v6  ;;  %v30030_v6 = vpop.f32.mrb[34].mxu1 }
 0x66f   : > { %24096 = vmatprep.mubr.msk.f32.mxu0 %vm653_vm1, %v10347_v8  ;;  %v30032_v7 = vpop.f32.mrb[35].mxu1  ;;  %v10372_v8 = vld [vmem:[%s27361_s29 + $0x1ba] sm:$0xff] }
 0x672   : > { %24097 = vmatmul.mubr.msk.f32.gmra.mrb[22].mxu0 %vm653_vm1, %v10348_v13  ;;  %v30038_v13 = vpop.f32.mrb[36].mxu1 }
 0x673   : > { %24099 = vmatprep.mubr.msk.f32.mxu0 %vm653_vm1, %v10349_v15  ;;  %v30040_v14 = vpop.f32.mrb[37].mxu1  ;;  %v33264_v15 = vmov 0.0|0.0  }
 0x674   : > { %25127 = vmatprep.subr.bf16.mxu1 %v33264_v15  ;;  %v10395_v15 = vld [vmem:[%s27361_s29 + $0x272] sm:$0xff] }
 0x676   : > { %24100 = vmatmul.mubr.msk.f32.gmra.mrb[24].mxu0 %vm653_vm1, %v10350_v19  ;;  %v10375_v19 = vld [vmem:[%s27361_s29 + $0x1d2] sm:$0xff] }
 0x677   : > { %24102 = vmatprep.mubr.msk.f32.mxu0 %vm653_vm1, %v10351_v20  ;;  %v30047_v20 = vpop.f32.mrb[38].mxu1 }
 0x67a   : > { %24103 = vmatmul.mubr.msk.f32.gmra.mrb[26].mxu0 %vm653_vm1, %v10352_v23  ;;  %v30049_v23 = vpop.f32.mrb[39].mxu1 }
 0x67b   : > { %24105 = vmatprep.mubr.msk.f32.mxu0 %vm653_vm1, %v10353_v24  ;;  %v10376_v24 = vld [vmem:[%s27361_s29 + $0x1da] sm:$0xff] }
 0x67e   : > { %24106 = vmatmul.mubr.msk.f32.gmra.mrb[28].mxu0 %vm653_vm1, %v10354_v26  ;;  %v10377_v26 = vld [vmem:[%s27361_s29 + $0x1e2] sm:$0xff] }
 0x67f   : > { %24108 = vmatprep.mubr.msk.f32.mxu0 %vm653_vm1, %v10355_v27  ;;  %v30055_v27 = vpop.f32.mrb[40].mxu1 }
 0x682   : > { %24109 = vmatmul.mubr.msk.f32.gmra.mrb[30].mxu0 %vm653_vm1, %v10356_v31  ;;  %v30057_v31 = vpop.f32.mrb[41].mxu1 }
 0x683   : > { %24111 = vmatprep.mubr.msk.f32.mxu0 %vm653_vm1, %v10357_v32  ;;  %v10378_v32 = vld [vmem:[%s27361_s29 + $0x1ea] sm:$0xff] }
 0x686   : > { %24112 = vmatmul.mubr.msk.f32.gmra.mrb[32].mxu0 %vm653_vm1, %v10358_v35  ;;  %v10379_v35 = vld [vmem:[%s27361_s29 + $0x1f2] sm:$0xff] }
 0x687   : > { %24114 = vmatprep.mubr.msk.f32.mxu0 %vm653_vm1, %v10359_v36  ;;  %v30063_v36 = vpop.f32.mrb[42].mxu1 }
 0x68a   : > { %24115 = vmatmul.mubr.msk.f32.gmra.mrb[34].mxu0 %vm653_vm1, %v10360_v39  ;;  %v30065_v39 = vpop.f32.mrb[43].mxu1 }
 0x68b   : > { %24117 = vmatprep.mubr.msk.f32.mxu0 %vm653_vm1, %v10361_v40  ;;  %v10380_v40 = vld [vmem:[%s27361_s29 + $0x1fa] sm:$0xff] }
 0x68e   : > { %24118 = vmatmul.mubr.msk.f32.gmra.mrb[36].mxu0 %vm653_vm1, %v10362_v43  ;;  %v10381_v43 = vld [vmem:[%s27361_s29 + $0x202] sm:$0xff] }
 0x68f   : > { %24120 = vmatprep.mubr.msk.f32.mxu0 %vm653_vm1, %v10363_v45  ;;  %v30071_v45 = vpop.f32.mrb[44].mxu1 }
 0x692   : > { %24121 = vmatmul.mubr.msk.f32.gmra.mrb[38].mxu0 %vm653_vm1, %v10364_v49  ;;  %v30073_v49 = vpop.f32.mrb[45].mxu1 }
 0x693   : > { %24123 = vmatprep.mubr.msk.f32.mxu0 %vm653_vm1, %v10365_v51  ;;  %v10382_v51 = vld [vmem:[%s27361_s29 + $0x20a] sm:$0xff] }
 0x696   : > { %24124 = vmatmul.mubr.msk.f32.gmra.mrb[40].mxu0 %vm653_vm1, %v10366_v55  ;;  %v10383_v55 = vld [vmem:[%s27361_s29 + $0x212] sm:$0xff] }
 0x697   : > { %24126 = vmatprep.mubr.msk.f32.mxu0 %vm653_vm1, %v10367_v57  ;;  %v30079_v57 = vpop.f32.mrb[46].mxu1 }
 0x69a   : > { %24127 = vmatmul.mubr.msk.f32.gmra.mrb[42].mxu0 %vm653_vm1, %v10368_v61  ;;  %v30081_v61 = vpop.f32.mrb[47].mxu1 }
 0x69b   : > { %24129 = vmatprep.mubr.msk.f32.mxu0 %vm653_vm1, %v10369_v3  ;;  %v10384_v3 = vld [vmem:[%s27361_s29 + $0x21a] sm:$0xff] }
 0x69e   : > { %24130 = vmatmul.mubr.msk.f32.gmra.mrb[44].mxu0 %vm653_vm1, %v10370_v63  ;;  %v10385_v63 = vld [vmem:[%s27361_s29 + $0x222] sm:$0xff] }
 0x69f   : > { %24132 = vmatprep.mubr.msk.f32.mxu0 %vm653_vm1, %v10371_v4  ;;  %v30087_v4 = vpop.f32.mrb[48].mxu1 }
 0x6a2   : > { %24133 = vmatmul.mubr.msk.f32.gmra.mrb[46].mxu0 %vm653_vm1, %v10372_v8  ;;  %v30089_v8 = vpop.f32.mrb[49].mxu1 }
 0x6a3   : > { %24135 = vmatprep.mubr.msk.f32.mxu0 %vm653_vm1, %v10373_v10  ;;  %v10386_v10 = vld [vmem:[%s27361_s29 + $0x22a] sm:$0xff] }
 0x6a6   : > { %24136 = vmatmul.mubr.msk.f32.gmra.mrb[48].mxu0 %vm653_vm1, %v10374_v17  ;;  %v10387_v17 = vld [vmem:[%s27361_s29 + $0x232] sm:$0xff] }
 0x6a7   : > { %24138 = vmatprep.mubr.msk.f32.mxu0 %vm653_vm1, %v10375_v19  ;;  %v30095_v19 = vpop.f32.mrb[50].mxu1 }
 0x6a8   : > { %33351 = vst [vmem:[#allocation7_spill] sm:$0xff] %v30095_v19 }
 0x6aa   : > { %24139 = vmatmul.mubr.msk.f32.gmra.mrb[50].mxu0 %vm653_vm1, %v10376_v24  ;;  %v30097_v24 = vpop.f32.mrb[51].mxu1 }
 0x6ab   : > { %24141 = vmatprep.mubr.msk.f32.mxu0 %vm653_vm1, %v10377_v26  ;;  %33352 = vst [vmem:[#allocation8_spill] sm:$0xff] %v30097_v24  ;;  %v10388_v26 = vld [vmem:[%s27361_s29 + $0x23a] sm:$0xff] }
 0x6ae   : > { %24142 = vmatmul.mubr.msk.f32.gmra.mrb[52].mxu0 %vm653_vm1, %v10378_v32  ;;  %v10389_v32 = vld [vmem:[%s27361_s29 + $0x242] sm:$0xff] }
 0x6af   : > { %24144 = vmatprep.mubr.msk.f32.mxu0 %vm653_vm1, %v10379_v35  ;;  %v30103_v35 = vpop.f32.mrb[52].mxu1 }
 0x6b0   : > { %33353 = vst [vmem:[#allocation9_spill] sm:$0xff] %v30103_v35 }
 0x6b2   : > { %24145 = vmatmul.mubr.msk.f32.gmra.mrb[54].mxu0 %vm653_vm1, %v10380_v40  ;;  %v30105_v40 = vpop.f32.mrb[53].mxu1 }
 0x6b3   : > { %24147 = vmatprep.mubr.msk.f32.mxu0 %vm653_vm1, %v10381_v43  ;;  %33354 = vst [vmem:[#allocation10_spill] sm:$0xff] %v30105_v40  ;;  %v10390_v43 = vld [vmem:[%s27361_s29 + $0x24a] sm:$0xff]  ;;  %v10435_v40 = vld [vmem:[%s27361_s29 + $0x3b2] sm:$0xff] }
 0x6b6   : > { %24148 = vmatmul.mubr.msk.f32.gmra.mrb[56].mxu0 %vm653_vm1, %v10382_v51  ;;  %v10391_v51 = vld [vmem:[%s27361_s29 + $0x252] sm:$0xff] }
 0x6b7   : > { %24150 = vmatprep.mubr.msk.f32.mxu0 %vm653_vm1, %v10383_v55  ;;  %v30111_v55 = vpop.f32.mrb[54].mxu1 }
 0x6b8   : > { %33355 = vst [vmem:[#allocation11_spill] sm:$0xff] %v30111_v55 }
 0x6ba   : > { %24151 = vmatmul.mubr.msk.f32.gmra.mrb[58].mxu0 %vm653_vm1, %v10384_v3  ;;  %v30113_v3 = vpop.f32.mrb[55].mxu1 }
 0x6bb   : > { %24153 = vmatprep.mubr.msk.f32.mxu0 %vm653_vm1, %v10385_v63  ;;  %33356 = vst [vmem:[#allocation12_spill] sm:$0xff] %v30113_v3  ;;  %v10392_v63 = vld [vmem:[%s27361_s29 + $0x25a] sm:$0xff] }
 0x6be   : > { %24154 = vmatmul.mubr.msk.f32.gmra.mrb[60].mxu0 %vm653_vm1, %v10386_v10  ;;  %v10393_v10 = vld [vmem:[%s27361_s29 + $0x262] sm:$0xff] }
 0x6bf   : > { %24156 = vmatprep.mubr.msk.f32.mxu0 %vm653_vm1, %v10387_v17  ;;  %v30119_v17 = vpop.f32.mrb[56].mxu1 }
 0x6c0   : > { %33357 = vst [vmem:[#allocation13_spill] sm:$0xff] %v30119_v17  ;;  %v10397_v17 = vld [vmem:[%s27361_s29 + $0x282] sm:$0xff] }
 0x6c2   : > { %24157 = vmatmul.mubr.msk.f32.gmra.mrb[62].mxu0 %vm653_vm1, %v10388_v26  ;;  %v30121_v26 = vpop.f32.mrb[57].mxu1 }
 0x6c3   : > { %24159 = vmatprep.mubr.msk.f32.mxu0 %vm653_vm1, %v10389_v32  ;;  %33358 = vst [vmem:[#allocation14_spill] sm:$0xff] %v30121_v26  ;;  %v10394_v32 = vld [vmem:[%s27361_s29 + $0x26a] sm:$0xff]  ;;  %v30127_v3 = vpop.f32.mrb[58].mxu1 }
 0x6c4   : > { %33359 = vst [vmem:[#allocation15_spill] sm:$0xff] %v30127_v3  ;;  %v10399_v3 = vld [vmem:[%s27361_s29 + $0x292] sm:$0xff] }
 0x6c6   : > { %24160 = vmatmul.mubr.msk.f32.gmra.mrb[64].mxu0 %vm653_vm1, %v10390_v43  ;;  %v30129_v43 = vpop.f32.mrb[59].mxu1 }
 0x6c7   : > { %24162 = vmatprep.mubr.msk.f32.mxu0 %vm653_vm1, %v10391_v51  ;;  %33360 = vst [vmem:[#allocation16_spill] sm:$0xff] %v30129_v43  ;;  %v10396_v51 = vld [vmem:[%s27361_s29 + $0x27a] sm:$0xff]  ;;  %v30135_v26 = vpop.f32.mrb[60].mxu1 }
 0x6c8   : > { %33361 = vst [vmem:[#allocation17_spill] sm:$0xff] %v30135_v26  ;;  %v10401_v26 = vld [vmem:[%s27361_s29 + $0x2a2] sm:$0xff] }
 0x6ca   : > { %24163 = vmatmul.mubr.msk.f32.gmra.mrb[66].mxu0 %vm653_vm1, %v10392_v63  ;;  %v30137_v63 = vpop.f32.mrb[61].mxu1 }
 0x6cb   : > { %24165 = vmatprep.mubr.msk.f32.mxu0 %vm653_vm1, %v10393_v10  ;;  %33362 = vst [vmem:[#allocation18_spill] sm:$0xff] %v30137_v63  ;;  %v10398_v10 = vld [vmem:[%s27361_s29 + $0x28a] sm:$0xff]  ;;  %v30143_v43 = vpop.f32.mrb[62].mxu1 }
 0x6cc   : > { %33363 = vst [vmem:[#allocation19_spill] sm:$0xff] %v30143_v43 }
 0x6ce   : > { %24166 = vmatmul.mubr.msk.f32.gmra.mrb[68].mxu0 %vm653_vm1, %v10394_v32  ;;  %v30145_v32 = vpop.f32.mrb[63].mxu1 }
 0x6cf   : > { %24168 = vmatprep.mubr.msk.f32.mxu0 %vm653_vm1, %v10395_v15  ;;  %33364 = vst [vmem:[#allocation20_spill] sm:$0xff] %v30145_v32  ;;  %v10400_v15 = vld [vmem:[%s27361_s29 + $0x29a] sm:$0xff]  ;;  %v30151_v63 = vpop.f32.mrb[64].mxu1 }
 0x6d0   : > { %33365 = vst [vmem:[#allocation21_spill] sm:$0xff] %v30151_v63  ;;  %v30153_v55 = vpop.f32.mrb[65].mxu1 }
 0x6d1   : > { %33366 = vst [vmem:[#allocation22_spill] sm:$0xff] %v30153_v55 }
 0x6d2   : > { %24169 = vmatmul.mubr.msk.f32.gmra.mrb[70].mxu0 %vm653_vm1, %v10396_v51  ;;  %v10403_v51 = vld [vmem:[%s27361_s29 + $0x2b2] sm:$0xff] }
 0x6d3   : > { %24171 = vmatprep.mubr.msk.f32.mxu0 %vm653_vm1, %v10397_v17  ;;  %v10402_v17 = vld [vmem:[%s27361_s29 + $0x2aa] sm:$0xff] }
 0x6d4   : > { %v30159_v32 = vpop.f32.mrb[66].mxu1 }
 0x6d5   : > { %33367 = vst [vmem:[#allocation23_spill] sm:$0xff] %v30159_v32  ;;  %v30161_v43 = vpop.f32.mrb[67].mxu1 }
 0x6d6   : > { %24172 = vmatmul.mubr.msk.f32.gmra.mrb[72].mxu0 %vm653_vm1, %v10398_v10  ;;  %33368 = vst [vmem:[#allocation24_spill] sm:$0xff] %v30161_v43  ;;  %v10405_v10 = vld [vmem:[%s27361_s29 + $0x2c2] sm:$0xff] }
 0x6d7   : > { %24174 = vmatprep.mubr.msk.f32.mxu0 %vm653_vm1, %v10399_v3  ;;  %v10404_v3 = vld [vmem:[%s27361_s29 + $0x2ba] sm:$0xff] }
 0x6da   : > { %24175 = vmatmul.mubr.msk.f32.gmra.mrb[74].mxu0 %vm653_vm1, %v10400_v15  ;;  %v11842_v15 = vld [vmem:[%s33247_s3 + $0x8] sm:$0xff] }
 0x6db   : > { %24177 = vmatprep.mubr.msk.f32.mxu0 %vm653_vm1, %v10401_v26  ;;  %v30170_v26 = vpop.f32.mrb[68].mxu1  ;;  %12247 = vmatprep.mubr.f32.mxu1 %v11842_v15  ;;  %v10408_v15 = vld [vmem:[%s27361_s29 + $0x2da] sm:$0xff] }
 0x6dc   : > { %33369 = vst [vmem:[#allocation25_spill] sm:$0xff] %v30170_v26  ;;  %v30172_v55 = vpop.f32.mrb[69].mxu1  ;;  %v10409_v26 = vld [vmem:[%s27361_s29 + $0x2e2] sm:$0xff] }
 0x6dd   : > { %33370 = vst [vmem:[#allocation26_spill] sm:$0xff] %v30172_v55  ;;  %v30178_v43 = vpop.f32.mrb[70].mxu1 }
 0x6de   : > { %24178 = vmatmul.mubr.msk.f32.gmra.mrb[76].mxu0 %vm653_vm1, %v10402_v17  ;;  %v10406_v17 = vld [vmem:[%s27361_s29 + $0x2ca] sm:$0xff]  ;;  %33371 = vst [vmem:[#allocation27_spill] sm:$0xff] %v30178_v43  ;;  %v30180_v32 = vpop.f32.mrb[71].mxu1  ;;  %v10411_v43 = vld [vmem:[%s27361_s29 + $0x2f2] sm:$0xff] }
 0x6df   : > { %24180 = vmatprep.mubr.msk.f32.mxu0 %vm653_vm1, %v10403_v51  ;;  %v10407_v51 = vld [vmem:[%s27361_s29 + $0x2d2] sm:$0xff]  ;;  %33372 = vst [vmem:[#allocation28_spill] sm:$0xff] %v30180_v32 }
 0x6e0   : > { %v30186_v55 = vpop.f32.mrb[72].mxu1 }
 0x6e1   : > { %33373 = vst [vmem:[#allocation29_spill] sm:$0xff] %v30186_v55  ;;  %v10413_v55 = vld [vmem:[%s27361_s29 + $0x302] sm:$0xff] }
 0x6e2   : > { %24181 = vmatmul.mubr.msk.f32.gmra.mrb[78].mxu0 %vm653_vm1, %v10404_v3  ;;  %v30188_v3 = vpop.f32.mrb[73].mxu1 }
 0x6e3   : > { %24183 = vmatprep.mubr.msk.f32.mxu0 %vm653_vm1, %v10405_v10  ;;  %33374 = vst [vmem:[#allocation30_spill] sm:$0xff] %v30188_v3  ;;  %v10410_v10 = vld [vmem:[%s27361_s29 + $0x2ea] sm:$0xff] }
 0x6e4   : > { %v30194_v32 = vpop.f32.mrb[74].mxu1 }
 0x6e5   : > { %33375 = vst [vmem:[#allocation31_spill] sm:$0xff] %v30194_v32  ;;  %v10415_v32 = vld [vmem:[%s27361_s29 + $0x312] sm:$0xff] }
 0x6e6   : > { %24184 = vmatmul.mubr.msk.f32.gmra.mrb[80].mxu0 %vm653_vm1, %v10406_v17  ;;  %v30196_v17 = vpop.f32.mrb[75].mxu1 }
 0x6e7   : > { %24186 = vmatprep.mubr.msk.f32.mxu0 %vm653_vm1, %v10407_v51  ;;  %33376 = vst [vmem:[#allocation32_spill] sm:$0xff] %v30196_v17  ;;  %v10412_v51 = vld [vmem:[%s27361_s29 + $0x2fa] sm:$0xff] }
 0x6e8   : > { %v30202_v3 = vpop.f32.mrb[76].mxu1 }
 0x6e9   : > { %33377 = vst [vmem:[#allocation33_spill] sm:$0xff] %v30202_v3  ;;  %v10417_v3 = vld [vmem:[%s27361_s29 + $0x322] sm:$0xff] }
 0x6ea   : > { %24187 = vmatmul.mubr.msk.f32.gmra.mrb[82].mxu0 %vm653_vm1, %v10408_v15  ;;  %v30204_v15 = vpop.f32.mrb[77].mxu1 }
 0x6eb   : > { %24189 = vmatprep.mubr.msk.f32.mxu0 %vm653_vm1, %v10409_v26  ;;  %33378 = vst [vmem:[#allocation34_spill] sm:$0xff] %v30204_v15  ;;  %v10414_v26 = vld [vmem:[%s27361_s29 + $0x30a] sm:$0xff] }
 0x6ec   : > { %v30210_v17 = vpop.f32.mrb[78].mxu1 }
 0x6ed   : > { %33379 = vst [vmem:[#allocation35_spill] sm:$0xff] %v30210_v17  ;;  %v10419_v17 = vld [vmem:[%s27361_s29 + $0x332] sm:$0xff] }
 0x6ee   : > { %24190 = vmatmul.mubr.msk.f32.gmra.mrb[84].mxu0 %vm653_vm1, %v10410_v10  ;;  %v30212_v10 = vpop.f32.mrb[79].mxu1 }
 0x6ef   : > { %24192 = vmatprep.mubr.msk.f32.mxu0 %vm653_vm1, %v10411_v43  ;;  %33380 = vst [vmem:[#allocation36_spill] sm:$0xff] %v30212_v10  ;;  %v10416_v43 = vld [vmem:[%s27361_s29 + $0x31a] sm:$0xff] }
 0x6f0   : > { %v30218_v15 = vpop.f32.mrb[80].mxu1 }
 0x6f1   : > { %33381 = vst [vmem:[#allocation37_spill] sm:$0xff] %v30218_v15  ;;  %v10421_v15 = vld [vmem:[%s27361_s29 + $0x342] sm:$0xff] }
 0x6f2   : > { %24193 = vmatmul.mubr.msk.f32.gmra.mrb[86].mxu0 %vm653_vm1, %v10412_v51  ;;  %v30220_v51 = vpop.f32.mrb[81].mxu1 }
 0x6f3   : > { %24195 = vmatprep.mubr.msk.f32.mxu0 %vm653_vm1, %v10413_v55  ;;  %33382 = vst [vmem:[#allocation38_spill] sm:$0xff] %v30220_v51  ;;  %v10418_v55 = vld [vmem:[%s27361_s29 + $0x32a] sm:$0xff] }
 0x6f4   : > { %v30226_v10 = vpop.f32.mrb[82].mxu1 }
 0x6f5   : > { %33383 = vst [vmem:[#allocation39_spill] sm:$0xff] %v30226_v10  ;;  %v10423_v10 = vld [vmem:[%s27361_s29 + $0x352] sm:$0xff] }
 0x6f6   : > { %24196 = vmatmul.mubr.msk.f32.gmra.mrb[88].mxu0 %vm653_vm1, %v10414_v26  ;;  %v30228_v26 = vpop.f32.mrb[83].mxu1 }
 0x6f7   : > { %24198 = vmatprep.mubr.msk.f32.mxu0 %vm653_vm1, %v10415_v32  ;;  %33384 = vst [vmem:[#allocation40_spill] sm:$0xff] %v30228_v26  ;;  %v10420_v32 = vld [vmem:[%s27361_s29 + $0x33a] sm:$0xff] }
 0x6f8   : > { %v30234_v51 = vpop.f32.mrb[84].mxu1 }
 0x6f9   : > { %33385 = vst [vmem:[#allocation41_spill] sm:$0xff] %v30234_v51  ;;  %v10425_v51 = vld [vmem:[%s27361_s29 + $0x362] sm:$0xff] }
 0x6fa   : > { %24199 = vmatmul.mubr.msk.f32.gmra.mrb[90].mxu0 %vm653_vm1, %v10416_v43  ;;  %v30236_v43 = vpop.f32.mrb[85].mxu1 }
 0x6fb   : > { %24201 = vmatprep.mubr.msk.f32.mxu0 %vm653_vm1, %v10417_v3  ;;  %33386 = vst [vmem:[#allocation42_spill] sm:$0xff] %v30236_v43  ;;  %v10422_v3 = vld [vmem:[%s27361_s29 + $0x34a] sm:$0xff] }
 0x6fc   : > { %v30242_v26 = vpop.f32.mrb[86].mxu1 }
 0x6fd   : > { %33387 = vst [vmem:[#allocation43_spill] sm:$0xff] %v30242_v26  ;;  %v10427_v26 = vld [vmem:[%s27361_s29 + $0x372] sm:$0xff] }
 0x6fe   : > { %24202 = vmatmul.mubr.msk.f32.gmra.mrb[92].mxu0 %vm653_vm1, %v10418_v55  ;;  %v30244_v55 = vpop.f32.mrb[87].mxu1 }
 0x6ff   : > { %24204 = vmatprep.mubr.msk.f32.mxu0 %vm653_vm1, %v10419_v17  ;;  %33388 = vst [vmem:[#allocation44_spill] sm:$0xff] %v30244_v55  ;;  %v10424_v17 = vld [vmem:[%s27361_s29 + $0x35a] sm:$0xff] }
 0x700   : > { %v30250_v43 = vpop.f32.mrb[88].mxu1 }
 0x701   : > { %33389 = vst [vmem:[#allocation45_spill] sm:$0xff] %v30250_v43  ;;  %v10429_v43 = vld [vmem:[%s27361_s29 + $0x382] sm:$0xff] }
 0x702   : > { %24205 = vmatmul.mubr.msk.f32.gmra.mrb[94].mxu0 %vm653_vm1, %v10420_v32  ;;  %v30252_v32 = vpop.f32.mrb[89].mxu1 }
 0x703   : > { %24207 = vmatprep.mubr.msk.f32.mxu0 %vm653_vm1, %v10421_v15  ;;  %33390 = vst [vmem:[#allocation46_spill] sm:$0xff] %v30252_v32  ;;  %v10426_v15 = vld [vmem:[%s27361_s29 + $0x36a] sm:$0xff] }
 0x704   : > { %v30258_v55 = vpop.f32.mrb[90].mxu1 }
 0x705   : > { %33391 = vst [vmem:[#allocation47_spill] sm:$0xff] %v30258_v55 }
 0x706   : > { %24208 = vmatmul.mubr.msk.f32.gmra.mrb[96].mxu0 %vm653_vm1, %v10422_v3  ;;  %v30260_v3 = vpop.f32.mrb[91].mxu1 }
 0x707   : > { %24210 = vmatprep.mubr.msk.f32.mxu0 %vm653_vm1, %v10423_v10  ;;  %33392 = vst [vmem:[#allocation48_spill] sm:$0xff] %v30260_v3  ;;  %v10428_v10 = vld [vmem:[%s27361_s29 + $0x37a] sm:$0xff] }
 0x708   : > { %v30266_v32 = vpop.f32.mrb[92].mxu1 }
 0x709   : > { %33393 = vst [vmem:[#allocation49_spill] sm:$0xff] %v30266_v32  ;;  %v30268_v63 = vpop.f32.mrb[93].mxu1 }
 0x70a   : > { %24211 = vmatmul.mubr.msk.f32.gmra.mrb[98].mxu0 %vm653_vm1, %v10424_v17  ;;  %33394 = vst [vmem:[#allocation50_spill] sm:$0xff] %v30268_v63  ;;  %v10431_v17 = vld [vmem:[%s27361_s29 + $0x392] sm:$0xff] }
 0x70b   : > { %24213 = vmatprep.mubr.msk.f32.mxu0 %vm653_vm1, %v10425_v51  ;;  %v10430_v51 = vld [vmem:[%s27361_s29 + $0x38a] sm:$0xff] }
 0x70c   : > { %v30274_v55 = vpop.f32.mrb[94].mxu1 }
 0x70d   : > { %33395 = vst [vmem:[#allocation51_spill] sm:$0xff] %v30274_v55  ;;  %v30276_v3 = vpop.f32.mrb[95].mxu1 }
 0x70e   : > { %24214 = vmatmul.mubr.msk.f32.gmra.mrb[100].mxu0 %vm653_vm1, %v10426_v15  ;;  %33396 = vst [vmem:[#allocation52_spill] sm:$0xff] %v30276_v3  ;;  %v10433_v15 = vld [vmem:[%s27361_s29 + $0x3a2] sm:$0xff] }
 0x70f   : > { %24216 = vmatprep.mubr.msk.f32.mxu0 %vm653_vm1, %v10427_v26  ;;  %v10432_v26 = vld [vmem:[%s27361_s29 + $0x39a] sm:$0xff] }
 0x710   : > { %v30282_v32 = vpop.f32.mrb[96].mxu1 }
 0x711   : > { %33397 = vst [vmem:[#allocation53_spill] sm:$0xff] %v30282_v32 }
 0x712   : > { %24217 = vmatmul.mubr.msk.f32.gmra.mrb[102].mxu0 %vm653_vm1, %v10428_v10  ;;  %v30289_v10 = vpop.f32.mrb[97].mxu1 }
 0x713   : > { %24219 = vmatprep.mubr.msk.f32.mxu0 %vm653_vm1, %v10429_v43  ;;  %v30287_v43 = vld [vmem:[%s33246_s2] ss:$0 sm:$0xff]  ;;  %33398 = vst [vmem:[#allocation54_spill] sm:$0xff] %v30289_v10 }
 0x714   : > { %v30298_v35 = vpop.f32.mrb[98].mxu1 }
 0x715   : > { %33399 = vst [vmem:[#allocation55_spill] sm:$0xff] %v30298_v35  ;;  %v30301_v19 = vpop.f32.mrb[99].mxu1  ;;  %v10437_v35 = vld [vmem:[%s27361_s29 + $0x3c2] sm:$0xff] }
 0x716   : > { %24220 = vmatmul.mubr.msk.f32.gmra.mrb[104].mxu0 %vm653_vm1, %v10430_v51  ;;  %33400 = vst [vmem:[#allocation56_spill] sm:$0xff] %v30301_v19 }
 0x717   : > { %24222 = vmatprep.mubr.msk.f32.mxu0 %vm653_vm1, %v10431_v17  ;;  %v10434_v17 = vld [vmem:[%s27361_s29 + $0x3aa] sm:$0xff] }
 0x719   : > { %v24065_v63 = vpop.f32.mrb[0].mxu0 }
 0x71a   : > { %v25583_v55 = vadd.f32 %v24065_v63, %v29867_v44  ;;  %v10875_v3 = vpop.f32.mrb[1].mxu0  ;;  %24223 = vmatmul.mubr.msk.f32.gmra.mrb[106].mxu0 %vm653_vm1, %v10432_v26 }
 0x71b   : > { %v25584_v51 = vadd.f32 %v10875_v3, %v29871_v46  ;;  %24225 = vmatprep.mubr.msk.f32.mxu0 %vm653_vm1, %v10433_v15 }
 0x71c   : > { %v11602_v32 = vadd.f32 %v25583_v55, %v30287_v43  ;;  %v10436_v55 = vld [vmem:[%s27361_s29 + $0x3ba] sm:$0xff] }
 0x71d   : > { %v11601_v24 = vadd.f32 %v25584_v51, %v30287_v43  ;;  %v24068_v10 = vpop.f32.mrb[2].mxu0  ;;  %v30310_v51 = vpop.f32.mrb[100].mxu1 }
 0x71e   : > { %v11722_v44 = vmul.f32 %v11602_v32, %v11602_v32  ;;  %v25585_v63 = vadd.f32 %v24068_v10, %v29879_v50  ;;  %v10885_v26 = vpop.f32.mrb[3].mxu0  ;;  %24226 = vmatmul.mubr.msk.f32.gmra.mrb[108].mxu0 %vm653_vm1, %v10434_v17  ;;  %v30313_v10 = vpop.f32.mrb[101].mxu1 }
 0x71f   : > { %v11721_v46 = vmul.f32 %v11601_v24, %v11601_v24  ;;  %v25586_v3 = vadd.f32 %v10885_v26, %v29883_v52  ;;  %24228 = vmatprep.mubr.msk.f32.mxu0 %vm653_vm1, %v10435_v40  ;;  %33401 = vst [vmem:[#allocation57_spill] sm:$0xff] %v30313_v10  ;;  %v30323_v10 = vpop.f32.mrb[102].mxu1 }
 0x720   : > { %v11604_v15 = vadd.f32 %v25585_v63, %v30287_v43  ;;  %v10438_v63 = vld [vmem:[%s27361_s29 + $0x3ca] sm:$0xff] }
 0x721   : > { %v25128_v19 = vpack.c.bf16 %v11722_v44, %v11721_v46  ;;  %v11603_v32 = vadd.f32 %v25586_v3, %v30287_v43  ;;  %v24071_v50 = vpop.f32.mrb[4].mxu0  ;;  %v33402_v46 = vmov 0.0|0.0   ;;  %v10439_v3 = vld [vmem:[%s27361_s29 + $0x3d2] sm:$0xff] }
 0x722   : > { %v11724_v17 = vmul.f32 %v11604_v15, %v11604_v15  ;;  %v25587_v24 = vadd.f32 %v24071_v50, %v29891_v56  ;;  %v10895_v52 = vpop.f32.mrb[5].mxu0  ;;  %24229 = vmatmul.mubr.msk.f32.gmra.mrb[110].mxu0 %vm653_vm1, %v10436_v55 }
 0x723   : > { %v11723_v40 = vmul.f32 %v11603_v32, %v11603_v32  ;;  %v25588_v26 = vadd.f32 %v10895_v52, %v29895_v58  ;;  %25129 = vmatpush1.bf16.msra.mxu1 %v25128_v19  ;;  %24231 = vmatprep.mubr.msk.f32.mxu0 %vm653_vm1, %v10437_v35  ;;  %v30326_v32 = vpop.f32.mrb[103].mxu1  ;;  %v10440_v52 = vld [vmem:[%s27361_s29 + $0x3da] sm:$0xff] }
 0x724   : > { %v11606_v44 = vadd.f32 %v25587_v24, %v30287_v43  ;;  %25130 = vmatprep.subr.bf16.mxu1 %v33402_v46 }
 0x725   : > { %v25131_v56 = vpack.c.bf16 %v11724_v17, %v11723_v40  ;;  %v11605_v15 = vadd.f32 %v25588_v26, %v30287_v43  ;;  %v24074_v55 = vpop.f32.mrb[6].mxu0  ;;  %v10441_v40 = vld [vmem:[%s27361_s29 + $0x3e2] sm:$0xff]  ;;  %v30336_v26 = vpop.f32.mrb[104].mxu1 }
 0x726   : > { %v11726_v58 = vmul.f32 %v11606_v44, %v11606_v44  ;;  %v25589_v19 = vadd.f32 %v24074_v55, %v29903_v62  ;;  %v10905_v35 = vpop.f32.mrb[7].mxu0  ;;  %24232 = vmatmul.mubr.msk.f32.gmra.mrb[112].mxu0 %vm653_vm1, %v10438_v63 }
 0x727   : > { %v11725_v50 = vmul.f32 %v11605_v15, %v11605_v15  ;;  %v25590_v24 = vadd.f32 %v10905_v35, %v29907_v1  ;;  %25132 = vmatpush1.bf16.msra.mxu1 %v25131_v56  ;;  %24234 = vmatprep.mubr.msk.f32.mxu0 %vm653_vm1, %v10439_v3  ;;  %v30339_v15 = vpop.f32.mrb[105].mxu1  ;;  %v10442_v35 = vld [vmem:[%s27361_s29 + $0x3ea] sm:$0xff] }
 0x728   : > { %v11608_v17 = vadd.f32 %v25589_v19, %v30287_v43  ;;  %25133 = vmatprep.subr.bf16.mxu1 %v33402_v46 }
 0x729   : > { %v25134_v62 = vpack.c.bf16 %v11726_v58, %v11725_v50  ;;  %v11607_v44 = vadd.f32 %v25590_v24, %v30287_v43  ;;  %v24077_v63 = vpop.f32.mrb[8].mxu0  ;;  %v10443_v50 = vld [vmem:[%s27361_s29 + $0x3f2] sm:$0xff]  ;;  %v30349_v24 = vpop.f32.mrb[106].mxu1 }
 0x72a   : > { %v11728_v1 = vmul.f32 %v11608_v17, %v11608_v17  ;;  %v25591_v56 = vadd.f32 %v24077_v63, %v29915_v5  ;;  %v10915_v3 = vpop.f32.mrb[9].mxu0  ;;  %24235 = vmatmul.mubr.msk.f32.gmra.mrb[114].mxu0 %vm653_vm1, %v10440_v52  ;;  %v30352_v52 = vpop.f32.mrb[107].mxu1 }
 0x72b   : > { %v11727_v55 = vmul.f32 %v11607_v44, %v11607_v44  ;;  %v25592_v19 = vadd.f32 %v10915_v3, %v29919_v0  ;;  %25135 = vmatpush1.bf16.msra.mxu1 %v25134_v62  ;;  %24237 = vmatprep.mubr.msk.f32.mxu0 %vm653_vm1, %v10441_v40  ;;  %v10444_v3 = vld [vmem:[%s27361_s29 + $0x3fa] sm:$0xff]  ;;  %s33202_s29 = scalar_lea.hbm %s33256_s12, %s20967_s28 }
 0x72c   : > { %v11610_v58 = vadd.f32 %v25591_v56, %v30287_v43  ;;  %25136 = vmatprep.subr.bf16.mxu1 %v33402_v46 }
 0x72d   : > { %v25137_v17 = vpack.c.bf16 %v11728_v1, %v11727_v55  ;;  %v11609_v5 = vadd.f32 %v25592_v19, %v30287_v43  ;;  %v24080_v63 = vpop.f32.mrb[10].mxu0  ;;  %v30361_v55 = vpop.f32.mrb[108].mxu1 }
 0x72e   : > { %v11730_v44 = vmul.f32 %v11610_v58, %v11610_v58  ;;  %v25593_v0 = vadd.f32 %v24080_v63, %v29927_v9  ;;  %v10925_v62 = vpop.f32.mrb[11].mxu0  ;;  %24238 = vmatmul.mubr.msk.f32.gmra.mrb[116].mxu0 %vm653_vm1, %v10442_v35  ;;  %v30364_v63 = vpop.f32.mrb[109].mxu1 }
 0x72f   : > { %v11729_v40 = vmul.f32 %v11609_v5, %v11609_v5  ;;  %v25594_v56 = vadd.f32 %v10925_v62, %v29931_v12  ;;  %25138 = vmatpush1.bf16.msra.mxu1 %v25137_v17  ;;  %24240 = vmatprep.mubr.msk.f32.mxu0 %vm653_vm1, %v10443_v50  ;;  %33403 = vst [vmem:[#allocation58_spill] sm:$0xff] %v30364_v63 }
 0x730   : > { %v11612_v1 = vadd.f32 %v25593_v0, %v30287_v43  ;;  %25139 = vmatprep.subr.bf16.mxu1 %v33402_v46 }
 0x731   : > { %v25140_v19 = vpack.c.bf16 %v11730_v44, %v11729_v40  ;;  %v11611_v58 = vadd.f32 %v25594_v56, %v30287_v43  ;;  %v24083_v9 = vpop.f32.mrb[12].mxu0  ;;  %v30372_v56 = vpop.f32.mrb[110].mxu1 }
 0x732   : > { %v11732_v35 = vmul.f32 %v11612_v1, %v11612_v1  ;;  %v25595_v5 = vadd.f32 %v24083_v9, %v29939_v16  ;;  %v10935_v12 = vpop.f32.mrb[13].mxu0  ;;  %24241 = vmatmul.mubr.msk.f32.gmra.mrb[118].mxu0 %vm653_vm1, %v10444_v3  ;;  %v30375_v63 = vpop.f32.mrb[111].mxu1 }
 0x733   : > { %v11731_v50 = vmul.f32 %v11611_v58, %v11611_v58  ;;  %v25596_v17 = vadd.f32 %v10935_v12, %v29943_v18  ;;  %25141 = vmatpush1.bf16.msra.mxu1 %v25140_v19  ;;  %v30381_v12 = vpop.f32.mrb[112].mxu1 }
 0x734   : > { %v11614_v0 = vadd.f32 %v25595_v5, %v30287_v43  ;;  %25142 = vmatprep.subr.bf16.mxu1 %v33402_v46 }
 0x735   : > { %v25143_v44 = vpack.c.bf16 %v11732_v35, %v11731_v50  ;;  %v11613_v62 = vadd.f32 %v25596_v17, %v30287_v43  ;;  %v24086_v40 = vpop.f32.mrb[14].mxu0 }
 0x736   : > { %v11734_v1 = vmul.f32 %v11614_v0, %v11614_v0  ;;  %v25597_v16 = vadd.f32 %v24086_v40, %v29950_v21  ;;  %v10945_v9 = vpop.f32.mrb[15].mxu0  ;;  %v30384_v0 = vpop.f32.mrb[113].mxu1 }
 0x737   : > { %v11733_v3 = vmul.f32 %v11613_v62, %v11613_v62  ;;  %v25598_v18 = vadd.f32 %v10945_v9, %v29952_v22  ;;  %25144 = vmatpush1.bf16.msra.mxu1 %v25143_v44  ;;  %v30390_v9 = vpop.f32.mrb[114].mxu1 }
 0x738   : > { %v11616_v19 = vadd.f32 %v25597_v16, %v30287_v43  ;;  %25145 = vmatprep.subr.bf16.mxu1 %v33402_v46 }
 0x739   : > { %v25146_v58 = vpack.c.bf16 %v11734_v1, %v11733_v3  ;;  %v11615_v35 = vadd.f32 %v25598_v18, %v30287_v43  ;;  %v24089_v5 = vpop.f32.mrb[16].mxu0 }
 0x73a   : > { %v11736_v50 = vmul.f32 %v11616_v19, %v11616_v19  ;;  %v25599_v21 = vadd.f32 %v24089_v5, %v29958_v25  ;;  %v10955_v17 = vpop.f32.mrb[17].mxu0  ;;  %v30393_v19 = vpop.f32.mrb[115].mxu1 }
 0x73b   : > { %v11735_v62 = vmul.f32 %v11615_v35, %v11615_v35  ;;  %v25600_v22 = vadd.f32 %v10955_v17, %v29960_v11  ;;  %25147 = vmatpush1.bf16.msra.mxu1 %v25146_v58  ;;  %v30399_v17 = vpop.f32.mrb[116].mxu1 }
 0x73c   : > { %v11618_v44 = vadd.f32 %v25599_v21, %v30287_v43  ;;  %25148 = vmatprep.subr.bf16.mxu1 %v33402_v46 }
 0x73d   : > { %v25149_v40 = vpack.c.bf16 %v11736_v50, %v11735_v62  ;;  %v11617_v1 = vadd.f32 %v25600_v22, %v30287_v43  ;;  %v24092_v16 = vpop.f32.mrb[18].mxu0 }
 0x73e   : > { %v11738_v3 = vmul.f32 %v11618_v44, %v11618_v44  ;;  %v25601_v25 = vadd.f32 %v24092_v16, %v29966_v28  ;;  %v10965_v18 = vpop.f32.mrb[19].mxu0  ;;  %v30402_v44 = vpop.f32.mrb[117].mxu1 }
 0x73f   : > { %v11737_v35 = vmul.f32 %v11617_v1, %v11617_v1  ;;  %v25602_v11 = vadd.f32 %v10965_v18, %v29968_v30  ;;  %25150 = vmatpush1.bf16.msra.mxu1 %v25149_v40  ;;  %v30408_v18 = vpop.f32.mrb[118].mxu1 }
 0x740   : > { %v11620_v58 = vadd.f32 %v25601_v25, %v30287_v43  ;;  %25151 = vmatprep.subr.bf16.mxu1 %v33402_v46 }
 0x741   : > { %v25152_v5 = vpack.c.bf16 %v11738_v3, %v11737_v35  ;;  %v11619_v50 = vadd.f32 %v25602_v11, %v30287_v43  ;;  %v24095_v21 = vpop.f32.mrb[20].mxu0 }
 0x742   : > { %v11740_v62 = vmul.f32 %v11620_v58, %v11620_v58  ;;  %v25603_v28 = vadd.f32 %v24095_v21, %v29974_v33  ;;  %v10975_v22 = vpop.f32.mrb[21].mxu0  ;;  %v30411_v58 = vpop.f32.mrb[119].mxu1 }
 0x743   : > { %v11739_v1 = vmul.f32 %v11619_v50, %v11619_v50  ;;  %v25604_v30 = vadd.f32 %v10975_v22, %v29976_v34  ;;  %25153 = vmatpush1.bf16.msra.mxu1 %v25152_v5 }
 0x744   : > { %v11622_v40 = vadd.f32 %v25603_v28, %v30287_v43  ;;  %25154 = vmatprep.subr.bf16.mxu1 %v33402_v46 }
 0x745   : > { %v25155_v16 = vpack.c.bf16 %v11740_v62, %v11739_v1  ;;  %v11621_v3 = vadd.f32 %v25604_v30, %v30287_v43  ;;  %v24098_v25 = vpop.f32.mrb[22].mxu0 }
 0x746   : > { %v11742_v35 = vmul.f32 %v11622_v40, %v11622_v40  ;;  %v25605_v33 = vadd.f32 %v24098_v25, %v29982_v37  ;;  %v10985_v11 = vpop.f32.mrb[23].mxu0 }
 0x747   : > { %v11741_v50 = vmul.f32 %v11621_v3, %v11621_v3  ;;  %v25606_v34 = vadd.f32 %v10985_v11, %v29984_v38  ;;  %25156 = vmatpush1.bf16.msra.mxu1 %v25155_v16 }
 0x748   : > { %v11624_v5 = vadd.f32 %v25605_v33, %v30287_v43  ;;  %25157 = vmatprep.subr.bf16.mxu1 %v33402_v46 }
 0x749   : > { %v25158_v21 = vpack.c.bf16 %v11742_v35, %v11741_v50  ;;  %v11623_v62 = vadd.f32 %v25606_v34, %v30287_v43  ;;  %v24101_v28 = vpop.f32.mrb[24].mxu0 }
 0x74a   : > { %v11744_v22 = vmul.f32 %v11624_v5, %v11624_v5  ;;  %v25607_v1 = vadd.f32 %v24101_v28, %v29990_v41  ;;  %v10995_v30 = vpop.f32.mrb[25].mxu0 }
 0x74b   : > { %v11743_v37 = vmul.f32 %v11623_v62, %v11623_v62  ;;  %v25608_v40 = vadd.f32 %v10995_v30, %v29992_v42  ;;  %25159 = vmatpush1.bf16.msra.mxu1 %v25158_v21 }
 0x74c   : > { %v11626_v3 = vadd.f32 %v25607_v1, %v30287_v43  ;;  %25160 = vmatprep.subr.bf16.mxu1 %v33402_v46 }
 0x74d   : > { %v25161_v38 = vpack.c.bf16 %v11744_v22, %v11743_v37  ;;  %v11625_v16 = vadd.f32 %v25608_v40, %v30287_v43  ;;  %v24104_v25 = vpop.f32.mrb[26].mxu0 }
 0x74e   : > { %v11746_v35 = vmul.f32 %v11626_v3, %v11626_v3  ;;  %v25609_v33 = vadd.f32 %v24104_v25, %v29998_v47  ;;  %v11005_v11 = vpop.f32.mrb[27].mxu0 }
 0x74f   : > { %v11745_v50 = vmul.f32 %v11625_v16, %v11625_v16  ;;  %v25610_v41 = vadd.f32 %v11005_v11, %v30000_v48  ;;  %25162 = vmatpush1.bf16.msra.mxu1 %v25161_v38 }
 0x750   : > { %v11628_v34 = vadd.f32 %v25609_v33, %v30287_v43  ;;  %25163 = vmatprep.subr.bf16.mxu1 %v33402_v46 }
 0x751   : > { %v25164_v42 = vpack.c.bf16 %v11746_v35, %v11745_v50  ;;  %v11627_v5 = vadd.f32 %v25610_v41, %v30287_v43  ;;  %v24107_v21 = vpop.f32.mrb[28].mxu0 }
 0x752   : > { %v11748_v62 = vmul.f32 %v11628_v34, %v11628_v34  ;;  %v25611_v28 = vadd.f32 %v24107_v21, %v30006_v53  ;;  %v11015_v22 = vpop.f32.mrb[29].mxu0 }
 0x753   : > { %v11747_v1 = vmul.f32 %v11627_v5, %v11627_v5  ;;  %v25612_v47 = vadd.f32 %v11015_v22, %v30008_v54  ;;  %25165 = vmatpush1.bf16.msra.mxu1 %v25164_v42 }
 0x754   : > { %v11630_v30 = vadd.f32 %v25611_v28, %v30287_v43  ;;  %25166 = vmatprep.subr.bf16.mxu1 %v33402_v46 }
 0x755   : > { %v25167_v48 = vpack.c.bf16 %v11748_v62, %v11747_v1  ;;  %v11629_v37 = vadd.f32 %v25612_v47, %v30287_v43  ;;  %v24110_v40 = vpop.f32.mrb[30].mxu0 }
 0x756   : > { %v11750_v3 = vmul.f32 %v11630_v30, %v11630_v30  ;;  %v25613_v38 = vadd.f32 %v24110_v40, %v30014_v59  ;;  %v11025_v16 = vpop.f32.mrb[31].mxu0 }
 0x757   : > { %v11749_v25 = vmul.f32 %v11629_v37, %v11629_v37  ;;  %v25614_v53 = vadd.f32 %v11025_v16, %v30016_v60  ;;  %25168 = vmatpush1.bf16.msra.mxu1 %v25167_v48  ;;  %v11850_v48 = vld [vmem:[%s33247_s3 + $0x48] sm:$0xff] }
 0x758   : > { %v11632_v35 = vadd.f32 %v25613_v38, %v30287_v43  ;;  %25169 = vmatprep.subr.bf16.mxu1 %v33402_v46 }
 0x759   : > { %v25170_v54 = vpack.c.bf16 %v11750_v3, %v11749_v25  ;;  %v11631_v33 = vadd.f32 %v25614_v53, %v30287_v43  ;;  %v24113_v11 = vpop.f32.mrb[32].mxu0  ;;  %v11849_v53 = vld [vmem:[%s33247_s3 + $0x40] sm:$0xff] }
 0x75a   : > { %v11752_v50 = vmul.f32 %v11632_v35, %v11632_v35  ;;  %v25615_v41 = vadd.f32 %v24113_v11, %v30022_v29  ;;  %v11035_v34 = vpop.f32.mrb[33].mxu0 }
 0x75b   : > { %v11751_v42 = vmul.f32 %v11631_v33, %v11631_v33  ;;  %v25616_v59 = vadd.f32 %v11035_v34, %v30024_v2  ;;  %25171 = vmatpush1.bf16.msra.mxu1 %v25170_v54  ;;  %v11841_v2 = vld [vmem:[%s33247_s3] sm:$0xff]  ;;  %v11858_v54 = vld [vmem:[%s33247_s3 + $0x88] sm:$0xff] }
 0x75c   : > { %v11634_v5 = vadd.f32 %v25615_v41, %v30287_v43  ;;  %25172 = vmatprep.subr.bf16.mxu1 %v33402_v46 }
 0x75d   : > { %v25173_v60 = vpack.c.bf16 %v11752_v50, %v11751_v42  ;;  %v11633_v21 = vadd.f32 %v25616_v59, %v30287_v43  ;;  %v24116_v62 = vpop.f32.mrb[34].mxu0  ;;  %v11857_v59 = vld [vmem:[%s33247_s3 + $0x80] sm:$0xff] }
 0x75e   : > { %v11754_v28 = vmul.f32 %v11634_v5, %v11634_v5  ;;  %v25617_v22 = vadd.f32 %v24116_v62, %v30030_v6  ;;  %v11045_v1 = vpop.f32.mrb[35].mxu0 }
 0x75f   : > { %v11753_v47 = vmul.f32 %v11633_v21, %v11633_v21  ;;  %v25618_v29 = vadd.f32 %v11045_v1, %v30032_v7  ;;  %25174 = vmatpush1.bf16.msra.mxu1 %v25173_v60  ;;  %v11866_v60 = vld [vmem:[%s33247_s3 + $0xc8] sm:$0xff] }
 0x760   : > { %v11636_v30 = vadd.f32 %v25617_v22, %v30287_v43  ;;  %25175 = vmatprep.subr.bf16.mxu1 %v33402_v46 }
 0x761   : > { %v25176_v37 = vpack.c.bf16 %v11754_v28, %v11753_v47  ;;  %v11635_v6 = vadd.f32 %v25618_v29, %v30287_v43  ;;  %v24119_v40 = vpop.f32.mrb[36].mxu0  ;;  %v11865_v29 = vld [vmem:[%s33247_s3 + $0xc0] sm:$0xff] }
 0x762   : > { %v11756_v3 = vmul.f32 %v11636_v30, %v11636_v30  ;;  %v25619_v7 = vadd.f32 %v24119_v40, %v30038_v13  ;;  %v11055_v38 = vpop.f32.mrb[37].mxu0  ;;  %12248 = vmatmul.mubr.f32.vlgmr.msra.gmra.mrb[120].mxu1 %v11841_v2  ;;  %v11874_v30 = vld [vmem:[%s33247_s3 + $0x108] sm:$0xff] }
 0x763   : > { %v11755_v16 = vmul.f32 %v11635_v6, %v11635_v6  ;;  %v25620_v25 = vadd.f32 %v11055_v38, %v30040_v14  ;;  %25177 = vmatpush1.bf16.msra.mxu1 %v25176_v37  ;;  %12252 = vmatprep.mubr.f32.mxu1 %v11850_v48  ;;  %v11873_v38 = vld [vmem:[%s33247_s3 + $0x100] sm:$0xff] }
 0x764   : > { %v11638_v35 = vadd.f32 %v25619_v7, %v30287_v43  ;;  %25178 = vmatprep.subr.bf16.mxu1 %v33402_v46 }
 0x765   : > { %v25179_v13 = vpack.c.bf16 %v11756_v3, %v11755_v16  ;;  %v11637_v33 = vadd.f32 %v25620_v25, %v30287_v43  ;;  %v24122_v11 = vpop.f32.mrb[38].mxu0  ;;  %v11882_v25 = vld [vmem:[%s33247_s3 + $0x148] sm:$0xff] }
 0x766   : > { %v11758_v50 = vmul.f32 %v11638_v35, %v11638_v35  ;;  %v25621_v14 = vadd.f32 %v24122_v11, %v30047_v20  ;;  %v11065_v41 = vpop.f32.mrb[39].mxu0  ;;  %12253 = vmatmul.mubr.f32.gmra.mrb[122].mxu1 %v11849_v53 }
 0x767   : > { %v11757_v34 = vmul.f32 %v11637_v33, %v11637_v33  ;;  %v25622_v42 = vadd.f32 %v11065_v41, %v30049_v23  ;;  %25180 = vmatpush1.bf16.msra.mxu1 %v25179_v13  ;;  %12257 = vmatprep.mubr.f32.mxu1 %v11858_v54  ;;  %v11890_v41 = vld [vmem:[%s33247_s3 + $0x188] sm:$0xff] }
 0x768   : > { %v11640_v5 = vadd.f32 %v25621_v14, %v30287_v43  ;;  %25181 = vmatprep.subr.bf16.mxu1 %v33402_v46 }
 0x769   : > { %v25182_v20 = vpack.c.bf16 %v11758_v50, %v11757_v34  ;;  %v11639_v21 = vadd.f32 %v25622_v42, %v30287_v43  ;;  %v24125_v62 = vpop.f32.mrb[40].mxu0  ;;  %v11881_v50 = vld [vmem:[%s33247_s3 + $0x140] sm:$0xff] }
 0x76a   : > { %v11760_v28 = vmul.f32 %v11640_v5, %v11640_v5  ;;  %v25623_v23 = vadd.f32 %v24125_v62, %v30055_v27  ;;  %v11075_v22 = vpop.f32.mrb[41].mxu0  ;;  %12258 = vmatmul.mubr.f32.gmra.mrb[124].mxu1 %v11857_v59 }
 0x76b   : > { %v11759_v1 = vmul.f32 %v11639_v21, %v11639_v21  ;;  %v25624_v47 = vadd.f32 %v11075_v22, %v30057_v31  ;;  %25183 = vmatpush1.bf16.msra.mxu1 %v25182_v20  ;;  %12262 = vmatprep.mubr.f32.mxu1 %v11866_v60  ;;  %v11889_v21 = vld [vmem:[%s33247_s3 + $0x180] sm:$0xff] }
 0x76c   : > { %v11642_v2 = vadd.f32 %v25623_v23, %v30287_v43  ;;  %25184 = vmatprep.subr.bf16.mxu1 %v33402_v46 }
 0x76d   : > { %v25185_v27 = vpack.c.bf16 %v11760_v28, %v11759_v1  ;;  %v11641_v48 = vadd.f32 %v25624_v47, %v30287_v43  ;;  %v24128_v37 = vpop.f32.mrb[42].mxu0  ;;  %v11898_v28 = vld [vmem:[%s33247_s3 + $0x1c8] sm:$0xff] }
 0x76e   : > { %v11762_v6 = vmul.f32 %v11642_v2, %v11642_v2  ;;  %v25625_v31 = vadd.f32 %v24128_v37, %v30063_v36  ;;  %v11085_v40 = vpop.f32.mrb[43].mxu0  ;;  %12263 = vmatmul.mubr.f32.gmra.mrb[126].mxu1 %v11865_v29 }
 0x76f   : > { %v11761_v3 = vmul.f32 %v11641_v48, %v11641_v48  ;;  %v25626_v7 = vadd.f32 %v11085_v40, %v30065_v39  ;;  %25186 = vmatpush1.bf16.msra.mxu1 %v25185_v27  ;;  %12267 = vmatprep.mubr.f32.mxu1 %v11874_v30  ;;  %v11897_v30 = vld [vmem:[%s33247_s3 + $0x1c0] sm:$0xff]  ;;  %v11906_v48 = vld [vmem:[%s33247_s3 + $0x208] sm:$0xff] }
 0x770   : > { %v11644_v16 = vadd.f32 %v25625_v31, %v30287_v43  ;;  %25187 = vmatprep.subr.bf16.mxu1 %v33402_v46 }
 0x771   : > { %v25188_v36 = vpack.c.bf16 %v11762_v6, %v11761_v3  ;;  %v11643_v53 = vadd.f32 %v25626_v7, %v30287_v43  ;;  %v24131_v35 = vpop.f32.mrb[44].mxu0 }
 0x772   : > { %v11764_v54 = vmul.f32 %v11644_v16, %v11644_v16  ;;  %v25627_v39 = vadd.f32 %v24131_v35, %v30071_v45  ;;  %v11095_v13 = vpop.f32.mrb[45].mxu0  ;;  %12268 = vmatmul.mubr.f32.gmra.mrb[128].mxu1 %v11873_v38  ;;  %v33405_v38 = vld [vmem:[#allocation8_spill] sm:$0xff] }
 0x773   : > { %v11763_v33 = vmul.f32 %v11643_v53, %v11643_v53  ;;  %v25628_v11 = vadd.f32 %v11095_v13, %v30073_v49  ;;  %25189 = vmatpush1.bf16.msra.mxu1 %v25188_v36  ;;  %12272 = vmatprep.mubr.f32.mxu1 %v11882_v25  ;;  %v11905_v25 = vld [vmem:[%s33247_s3 + $0x200] sm:$0xff]  ;;  %v11914_v53 = vld [vmem:[%s33247_s3 + $0x248] sm:$0xff] }
 0x774   : > { %v11646_v14 = vadd.f32 %v25627_v39, %v30287_v43  ;;  %25190 = vmatprep.subr.bf16.mxu1 %v33402_v46 }
 0x775   : > { %v25191_v45 = vpack.c.bf16 %v11764_v54, %v11763_v33  ;;  %v11645_v34 = vadd.f32 %v25628_v11, %v30287_v43  ;;  %v24134_v42 = vpop.f32.mrb[46].mxu0  ;;  %v33406_v33 = vld [vmem:[#allocation9_spill] sm:$0xff] }
 0x776   : > { %v11766_v59 = vmul.f32 %v11646_v14, %v11646_v14  ;;  %v25629_v49 = vadd.f32 %v24134_v42, %v30079_v57  ;;  %v11105_v5 = vpop.f32.mrb[47].mxu0  ;;  %12273 = vmatmul.mubr.f32.gmra.mrb[130].mxu1 %v11881_v50 }
 0x777   : > { %v11765_v60 = vmul.f32 %v11645_v34, %v11645_v34  ;;  %v25630_v20 = vadd.f32 %v11105_v5, %v30081_v61  ;;  %25192 = vmatpush1.bf16.msra.mxu1 %v25191_v45  ;;  %12277 = vmatprep.mubr.f32.mxu1 %v11890_v41  ;;  %v33407_v41 = vld [vmem:[#allocation10_spill] sm:$0xff]  ;;  %v11913_v34 = vld [vmem:[%s33247_s3 + $0x240] sm:$0xff] }
 0x778   : > { %v11648_v62 = vadd.f32 %v25629_v49, %v30287_v43  ;;  %25193 = vmatprep.subr.bf16.mxu1 %v33402_v46 }
 0x779   : > { %v25194_v57 = vpack.c.bf16 %v11766_v59, %v11765_v60  ;;  %v11647_v23 = vadd.f32 %v25630_v20, %v30287_v43  ;;  %v24137_v22 = vpop.f32.mrb[48].mxu0  ;;  %v11922_v59 = vld [vmem:[%s33247_s3 + $0x288] sm:$0xff] }
 0x77a   : > { %v11768_v1 = vmul.f32 %v11648_v62, %v11648_v62  ;;  %v25631_v61 = vadd.f32 %v24137_v22, %v30087_v4  ;;  %v11115_v47 = vpop.f32.mrb[49].mxu0  ;;  %12278 = vmatmul.mubr.f32.gmra.mrb[132].mxu1 %v11889_v21  ;;  %v33408_v21 = vld [vmem:[#allocation11_spill] sm:$0xff] }
 0x77b   : > { %v11767_v29 = vmul.f32 %v11647_v23, %v11647_v23  ;;  %v25632_v2 = vadd.f32 %v11115_v47, %v30089_v8  ;;  %25195 = vmatpush1.bf16.msra.mxu1 %v25194_v57  ;;  %12282 = vmatprep.mubr.f32.mxu1 %v11898_v28  ;;  %v33404_v8 = vld [vmem:[#allocation7_spill] sm:$0xff]  ;;  %v33409_v23 = vld [vmem:[#allocation12_spill] sm:$0xff]  ;;  %v11930_v47 = vld [vmem:[%s33247_s3 + $0x2c8] sm:$0xff] }
 0x77c   : > { %v11650_v27 = vadd.f32 %v25631_v61, %v30287_v43  ;;  %25196 = vmatprep.subr.bf16.mxu1 %v33402_v46 }
 0x77d   : > { %v25197_v4 = vpack.c.bf16 %v11768_v1, %v11767_v29  ;;  %v11649_v37 = vadd.f32 %v25632_v2, %v30287_v43  ;;  %v24140_v6 = vpop.f32.mrb[50].mxu0  ;;  %v11921_v1 = vld [vmem:[%s33247_s3 + $0x280] sm:$0xff] }
 0x77e   : > { %v11770_v31 = vmul.f32 %v11650_v27, %v11650_v27  ;;  %v25633_v40 = vadd.f32 %v24140_v6, %v33404_v8  ;;  %v11125_v3 = vpop.f32.mrb[51].mxu0  ;;  %12283 = vmatmul.mubr.f32.gmra.mrb[134].mxu1 %v11897_v30 }
 0x77f   : > { %v11769_v7 = vmul.f32 %v11649_v37, %v11649_v37  ;;  %v25634_v16 = vadd.f32 %v11125_v3, %v33405_v38  ;;  %25198 = vmatpush1.bf16.msra.mxu1 %v25197_v4  ;;  %12287 = vmatprep.mubr.f32.mxu1 %v11906_v48  ;;  %v33410_v48 = vld [vmem:[#allocation13_spill] sm:$0xff] }
 0x780   : > { %v11652_v36 = vadd.f32 %v25633_v40, %v30287_v43  ;;  %25199 = vmatprep.subr.bf16.mxu1 %v33402_v46  ;;  %v11929_v40 = vld [vmem:[%s33247_s3 + $0x2c0] sm:$0xff] }
 0x781   : > { %v25200_v35 = vpack.c.bf16 %v11770_v31, %v11769_v7  ;;  %v11651_v54 = vadd.f32 %v25634_v16, %v30287_v43  ;;  %v24143_v39 = vpop.f32.mrb[52].mxu0  ;;  %v33411_v31 = vld [vmem:[#allocation14_spill] sm:$0xff] }
 0x782   : > { %v11772_v13 = vmul.f32 %v11652_v36, %v11652_v36  ;;  %v25635_v11 = vadd.f32 %v24143_v39, %v33406_v33  ;;  %v11135_v50 = vpop.f32.mrb[53].mxu0  ;;  %12288 = vmatmul.mubr.f32.gmra.mrb[136].mxu1 %v11905_v25  ;;  %v11938_v7 = vld [vmem:[%s33247_s3 + $0x308] sm:$0xff] }
 0x783   : > { %v11771_v14 = vmul.f32 %v11651_v54, %v11651_v54  ;;  %v25636_v45 = vadd.f32 %v11135_v50, %v33407_v41  ;;  %25201 = vmatpush1.bf16.msra.mxu1 %v25200_v35  ;;  %12292 = vmatprep.mubr.f32.mxu1 %v11914_v53  ;;  %v33412_v53 = vld [vmem:[#allocation15_spill] sm:$0xff] }
 0x784   : > { %v11654_v42 = vadd.f32 %v25635_v11, %v30287_v43  ;;  %25202 = vmatprep.subr.bf16.mxu1 %v33402_v46  ;;  %v11937_v11 = vld [vmem:[%s33247_s3 + $0x300] sm:$0xff] }
 0x785   : > { %v25203_v49 = vpack.c.bf16 %v11772_v13, %v11771_v14  ;;  %v11653_v5 = vadd.f32 %v25636_v45, %v30287_v43  ;;  %v24146_v60 = vpop.f32.mrb[54].mxu0  ;;  %v33413_v13 = vld [vmem:[#allocation16_spill] sm:$0xff]  ;;  %v11946_v14 = vld [vmem:[%s33247_s3 + $0x348] sm:$0xff] }
 0x786   : > { %v11774_v20 = vmul.f32 %v11654_v42, %v11654_v42  ;;  %v25637_v62 = vadd.f32 %v24146_v60, %v33408_v21  ;;  %v11145_v28 = vpop.f32.mrb[55].mxu0  ;;  %12293 = vmatmul.mubr.f32.gmra.mrb[138].mxu1 %v11913_v34 }
 0x787   : > { %v11773_v57 = vmul.f32 %v11653_v5, %v11653_v5  ;;  %v25638_v22 = vadd.f32 %v11145_v28, %v33409_v23  ;;  %25204 = vmatpush1.bf16.msra.mxu1 %v25203_v49  ;;  %12297 = vmatprep.mubr.f32.mxu1 %v11922_v59  ;;  %v33414_v59 = vld [vmem:[#allocation17_spill] sm:$0xff] }
 0x788   : > { %v11656_v61 = vadd.f32 %v25637_v62, %v30287_v43  ;;  %25205 = vmatprep.subr.bf16.mxu1 %v33402_v46  ;;  %v11945_v62 = vld [vmem:[%s33247_s3 + $0x340] sm:$0xff] }
 0x789   : > { %v25206_v29 = vpack.c.bf16 %v11774_v20, %v11773_v57  ;;  %v11655_v2 = vadd.f32 %v25638_v22, %v30287_v43  ;;  %v24149_v30 = vpop.f32.mrb[56].mxu0  ;;  %v33415_v20 = vld [vmem:[#allocation18_spill] sm:$0xff] }
 0x78a   : > { %v11776_v27 = vmul.f32 %v11656_v61, %v11656_v61  ;;  %v25639_v4 = vadd.f32 %v24149_v30, %v33410_v48  ;;  %v11155_v37 = vpop.f32.mrb[57].mxu0  ;;  %12298 = vmatmul.mubr.f32.gmra.mrb[140].mxu1 %v11921_v1  ;;  %v11954_v57 = vld [vmem:[%s33247_s3 + $0x388] sm:$0xff] }
 0x78b   : > { %v11775_v6 = vmul.f32 %v11655_v2, %v11655_v2  ;;  %v25640_v8 = vadd.f32 %v11155_v37, %v33411_v31  ;;  %25207 = vmatpush1.bf16.msra.mxu1 %v25206_v29  ;;  %12302 = vmatprep.mubr.f32.mxu1 %v11930_v47  ;;  %v33416_v47 = vld [vmem:[#allocation19_spill] sm:$0xff] }
 0x78c   : > { %v11658_v3 = vadd.f32 %v25639_v4, %v30287_v43  ;;  %25208 = vmatprep.subr.bf16.mxu1 %v33402_v46  ;;  %v11953_v4 = vld [vmem:[%s33247_s3 + $0x380] sm:$0xff] }
 0x78d   : > { %v25209_v38 = vpack.c.bf16 %v11776_v27, %v11775_v6  ;;  %v11657_v16 = vadd.f32 %v25640_v8, %v30287_v43  ;;  %v24152_v25 = vpop.f32.mrb[58].mxu0  ;;  %v33417_v27 = vld [vmem:[#allocation20_spill] sm:$0xff]  ;;  %v11962_v6 = vld [vmem:[%s33247_s3 + $0x3c8] sm:$0xff] }
 0x78e   : > { %v11778_v36 = vmul.f32 %v11658_v3, %v11658_v3  ;;  %v25641_v35 = vadd.f32 %v24152_v25, %v33412_v53  ;;  %v11165_v54 = vpop.f32.mrb[59].mxu0  ;;  %12303 = vmatmul.mubr.f32.gmra.mrb[142].mxu1 %v11929_v40 }
 0x78f   : > { %v11777_v39 = vmul.f32 %v11657_v16, %v11657_v16  ;;  %v25642_v33 = vadd.f32 %v11165_v54, %v33413_v13  ;;  %25210 = vmatpush1.bf16.msra.mxu1 %v25209_v38  ;;  %12307 = vmatprep.mubr.f32.mxu1 %v11938_v7  ;;  %v33418_v7 = vld [vmem:[#allocation21_spill] sm:$0xff] }
 0x790   : > { %v11660_v50 = vadd.f32 %v25641_v35, %v30287_v43  ;;  %25211 = vmatprep.subr.bf16.mxu1 %v33402_v46  ;;  %v11961_v35 = vld [vmem:[%s33247_s3 + $0x3c0] sm:$0xff] }
 0x791   : > { %v25212_v41 = vpack.c.bf16 %v11778_v36, %v11777_v39  ;;  %v11659_v45 = vadd.f32 %v25642_v33, %v30287_v43  ;;  %v24155_v34 = vpop.f32.mrb[60].mxu0  ;;  %v33419_v36 = vld [vmem:[#allocation22_spill] sm:$0xff] }
 0x792   : > { %v11780_v42 = vmul.f32 %v11660_v50, %v11660_v50  ;;  %v25643_v49 = vadd.f32 %v24155_v34, %v33414_v59  ;;  %v11175_v5 = vpop.f32.mrb[61].mxu0  ;;  %12308 = vmatmul.mubr.f32.gmra.mrb[144].mxu1 %v11937_v11  ;;  %v11970_v39 = vld [vmem:[%s33247_s3 + $0x408] sm:$0xff] }
 0x793   : > { %v11779_v60 = vmul.f32 %v11659_v45, %v11659_v45  ;;  %v25644_v21 = vadd.f32 %v11175_v5, %v33415_v20  ;;  %25213 = vmatpush1.bf16.msra.mxu1 %v25212_v41  ;;  %12312 = vmatprep.mubr.f32.mxu1 %v11946_v14  ;;  %v33420_v14 = vld [vmem:[#allocation23_spill] sm:$0xff]  ;;  %v33454_v20 = vld [vmem:[#allocation54_spill] sm:$0xff] }
 0x794   : > { %v11662_v28 = vadd.f32 %v25643_v49, %v30287_v43  ;;  %25214 = vmatprep.subr.bf16.mxu1 %v33402_v46  ;;  %v11969_v49 = vld [vmem:[%s33247_s3 + $0x400] sm:$0xff] }
 0x795   : > { %v25215_v23 = vpack.c.bf16 %v11780_v42, %v11779_v60  ;;  %v11661_v22 = vadd.f32 %v25644_v21, %v30287_v43  ;;  %v24158_v1 = vpop.f32.mrb[62].mxu0  ;;  %v33421_v42 = vld [vmem:[#allocation24_spill] sm:$0xff]  ;;  %v11978_v60 = vld [vmem:[%s33247_s3 + $0x448] sm:$0xff] }
 0x796   : > { %v11782_v61 = vmul.f32 %v11662_v28, %v11662_v28  ;;  %v25645_v29 = vadd.f32 %v24158_v1, %v33416_v47  ;;  %v11185_v2 = vpop.f32.mrb[63].mxu0  ;;  %12313 = vmatmul.mubr.f32.gmra.mrb[146].mxu1 %v11945_v62 }
 0x797   : > { %v11781_v30 = vmul.f32 %v11661_v22, %v11661_v22  ;;  %v25646_v48 = vadd.f32 %v11185_v2, %v33417_v27  ;;  %25216 = vmatpush1.bf16.msra.mxu1 %v25215_v23  ;;  %12317 = vmatprep.mubr.f32.mxu1 %v11954_v57  ;;  %v33422_v57 = vld [vmem:[#allocation25_spill] sm:$0xff] }
 0x798   : > { %v11664_v37 = vadd.f32 %v25645_v29, %v30287_v43  ;;  %25217 = vmatprep.subr.bf16.mxu1 %v33402_v46  ;;  %v11977_v29 = vld [vmem:[%s33247_s3 + $0x440] sm:$0xff] }
 0x799   : > { %v25218_v31 = vpack.c.bf16 %v11782_v61, %v11781_v30  ;;  %v11663_v8 = vadd.f32 %v25646_v48, %v30287_v43  ;;  %v24161_v40 = vpop.f32.mrb[64].mxu0  ;;  %v33423_v61 = vld [vmem:[#allocation26_spill] sm:$0xff]  ;;  %v12081_v27 = vld [vmem:[%s33247_s3 + $0x780] sm:$0xff] }
 0x79a   : > { %v11784_v3 = vmul.f32 %v11664_v37, %v11664_v37  ;;  %v25647_v38 = vadd.f32 %v24161_v40, %v33418_v7  ;;  %v11195_v16 = vpop.f32.mrb[65].mxu0  ;;  %12318 = vmatmul.mubr.f32.gmra.mrb[148].mxu1 %v11953_v4  ;;  %v11986_v30 = vld [vmem:[%s33247_s3 + $0x488] sm:$0xff] }
 0x79b   : > { %v11783_v25 = vmul.f32 %v11663_v8, %v11663_v8  ;;  %v25648_v53 = vadd.f32 %v11195_v16, %v33419_v36  ;;  %25219 = vmatpush1.bf16.msra.mxu1 %v25218_v31  ;;  %12322 = vmatprep.mubr.f32.mxu1 %v11962_v6  ;;  %v33424_v6 = vld [vmem:[#allocation27_spill] sm:$0xff]  ;;  %v33452_v36 = vld [vmem:[#allocation52_spill] sm:$0xff] }
 0x79c   : > { %v11666_v54 = vadd.f32 %v25647_v38, %v30287_v43  ;;  %25220 = vmatprep.subr.bf16.mxu1 %v33402_v46  ;;  %v11985_v38 = vld [vmem:[%s33247_s3 + $0x480] sm:$0xff] }
 0x79d   : > { %v25221_v13 = vpack.c.bf16 %v11784_v3, %v11783_v25  ;;  %v11665_v33 = vadd.f32 %v25648_v53, %v30287_v43  ;;  %v24164_v11 = vpop.f32.mrb[66].mxu0  ;;  %v33425_v3 = vld [vmem:[#allocation28_spill] sm:$0xff]  ;;  %v11994_v25 = vld [vmem:[%s33247_s3 + $0x4c8] sm:$0xff] }
 0x79e   : > { %v30618_v50 = vmul.f32 %v11666_v54, %v11666_v54  ;;  %v25649_v41 = vadd.f32 %v24164_v11, %v33420_v14  ;;  %v11205_v45 = vpop.f32.mrb[67].mxu0  ;;  %12323 = vmatmul.mubr.f32.gmra.mrb[150].mxu1 %v11961_v35  ;;  %v33427_v14 = vld [vmem:[#allocation30_spill] sm:$0xff] }
 0x79f   : > { %v30621_v34 = vmul.f32 %v11665_v33, %v11665_v33  ;;  %v25650_v59 = vadd.f32 %v11205_v45, %v33421_v42  ;;  %25222 = vmatpush1.bf16.msra.mxu1 %v25221_v13  ;;  %12327 = vmatprep.mubr.f32.mxu1 %v11970_v39  ;;  %v33426_v39 = vld [vmem:[#allocation29_spill] sm:$0xff] }
 0x7a0   : > { %v11668_v5 = vadd.f32 %v25649_v41, %v30287_v43  ;;  %25223 = vmatprep.subr.bf16.mxu1 %v33402_v46  ;;  %v11993_v45 = vld [vmem:[%s33247_s3 + $0x4c0] sm:$0xff] }
 0x7a1   : > { %v11667_v21 = vadd.f32 %v25650_v59, %v30287_v43  ;;  %v24167_v62 = vpop.f32.mrb[68].mxu0  ;;  %v12002_v59 = vld [vmem:[%s33247_s3 + $0x508] sm:$0xff] }
 0x7a2   : > { %v30635_v28 = vmul.f32 %v11668_v5, %v11668_v5  ;;  %v25651_v23 = vadd.f32 %v24167_v62, %v33422_v57  ;;  %v11215_v22 = vpop.f32.mrb[69].mxu0  ;;  %12328 = vmatmul.mubr.f32.gmra.mrb[152].mxu1 %v11969_v49  ;;  %v33428_v62 = vld [vmem:[#allocation31_spill] sm:$0xff]  ;;  %v12073_v49 = vld [vmem:[%s33247_s3 + $0x740] sm:$0xff] }
 0x7a3   : > { %v30638_v1 = vmul.f32 %v11667_v21, %v11667_v21  ;;  %v25652_v47 = vadd.f32 %v11215_v22, %v33423_v61  ;;  %12332 = vmatprep.mubr.f32.mxu1 %v11978_v60  ;;  %v33429_v61 = vld [vmem:[#allocation32_spill] sm:$0xff] }
 0x7a4   : > { %v11670_v2 = vadd.f32 %v25651_v23, %v30287_v43 }
 0x7a5   : > { %v11669_v48 = vadd.f32 %v25652_v47, %v30287_v43  ;;  %v24170_v4 = vpop.f32.mrb[70].mxu0 }
 0x7a6   : > { %v30651_v37 = vmul.f32 %v11670_v2, %v11670_v2  ;;  %v25653_v31 = vadd.f32 %v24170_v4, %v33424_v6  ;;  %v11225_v8 = vpop.f32.mrb[71].mxu0  ;;  %12333 = vmatmul.mubr.f32.gmra.mrb[154].mxu1 %v11977_v29  ;;  %v12001_v29 = vld [vmem:[%s33247_s3 + $0x500] sm:$0xff] }
 0x7a7   : > { %v30654_v40 = vmul.f32 %v11669_v48, %v11669_v48  ;;  %v25654_v7 = vadd.f32 %v11225_v8, %v33425_v3  ;;  %12337 = vmatprep.mubr.f32.mxu1 %v11986_v30  ;;  %v12010_v30 = vld [vmem:[%s33247_s3 + $0x548] sm:$0xff] }
 0x7a8   : > { %v11672_v16 = vadd.f32 %v25653_v31, %v30287_v43  ;;  %v33430_v8 = vld [vmem:[#allocation33_spill] sm:$0xff]  ;;  %v33448_v48 = vld [vmem:[#allocation50_spill] sm:$0xff] }
 0x7a9   : > { %v11671_v53 = vadd.f32 %v25654_v7, %v30287_v43  ;;  %v24173_v35 = vpop.f32.mrb[72].mxu0  ;;  %v30679_v43 = vld [vmem:[%s33246_s2] ss:$0 sm:$0xff] }
 0x7aa   : > { %v30667_v54 = vmul.f32 %v11672_v16, %v11672_v16  ;;  %v25655_v13 = vadd.f32 %v24173_v35, %v33426_v39  ;;  %v11235_v33 = vpop.f32.mrb[73].mxu0  ;;  %12338 = vmatmul.mubr.f32.gmra.mrb[156].mxu1 %v11985_v38  ;;  %v33431_v16 = vld [vmem:[#allocation34_spill] sm:$0xff] }
 0x7ab   : > { %v30670_v11 = vmul.f32 %v11671_v53, %v11671_v53  ;;  %v25656_v41 = vadd.f32 %v11235_v33, %v33427_v14  ;;  %12342 = vmatprep.mubr.f32.mxu1 %v11994_v25  ;;  %v12009_v53 = vld [vmem:[%s33247_s3 + $0x540] sm:$0xff]  ;;  %v12018_v39 = vld [vmem:[%s33247_s3 + $0x588] sm:$0xff] }
 0x7ac   : > { %v11674_v42 = vadd.f32 %v30679_v43, %v25655_v13  ;;  %v12065_v13 = vld [vmem:[%s33247_s3 + $0x700] sm:$0xff] }
 0x7ad   : > { %v11673_v5 = vadd.f32 %v30679_v43, %v25656_v41  ;;  %v24176_v60 = vpop.f32.mrb[74].mxu0 }
 0x7ae   : > { %v30688_v21 = vmul.f32 %v11674_v42, %v11674_v42  ;;  %v25657_v57 = vadd.f32 %v24176_v60, %v33428_v62  ;;  %v11245_v23 = vpop.f32.mrb[75].mxu0  ;;  %12343 = vmatmul.mubr.f32.gmra.mrb[158].mxu1 %v11993_v45  ;;  %v33432_v45 = vld [vmem:[#allocation35_spill] sm:$0xff]  ;;  %v33433_v60 = vld [vmem:[#allocation36_spill] sm:$0xff] }
 0x7af   : > { %v30691_v22 = vmul.f32 %v11673_v5, %v11673_v5  ;;  %v25658_v47 = vadd.f32 %v11245_v23, %v33429_v61  ;;  %12347 = vmatprep.mubr.f32.mxu1 %v12002_v59  ;;  %v12026_v61 = vld [vmem:[%s33247_s3 + $0x5c8] sm:$0xff] }
 0x7b0   : > { %v11676_v2 = vadd.f32 %v30679_v43, %v25657_v57  ;;  %v12017_v57 = vld [vmem:[%s33247_s3 + $0x580] sm:$0xff] }
 0x7b1   : > { %v11675_v4 = vadd.f32 %v30679_v43, %v25658_v47  ;;  %v24179_v6 = vpop.f32.mrb[76].mxu0  ;;  %v33445_v47 = vld [vmem:[#allocation48_spill] sm:$0xff] }
 0x7b2   : > { %v30704_v31 = vmul.f32 %v11676_v2, %v11676_v2  ;;  %v25659_v3 = vadd.f32 %v24179_v6, %v33430_v8  ;;  %v11255_v7 = vpop.f32.mrb[77].mxu0  ;;  %12348 = vmatmul.mubr.f32.gmra.mrb[160].mxu1 %v12001_v29 }
 0x7b3   : > { %v30707_v38 = vmul.f32 %v11675_v4, %v11675_v4  ;;  %v25660_v25 = vadd.f32 %v11255_v7, %v33431_v16  ;;  %12352 = vmatprep.mubr.f32.mxu1 %v12010_v30  ;;  %v33434_v4 = vld [vmem:[#allocation37_spill] sm:$0xff]  ;;  %v33435_v7 = vld [vmem:[#allocation38_spill] sm:$0xff] }
 0x7b4   : > { %v11678_v35 = vadd.f32 %v30679_v43, %v25659_v3 }
 0x7b5   : > { %v11677_v33 = vadd.f32 %v30679_v43, %v25660_v25  ;;  %v24182_v14 = vpop.f32.mrb[78].mxu0  ;;  %v12025_v25 = vld [vmem:[%s33247_s3 + $0x5c0] sm:$0xff] }
 0x7b6   : > { %v30720_v41 = vmul.f32 %v11678_v35, %v11678_v35  ;;  %v25661_v42 = vadd.f32 %v24182_v14, %v33432_v45  ;;  %v11265_v59 = vpop.f32.mrb[79].mxu0  ;;  %12353 = vmatmul.mubr.f32.gmra.mrb[162].mxu1 %v12009_v53  ;;  %v12034_v35 = vld [vmem:[%s33247_s3 + $0x608] sm:$0xff] }
 0x7b7   : > { %v30723_v5 = vmul.f32 %v11677_v33, %v11677_v33  ;;  %v25662_v62 = vadd.f32 %v11265_v59, %v33433_v60  ;;  %12357 = vmatprep.mubr.f32.mxu1 %v12018_v39  ;;  %v12057_v39 = vld [vmem:[%s33247_s3 + $0x6c0] sm:$0xff] }
 0x7b8   : > { %v11680_v23 = vadd.f32 %v30679_v43, %v25661_v42  ;;  %v33436_v42 = vld [vmem:[#allocation39_spill] sm:$0xff] }
 0x7b9   : > { %v11679_v29 = vadd.f32 %v30679_v43, %v25662_v62  ;;  %v24185_v2 = vpop.f32.mrb[80].mxu0 }
 0x7ba   : > { %v30736_v30 = vmul.f32 %v11680_v23, %v11680_v23  ;;  %v25663_v6 = vadd.f32 %v24185_v2, %v33434_v4  ;;  %v11275_v8 = vpop.f32.mrb[81].mxu0  ;;  %12358 = vmatmul.mubr.f32.gmra.mrb[164].mxu1 %v12017_v57  ;;  %v33437_v57 = vld [vmem:[#allocation40_spill] sm:$0xff]  ;;  %v12042_v2 = vld [vmem:[%s33247_s3 + $0x648] sm:$0xff] }
 0x7bb   : > { %v30739_v3 = vmul.f32 %v11679_v29, %v11679_v29  ;;  %v25664_v16 = vadd.f32 %v11275_v8, %v33435_v7  ;;  %12362 = vmatprep.mubr.f32.mxu1 %v12026_v61  ;;  %v12033_v61 = vld [vmem:[%s33247_s3 + $0x600] sm:$0xff]  ;;  %v33443_v4 = vld [vmem:[#allocation46_spill] sm:$0xff] }
 0x7bc   : > { %v11682_v53 = vadd.f32 %v30679_v43, %v25663_v6 }
 0x7bd   : > { %v11681_v33 = vadd.f32 %v30679_v43, %v25664_v16  ;;  %v24188_v14 = vpop.f32.mrb[82].mxu0  ;;  %v33438_v16 = vld [vmem:[#allocation41_spill] sm:$0xff] }
 0x7be   : > { %v30752_v45 = vmul.f32 %v11682_v53, %v11682_v53  ;;  %v25665_v59 = vadd.f32 %v24188_v14, %v33436_v42  ;;  %v11285_v60 = vpop.f32.mrb[83].mxu0  ;;  %12363 = vmatmul.mubr.f32.gmra.mrb[166].mxu1 %v12025_v25  ;;  %v12041_v42 = vld [vmem:[%s33247_s3 + $0x640] sm:$0xff] }
 0x7bf   : > { %v30755_v62 = vmul.f32 %v11681_v33, %v11681_v33  ;;  %v25666_v23 = vadd.f32 %v11285_v60, %v33437_v57  ;;  %12367 = vmatprep.mubr.f32.mxu1 %v12034_v35  ;;  %v33439_v33 = vld [vmem:[#allocation42_spill] sm:$0xff] }
 0x7c0   : > { %v11684_v29 = vadd.f32 %v30679_v43, %v25665_v59  ;;  %v12050_v60 = vld [vmem:[%s33247_s3 + $0x688] sm:$0xff] }
 0x7c1   : > { %v11683_v6 = vadd.f32 %v30679_v43, %v25666_v23  ;;  %v24191_v8 = vpop.f32.mrb[84].mxu0 }
 0x7c2   : > { %v30768_v7 = vmul.f32 %v11684_v29, %v11684_v29  ;;  %v25667_v25 = vadd.f32 %v24191_v8, %v33438_v16  ;;  %v11295_v53 = vpop.f32.mrb[85].mxu0  ;;  %12368 = vmatmul.mubr.f32.gmra.mrb[168].mxu1 %v12033_v61 }
 0x7c3   : > { %v30771_v35 = vmul.f32 %v11683_v6, %v11683_v6  ;;  %v25668_v14 = vadd.f32 %v11295_v53, %v33439_v33  ;;  %12372 = vmatprep.mubr.f32.mxu1 %v12042_v2  ;;  %v33440_v6 = vld [vmem:[#allocation43_spill] sm:$0xff]  ;;  %v33441_v53 = vld [vmem:[#allocation44_spill] sm:$0xff] }
 0x7c4   : > { %v11686_v59 = vadd.f32 %v30679_v43, %v25667_v25  ;;  %v12049_v33 = vld [vmem:[%s33247_s3 + $0x680] sm:$0xff] }
 0x7c5   : > { %v11685_v23 = vadd.f32 %v30679_v43, %v25668_v14  ;;  %v24194_v61 = vpop.f32.mrb[86].mxu0  ;;  %v12058_v14 = vld [vmem:[%s33247_s3 + $0x6c8] sm:$0xff] }
 0x7c6   : > { %v30784_v29 = vmul.f32 %v11686_v59, %v11686_v59  ;;  %v25669_v2 = vadd.f32 %v24194_v61, %v33440_v6  ;;  %v11305_v8 = vpop.f32.mrb[87].mxu0  ;;  %12373 = vmatmul.mubr.f32.gmra.mrb[170].mxu1 %v12041_v42  ;;  %v33442_v6 = vld [vmem:[#allocation45_spill] sm:$0xff] }
 0x7c7   : > { %v30787_v16 = vmul.f32 %v11685_v23, %v11685_v23  ;;  %v25670_v25 = vadd.f32 %v11305_v8, %v33441_v53  ;;  %12377 = vmatprep.mubr.f32.mxu1 %v12050_v60 }
 0x7c8   : > { %v11688_v57 = vadd.f32 %v30679_v43, %v25669_v2 }
 0x7c9   : > { %v11687_v42 = vadd.f32 %v30679_v43, %v25670_v25  ;;  %v24197_v23 = vpop.f32.mrb[88].mxu0 }
 0x7ca   : > { %v30800_v61 = vmul.f32 %v11688_v57, %v11688_v57  ;;  %v25671_v60 = vadd.f32 %v24197_v23, %v33442_v6  ;;  %v11315_v8 = vpop.f32.mrb[89].mxu0  ;;  %12378 = vmatmul.mubr.f32.gmra.mrb[172].mxu1 %v12049_v33  ;;  %v12066_v57 = vld [vmem:[%s33247_s3 + $0x708] sm:$0xff] }
 0x7cb   : > { %v30803_v53 = vmul.f32 %v11687_v42, %v11687_v42  ;;  %v25672_v2 = vadd.f32 %v11315_v8, %v33443_v4  ;;  %12382 = vmatprep.mubr.f32.mxu1 %v12058_v14  ;;  %v33444_v4 = vld [vmem:[#allocation47_spill] sm:$0xff] }
 0x7cc   : > { %v11690_v59 = vadd.f32 %v30679_v43, %v25671_v60 }
 0x7cd   : > { %v11689_v33 = vadd.f32 %v30679_v43, %v25672_v2  ;;  %v24200_v42 = vpop.f32.mrb[90].mxu0 }
 0x7ce   : > { %v30816_v23 = vmul.f32 %v11690_v59, %v11690_v59  ;;  %v25673_v14 = vadd.f32 %v24200_v42, %v33444_v4  ;;  %v11325_v6 = vpop.f32.mrb[91].mxu0  ;;  %12383 = vmatmul.mubr.f32.gmra.mrb[174].mxu1 %v12057_v39  ;;  %v12074_v59 = vld [vmem:[%s33247_s3 + $0x748] sm:$0xff] }
 0x7cf   : > { %v30819_v8 = vmul.f32 %v11689_v33, %v11689_v33  ;;  %v25674_v60 = vadd.f32 %v11325_v6, %v33445_v47  ;;  %12387 = vmatprep.mubr.f32.mxu1 %v12066_v57  ;;  %v33446_v47 = vld [vmem:[#allocation49_spill] sm:$0xff] }
 0x7d0   : > { %v11692_v25 = vadd.f32 %v30679_v43, %v25673_v14 }
 0x7d1   : > { %v11691_v39 = vadd.f32 %v30679_v43, %v25674_v60  ;;  %v24203_v33 = vpop.f32.mrb[92].mxu0 }
 0x7d2   : > { %v30832_v42 = vmul.f32 %v11692_v25, %v11692_v25  ;;  %v25675_v57 = vadd.f32 %v24203_v33, %v33446_v47  ;;  %v11335_v4 = vpop.f32.mrb[93].mxu0  ;;  %12388 = vmatmul.mubr.f32.gmra.mrb[176].mxu1 %v12065_v13  ;;  %v12082_v25 = vld [vmem:[%s33247_s3 + $0x788] sm:$0xff] }
 0x7d3   : > { %v30835_v6 = vmul.f32 %v11691_v39, %v11691_v39  ;;  %v25676_v14 = vadd.f32 %v11335_v4, %v33448_v48  ;;  %12392 = vmatprep.mubr.f32.mxu1 %v12074_v59  ;;  %v33450_v48 = vld [vmem:[#allocation51_spill] sm:$0xff] }
 0x7d4   : > { %v11694_v2 = vadd.f32 %v30679_v43, %v25675_v57 }
 0x7d5   : > { %33447 = vst [vmem:[#allocation7_spill] sm:$0xff] %v30835_v6  ;;  %v11693_v13 = vadd.f32 %v30679_v43, %v25676_v14  ;;  %v24206_v39 = vpop.f32.mrb[94].mxu0  ;;  %v11843_v6 = vld [vmem:[%s33247_s3 + $0x10] sm:$0xff] }
 0x7d6   : > { %v30848_v33 = vmul.f32 %v11694_v2, %v11694_v2  ;;  %v25677_v59 = vadd.f32 %v24206_v39, %v33450_v48  ;;  %v11345_v47 = vpop.f32.mrb[95].mxu0  ;;  %12393 = vmatmul.mubr.f32.gmra.mrb[178].mxu1 %v12073_v49  ;;  %v11844_v2 = vld [vmem:[%s33247_s3 + $0x18] sm:$0xff] }
 0x7d7   : > { %v30851_v4 = vmul.f32 %v11693_v13, %v11693_v13  ;;  %v25678_v57 = vadd.f32 %v11345_v47, %v33452_v36  ;;  %12397 = vmatprep.mubr.f32.mxu1 %v12082_v25  ;;  %v33453_v36 = vld [vmem:[#allocation53_spill] sm:$0xff] }
 0x7d8   : > { %33449 = vst [vmem:[#allocation8_spill] sm:$0xff] %v30848_v33  ;;  %v11696_v60 = vadd.f32 %v30679_v43, %v25677_v59  ;;  %v33457_v33 = vpack.c.bf16 %v30618_v50, %v30621_v34 }
 0x7d9   : > { %33451 = vst [vmem:[#allocation9_spill] sm:$0xff] %v30851_v4  ;;  %v11695_v49 = vadd.f32 %v30679_v43, %v25678_v57  ;;  %v24209_v13 = vpop.f32.mrb[96].mxu0  ;;  %v33456_v4 = vld [vmem:[#allocation56_spill] sm:$0xff] }
 0x7da   : > { %v30864_v39 = vmul.f32 %v11696_v60, %v11696_v60  ;;  %v25679_v25 = vadd.f32 %v24209_v13, %v33453_v36  ;;  %v11355_v48 = vpop.f32.mrb[97].mxu0  ;;  %12398 = vmatmul.mubr.f32.gmra.mrb[180].mxu1 %v12081_v27  ;;  %v11852_v60 = vld [vmem:[%s33247_s3 + $0x58] sm:$0xff] }
 0x7db   : > { %v30867_v47 = vmul.f32 %v11695_v49, %v11695_v49  ;;  %v25680_v59 = vadd.f32 %v11355_v48, %v33454_v20  ;;  %12467 = vmatprep.mubr.f32.mxu1 %v11844_v2  ;;  %v33455_v20 = vld [vmem:[#allocation55_spill] sm:$0xff] }
 0x7dc   : > { %v11698_v14 = vadd.f32 %v30679_v43, %v25679_v25 }
 0x7dd   : > { %v25269_v57 = vpack.c.bf16 %v30864_v39, %v30867_v47  ;;  %v11697_v27 = vadd.f32 %v30679_v43, %v25680_v59  ;;  %v24212_v49 = vpop.f32.mrb[98].mxu0  ;;  %v11851_v59 = vld [vmem:[%s33247_s3 + $0x50] sm:$0xff]  ;;  %v11988_v39 = vld [vmem:[%s33247_s3 + $0x498] sm:$0xff] }
 0x7de   : > { %v30880_v13 = vmul.f32 %v11698_v14, %v11698_v14  ;;  %v25681_v2 = vadd.f32 %v24212_v49, %v33455_v20  ;;  %v11365_v36 = vpop.f32.mrb[99].mxu0  ;;  %12468 = vmatmul.mubr.f32.vlgmr.msra.gmra.mrb[120].mxu1 %v11843_v6  ;;  %v11860_v6 = vld [vmem:[%s33247_s3 + $0x98] sm:$0xff]  ;;  %v33458_v20 = vld [vmem:[#allocation57_spill] sm:$0xff]  ;;  %v11987_v47 = vld [vmem:[%s33247_s3 + $0x490] sm:$0xff] }
 0x7df   : > { %v30883_v48 = vmul.f32 %v11697_v27, %v11697_v27  ;;  %v25682_v25 = vadd.f32 %v11365_v36, %v33456_v4  ;;  %25225 = vmatpush1.bf16.msra.mxu1 %v33457_v33  ;;  %12472 = vmatprep.mubr.f32.mxu1 %v11852_v60  ;;  %v33459_v36 = vpack.c.bf16 %v30635_v28, %v30638_v1 }
 0x7e0   : > { %v11700_v14 = vadd.f32 %v30679_v43, %v25681_v2  ;;  %25226 = vmatprep.subr.bf16.mxu1 %v33402_v46 }
 0x7e1   : > { %v25272_v4 = vpack.c.bf16 %v30880_v13, %v30883_v48  ;;  %v11699_v27 = vadd.f32 %v30679_v43, %v25682_v25  ;;  %v24215_v50 = vpop.f32.mrb[100].mxu0  ;;  %v11859_v25 = vld [vmem:[%s33247_s3 + $0x90] sm:$0xff]  ;;  %v11861_v13 = vld [vmem:[%s33247_s3 + $0xa0] sm:$0xff]  ;;  %v11870_v48 = vld [vmem:[%s33247_s3 + $0xe8] sm:$0xff] }
 0x7e2   : > { %v30900_v34 = vmul.f32 %v11700_v14, %v11700_v14  ;;  %v25683_v33 = vadd.f32 %v24215_v50, %v30310_v51  ;;  %v11375_v60 = vpop.f32.mrb[101].mxu0  ;;  %12473 = vmatmul.mubr.f32.gmra.mrb[122].mxu1 %v11851_v59  ;;  %v11868_v51 = vld [vmem:[%s33247_s3 + $0xd8] sm:$0xff] }
 0x7e3   : > { %v30903_v49 = vmul.f32 %v11699_v27, %v11699_v27  ;;  %v25684_v2 = vadd.f32 %v11375_v60, %v33458_v20  ;;  %25228 = vmatpush1.bf16.msra.mxu1 %v33459_v36  ;;  %12477 = vmatprep.mubr.f32.mxu1 %v11860_v6  ;;  %v33460_v20 = vpack.c.bf16 %v30651_v37, %v30654_v40 }
 0x7e4   : > { %v11702_v14 = vadd.f32 %v30679_v43, %v25683_v33  ;;  %25229 = vmatprep.subr.bf16.mxu1 %v33402_v46 }
 0x7e5   : > { %v25275_v59 = vpack.c.bf16 %v30900_v34, %v30903_v49  ;;  %v11701_v27 = vadd.f32 %v30679_v43, %v25684_v2  ;;  %v24218_v28 = vpop.f32.mrb[102].mxu0  ;;  %v11867_v2 = vld [vmem:[%s33247_s3 + $0xd0] sm:$0xff]  ;;  %v11878_v34 = vld [vmem:[%s33247_s3 + $0x128] sm:$0xff]  ;;  %v11877_v49 = vld [vmem:[%s33247_s3 + $0x120] sm:$0xff] }
 0x7e6   : > { %v30920_v1 = vmul.f32 %v11702_v14, %v11702_v14  ;;  %v25685_v6 = vadd.f32 %v24218_v28, %v30323_v10  ;;  %v11385_v50 = vpop.f32.mrb[103].mxu0  ;;  %12478 = vmatmul.mubr.f32.gmra.mrb[124].mxu1 %v11859_v25  ;;  %v11876_v10 = vld [vmem:[%s33247_s3 + $0x118] sm:$0xff] }
 0x7e7   : > { %v30923_v60 = vmul.f32 %v11701_v27, %v11701_v27  ;;  %v25686_v33 = vadd.f32 %v11385_v50, %v30326_v32  ;;  %25231 = vmatpush1.bf16.msra.mxu1 %v33460_v20  ;;  %12482 = vmatprep.mubr.f32.mxu1 %v11868_v51  ;;  %v11875_v50 = vld [vmem:[%s33247_s3 + $0x110] sm:$0xff] }
 0x7e8   : > { %v11704_v36 = vadd.f32 %v30679_v43, %v25685_v6  ;;  %25232 = vmatprep.subr.bf16.mxu1 %v33402_v46  ;;  %v33461_v6 = vpack.c.bf16 %v30667_v54, %v30670_v11 }
 0x7e9   : > { %v25278_v32 = vpack.c.bf16 %v30920_v1, %v30923_v60  ;;  %v11703_v25 = vadd.f32 %v30679_v43, %v25686_v33  ;;  %v24221_v37 = vpop.f32.mrb[104].mxu0  ;;  %v11885_v1 = vld [vmem:[%s33247_s3 + $0x160] sm:$0xff]  ;;  %v11894_v60 = vld [vmem:[%s33247_s3 + $0x1a8] sm:$0xff] }
 0x7ea   : > { %v30940_v40 = vmul.f32 %v11704_v36, %v11704_v36  ;;  %v25687_v14 = vadd.f32 %v24221_v37, %v30336_v26  ;;  %v11395_v51 = vpop.f32.mrb[105].mxu0  ;;  %12483 = vmatmul.mubr.f32.gmra.mrb[126].mxu1 %v11867_v2  ;;  %v11884_v26 = vld [vmem:[%s33247_s3 + $0x158] sm:$0xff]  ;;  %v33462_v37 = vpack.c.bf16 %v30688_v21, %v30691_v22 }
 0x7eb   : > { %v30943_v27 = vmul.f32 %v11703_v25, %v11703_v25  ;;  %v25688_v28 = vadd.f32 %v11395_v51, %v30339_v15  ;;  %25234 = vmatpush1.bf16.msra.mxu1 %v33461_v6  ;;  %12487 = vmatprep.mubr.f32.mxu1 %v11876_v10 }
 0x7ec   : > { %v11706_v33 = vadd.f32 %v30679_v43, %v25687_v14  ;;  %25235 = vmatprep.subr.bf16.mxu1 %v33402_v46  ;;  %v11883_v14 = vld [vmem:[%s33247_s3 + $0x150] sm:$0xff] }
 0x7ed   : > { %v25281_v15 = vpack.c.bf16 %v30940_v40, %v30943_v27  ;;  %v11705_v20 = vadd.f32 %v30679_v43, %v25688_v28  ;;  %v24224_v54 = vpop.f32.mrb[106].mxu0  ;;  %v11902_v40 = vld [vmem:[%s33247_s3 + $0x1e8] sm:$0xff]  ;;  %v11901_v27 = vld [vmem:[%s33247_s3 + $0x1e0] sm:$0xff] }
 0x7ee   : > { %v30960_v11 = vmul.f32 %v11706_v33, %v11706_v33  ;;  %v25689_v2 = vadd.f32 %v24224_v54, %v30349_v24  ;;  %v11405_v36 = vpop.f32.mrb[107].mxu0  ;;  %12488 = vmatmul.mubr.f32.gmra.mrb[128].mxu1 %v11875_v50  ;;  %v11892_v24 = vld [vmem:[%s33247_s3 + $0x198] sm:$0xff]  ;;  %v33464_v54 = vpack.c.bf16 %v30704_v31, %v30707_v38 }
 0x7ef   : > { %v30963_v10 = vmul.f32 %v11705_v20, %v11705_v20  ;;  %v25690_v25 = vadd.f32 %v11405_v36, %v30352_v52  ;;  %25237 = vmatpush1.bf16.msra.mxu1 %v33462_v37  ;;  %12492 = vmatprep.mubr.f32.mxu1 %v11884_v26  ;;  %v33463_v26 = vld [vmem:[#allocation58_spill] sm:$0xff] }
 0x7f0   : > { %v11708_v51 = vadd.f32 %v30679_v43, %v25689_v2  ;;  %25238 = vmatprep.subr.bf16.mxu1 %v33402_v46  ;;  %v11891_v2 = vld [vmem:[%s33247_s3 + $0x190] sm:$0xff] }
 0x7f1   : > { %v25284_v52 = vpack.c.bf16 %v30960_v11, %v30963_v10  ;;  %v11707_v28 = vadd.f32 %v30679_v43, %v25690_v25  ;;  %v24227_v21 = vpop.f32.mrb[108].mxu0  ;;  %v11909_v11 = vld [vmem:[%s33247_s3 + $0x220] sm:$0xff]  ;;  %v11918_v10 = vld [vmem:[%s33247_s3 + $0x268] sm:$0xff] }
 0x7f2   : > { %v30980_v22 = vmul.f32 %v11708_v51, %v11708_v51  ;;  %v25691_v6 = vadd.f32 %v24227_v21, %v30361_v55  ;;  %v11415_v50 = vpop.f32.mrb[109].mxu0  ;;  %12493 = vmatmul.mubr.f32.gmra.mrb[130].mxu1 %v11883_v14  ;;  %v11900_v55 = vld [vmem:[%s33247_s3 + $0x1d8] sm:$0xff]  ;;  %v33465_v21 = vpack.c.bf16 %v30720_v41, %v30723_v5 }
 0x7f3   : > { %v30983_v33 = vmul.f32 %v11707_v28, %v11707_v28  ;;  %v25692_v20 = vadd.f32 %v11415_v50, %v33463_v26  ;;  %25240 = vmatpush1.bf16.msra.mxu1 %v33464_v54  ;;  %12497 = vmatprep.mubr.f32.mxu1 %v11892_v24 }
 0x7f4   : > { %v11710_v36 = vadd.f32 %v30679_v43, %v25691_v6  ;;  %25241 = vmatprep.subr.bf16.mxu1 %v33402_v46  ;;  %v11899_v6 = vld [vmem:[%s33247_s3 + $0x1d0] sm:$0xff] }
 0x7f5   : > { %v25287_v25 = vpack.c.bf16 %v30980_v22, %v30983_v33  ;;  %v11709_v37 = vadd.f32 %v30679_v43, %v25692_v20  ;;  %v24230_v31 = vpop.f32.mrb[110].mxu0  ;;  %v11926_v22 = vld [vmem:[%s33247_s3 + $0x2a8] sm:$0xff]  ;;  %v11925_v33 = vld [vmem:[%s33247_s3 + $0x2a0] sm:$0xff] }
 0x7f6   : > { %v31000_v38 = vmul.f32 %v11710_v36, %v11710_v36  ;;  %v25693_v14 = vadd.f32 %v24230_v31, %v30372_v56  ;;  %v11425_v51 = vpop.f32.mrb[111].mxu0  ;;  %12498 = vmatmul.mubr.f32.gmra.mrb[132].mxu1 %v11891_v2  ;;  %v11908_v56 = vld [vmem:[%s33247_s3 + $0x218] sm:$0xff] }
 0x7f7   : > { %v31003_v24 = vmul.f32 %v11709_v37, %v11709_v37  ;;  %v25694_v28 = vadd.f32 %v11425_v51, %v30375_v63  ;;  %25243 = vmatpush1.bf16.msra.mxu1 %v33465_v21  ;;  %12502 = vmatprep.mubr.f32.mxu1 %v11900_v55  ;;  %v33466_v55 = vpack.c.bf16 %v30736_v30, %v30739_v3  ;;  %v11907_v37 = vld [vmem:[%s33247_s3 + $0x210] sm:$0xff] }
 0x7f8   : > { %v11712_v50 = vadd.f32 %v30679_v43, %v25693_v14  ;;  %25244 = vmatprep.subr.bf16.mxu1 %v33402_v46 }
 0x7f9   : > { %v25290_v63 = vpack.c.bf16 %v31000_v38, %v31003_v24  ;;  %v11711_v26 = vadd.f32 %v30679_v43, %v25694_v28  ;;  %v24233_v41 = vpop.f32.mrb[112].mxu0  ;;  %v11933_v38 = vld [vmem:[%s33247_s3 + $0x2e0] sm:$0xff]  ;;  %v11942_v24 = vld [vmem:[%s33247_s3 + $0x328] sm:$0xff] }
 0x7fa   : > { %v31020_v5 = vmul.f32 %v11712_v50, %v11712_v50  ;;  %v25695_v20 = vadd.f32 %v24233_v41, %v30381_v12  ;;  %v11435_v54 = vpop.f32.mrb[113].mxu0  ;;  %12503 = vmatmul.mubr.f32.gmra.mrb[134].mxu1 %v11899_v6  ;;  %v11916_v12 = vld [vmem:[%s33247_s3 + $0x258] sm:$0xff]  ;;  %v33467_v50 = vpack.c.bf16 %v30752_v45, %v30755_v62 }
 0x7fb   : > { %v31023_v2 = vmul.f32 %v11711_v26, %v11711_v26  ;;  %v25696_v36 = vadd.f32 %v11435_v54, %v30384_v0  ;;  %25246 = vmatpush1.bf16.msra.mxu1 %v33466_v55  ;;  %12507 = vmatprep.mubr.f32.mxu1 %v11908_v56  ;;  %v11915_v56 = vld [vmem:[%s33247_s3 + $0x250] sm:$0xff] }
 0x7fc   : > { %v11714_v31 = vadd.f32 %v30679_v43, %v25695_v20  ;;  %25247 = vmatprep.subr.bf16.mxu1 %v33402_v46 }
 0x7fd   : > { %v25293_v0 = vpack.c.bf16 %v31020_v5, %v31023_v2  ;;  %v11713_v14 = vadd.f32 %v30679_v43, %v25696_v36  ;;  %v24236_v30 = vpop.f32.mrb[114].mxu0  ;;  %v11950_v5 = vld [vmem:[%s33247_s3 + $0x368] sm:$0xff]  ;;  %v11949_v2 = vld [vmem:[%s33247_s3 + $0x360] sm:$0xff] }
 0x7fe   : > { %v31040_v3 = vmul.f32 %v11714_v31, %v11714_v31  ;;  %v25697_v51 = vadd.f32 %v24236_v30, %v30390_v9  ;;  %v11445_v28 = vpop.f32.mrb[115].mxu0  ;;  %12508 = vmatmul.mubr.f32.gmra.mrb[136].mxu1 %v11907_v37  ;;  %v11924_v9 = vld [vmem:[%s33247_s3 + $0x298] sm:$0xff]  ;;  %v33468_v37 = vpack.c.bf16 %v30768_v7, %v30771_v35  ;;  %v11923_v31 = vld [vmem:[%s33247_s3 + $0x290] sm:$0xff] }
 0x7ff   : > { %v31043_v21 = vmul.f32 %v11713_v14, %v11713_v14  ;;  %v25698_v6 = vadd.f32 %v11445_v28, %v30393_v19  ;;  %25249 = vmatpush1.bf16.msra.mxu1 %v33467_v50  ;;  %12512 = vmatprep.mubr.f32.mxu1 %v11916_v12  ;;  %v33469_v50 = vpack.c.bf16 %v30784_v29, %v30787_v16 }
 0x800   : > { %v11716_v26 = vadd.f32 %v30679_v43, %v25697_v51  ;;  %25250 = vmatprep.subr.bf16.mxu1 %v33402_v46 }
 0x801   : > { %v25296_v19 = vpack.c.bf16 %v31040_v3, %v31043_v21  ;;  %v11715_v41 = vadd.f32 %v30679_v43, %v25698_v6  ;;  %v24239_v45 = vpop.f32.mrb[116].mxu0  ;;  %v11957_v3 = vld [vmem:[%s33247_s3 + $0x3a0] sm:$0xff]  ;;  %v11966_v21 = vld [vmem:[%s33247_s3 + $0x3e8] sm:$0xff] }
 0x802   : > { %v31060_v62 = vmul.f32 %v11716_v26, %v11716_v26  ;;  %v25699_v20 = vadd.f32 %v24239_v45, %v30399_v17  ;;  %v11455_v54 = vpop.f32.mrb[117].mxu0  ;;  %12513 = vmatmul.mubr.f32.gmra.mrb[138].mxu1 %v11915_v56  ;;  %v11932_v17 = vld [vmem:[%s33247_s3 + $0x2d8] sm:$0xff]  ;;  %v11931_v56 = vld [vmem:[%s33247_s3 + $0x2d0] sm:$0xff] }
 0x803   : > { %v31063_v36 = vmul.f32 %v11715_v41, %v11715_v41  ;;  %v25700_v55 = vadd.f32 %v11455_v54, %v30402_v44  ;;  %25252 = vmatpush1.bf16.msra.mxu1 %v33468_v37  ;;  %12517 = vmatprep.mubr.f32.mxu1 %v11924_v9  ;;  %v33470_v41 = vpack.c.bf16 %v30800_v61, %v30803_v53  ;;  %v11939_v45 = vld [vmem:[%s33247_s3 + $0x310] sm:$0xff]  ;;  %v11956_v53 = vld [vmem:[%s33247_s3 + $0x398] sm:$0xff] }
 0x804   : > { %v11718_v12 = vadd.f32 %v30679_v43, %v25699_v20  ;;  %25253 = vmatprep.subr.bf16.mxu1 %v33402_v46  ;;  %v33471_v54 = vpack.c.bf16 %v30816_v23, %v30819_v8  ;;  %v11947_v61 = vld [vmem:[%s33247_s3 + $0x350] sm:$0xff]  ;;  %v11964_v8 = vld [vmem:[%s33247_s3 + $0x3d8] sm:$0xff] }
 0x805   : > { %v25299_v44 = vpack.c.bf16 %v31060_v62, %v31063_v36  ;;  %v11717_v14 = vadd.f32 %v30679_v43, %v25700_v55  ;;  %v24242_v7 = vpop.f32.mrb[118].mxu0  ;;  %v33472_v55 = vld [vmem:[#allocation7_spill] sm:$0xff]  ;;  %v11974_v62 = vld [vmem:[%s33247_s3 + $0x428] sm:$0xff]  ;;  %v11973_v36 = vld [vmem:[%s33247_s3 + $0x420] sm:$0xff] }
 0x806   : > { %v31080_v35 = vmul.f32 %v11718_v12, %v11718_v12  ;;  %v25701_v30 = vadd.f32 %v24242_v7, %v30408_v18  ;;  %v11465_v51 = vpop.f32.mrb[119].mxu0  ;;  %12518 = vmatmul.mubr.f32.gmra.mrb[140].mxu1 %v11923_v31  ;;  %v11940_v18 = vld [vmem:[%s33247_s3 + $0x318] sm:$0xff]  ;;  %v33473_v37 = vpack.c.bf16 %v30832_v42, %v33472_v55  ;;  %v11955_v23 = vld [vmem:[%s33247_s3 + $0x390] sm:$0xff]  ;;  %v33475_v12 = vld [vmem:[#allocation9_spill] sm:$0xff] }
 0x807   : > { %v31083_v28 = vmul.f32 %v11717_v14, %v11717_v14  ;;  %v25702_v6 = vadd.f32 %v11465_v51, %v30411_v58  ;;  %25255 = vmatpush1.bf16.msra.mxu1 %v33469_v50  ;;  %12522 = vmatprep.mubr.f32.mxu1 %v11932_v17  ;;  %v33474_v31 = vld [vmem:[#allocation8_spill] sm:$0xff]  ;;  %v11963_v42 = vld [vmem:[%s33247_s3 + $0x3d0] sm:$0xff] }
 0x808   : > { %v11720_v26 = vadd.f32 %v30679_v43, %v25701_v30  ;;  %25256 = vmatprep.subr.bf16.mxu1 %v33402_v46  ;;  %v33476_v17 = vpack.c.bf16 %v33474_v31, %v33475_v12  ;;  %v11972_v14 = vld [vmem:[%s33247_s3 + $0x418] sm:$0xff]  ;;  %v11971_v7 = vld [vmem:[%s33247_s3 + $0x410] sm:$0xff] }
 0x809   : > { %v25302_v58 = vpack.c.bf16 %v31080_v35, %v31083_v28  ;;  %v11719_v9 = vadd.f32 %v30679_v43, %v25702_v6  ;;  %v11948_v43 = vld [vmem:[%s33247_s3 + $0x358] sm:$0xff]  ;;  %v11979_v51 = vld [vmem:[%s33247_s3 + $0x450] sm:$0xff]  ;;  %v11981_v35 = vld [vmem:[%s33247_s3 + $0x460] sm:$0xff] }
 0x80a   : > { %v31100_v29 = vmul.f32 %v11720_v26, %v11720_v26  ;;  %12523 = vmatmul.mubr.f32.gmra.mrb[142].mxu1 %v11931_v56  ;;  %v11980_v30 = vld [vmem:[%s33247_s3 + $0x458] sm:$0xff]  ;;  %v11995_v6 = vld [vmem:[%s33247_s3 + $0x4d0] sm:$0xff]  ;;  %v11990_v28 = vld [vmem:[%s33247_s3 + $0x4a8] sm:$0xff] }
 0x80b   : > { %v31102_v16 = vmul.f32 %v11719_v9, %v11719_v9  ;;  %25258 = vmatpush1.bf16.msra.mxu1 %v33470_v41  ;;  %12527 = vmatprep.mubr.f32.mxu1 %v11940_v18  ;;  %v12004_v50 = vld [vmem:[%s33247_s3 + $0x518] sm:$0xff]  ;;  %v12003_v56 = vld [vmem:[%s33247_s3 + $0x510] sm:$0xff] }
 0x80c   : > { %25259 = vmatprep.subr.bf16.mxu1 %v33402_v46  ;;  %v12012_v26 = vld [vmem:[%s33247_s3 + $0x558] sm:$0xff]  ;;  %v12011_v18 = vld [vmem:[%s33247_s3 + $0x550] sm:$0xff] }
 0x80d   : > { %v25305_v20 = vpack.c.bf16 %v31100_v29, %v31102_v16  ;;  %v12020_v9 = vld [vmem:[%s33247_s3 + $0x598] sm:$0xff]  ;;  %v12019_v41 = vld [vmem:[%s33247_s3 + $0x590] sm:$0xff]  ;;  %v11998_v29 = vld [vmem:[%s33247_s3 + $0x4e8] sm:$0xff] }
 0x80e   : > { %12528 = vmatmul.mubr.f32.gmra.mrb[144].mxu1 %v11939_v45  ;;  %v12028_v45 = vld [vmem:[%s33247_s3 + $0x5d8] sm:$0xff]  ;;  %v12043_v55 = vld [vmem:[%s33247_s3 + $0x650] sm:$0xff]  ;;  %v11997_v16 = vld [vmem:[%s33247_s3 + $0x4e0] sm:$0xff] }
 0x80f   : > { %25261 = vmatpush1.bf16.msra.mxu1 %v33471_v54  ;;  %12532 = vmatprep.mubr.f32.mxu1 %v11948_v43  ;;  %v12027_v43 = vld [vmem:[%s33247_s3 + $0x5d0] sm:$0xff]  ;;  %v12036_v54 = vld [vmem:[%s33247_s3 + $0x618] sm:$0xff] }
 0x810   : > { %25262 = vmatprep.subr.bf16.mxu1 %v33402_v46  ;;  %v12059_v31 = vld [vmem:[%s33247_s3 + $0x6d0] sm:$0xff]  ;;  %v12068_v12 = vld [vmem:[%s33247_s3 + $0x718] sm:$0xff] }
 0x812   : > { %12533 = vmatmul.mubr.f32.gmra.mrb[146].mxu1 %v11947_v61  ;;  %v12035_v61 = vld [vmem:[%s33247_s3 + $0x610] sm:$0xff] }
 0x813   : > { %25264 = vmatpush1.bf16.msra.mxu1 %v33473_v37  ;;  %12537 = vmatprep.mubr.f32.mxu1 %v11956_v53  ;;  %v12044_v53 = vld [vmem:[%s33247_s3 + $0x658] sm:$0xff] }
 0x814   : > { %25265 = vmatprep.subr.bf16.mxu1 %v33402_v46  ;;  %v12052_v37 = vld [vmem:[%s33247_s3 + $0x698] sm:$0xff] }
 0x816   : > { %12538 = vmatmul.mubr.f32.gmra.mrb[148].mxu1 %v11955_v23  ;;  %v12051_v23 = vld [vmem:[%s33247_s3 + $0x690] sm:$0xff] }
 0x817   : > { %25267 = vmatpush1.bf16.msra.mxu1 %v33476_v17  ;;  %12542 = vmatprep.mubr.f32.mxu1 %v11964_v8  ;;  %v12060_v8 = vld [vmem:[%s33247_s3 + $0x6d8] sm:$0xff]  ;;  %v12067_v17 = vld [vmem:[%s33247_s3 + $0x710] sm:$0xff] }
 0x818   : > { %25268 = vmatprep.subr.bf16.mxu1 %v33402_v46 }
 0x81a   : > { %12543 = vmatmul.mubr.f32.gmra.mrb[150].mxu1 %v11963_v42  ;;  %v12076_v42 = vld [vmem:[%s33247_s3 + $0x758] sm:$0xff] }
 0x81b   : > { %25270 = vmatpush1.bf16.msra.mxu1 %v25269_v57  ;;  %12547 = vmatprep.mubr.f32.mxu1 %v11972_v14  ;;  %v11996_v57 = vld [vmem:[%s33247_s3 + $0x4d8] sm:$0xff]  ;;  %v12075_v14 = vld [vmem:[%s33247_s3 + $0x750] sm:$0xff] }
 0x81c   : > { %25271 = vmatprep.subr.bf16.mxu1 %v33402_v46 }
 0x81e   : > { %12548 = vmatmul.mubr.f32.gmra.mrb[152].mxu1 %v11971_v7  ;;  %v12084_v7 = vld [vmem:[%s33247_s3 + $0x798] sm:$0xff] }
 0x81f   : > { %12552 = vmatprep.mubr.f32.mxu1 %v11980_v30  ;;  %v12083_v30 = vld [vmem:[%s33247_s3 + $0x790] sm:$0xff] }
 0x822   : > { %12553 = vmatmul.mubr.f32.gmra.mrb[154].mxu1 %v11979_v51  ;;  %v11846_v51 = vld [vmem:[%s33247_s3 + $0x28] sm:$0xff] }
 0x823   : > { %12557 = vmatprep.mubr.f32.mxu1 %v11988_v39  ;;  %v11845_v39 = vld [vmem:[%s33247_s3 + $0x20] sm:$0xff] }
 0x826   : > { %12558 = vmatmul.mubr.f32.gmra.mrb[156].mxu1 %v11987_v47  ;;  %v11854_v47 = vld [vmem:[%s33247_s3 + $0x68] sm:$0xff] }
 0x827   : > { %12562 = vmatprep.mubr.f32.mxu1 %v11996_v57  ;;  %v11853_v57 = vld [vmem:[%s33247_s3 + $0x60] sm:$0xff] }
 0x82a   : > { %12563 = vmatmul.mubr.f32.gmra.mrb[158].mxu1 %v11995_v6  ;;  %v11862_v6 = vld [vmem:[%s33247_s3 + $0xa8] sm:$0xff] }
 0x82b   : > { %12567 = vmatprep.mubr.f32.mxu1 %v12004_v50  ;;  %v12005_v50 = vld [vmem:[%s33247_s3 + $0x520] sm:$0xff] }
 0x82e   : > { %12568 = vmatmul.mubr.f32.gmra.mrb[160].mxu1 %v12003_v56  ;;  %v12014_v56 = vld [vmem:[%s33247_s3 + $0x568] sm:$0xff] }
 0x82f   : > { %12572 = vmatprep.mubr.f32.mxu1 %v12012_v26  ;;  %v12013_v26 = vld [vmem:[%s33247_s3 + $0x560] sm:$0xff] }
 0x832   : > { %12573 = vmatmul.mubr.f32.gmra.mrb[162].mxu1 %v12011_v18  ;;  %v12022_v18 = vld [vmem:[%s33247_s3 + $0x5a8] sm:$0xff] }
 0x833   : > { %12577 = vmatprep.mubr.f32.mxu1 %v12020_v9  ;;  %v12021_v9 = vld [vmem:[%s33247_s3 + $0x5a0] sm:$0xff] }
 0x836   : > { %12578 = vmatmul.mubr.f32.gmra.mrb[164].mxu1 %v12019_v41  ;;  %v12030_v41 = vld [vmem:[%s33247_s3 + $0x5e8] sm:$0xff] }
 0x837   : > { %12582 = vmatprep.mubr.f32.mxu1 %v12028_v45  ;;  %v12029_v45 = vld [vmem:[%s33247_s3 + $0x5e0] sm:$0xff] }
 0x83a   : > { %12583 = vmatmul.mubr.f32.gmra.mrb[166].mxu1 %v12027_v43  ;;  %v12038_v43 = vld [vmem:[%s33247_s3 + $0x628] sm:$0xff] }
 0x83b   : > { %12587 = vmatprep.mubr.f32.mxu1 %v12036_v54  ;;  %v12037_v54 = vld [vmem:[%s33247_s3 + $0x620] sm:$0xff] }
 0x83e   : > { %12588 = vmatmul.mubr.f32.gmra.mrb[168].mxu1 %v12035_v61  ;;  %v12046_v61 = vld [vmem:[%s33247_s3 + $0x668] sm:$0xff] }
 0x83f   : > { %12592 = vmatprep.mubr.f32.mxu1 %v12044_v53  ;;  %v12045_v53 = vld [vmem:[%s33247_s3 + $0x660] sm:$0xff] }
 0x842   : > { %12593 = vmatmul.mubr.f32.gmra.mrb[170].mxu1 %v12043_v55  ;;  %v12054_v55 = vld [vmem:[%s33247_s3 + $0x6a8] sm:$0xff] }
 0x843   : > { %12597 = vmatprep.mubr.f32.mxu1 %v12052_v37  ;;  %v12053_v37 = vld [vmem:[%s33247_s3 + $0x6a0] sm:$0xff] }
 0x846   : > { %12598 = vmatmul.mubr.f32.gmra.mrb[172].mxu1 %v12051_v23  ;;  %v12062_v23 = vld [vmem:[%s33247_s3 + $0x6e8] sm:$0xff] }
 0x847   : > { %12602 = vmatprep.mubr.f32.mxu1 %v12060_v8  ;;  %v12061_v8 = vld [vmem:[%s33247_s3 + $0x6e0] sm:$0xff] }
 0x84a   : > { %12603 = vmatmul.mubr.f32.gmra.mrb[174].mxu1 %v12059_v31  ;;  %v12070_v31 = vld [vmem:[%s33247_s3 + $0x728] sm:$0xff] }
 0x84b   : > { %12607 = vmatprep.mubr.f32.mxu1 %v12068_v12  ;;  %v12069_v12 = vld [vmem:[%s33247_s3 + $0x720] sm:$0xff] }
 0x84e   : > { %12608 = vmatmul.mubr.f32.gmra.mrb[176].mxu1 %v12067_v17  ;;  %v12078_v17 = vld [vmem:[%s33247_s3 + $0x768] sm:$0xff] }
 0x84f   : > { %12612 = vmatprep.mubr.f32.mxu1 %v12076_v42  ;;  %v12077_v42 = vld [vmem:[%s33247_s3 + $0x760] sm:$0xff] }
 0x852   : > { %12613 = vmatmul.mubr.f32.gmra.mrb[178].mxu1 %v12075_v14  ;;  %v12086_v14 = vld [vmem:[%s33247_s3 + $0x7a8] sm:$0xff] }
 0x853   : > { %12617 = vmatprep.mubr.f32.mxu1 %v12084_v7  ;;  %v13145_v7 = vld [vmem:[%s33248_s4 + $0x10] sm:$0xff] }
 0x856   : > { %12618 = vmatmul.mubr.f32.gmra.mrb[180].mxu1 %v12083_v30  ;;  %v13146_v30 = vld [vmem:[%s33248_s4 + $0x18] sm:$0xff] }
 0x857   : > { %12687 = vmatprep.mubr.f32.mxu1 %v11846_v51  ;;  %v12085_v51 = vld [vmem:[%s33247_s3 + $0x7a0] sm:$0xff] }
 0x85a   : > { %12688 = vmatmul.mubr.f32.vlgmr.msra.gmra.mrb[120].mxu1 %v11845_v39  ;;  %v25307_v39 = vpack.c.bf16 %v13146_v30, %v13145_v7  ;;  %v12079_v7 = vld [vmem:[%s33247_s3 + $0x770] sm:$0xff]  ;;  %v12088_v30 = vld [vmem:[%s33247_s3 + $0x7b8] sm:$0xff] }
 0x85b   : > { %25273 = vmatpush1.bf16.msra.mxu1 %v25272_v4  ;;  %12692 = vmatprep.mubr.f32.mxu1 %v11854_v47  ;;  %v11869_v4 = vld [vmem:[%s33247_s3 + $0xe0] sm:$0xff]  ;;  %v11848_v47 = vld [vmem:[%s33247_s3 + $0x38] sm:$0xff] }
 0x85c   : > { %25274 = vmatprep.subr.bf16.mxu1 %v33402_v46 }
 0x85e   : > { %12693 = vmatmul.mubr.f32.gmra.mrb[122].mxu1 %v11853_v57  ;;  %v11847_v57 = vld [vmem:[%s33247_s3 + $0x30] sm:$0xff] }
 0x85f   : > { %25276 = vmatpush1.bf16.msra.mxu1 %v25275_v59  ;;  %12697 = vmatprep.mubr.f32.mxu1 %v11862_v6  ;;  %v11886_v59 = vld [vmem:[%s33247_s3 + $0x168] sm:$0xff]  ;;  %v11856_v6 = vld [vmem:[%s33247_s3 + $0x78] sm:$0xff] }
 0x860   : > { %25277 = vmatprep.subr.bf16.mxu1 %v33402_v46 }
 0x862   : > { %12698 = vmatmul.mubr.f32.gmra.mrb[124].mxu1 %v11861_v13  ;;  %v11855_v13 = vld [vmem:[%s33247_s3 + $0x70] sm:$0xff] }
 0x863   : > { %25279 = vmatpush1.bf16.msra.mxu1 %v25278_v32  ;;  %12702 = vmatprep.mubr.f32.mxu1 %v11870_v48  ;;  %v11893_v32 = vld [vmem:[%s33247_s3 + $0x1a0] sm:$0xff]  ;;  %v11864_v48 = vld [vmem:[%s33247_s3 + $0xb8] sm:$0xff] }
 0x864   : > { %25280 = vmatprep.subr.bf16.mxu1 %v33402_v46 }
 0x866   : > { %12703 = vmatmul.mubr.f32.gmra.mrb[126].mxu1 %v11869_v4  ;;  %v11863_v4 = vld [vmem:[%s33247_s3 + $0xb0] sm:$0xff] }
 0x867   : > { %25282 = vmatpush1.bf16.msra.mxu1 %v25281_v15  ;;  %12707 = vmatprep.mubr.f32.mxu1 %v11878_v34  ;;  %v11910_v15 = vld [vmem:[%s33247_s3 + $0x228] sm:$0xff]  ;;  %v11872_v34 = vld [vmem:[%s33247_s3 + $0xf8] sm:$0xff] }
 0x868   : > { %25283 = vmatprep.subr.bf16.mxu1 %v33402_v46 }
 0x86a   : > { %12708 = vmatmul.mubr.f32.gmra.mrb[128].mxu1 %v11877_v49  ;;  %v11871_v49 = vld [vmem:[%s33247_s3 + $0xf0] sm:$0xff] }
 0x86b   : > { %25285 = vmatpush1.bf16.msra.mxu1 %v25284_v52  ;;  %12712 = vmatprep.mubr.f32.mxu1 %v11886_v59  ;;  %v11917_v52 = vld [vmem:[%s33247_s3 + $0x260] sm:$0xff]  ;;  %v11880_v59 = vld [vmem:[%s33247_s3 + $0x138] sm:$0xff] }
 0x86c   : > { %25286 = vmatprep.subr.bf16.mxu1 %v33402_v46 }
 0x86e   : > { %12713 = vmatmul.mubr.f32.gmra.mrb[130].mxu1 %v11885_v1  ;;  %v11879_v1 = vld [vmem:[%s33247_s3 + $0x130] sm:$0xff] }
 0x86f   : > { %25288 = vmatpush1.bf16.msra.mxu1 %v25287_v25  ;;  %12717 = vmatprep.mubr.f32.mxu1 %v11894_v60  ;;  %v11934_v25 = vld [vmem:[%s33247_s3 + $0x2e8] sm:$0xff]  ;;  %v11888_v60 = vld [vmem:[%s33247_s3 + $0x178] sm:$0xff] }
 0x870   : > { %25289 = vmatprep.subr.bf16.mxu1 %v33402_v46 }
 0x872   : > { %12718 = vmatmul.mubr.f32.gmra.mrb[132].mxu1 %v11893_v32  ;;  %v11887_v32 = vld [vmem:[%s33247_s3 + $0x170] sm:$0xff] }
 0x873   : > { %25291 = vmatpush1.bf16.msra.mxu1 %v25290_v63  ;;  %12722 = vmatprep.mubr.f32.mxu1 %v11902_v40  ;;  %v11941_v63 = vld [vmem:[%s33247_s3 + $0x320] sm:$0xff]  ;;  %v11896_v40 = vld [vmem:[%s33247_s3 + $0x1b8] sm:$0xff] }
 0x874   : > { %25292 = vmatprep.subr.bf16.mxu1 %v33402_v46 }
 0x876   : > { %12723 = vmatmul.mubr.f32.gmra.mrb[134].mxu1 %v11901_v27  ;;  %v11895_v27 = vld [vmem:[%s33247_s3 + $0x1b0] sm:$0xff] }
 0x877   : > { %25294 = vmatpush1.bf16.msra.mxu1 %v25293_v0  ;;  %12727 = vmatprep.mubr.f32.mxu1 %v11910_v15  ;;  %v11958_v0 = vld [vmem:[%s33247_s3 + $0x3a8] sm:$0xff]  ;;  %v11904_v15 = vld [vmem:[%s33247_s3 + $0x1f8] sm:$0xff] }
 0x878   : > { %25295 = vmatprep.subr.bf16.mxu1 %v33402_v46 }
 0x87a   : > { %12728 = vmatmul.mubr.f32.gmra.mrb[136].mxu1 %v11909_v11  ;;  %v11903_v11 = vld [vmem:[%s33247_s3 + $0x1f0] sm:$0xff] }
 0x87b   : > { %25297 = vmatpush1.bf16.msra.mxu1 %v25296_v19  ;;  %12732 = vmatprep.mubr.f32.mxu1 %v11918_v10  ;;  %v11965_v19 = vld [vmem:[%s33247_s3 + $0x3e0] sm:$0xff]  ;;  %v11912_v10 = vld [vmem:[%s33247_s3 + $0x238] sm:$0xff] }
 0x87c   : > { %25298 = vmatprep.subr.bf16.mxu1 %v33402_v46 }
 0x87e   : > { %12733 = vmatmul.mubr.f32.gmra.mrb[138].mxu1 %v11917_v52  ;;  %v11911_v52 = vld [vmem:[%s33247_s3 + $0x230] sm:$0xff] }
 0x87f   : > { %25300 = vmatpush1.bf16.msra.mxu1 %v25299_v44  ;;  %12737 = vmatprep.mubr.f32.mxu1 %v11926_v22  ;;  %v11982_v44 = vld [vmem:[%s33247_s3 + $0x468] sm:$0xff]  ;;  %v11920_v22 = vld [vmem:[%s33247_s3 + $0x278] sm:$0xff] }
 0x880   : > { %25301 = vmatprep.subr.bf16.mxu1 %v33402_v46 }
 0x882   : > { %12738 = vmatmul.mubr.f32.gmra.mrb[140].mxu1 %v11925_v33  ;;  %v11919_v33 = vld [vmem:[%s33247_s3 + $0x270] sm:$0xff] }
 0x883   : > { %25303 = vmatpush1.bf16.msra.mxu1 %v25302_v58  ;;  %12742 = vmatprep.mubr.f32.mxu1 %v11934_v25  ;;  %v11989_v58 = vld [vmem:[%s33247_s3 + $0x4a0] sm:$0xff]  ;;  %v11928_v25 = vld [vmem:[%s33247_s3 + $0x2b8] sm:$0xff] }
 0x884   : > { %25304 = vmatprep.subr.bf16.mxu1 %v33402_v46 }
 0x886   : > { %12743 = vmatmul.mubr.f32.gmra.mrb[142].mxu1 %v11933_v38  ;;  %v11927_v38 = vld [vmem:[%s33247_s3 + $0x2b0] sm:$0xff] }
 0x887   : > { %25306 = vmatpush1.bf16.msra.mxu1 %v25305_v20  ;;  %12747 = vmatprep.mubr.f32.mxu1 %v11942_v24  ;;  %v12006_v20 = vld [vmem:[%s33247_s3 + $0x528] sm:$0xff]  ;;  %v11936_v24 = vld [vmem:[%s33247_s3 + $0x2f8] sm:$0xff] }
 0x888   : > { %25308 = vmatprep.subr.bf16.mxu1 %v25307_v39 }
 0x88a   : > { %12748 = vmatmul.mubr.f32.gmra.mrb[144].mxu1 %v11941_v63  ;;  %v11935_v63 = vld [vmem:[%s33247_s3 + $0x2f0] sm:$0xff] }
 0x88b   : > { %12752 = vmatprep.mubr.f32.mxu1 %v11950_v5  ;;  %v11944_v5 = vld [vmem:[%s33247_s3 + $0x338] sm:$0xff] }
 0x88e   : > { %12753 = vmatmul.mubr.f32.gmra.mrb[146].mxu1 %v11949_v2  ;;  %v11943_v2 = vld [vmem:[%s33247_s3 + $0x330] sm:$0xff] }
 0x88f   : > { %12757 = vmatprep.mubr.f32.mxu1 %v11958_v0  ;;  %v11952_v0 = vld [vmem:[%s33247_s3 + $0x378] sm:$0xff] }
 0x892   : > { %12758 = vmatmul.mubr.f32.gmra.mrb[148].mxu1 %v11957_v3  ;;  %v11951_v3 = vld [vmem:[%s33247_s3 + $0x370] sm:$0xff] }
 0x893   : > { %12762 = vmatprep.mubr.f32.mxu1 %v11966_v21  ;;  %v11960_v21 = vld [vmem:[%s33247_s3 + $0x3b8] sm:$0xff] }
 0x896   : > { %12763 = vmatmul.mubr.f32.gmra.mrb[150].mxu1 %v11965_v19  ;;  %v11959_v19 = vld [vmem:[%s33247_s3 + $0x3b0] sm:$0xff] }
 0x897   : > { %12767 = vmatprep.mubr.f32.mxu1 %v11974_v62  ;;  %v11968_v62 = vld [vmem:[%s33247_s3 + $0x3f8] sm:$0xff] }
 0x89a   : > { %12768 = vmatmul.mubr.f32.gmra.mrb[152].mxu1 %v11973_v36  ;;  %v11967_v36 = vld [vmem:[%s33247_s3 + $0x3f0] sm:$0xff] }
 0x89b   : > { %12772 = vmatprep.mubr.f32.mxu1 %v11982_v44  ;;  %v11976_v44 = vld [vmem:[%s33247_s3 + $0x438] sm:$0xff] }
 0x89e   : > { %12773 = vmatmul.mubr.f32.gmra.mrb[154].mxu1 %v11981_v35  ;;  %v11975_v35 = vld [vmem:[%s33247_s3 + $0x430] sm:$0xff] }
 0x89f   : > { %12777 = vmatprep.mubr.f32.mxu1 %v11990_v28  ;;  %v11984_v28 = vld [vmem:[%s33247_s3 + $0x478] sm:$0xff] }
 0x8a2   : > { %12778 = vmatmul.mubr.f32.gmra.mrb[156].mxu1 %v11989_v58  ;;  %v11983_v58 = vld [vmem:[%s33247_s3 + $0x470] sm:$0xff] }
 0x8a3   : > { %12782 = vmatprep.mubr.f32.mxu1 %v11998_v29  ;;  %v11992_v29 = vld [vmem:[%s33247_s3 + $0x4b8] sm:$0xff] }
 0x8a6   : > { %12783 = vmatmul.mubr.f32.gmra.mrb[158].mxu1 %v11997_v16  ;;  %v11991_v16 = vld [vmem:[%s33247_s3 + $0x4b0] sm:$0xff] }
 0x8a7   : > { %12787 = vmatprep.mubr.f32.mxu1 %v12006_v20  ;;  %v12000_v20 = vld [vmem:[%s33247_s3 + $0x4f8] sm:$0xff] }
 0x8aa   : > { %12788 = vmatmul.mubr.f32.gmra.mrb[160].mxu1 %v12005_v50  ;;  %v11999_v50 = vld [vmem:[%s33247_s3 + $0x4f0] sm:$0xff] }
 0x8ab   : > { %12792 = vmatprep.mubr.f32.mxu1 %v12014_v56  ;;  %v12008_v56 = vld [vmem:[%s33247_s3 + $0x538] sm:$0xff] }
 0x8ae   : > { %12793 = vmatmul.mubr.f32.gmra.mrb[162].mxu1 %v12013_v26  ;;  %v12007_v26 = vld [vmem:[%s33247_s3 + $0x530] sm:$0xff] }
 0x8af   : > { %12797 = vmatprep.mubr.f32.mxu1 %v12022_v18  ;;  %v12016_v18 = vld [vmem:[%s33247_s3 + $0x578] sm:$0xff] }
 0x8b2   : > { %12798 = vmatmul.mubr.f32.gmra.mrb[164].mxu1 %v12021_v9  ;;  %v12015_v9 = vld [vmem:[%s33247_s3 + $0x570] sm:$0xff] }
 0x8b3   : > { %12802 = vmatprep.mubr.f32.mxu1 %v12030_v41  ;;  %v12024_v41 = vld [vmem:[%s33247_s3 + $0x5b8] sm:$0xff] }
 0x8b6   : > { %12803 = vmatmul.mubr.f32.gmra.mrb[166].mxu1 %v12029_v45  ;;  %v12023_v45 = vld [vmem:[%s33247_s3 + $0x5b0] sm:$0xff] }
 0x8b7   : > { %12807 = vmatprep.mubr.f32.mxu1 %v12038_v43  ;;  %v12032_v43 = vld [vmem:[%s33247_s3 + $0x5f8] sm:$0xff] }
 0x8ba   : > { %12808 = vmatmul.mubr.f32.gmra.mrb[168].mxu1 %v12037_v54  ;;  %v12031_v54 = vld [vmem:[%s33247_s3 + $0x5f0] sm:$0xff] }
 0x8bb   : > { %12812 = vmatprep.mubr.f32.mxu1 %v12046_v61  ;;  %v12040_v61 = vld [vmem:[%s33247_s3 + $0x638] sm:$0xff] }
 0x8be   : > { %12813 = vmatmul.mubr.f32.gmra.mrb[170].mxu1 %v12045_v53  ;;  %v12039_v53 = vld [vmem:[%s33247_s3 + $0x630] sm:$0xff] }
 0x8bf   : > { %12817 = vmatprep.mubr.f32.mxu1 %v12054_v55  ;;  %v12048_v55 = vld [vmem:[%s33247_s3 + $0x678] sm:$0xff] }
 0x8c2   : > { %12818 = vmatmul.mubr.f32.gmra.mrb[172].mxu1 %v12053_v37  ;;  %v12047_v37 = vld [vmem:[%s33247_s3 + $0x670] sm:$0xff] }
 0x8c3   : > { %12822 = vmatprep.mubr.f32.mxu1 %v12062_v23  ;;  %v12056_v23 = vld [vmem:[%s33247_s3 + $0x6b8] sm:$0xff] }
 0x8c6   : > { %12823 = vmatmul.mubr.f32.gmra.mrb[174].mxu1 %v12061_v8  ;;  %v12055_v8 = vld [vmem:[%s33247_s3 + $0x6b0] sm:$0xff] }
 0x8c7   : > { %12827 = vmatprep.mubr.f32.mxu1 %v12070_v31  ;;  %v12064_v31 = vld [vmem:[%s33247_s3 + $0x6f8] sm:$0xff] }
 0x8ca   : > { %12828 = vmatmul.mubr.f32.gmra.mrb[176].mxu1 %v12069_v12  ;;  %v12063_v12 = vld [vmem:[%s33247_s3 + $0x6f0] sm:$0xff] }
 0x8cb   : > { %12832 = vmatprep.mubr.f32.mxu1 %v12078_v17  ;;  %v12072_v17 = vld [vmem:[%s33247_s3 + $0x738] sm:$0xff] }
 0x8ce   : > { %12833 = vmatmul.mubr.f32.gmra.mrb[178].mxu1 %v12077_v42  ;;  %v12071_v42 = vld [vmem:[%s33247_s3 + $0x730] sm:$0xff] }
 0x8cf   : > { %12837 = vmatprep.mubr.f32.mxu1 %v12086_v14  ;;  %v12080_v14 = vld [vmem:[%s33247_s3 + $0x778] sm:$0xff] }
 0x8d2   : > { %12838 = vmatmul.mubr.f32.gmra.mrb[180].mxu1 %v12085_v51  ;;  %v12087_v51 = vld [vmem:[%s33247_s3 + $0x7b0] sm:$0xff] }
 0x8d3   : > { %20506 = vmatprep.mubr.msk.f32.mxu1 %vm12089_vm2, %v11848_v47  ;;  %v13120_v47 = vld [vmem:[%s33248_s4 + $0x8] sm:$0xff] }
 0x8d6   : > { %12908 = vmatmul.mubr.f32.vlgmr.msra.gmra.mrb[120].mxu1 %v11847_v57 }
 0x8d7   : > { %20507 = vmatprep.mubr.msk.f32.mxu1 %vm12089_vm2, %v11856_v6  ;;  %25310 = vmatpush3.bf16.msra.mxu1 %v25307_v39  ;;  %v13119_v39 = vld [vmem:[%s33248_s4] sm:$0xff] }
 0x8d8   : > { %v25311_v57 = vpack.c.bf16 %v13120_v47, %v13119_v39 }
 0x8da   : > { %12913 = vmatmul.mubr.f32.gmra.mrb[122].mxu1 %v11855_v13  ;;  %25312 = vmatprep.subr.bf16.mxu1 %v25311_v57 }
 0x8db   : > { %20508 = vmatprep.mubr.msk.f32.mxu1 %vm12089_vm2, %v11864_v48 }
 0x8de   : > { %12918 = vmatmul.mubr.f32.gmra.mrb[124].mxu1 %v11863_v4 }
 0x8df   : > { %20509 = vmatprep.mubr.msk.f32.mxu1 %vm12089_vm2, %v11872_v34 }
 0x8e2   : > { %12923 = vmatmul.mubr.f32.gmra.mrb[126].mxu1 %v11871_v49 }
 0x8e3   : > { %20510 = vmatprep.mubr.msk.f32.mxu1 %vm12089_vm2, %v11880_v59 }
 0x8e6   : > { %12928 = vmatmul.mubr.f32.gmra.mrb[128].mxu1 %v11879_v1 }
 0x8e7   : > { %20511 = vmatprep.mubr.msk.f32.mxu1 %vm12089_vm2, %v11888_v60 }
 0x8ea   : > { %12933 = vmatmul.mubr.f32.gmra.mrb[130].mxu1 %v11887_v32 }
 0x8eb   : > { %20512 = vmatprep.mubr.msk.f32.mxu1 %vm12089_vm2, %v11896_v40 }
 0x8ee   : > { %12938 = vmatmul.mubr.f32.gmra.mrb[132].mxu1 %v11895_v27 }
 0x8ef   : > { %20513 = vmatprep.mubr.msk.f32.mxu1 %vm12089_vm2, %v11904_v15 }
 0x8f2   : > { %12943 = vmatmul.mubr.f32.gmra.mrb[134].mxu1 %v11903_v11 }
 0x8f3   : > { %20514 = vmatprep.mubr.msk.f32.mxu1 %vm12089_vm2, %v11912_v10 }
 0x8f6   : > { %12948 = vmatmul.mubr.f32.gmra.mrb[136].mxu1 %v11911_v52  ;;  %v13685_v52 = vld [vmem:[%s33248_s4 + $0x20] sm:$0xff] }
 0x8f7   : > { %20515 = vmatprep.mubr.msk.f32.mxu1 %vm12089_vm2, %v11920_v22  ;;  %v13686_v22 = vld [vmem:[%s33248_s4 + $0x28] sm:$0xff] }
 0x8fa   : > { %12953 = vmatmul.mubr.f32.gmra.mrb[138].mxu1 %v11919_v33 }
 0x8fb   : > { %20516 = vmatprep.mubr.msk.f32.mxu1 %vm12089_vm2, %v11928_v25 }
 0x8fe   : > { %12958 = vmatmul.mubr.f32.gmra.mrb[140].mxu1 %v11927_v38  ;;  %v31719_v38 = vpack.c.bf16 %v13686_v22, %v13685_v52 }
 0x8ff   : > { %20517 = vmatprep.mubr.msk.f32.mxu1 %vm12089_vm2, %v11936_v24 }
 0x902   : > { %12963 = vmatmul.mubr.f32.gmra.mrb[142].mxu1 %v11935_v63 }
 0x903   : > { %20518 = vmatprep.mubr.msk.f32.mxu1 %vm12089_vm2, %v11944_v5 }
 0x906   : > { %12968 = vmatmul.mubr.f32.gmra.mrb[144].mxu1 %v11943_v2 }
 0x907   : > { %20519 = vmatprep.mubr.msk.f32.mxu1 %vm12089_vm2, %v11952_v0 }
 0x90a   : > { %12973 = vmatmul.mubr.f32.gmra.mrb[146].mxu1 %v11951_v3 }
 0x90b   : > { %20520 = vmatprep.mubr.msk.f32.mxu1 %vm12089_vm2, %v11960_v21 }
 0x90e   : > { %12978 = vmatmul.mubr.f32.gmra.mrb[148].mxu1 %v11959_v19 }
 0x90f   : > { %20521 = vmatprep.mubr.msk.f32.mxu1 %vm12089_vm2, %v11968_v62 }
 0x912   : > { %12983 = vmatmul.mubr.f32.gmra.mrb[150].mxu1 %v11967_v36 }
 0x913   : > { %20522 = vmatprep.mubr.msk.f32.mxu1 %vm12089_vm2, %v11976_v44 }
 0x916   : > { %12988 = vmatmul.mubr.f32.gmra.mrb[152].mxu1 %v11975_v35 }
 0x917   : > { %20523 = vmatprep.mubr.msk.f32.mxu1 %vm12089_vm2, %v11984_v28 }
 0x91a   : > { %12993 = vmatmul.mubr.f32.gmra.mrb[154].mxu1 %v11983_v58 }
 0x91b   : > { %20524 = vmatprep.mubr.msk.f32.mxu1 %vm12089_vm2, %v11992_v29 }
 0x91e   : > { %12998 = vmatmul.mubr.f32.gmra.mrb[156].mxu1 %v11991_v16 }
 0x91f   : > { %20525 = vmatprep.mubr.msk.f32.mxu1 %vm12089_vm2, %v12000_v20 }
 0x922   : > { %13003 = vmatmul.mubr.f32.gmra.mrb[158].mxu1 %v11999_v50 }
 0x923   : > { %20526 = vmatprep.mubr.msk.f32.mxu1 %vm12089_vm2, %v12008_v56 }
 0x926   : > { %13008 = vmatmul.mubr.f32.gmra.mrb[160].mxu1 %v12007_v26 }
 0x927   : > { %20527 = vmatprep.mubr.msk.f32.mxu1 %vm12089_vm2, %v12016_v18 }
 0x92a   : > { %13013 = vmatmul.mubr.f32.gmra.mrb[162].mxu1 %v12015_v9 }
 0x92b   : > { %20528 = vmatprep.mubr.msk.f32.mxu1 %vm12089_vm2, %v12024_v41 }
 0x92e   : > { %13018 = vmatmul.mubr.f32.gmra.mrb[164].mxu1 %v12023_v45 }
 0x92f   : > { %20529 = vmatprep.mubr.msk.f32.mxu1 %vm12089_vm2, %v12032_v43 }
 0x932   : > { %13023 = vmatmul.mubr.f32.gmra.mrb[166].mxu1 %v12031_v54 }
 0x933   : > { %20530 = vmatprep.mubr.msk.f32.mxu1 %vm12089_vm2, %v12040_v61 }
 0x936   : > { %13028 = vmatmul.mubr.f32.gmra.mrb[168].mxu1 %v12039_v53 }
 0x937   : > { %20531 = vmatprep.mubr.msk.f32.mxu1 %vm12089_vm2, %v12048_v55 }
 0x93a   : > { %13033 = vmatmul.mubr.f32.gmra.mrb[170].mxu1 %v12047_v37 }
 0x93b   : > { %20532 = vmatprep.mubr.msk.f32.mxu1 %vm12089_vm2, %v12056_v23 }
 0x93e   : > { %13038 = vmatmul.mubr.f32.gmra.mrb[172].mxu1 %v12055_v8 }
 0x93f   : > { %20533 = vmatprep.mubr.msk.f32.mxu1 %vm12089_vm2, %v12064_v31 }
 0x942   : > { %13043 = vmatmul.mubr.f32.gmra.mrb[174].mxu1 %v12063_v12 }
 0x943   : > { %20534 = vmatprep.mubr.msk.f32.mxu1 %vm12089_vm2, %v12072_v17 }
 0x946   : > { %13048 = vmatmul.mubr.f32.gmra.mrb[176].mxu1 %v12071_v42 }
 0x947   : > { %20535 = vmatprep.mubr.msk.f32.mxu1 %vm12089_vm2, %v12080_v14 }
 0x94a   : > { %13053 = vmatmul.mubr.f32.gmra.mrb[178].mxu1 %v12079_v7 }
 0x94b   : > { %20536 = vmatprep.mubr.msk.f32.mxu1 %vm12089_vm2, %v12088_v30 }
 0x94e   : > { %13058 = vmatmul.mubr.f32.gmra.mrb[180].mxu1 %v12087_v51 }
 0x9a9   : > { %v12909_v6 = vpop.f32.mrb[120].mxu1 }
 0x9aa   : > { %13064 = vst.msk [vmem:[#allocation2] sm:$0xff] %vm13063_vm3, %v12909_v6  ;;  %v12911_v13 = vpop.f32.mrb[121].mxu1 }
 0x9ad   : > { %v12914_v48 = vpop.f32.mrb[122].mxu1 }
 0x9ae   : > { %13065 = vst.msk [vmem:[#allocation2 + $0x8] sm:$0xff] %vm13063_vm3, %v12914_v48  ;;  %v12916_v4 = vpop.f32.mrb[123].mxu1 }
 0x9b1   : > { %v12919_v34 = vpop.f32.mrb[124].mxu1 }
 0x9b2   : > { %13066 = vst.msk [vmem:[#allocation2 + $0x10] sm:$0xff] %vm13063_vm3, %v12919_v34  ;;  %v12921_v49 = vpop.f32.mrb[125].mxu1 }
 0x9b5   : > { %v12924_v59 = vpop.f32.mrb[126].mxu1  ;;  %v13121_v1 = vld [vmem:[#allocation2 + $0x1] sm:$0xff] }
 0x9b6   : > { %13067 = vst.msk [vmem:[#allocation2 + $0x18] sm:$0xff] %vm13063_vm3, %v12924_v59  ;;  %v12926_v60 = vpop.f32.mrb[127].mxu1  ;;  %24247 = vmatprep.mubr.msk.f32.mxu1 %vm13063_vm3, %v13121_v1 }
 0x9b9   : > { %v12929_v32 = vpop.f32.mrb[128].mxu1  ;;  %v13122_v40 = vld [vmem:[#allocation2 + $0x9] sm:$0xff] }
 0x9ba   : > { %13068 = vst.msk [vmem:[#allocation2 + $0x20] sm:$0xff] %vm13063_vm3, %v12929_v32  ;;  %v12931_v27 = vpop.f32.mrb[129].mxu1  ;;  %24248 = vmatmul.mubr.msk.f32.vlgmr.msra.gmra.mrb[182].mxu1 %vm13063_vm3, %v13122_v40 }
 0x9bb   : > { %25314 = vmatpush3.bf16.msra.mxu1 %v25311_v57 }
 0x9bc   : > { %25316 = vmatprep.subr.bf16.mxu1 %v31719_v38 }
 0x9bd   : > { %v12934_v15 = vpop.f32.mrb[130].mxu1  ;;  %v31706_v11 = vld [vmem:[#allocation2 + $0x11] sm:$0xff] }
 0x9be   : > { %13069 = vst.msk [vmem:[#allocation2 + $0x28] sm:$0xff] %vm13063_vm3, %v12934_v15  ;;  %v12936_v10 = vpop.f32.mrb[131].mxu1  ;;  %24250 = vmatprep.mubr.msk.f32.mxu1 %vm13063_vm3, %v31706_v11 }
 0x9c1   : > { %v12939_v33 = vpop.f32.mrb[132].mxu1  ;;  %v31717_v25 = vld [vmem:[#allocation2 + $0x19] sm:$0xff] }
 0x9c2   : > { %13070 = vst.msk [vmem:[#allocation2 + $0x30] sm:$0xff] %vm13063_vm3, %v12939_v33  ;;  %v12941_v24 = vpop.f32.mrb[133].mxu1  ;;  %24251 = vmatmul.mubr.msk.f32.gmra.mrb[184].mxu1 %vm13063_vm3, %v31717_v25 }
 0x9c3   : > { %v13992_v24 = vld [vmem:[%s33248_s4 + $0x30] sm:$0xff] }
 0x9c5   : > { %v12944_v63 = vpop.f32.mrb[134].mxu1  ;;  %v31725_v5 = vld [vmem:[#allocation2 + $0x21] sm:$0xff] }
 0x9c6   : > { %13071 = vst.msk [vmem:[#allocation2 + $0x38] sm:$0xff] %vm13063_vm3, %v12944_v63  ;;  %v12946_v2 = vpop.f32.mrb[135].mxu1  ;;  %24253 = vmatprep.mubr.msk.f32.mxu1 %vm13063_vm3, %v31725_v5  ;;  %v13993_v63 = vld [vmem:[%s33248_s4 + $0x38] sm:$0xff] }
 0x9c9   : > { %v12949_v0 = vpop.f32.mrb[136].mxu1  ;;  %v31730_v3 = vld [vmem:[#allocation2 + $0x29] sm:$0xff] }
 0x9ca   : > { %13072 = vst.msk [vmem:[#allocation2 + $0x40] sm:$0xff] %vm13063_vm3, %v12949_v0  ;;  %v12951_v21 = vpop.f32.mrb[137].mxu1  ;;  %24254 = vmatmul.mubr.msk.f32.gmra.mrb[186].mxu1 %vm13063_vm3, %v31730_v3  ;;  %v13095_v0 = vld [vmem:[#allocation2] sm:$0xff] }
 0x9cb   : > { %v31832_v21 = vpack.c.bf16 %v13993_v63, %v13992_v24  ;;  %v31937_v24 = vld [vmem:[#allocation2 + $0x12] sm:$0xff]  ;;  %v31942_v63 = vld [vmem:[#allocation2 + $0x1a] sm:$0xff] }
 0x9cd   : > { %v12954_v19 = vpop.f32.mrb[138].mxu1  ;;  %v31735_v62 = vld [vmem:[#allocation2 + $0x31] sm:$0xff] }
 0x9ce   : > { %13073 = vst.msk [vmem:[#allocation2 + $0x48] sm:$0xff] %vm13063_vm3, %v12954_v19  ;;  %v12956_v36 = vpop.f32.mrb[139].mxu1  ;;  %24256 = vmatprep.mubr.msk.f32.mxu1 %vm13063_vm3, %v31735_v62 }
 0x9cf   : > { %v13096_v36 = vld [vmem:[#allocation2 + $0x8] sm:$0xff] }
 0x9d1   : > { %v12959_v44 = vpop.f32.mrb[140].mxu1  ;;  %v31740_v35 = vld [vmem:[#allocation2 + $0x39] sm:$0xff] }
 0x9d2   : > { %13074 = vst.msk [vmem:[#allocation2 + $0x50] sm:$0xff] %vm13063_vm3, %v12959_v44  ;;  %v12961_v28 = vpop.f32.mrb[141].mxu1  ;;  %24257 = vmatmul.mubr.msk.f32.gmra.mrb[188].mxu1 %vm13063_vm3, %v31740_v35 }
 0x9d3   : > { %v31836_v28 = vld [vmem:[#allocation2 + $0x10] sm:$0xff] }
 0x9d5   : > { %v12964_v58 = vpop.f32.mrb[142].mxu1  ;;  %v31745_v29 = vld [vmem:[#allocation2 + $0x41] sm:$0xff] }
 0x9d6   : > { %13075 = vst.msk [vmem:[#allocation2 + $0x58] sm:$0xff] %vm13063_vm3, %v12964_v58  ;;  %v12966_v16 = vpop.f32.mrb[143].mxu1  ;;  %24259 = vmatprep.mubr.msk.f32.mxu1 %vm13063_vm3, %v31745_v29 }
 0x9d7   : > { %v31842_v16 = vld [vmem:[#allocation2 + $0x18] sm:$0xff] }
 0x9d9   : > { %v12969_v20 = vpop.f32.mrb[144].mxu1  ;;  %v31750_v50 = vld [vmem:[#allocation2 + $0x49] sm:$0xff] }
 0x9da   : > { %13076 = vst.msk [vmem:[#allocation2 + $0x60] sm:$0xff] %vm13063_vm3, %v12969_v20  ;;  %v12971_v56 = vpop.f32.mrb[145].mxu1  ;;  %24260 = vmatmul.mubr.msk.f32.gmra.mrb[190].mxu1 %vm13063_vm3, %v31750_v50 }
 0x9db   : > { %v31847_v56 = vld [vmem:[#allocation2 + $0x20] sm:$0xff] }
 0x9dd   : > { %v12974_v26 = vpop.f32.mrb[146].mxu1  ;;  %v31755_v18 = vld [vmem:[#allocation2 + $0x51] sm:$0xff] }
 0x9de   : > { %13077 = vst.msk [vmem:[#allocation2 + $0x68] sm:$0xff] %vm13063_vm3, %v12974_v26  ;;  %v12976_v9 = vpop.f32.mrb[147].mxu1  ;;  %24262 = vmatprep.mubr.msk.f32.mxu1 %vm13063_vm3, %v31755_v18 }
 0x9df   : > { %v31851_v9 = vld [vmem:[#allocation2 + $0x28] sm:$0xff] }
 0x9e1   : > { %v12979_v41 = vpop.f32.mrb[148].mxu1  ;;  %v31760_v45 = vld [vmem:[#allocation2 + $0x59] sm:$0xff] }
 0x9e2   : > { %13078 = vst.msk [vmem:[#allocation2 + $0x70] sm:$0xff] %vm13063_vm3, %v12979_v41  ;;  %v12981_v43 = vpop.f32.mrb[149].mxu1  ;;  %24263 = vmatmul.mubr.msk.f32.gmra.mrb[192].mxu1 %vm13063_vm3, %v31760_v45  ;;  %v31856_v41 = vld [vmem:[#allocation2 + $0x30] sm:$0xff] }
 0x9e5   : > { %v12984_v54 = vpop.f32.mrb[150].mxu1  ;;  %v31765_v61 = vld [vmem:[#allocation2 + $0x61] sm:$0xff] }
 0x9e6   : > { %13079 = vst.msk [vmem:[#allocation2 + $0x78] sm:$0xff] %vm13063_vm3, %v12984_v54  ;;  %v12986_v53 = vpop.f32.mrb[151].mxu1  ;;  %24265 = vmatprep.mubr.msk.f32.mxu1 %vm13063_vm3, %v31765_v61  ;;  %v31860_v54 = vld [vmem:[#allocation2 + $0x38] sm:$0xff] }
 0x9e9   : > { %v12989_v55 = vpop.f32.mrb[152].mxu1  ;;  %v31770_v37 = vld [vmem:[#allocation2 + $0x69] sm:$0xff] }
 0x9ea   : > { %13080 = vst.msk [vmem:[#allocation2 + $0x80] sm:$0xff] %vm13063_vm3, %v12989_v55  ;;  %v12991_v23 = vpop.f32.mrb[153].mxu1  ;;  %24266 = vmatmul.mubr.msk.f32.gmra.mrb[194].mxu1 %vm13063_vm3, %v31770_v37  ;;  %v31865_v55 = vld [vmem:[#allocation2 + $0x40] sm:$0xff] }
 0x9eb   : > { %v31869_v23 = vld [vmem:[#allocation2 + $0x48] sm:$0xff] }
 0x9ed   : > { %v12994_v8 = vpop.f32.mrb[154].mxu1  ;;  %v31775_v31 = vld [vmem:[#allocation2 + $0x71] sm:$0xff] }
 0x9ee   : > { %13081 = vst.msk [vmem:[#allocation2 + $0x88] sm:$0xff] %vm13063_vm3, %v12994_v8  ;;  %v12996_v12 = vpop.f32.mrb[155].mxu1  ;;  %24268 = vmatprep.mubr.msk.f32.mxu1 %vm13063_vm3, %v31775_v31  ;;  %v31873_v8 = vld [vmem:[#allocation2 + $0x50] sm:$0xff] }
 0x9ef   : > { %v31877_v12 = vld [vmem:[#allocation2 + $0x58] sm:$0xff] }
 0x9f1   : > { %v12999_v17 = vpop.f32.mrb[156].mxu1  ;;  %v31780_v42 = vld [vmem:[#allocation2 + $0x79] sm:$0xff] }
 0x9f2   : > { %13082 = vst.msk [vmem:[#allocation2 + $0x90] sm:$0xff] %vm13063_vm3, %v12999_v17  ;;  %v13001_v14 = vpop.f32.mrb[157].mxu1  ;;  %24269 = vmatmul.mubr.msk.f32.gmra.mrb[196].mxu1 %vm13063_vm3, %v31780_v42  ;;  %v31881_v17 = vld [vmem:[#allocation2 + $0x60] sm:$0xff] }
 0x9f3   : > { %v31885_v14 = vld [vmem:[#allocation2 + $0x68] sm:$0xff] }
 0x9f5   : > { %v13004_v7 = vpop.f32.mrb[158].mxu1  ;;  %v31785_v30 = vld [vmem:[#allocation2 + $0x81] sm:$0xff] }
 0x9f6   : > { %13083 = vst.msk [vmem:[#allocation2 + $0x98] sm:$0xff] %vm13063_vm3, %v13004_v7  ;;  %v13006_v51 = vpop.f32.mrb[159].mxu1  ;;  %24271 = vmatprep.mubr.msk.f32.mxu1 %vm13063_vm3, %v31785_v30  ;;  %v31889_v7 = vld [vmem:[#allocation2 + $0x70] sm:$0xff] }
 0x9f7   : > { %v31893_v51 = vld [vmem:[#allocation2 + $0x78] sm:$0xff] }
 0x9f9   : > { %v13009_v39 = vpop.f32.mrb[160].mxu1  ;;  %v31790_v47 = vld [vmem:[#allocation2 + $0x89] sm:$0xff] }
 0x9fa   : > { %13084 = vst.msk [vmem:[#allocation2 + $0xa0] sm:$0xff] %vm13063_vm3, %v13009_v39  ;;  %v13011_v57 = vpop.f32.mrb[161].mxu1  ;;  %24272 = vmatmul.mubr.msk.f32.gmra.mrb[198].mxu1 %vm13063_vm3, %v31790_v47  ;;  %v31897_v39 = vld [vmem:[#allocation2 + $0x80] sm:$0xff] }
 0x9fb   : > { %v31901_v57 = vld [vmem:[#allocation2 + $0x88] sm:$0xff] }
 0x9fd   : > { %v13014_v6 = vpop.f32.mrb[162].mxu1  ;;  %v31795_v13 = vld [vmem:[#allocation2 + $0x91] sm:$0xff] }
 0x9fe   : > { %13085 = vst.msk [vmem:[#allocation2 + $0xa8] sm:$0xff] %vm13063_vm3, %v13014_v6  ;;  %v13016_v48 = vpop.f32.mrb[163].mxu1  ;;  %24274 = vmatprep.mubr.msk.f32.mxu1 %vm13063_vm3, %v31795_v13  ;;  %v31905_v6 = vld [vmem:[#allocation2 + $0x90] sm:$0xff] }
 0x9ff   : > { %v31909_v48 = vld [vmem:[#allocation2 + $0x98] sm:$0xff] }
 0xa01   : > { %v13019_v4 = vpop.f32.mrb[164].mxu1  ;;  %v31800_v34 = vld [vmem:[#allocation2 + $0x99] sm:$0xff] }
 0xa02   : > { %13086 = vst.msk [vmem:[#allocation2 + $0xb0] sm:$0xff] %vm13063_vm3, %v13019_v4  ;;  %v13021_v49 = vpop.f32.mrb[165].mxu1  ;;  %24275 = vmatmul.mubr.msk.f32.gmra.mrb[200].mxu1 %vm13063_vm3, %v31800_v34  ;;  %v31913_v4 = vld [vmem:[#allocation2 + $0xa0] sm:$0xff] }
 0xa05   : > { %v13024_v59 = vpop.f32.mrb[166].mxu1  ;;  %v31805_v1 = vld [vmem:[#allocation2 + $0xa1] sm:$0xff] }
 0xa06   : > { %13087 = vst.msk [vmem:[#allocation2 + $0xb8] sm:$0xff] %vm13063_vm3, %v13024_v59  ;;  %v13026_v60 = vpop.f32.mrb[167].mxu1  ;;  %24277 = vmatprep.mubr.msk.f32.mxu1 %vm13063_vm3, %v31805_v1  ;;  %v31917_v49 = vld [vmem:[#allocation2 + $0xa8] sm:$0xff] }
 0xa07   : > { %v32010_v46 = vld [vmem:[#allocation2 + $0xa2] sm:$0xff] }
 0xa08   : > { %33484 = vst [vmem:[#allocation17_spill] sm:$0xff] %v32010_v46 }
 0xa09   : > { %v13029_v32 = vpop.f32.mrb[168].mxu1  ;;  %v31810_v40 = vld [vmem:[#allocation2 + $0xa9] sm:$0xff] }
 0xa0a   : > { %13088 = vst.msk [vmem:[#allocation2 + $0xc0] sm:$0xff] %vm13063_vm3, %v13029_v32  ;;  %v13031_v27 = vpop.f32.mrb[169].mxu1  ;;  %24278 = vmatmul.mubr.msk.f32.gmra.mrb[202].mxu1 %vm13063_vm3, %v31810_v40  ;;  %v31921_v59 = vld [vmem:[#allocation2 + $0xb0] sm:$0xff]  ;;  %v14299_v32 = vld [vmem:[%s33248_s4 + $0x40] sm:$0xff] }
 0xa0b   : > { %v14300_v27 = vld [vmem:[%s33248_s4 + $0x48] sm:$0xff] }
 0xa0d   : > { %v13034_v15 = vpop.f32.mrb[170].mxu1  ;;  %v31815_v10 = vld [vmem:[#allocation2 + $0xb1] sm:$0xff] }
 0xa0e   : > { %13089 = vst.msk [vmem:[#allocation2 + $0xc8] sm:$0xff] %vm13063_vm3, %v13034_v15  ;;  %v13036_v52 = vpop.f32.mrb[171].mxu1  ;;  %24280 = vmatprep.mubr.msk.f32.mxu1 %vm13063_vm3, %v31815_v10  ;;  %v31925_v60 = vld [vmem:[#allocation2 + $0xb8] sm:$0xff]  ;;  %v13661_v15 = vld [vmem:[#allocation2 + $0x2] sm:$0xff] }
 0xa0f   : > { %v25323_v52 = vpack.c.bf16 %v14300_v27, %v14299_v32  ;;  %v31994_v32 = vld [vmem:[#allocation2 + $0x82] sm:$0xff]  ;;  %v31998_v27 = vld [vmem:[#allocation2 + $0x8a] sm:$0xff] }
 0xa10   : > { %33480 = vst [vmem:[#allocation13_spill] sm:$0xff] %v31994_v32  ;;  %33481 = vst [vmem:[#allocation14_spill] sm:$0xff] %v31998_v27 }
 0xa11   : > { %v13039_v22 = vpop.f32.mrb[172].mxu1  ;;  %v31820_v33 = vld [vmem:[#allocation2 + $0xb9] sm:$0xff] }
 0xa12   : > { %13090 = vst.msk [vmem:[#allocation2 + $0xd0] sm:$0xff] %vm13063_vm3, %v13039_v22  ;;  %v13041_v2 = vpop.f32.mrb[173].mxu1  ;;  %24281 = vmatmul.mubr.msk.f32.gmra.mrb[204].mxu1 %vm13063_vm3, %v31820_v33  ;;  %v13662_v22 = vld [vmem:[#allocation2 + $0xa] sm:$0xff] }
 0xa13   : > { %24287 = vmatprep.mubr.msk.f32.mxu1 %vm13063_vm3, %v13095_v0  ;;  %v31946_v2 = vld [vmem:[#allocation2 + $0x22] sm:$0xff]  ;;  %v31950_v0 = vld [vmem:[#allocation2 + $0x2a] sm:$0xff] }
 0xa15   : > { %v13044_v19 = vpop.f32.mrb[174].mxu1 }
 0xa16   : > { %13091 = vst.msk [vmem:[#allocation2 + $0xd8] sm:$0xff] %vm13063_vm3, %v13044_v19  ;;  %v13046_v44 = vpop.f32.mrb[175].mxu1  ;;  %24288 = vmatmul.mubr.msk.f32.vlgmr.msra.gmra.mrb[182].mxu1 %vm13063_vm3, %v13096_v36  ;;  %v31954_v19 = vld [vmem:[#allocation2 + $0x32] sm:$0xff]  ;;  %v31962_v36 = vld [vmem:[#allocation2 + $0x42] sm:$0xff] }
 0xa17   : > { %24290 = vmatprep.mubr.msk.f32.mxu1 %vm13063_vm3, %v31836_v28  ;;  %25318 = vmatpush3.bf16.msra.mxu1 %v31719_v38  ;;  %v31966_v44 = vld [vmem:[#allocation2 + $0x4a] sm:$0xff] }
 0xa18   : > { %25320 = vmatprep.subr.bf16.mxu1 %v31832_v21 }
 0xa19   : > { %v13049_v58 = vpop.f32.mrb[176].mxu1 }
 0xa1a   : > { %13092 = vst.msk [vmem:[#allocation2 + $0xe0] sm:$0xff] %vm13063_vm3, %v13049_v58  ;;  %v13051_v20 = vpop.f32.mrb[177].mxu1  ;;  %24291 = vmatmul.mubr.msk.f32.gmra.mrb[184].mxu1 %vm13063_vm3, %v31842_v16  ;;  %v31970_v58 = vld [vmem:[#allocation2 + $0x52] sm:$0xff] }
 0xa1b   : > { %24293 = vmatprep.mubr.msk.f32.mxu1 %vm13063_vm3, %v31847_v56  ;;  %v31974_v20 = vld [vmem:[#allocation2 + $0x5a] sm:$0xff] }
 0xa1d   : > { %v13054_v26 = vpop.f32.mrb[178].mxu1 }
 0xa1e   : > { %13093 = vst.msk [vmem:[#allocation2 + $0xe8] sm:$0xff] %vm13063_vm3, %v13054_v26  ;;  %v13056_v38 = vpop.f32.mrb[179].mxu1  ;;  %24294 = vmatmul.mubr.msk.f32.gmra.mrb[186].mxu1 %vm13063_vm3, %v31851_v9  ;;  %v31978_v26 = vld [vmem:[#allocation2 + $0x62] sm:$0xff] }
 0xa1f   : > { %24296 = vmatprep.mubr.msk.f32.mxu1 %vm13063_vm3, %v31856_v41  ;;  %v31982_v38 = vld [vmem:[#allocation2 + $0x6a] sm:$0xff] }
 0xa20   : > { %33477 = vst [vmem:[#allocation10_spill] sm:$0xff] %v31982_v38 }
 0xa21   : > { %v13059_v43 = vpop.f32.mrb[180].mxu1 }
 0xa22   : > { %13094 = vst.msk [vmem:[#allocation2 + $0xf0] sm:$0xff] %vm13063_vm3, %v13059_v43  ;;  %v13061_v53 = vpop.f32.mrb[181].mxu1  ;;  %24297 = vmatmul.mubr.msk.f32.gmra.mrb[188].mxu1 %vm13063_vm3, %v31860_v54  ;;  %v31986_v43 = vld [vmem:[#allocation2 + $0x72] sm:$0xff] }
 0xa23   : > { %24299 = vmatprep.mubr.msk.f32.mxu1 %vm13063_vm3, %v31865_v55  ;;  %33478 = vst [vmem:[#allocation11_spill] sm:$0xff] %v31986_v43  ;;  %v31990_v53 = vld [vmem:[#allocation2 + $0x7a] sm:$0xff] }
 0xa24   : > { %33479 = vst [vmem:[#allocation12_spill] sm:$0xff] %v31990_v53 }
 0xa26   : > { %24300 = vmatmul.mubr.msk.f32.gmra.mrb[190].mxu1 %vm13063_vm3, %v31869_v23 }
 0xa27   : > { %24302 = vmatprep.mubr.msk.f32.mxu1 %vm13063_vm3, %v31873_v8 }
 0xa2a   : > { %24303 = vmatmul.mubr.msk.f32.gmra.mrb[192].mxu1 %vm13063_vm3, %v31877_v12 }
 0xa2b   : > { %24305 = vmatprep.mubr.msk.f32.mxu1 %vm13063_vm3, %v31881_v17 }
 0xa2e   : > { %24306 = vmatmul.mubr.msk.f32.gmra.mrb[194].mxu1 %vm13063_vm3, %v31885_v14 }
 0xa2f   : > { %24308 = vmatprep.mubr.msk.f32.mxu1 %vm13063_vm3, %v31889_v7 }
 0xa32   : > { %24309 = vmatmul.mubr.msk.f32.gmra.mrb[196].mxu1 %vm13063_vm3, %v31893_v51 }
 0xa33   : > { %24311 = vmatprep.mubr.msk.f32.mxu1 %vm13063_vm3, %v31897_v39 }
 0xa36   : > { %24312 = vmatmul.mubr.msk.f32.gmra.mrb[198].mxu1 %vm13063_vm3, %v31901_v57 }
 0xa37   : > { %24314 = vmatprep.mubr.msk.f32.mxu1 %vm13063_vm3, %v31905_v6 }
 0xa3a   : > { %24315 = vmatmul.mubr.msk.f32.gmra.mrb[200].mxu1 %vm13063_vm3, %v31909_v48 }
 0xa3b   : > { %24317 = vmatprep.mubr.msk.f32.mxu1 %vm13063_vm3, %v31913_v4 }
 0xa3e   : > { %24318 = vmatmul.mubr.msk.f32.gmra.mrb[202].mxu1 %vm13063_vm3, %v31917_v49 }
 0xa3f   : > { %24320 = vmatprep.mubr.msk.f32.mxu1 %vm13063_vm3, %v31921_v59 }
 0xa42   : > { %24321 = vmatmul.mubr.msk.f32.gmra.mrb[204].mxu1 %vm13063_vm3, %v31925_v60 }
 0xa43   : > { %24327 = vmatprep.mubr.msk.f32.mxu1 %vm13063_vm3, %v13661_v15  ;;  %v32002_v15 = vld [vmem:[#allocation2 + $0x92] sm:$0xff] }
 0xa44   : > { %33482 = vst [vmem:[#allocation15_spill] sm:$0xff] %v32002_v15 }
 0xa46   : > { %24328 = vmatmul.mubr.msk.f32.vlgmr.msra.gmra.mrb[182].mxu1 %vm13063_vm3, %v13662_v22  ;;  %v32006_v22 = vld [vmem:[#allocation2 + $0x9a] sm:$0xff] }
 0xa47   : > { %24330 = vmatprep.mubr.msk.f32.mxu1 %vm13063_vm3, %v31937_v24  ;;  %25322 = vmatpush3.bf16.msra.mxu1 %v31832_v21  ;;  %v31958_v21 = vld [vmem:[#allocation2 + $0x3a] sm:$0xff]  ;;  %33483 = vst [vmem:[#allocation16_spill] sm:$0xff] %v32006_v22 }
 0xa48   : > { %25324 = vmatprep.subr.bf16.mxu1 %v25323_v52 }
 0xa4a   : > { %24331 = vmatmul.mubr.msk.f32.gmra.mrb[184].mxu1 %vm13063_vm3, %v31942_v63 }
 0xa4b   : > { %24333 = vmatprep.mubr.msk.f32.mxu1 %vm13063_vm3, %v31946_v2 }
 0xa4e   : > { %24334 = vmatmul.mubr.msk.f32.gmra.mrb[186].mxu1 %vm13063_vm3, %v31950_v0 }
 0xa4f   : > { %24336 = vmatprep.mubr.msk.f32.mxu1 %vm13063_vm3, %v31954_v19 }
 0xa52   : > { %24337 = vmatmul.mubr.msk.f32.gmra.mrb[188].mxu1 %vm13063_vm3, %v31958_v21 }
 0xa53   : > { %24339 = vmatprep.mubr.msk.f32.mxu1 %vm13063_vm3, %v31962_v36 }
 0xa56   : > { %24340 = vmatmul.mubr.msk.f32.gmra.mrb[190].mxu1 %vm13063_vm3, %v31966_v44 }
 0xa57   : > { %24342 = vmatprep.mubr.msk.f32.mxu1 %vm13063_vm3, %v31970_v58 }
 0xa5a   : > { %24343 = vmatmul.mubr.msk.f32.gmra.mrb[192].mxu1 %vm13063_vm3, %v31974_v20 }
 0xa5b   : > { %24345 = vmatprep.mubr.msk.f32.mxu1 %vm13063_vm3, %v31978_v26 }
 0xa5e   : > { %24346 = vmatmul.mubr.msk.f32.gmra.mrb[194].mxu1 %vm13063_vm3, %v31982_v38  ;;  %v32038_v38 = vld [vmem:[#allocation2 + $0x1b] sm:$0xff] }
 0xa5f   : > { %24348 = vmatprep.mubr.msk.f32.mxu1 %vm13063_vm3, %v31986_v43  ;;  %v13969_v43 = vld [vmem:[#allocation2 + $0xb] sm:$0xff] }
 0xa62   : > { %24349 = vmatmul.mubr.msk.f32.gmra.mrb[196].mxu1 %vm13063_vm3, %v31990_v53  ;;  %v13968_v53 = vld [vmem:[#allocation2 + $0x3] sm:$0xff] }
 0xa63   : > { %24351 = vmatprep.mubr.msk.f32.mxu1 %vm13063_vm3, %v31994_v32  ;;  %v32014_v32 = vld [vmem:[#allocation2 + $0xaa] sm:$0xff] }
 0xa64   : > { %33485 = vst [vmem:[#allocation18_spill] sm:$0xff] %v32014_v32 }
 0xa66   : > { %24352 = vmatmul.mubr.msk.f32.gmra.mrb[198].mxu1 %vm13063_vm3, %v31998_v27  ;;  %v32018_v27 = vld [vmem:[#allocation2 + $0xb2] sm:$0xff] }
 0xa67   : > { %24354 = vmatprep.mubr.msk.f32.mxu1 %vm13063_vm3, %v32002_v15  ;;  %33486 = vst [vmem:[#allocation19_spill] sm:$0xff] %v32018_v27  ;;  %v32022_v15 = vld [vmem:[#allocation2 + $0xba] sm:$0xff] }
 0xa68   : > { %33487 = vst [vmem:[#allocation20_spill] sm:$0xff] %v32022_v15 }
 0xa6a   : > { %24355 = vmatmul.mubr.msk.f32.gmra.mrb[200].mxu1 %vm13063_vm3, %v32006_v22  ;;  %v14606_v22 = vld [vmem:[%s33248_s4 + $0x50] sm:$0xff] }
 0xa6b   : > { %24357 = vmatprep.mubr.msk.f32.mxu1 %vm13063_vm3, %v32010_v46  ;;  %v14607_v46 = vld [vmem:[%s33248_s4 + $0x58] sm:$0xff] }
 0xa6e   : > { %24358 = vmatmul.mubr.msk.f32.gmra.mrb[202].mxu1 %vm13063_vm3, %v32014_v32  ;;  %v25327_v32 = vpack.c.bf16 %v14607_v46, %v14606_v22  ;;  %v32046_v46 = vld [vmem:[#allocation2 + $0x2b] sm:$0xff] }
 0xa6f   : > { %24360 = vmatprep.mubr.msk.f32.mxu1 %vm13063_vm3, %v32018_v27  ;;  %v32034_v27 = vld [vmem:[#allocation2 + $0x13] sm:$0xff]  ;;  %33488 = vst [vmem:[#allocation21_spill] sm:$0xff] %v32046_v46  ;;  %v32062_v22 = vld [vmem:[#allocation2 + $0x4b] sm:$0xff] }
 0xa70   : > { %33492 = vst [vmem:[#allocation25_spill] sm:$0xff] %v32062_v22 }
 0xa72   : > { %24361 = vmatmul.mubr.msk.f32.gmra.mrb[204].mxu1 %vm13063_vm3, %v32022_v15  ;;  %v32042_v15 = vld [vmem:[#allocation2 + $0x23] sm:$0xff] }
 0xa73   : > { %24367 = vmatprep.mubr.msk.f32.mxu1 %vm13063_vm3, %v13968_v53  ;;  %v32058_v53 = vld [vmem:[#allocation2 + $0x43] sm:$0xff] }
 0xa74   : > { %33491 = vst [vmem:[#allocation24_spill] sm:$0xff] %v32058_v53 }
 0xa76   : > { %24368 = vmatmul.mubr.msk.f32.vlgmr.msra.gmra.mrb[182].mxu1 %vm13063_vm3, %v13969_v43  ;;  %v32050_v43 = vld [vmem:[#allocation2 + $0x33] sm:$0xff] }
 0xa77   : > { %24370 = vmatprep.mubr.msk.f32.mxu1 %vm13063_vm3, %v32034_v27  ;;  %25326 = vmatpush3.bf16.msra.mxu1 %v25323_v52  ;;  %33489 = vst [vmem:[#allocation22_spill] sm:$0xff] %v32050_v43  ;;  %v32054_v52 = vld [vmem:[#allocation2 + $0x3b] sm:$0xff] }
 0xa78   : > { %25328 = vmatprep.subr.bf16.mxu1 %v25327_v32  ;;  %33490 = vst [vmem:[#allocation23_spill] sm:$0xff] %v32054_v52 }
 0xa7a   : > { %24371 = vmatmul.mubr.msk.f32.gmra.mrb[184].mxu1 %vm13063_vm3, %v32038_v38 }
 0xa7b   : > { %24373 = vmatprep.mubr.msk.f32.mxu1 %vm13063_vm3, %v32042_v15 }
 0xa7e   : > { %24374 = vmatmul.mubr.msk.f32.gmra.mrb[186].mxu1 %vm13063_vm3, %v32046_v46  ;;  %v32066_v46 = vld [vmem:[#allocation2 + $0x53] sm:$0xff] }
 0xa7f   : > { %24376 = vmatprep.mubr.msk.f32.mxu1 %vm13063_vm3, %v32050_v43  ;;  %33493 = vst [vmem:[#allocation26_spill] sm:$0xff] %v32066_v46  ;;  %v32070_v43 = vld [vmem:[#allocation2 + $0x5b] sm:$0xff] }
 0xa80   : > { %33494 = vst [vmem:[#allocation27_spill] sm:$0xff] %v32070_v43 }
 0xa82   : > { %24377 = vmatmul.mubr.msk.f32.gmra.mrb[188].mxu1 %vm13063_vm3, %v32054_v52  ;;  %v32074_v52 = vld [vmem:[#allocation2 + $0x63] sm:$0xff] }
 0xa83   : > { %24379 = vmatprep.mubr.msk.f32.mxu1 %vm13063_vm3, %v32058_v53  ;;  %33495 = vst [vmem:[#allocation28_spill] sm:$0xff] %v32074_v52  ;;  %v32078_v53 = vld [vmem:[#allocation2 + $0x6b] sm:$0xff] }
 0xa84   : > { %33496 = vst [vmem:[#allocation29_spill] sm:$0xff] %v32078_v53 }
 0xa86   : > { %24380 = vmatmul.mubr.msk.f32.gmra.mrb[190].mxu1 %vm13063_vm3, %v32062_v22  ;;  %v32082_v22 = vld [vmem:[#allocation2 + $0x73] sm:$0xff] }
 0xa87   : > { %24382 = vmatprep.mubr.msk.f32.mxu1 %vm13063_vm3, %v32066_v46  ;;  %33497 = vst [vmem:[#allocation30_spill] sm:$0xff] %v32082_v22  ;;  %v32086_v46 = vld [vmem:[#allocation2 + $0x7b] sm:$0xff] }
 0xa88   : > { %33498 = vst [vmem:[#allocation31_spill] sm:$0xff] %v32086_v46 }
 0xa8a   : > { %24383 = vmatmul.mubr.msk.f32.gmra.mrb[192].mxu1 %vm13063_vm3, %v32070_v43  ;;  %v32090_v43 = vld [vmem:[#allocation2 + $0x83] sm:$0xff] }
 0xa8b   : > { %24385 = vmatprep.mubr.msk.f32.mxu1 %vm13063_vm3, %v32074_v52  ;;  %33499 = vst [vmem:[#allocation32_spill] sm:$0xff] %v32090_v43  ;;  %v32094_v52 = vld [vmem:[#allocation2 + $0x8b] sm:$0xff] }
 0xa8c   : > { %33500 = vst [vmem:[#allocation33_spill] sm:$0xff] %v32094_v52 }
 0xa8e   : > { %24386 = vmatmul.mubr.msk.f32.gmra.mrb[194].mxu1 %vm13063_vm3, %v32078_v53  ;;  %v32098_v53 = vld [vmem:[#allocation2 + $0x93] sm:$0xff] }
 0xa8f   : > { %24388 = vmatprep.mubr.msk.f32.mxu1 %vm13063_vm3, %v32082_v22  ;;  %33501 = vst [vmem:[#allocation34_spill] sm:$0xff] %v32098_v53  ;;  %v32102_v22 = vld [vmem:[#allocation2 + $0x9b] sm:$0xff] }
 0xa90   : > { %33502 = vst [vmem:[#allocation35_spill] sm:$0xff] %v32102_v22 }
 0xa92   : > { %24389 = vmatmul.mubr.msk.f32.gmra.mrb[196].mxu1 %vm13063_vm3, %v32086_v46  ;;  %v32106_v46 = vld [vmem:[#allocation2 + $0xa3] sm:$0xff] }
 0xa93   : > { %24391 = vmatprep.mubr.msk.f32.mxu1 %vm13063_vm3, %v32090_v43  ;;  %33503 = vst [vmem:[#allocation36_spill] sm:$0xff] %v32106_v46  ;;  %v32110_v43 = vld [vmem:[#allocation2 + $0xab] sm:$0xff] }
 0xa94   : > { %33504 = vst [vmem:[#allocation37_spill] sm:$0xff] %v32110_v43 }
 0xa96   : > { %24392 = vmatmul.mubr.msk.f32.gmra.mrb[198].mxu1 %vm13063_vm3, %v32094_v52  ;;  %v32114_v52 = vld [vmem:[#allocation2 + $0xb3] sm:$0xff] }
 0xa97   : > { %24394 = vmatprep.mubr.msk.f32.mxu1 %vm13063_vm3, %v32098_v53  ;;  %v32118_v53 = vld [vmem:[#allocation2 + $0xbb] sm:$0xff] }
 0xa98   : > { %33505 = vst [vmem:[#allocation38_spill] sm:$0xff] %v32118_v53 }
 0xa9a   : > { %24395 = vmatmul.mubr.msk.f32.gmra.mrb[200].mxu1 %vm13063_vm3, %v32102_v22  ;;  %v14913_v22 = vld [vmem:[%s33248_s4 + $0x60] sm:$0xff] }
 0xa9b   : > { %24397 = vmatprep.mubr.msk.f32.mxu1 %vm13063_vm3, %v32106_v46  ;;  %v14914_v46 = vld [vmem:[%s33248_s4 + $0x68] sm:$0xff] }
 0xa9e   : > { %24398 = vmatmul.mubr.msk.f32.gmra.mrb[202].mxu1 %vm13063_vm3, %v32110_v43  ;;  %v25331_v43 = vpack.c.bf16 %v14914_v46, %v14913_v22  ;;  %v15221_v46 = vld [vmem:[%s33248_s4 + $0x78] sm:$0xff] }
 0xa9f   : > { %24400 = vmatprep.mubr.msk.f32.mxu1 %vm13063_vm3, %v32114_v52 }
 0xaa2   : > { %24401 = vmatmul.mubr.msk.f32.gmra.mrb[204].mxu1 %vm13063_vm3, %v32118_v53 }
 0xaa3   : > { %24407 = vmatprep.mubr.msk.f32.mxu1 %vm13063_vm3, %v31836_v28  ;;  %v32172_v28 = vld [vmem:[#allocation2 + $0xc0] sm:$0xff] }
 0xaa6   : > { %24408 = vmatmul.mubr.msk.f32.vlgmr.msra.gmra.mrb[182].mxu1 %vm13063_vm3, %v31842_v16  ;;  %v32176_v16 = vld [vmem:[#allocation2 + $0xc8] sm:$0xff] }
 0xaa7   : > { %24410 = vmatprep.mubr.msk.f32.mxu1 %vm13063_vm3, %v31847_v56  ;;  %25330 = vmatpush3.bf16.msra.mxu1 %v25327_v32  ;;  %v15220_v32 = vld [vmem:[%s33248_s4 + $0x70] sm:$0xff] }
 0xaa8   : > { %25332 = vmatprep.subr.bf16.mxu1 %v25331_v43  ;;  %v25335_v22 = vpack.c.bf16 %v15221_v46, %v15220_v32  ;;  %v33515_v32 = vld [vmem:[#allocation19_spill] sm:$0xff]  ;;  %v33516_v46 = vld [vmem:[#allocation20_spill] sm:$0xff] }
 0xaaa   : > { %24411 = vmatmul.mubr.msk.f32.gmra.mrb[184].mxu1 %vm13063_vm3, %v31851_v9 }
 0xaab   : > { %24413 = vmatprep.mubr.msk.f32.mxu1 %vm13063_vm3, %v31856_v41 }
 0xaae   : > { %24414 = vmatmul.mubr.msk.f32.gmra.mrb[186].mxu1 %vm13063_vm3, %v31860_v54 }
 0xaaf   : > { %24416 = vmatprep.mubr.msk.f32.mxu1 %vm13063_vm3, %v31865_v55 }
 0xab2   : > { %24417 = vmatmul.mubr.msk.f32.gmra.mrb[188].mxu1 %vm13063_vm3, %v31869_v23 }
 0xab3   : > { %24419 = vmatprep.mubr.msk.f32.mxu1 %vm13063_vm3, %v31873_v8 }
 0xab6   : > { %24420 = vmatmul.mubr.msk.f32.gmra.mrb[190].mxu1 %vm13063_vm3, %v31877_v12 }
 0xab7   : > { %24422 = vmatprep.mubr.msk.f32.mxu1 %vm13063_vm3, %v31881_v17 }
 0xaba   : > { %24423 = vmatmul.mubr.msk.f32.gmra.mrb[192].mxu1 %vm13063_vm3, %v31885_v14 }
 0xabb   : > { %24425 = vmatprep.mubr.msk.f32.mxu1 %vm13063_vm3, %v31889_v7 }
 0xabe   : > { %24426 = vmatmul.mubr.msk.f32.gmra.mrb[194].mxu1 %vm13063_vm3, %v31893_v51 }
 0xabf   : > { %24428 = vmatprep.mubr.msk.f32.mxu1 %vm13063_vm3, %v31897_v39 }
 0xac2   : > { %24429 = vmatmul.mubr.msk.f32.gmra.mrb[196].mxu1 %vm13063_vm3, %v31901_v57 }
 0xac3   : > { %24431 = vmatprep.mubr.msk.f32.mxu1 %vm13063_vm3, %v31905_v6 }
 0xac6   : > { %24432 = vmatmul.mubr.msk.f32.gmra.mrb[198].mxu1 %vm13063_vm3, %v31909_v48 }
 0xac7   : > { %24434 = vmatprep.mubr.msk.f32.mxu1 %vm13063_vm3, %v31913_v4 }
 0xaca   : > { %24435 = vmatmul.mubr.msk.f32.gmra.mrb[200].mxu1 %vm13063_vm3, %v31917_v49 }
 0xacb   : > { %24437 = vmatprep.mubr.msk.f32.mxu1 %vm13063_vm3, %v31921_v59 }
 0xace   : > { %24438 = vmatmul.mubr.msk.f32.gmra.mrb[202].mxu1 %vm13063_vm3, %v31925_v60 }
 0xacf   : > { %24440 = vmatprep.mubr.msk.f32.mxu1 %vm13063_vm3, %v32172_v28 }
 0xad2   : > { %24441 = vmatmul.mubr.msk.f32.gmra.mrb[204].mxu1 %vm13063_vm3, %v32176_v16 }
 0xad3   : > { %24447 = vmatprep.mubr.msk.f32.mxu1 %vm13063_vm3, %v31706_v11  ;;  %v32230_v11 = vld [vmem:[#allocation2 + $0xc1] sm:$0xff] }
 0xad6   : > { %24448 = vmatmul.mubr.msk.f32.vlgmr.msra.gmra.mrb[182].mxu1 %vm13063_vm3, %v31717_v25  ;;  %v32234_v25 = vld [vmem:[#allocation2 + $0xc9] sm:$0xff] }
 0xad7   : > { %24450 = vmatprep.mubr.msk.f32.mxu1 %vm13063_vm3, %v31725_v5  ;;  %25334 = vmatpush3.bf16.msra.mxu1 %v25331_v43  ;;  %v15527_v5 = vld [vmem:[%s33248_s4 + $0x80] sm:$0xff]  ;;  %v33514_v43 = vld [vmem:[#allocation18_spill] sm:$0xff] }
 0xad8   : > { %25336 = vmatprep.subr.bf16.mxu1 %v25335_v22 }
 0xada   : > { %24451 = vmatmul.mubr.msk.f32.gmra.mrb[184].mxu1 %vm13063_vm3, %v31730_v3  ;;  %v15528_v3 = vld [vmem:[%s33248_s4 + $0x88] sm:$0xff] }
 0xadb   : > { %24453 = vmatprep.mubr.msk.f32.mxu1 %vm13063_vm3, %v31735_v62  ;;  %v25339_v62 = vpack.c.bf16 %v15528_v3, %v15527_v5  ;;  %v32292_v5 = vld [vmem:[#allocation2 + $0xca] sm:$0xff] }
 0xadc   : > { %33518 = vst [vmem:[#allocation40_spill] sm:$0xff] %v32292_v5  ;;  %v15834_v3 = vld [vmem:[%s33248_s4 + $0x90] sm:$0xff] }
 0xade   : > { %24454 = vmatmul.mubr.msk.f32.gmra.mrb[186].mxu1 %vm13063_vm3, %v31740_v35  ;;  %v33506_v35 = vld [vmem:[#allocation10_spill] sm:$0xff] }
 0xadf   : > { %24456 = vmatprep.mubr.msk.f32.mxu1 %vm13063_vm3, %v31745_v29  ;;  %v33507_v29 = vld [vmem:[#allocation11_spill] sm:$0xff] }
 0xae2   : > { %24457 = vmatmul.mubr.msk.f32.gmra.mrb[188].mxu1 %vm13063_vm3, %v31750_v50  ;;  %v33508_v50 = vld [vmem:[#allocation12_spill] sm:$0xff] }
 0xae3   : > { %24459 = vmatprep.mubr.msk.f32.mxu1 %vm13063_vm3, %v31755_v18  ;;  %v33509_v18 = vld [vmem:[#allocation13_spill] sm:$0xff] }
 0xae6   : > { %24460 = vmatmul.mubr.msk.f32.gmra.mrb[190].mxu1 %vm13063_vm3, %v31760_v45  ;;  %v33510_v45 = vld [vmem:[#allocation14_spill] sm:$0xff] }
 0xae7   : > { %24462 = vmatprep.mubr.msk.f32.mxu1 %vm13063_vm3, %v31765_v61  ;;  %v33511_v61 = vld [vmem:[#allocation15_spill] sm:$0xff] }
 0xaea   : > { %24463 = vmatmul.mubr.msk.f32.gmra.mrb[192].mxu1 %vm13063_vm3, %v31770_v37 }
 0xaeb   : > { %24465 = vmatprep.mubr.msk.f32.mxu1 %vm13063_vm3, %v31775_v31 }
 0xaee   : > { %24466 = vmatmul.mubr.msk.f32.gmra.mrb[194].mxu1 %vm13063_vm3, %v31780_v42 }
 0xaef   : > { %24468 = vmatprep.mubr.msk.f32.mxu1 %vm13063_vm3, %v31785_v30 }
 0xaf2   : > { %24469 = vmatmul.mubr.msk.f32.gmra.mrb[196].mxu1 %vm13063_vm3, %v31790_v47 }
 0xaf3   : > { %24471 = vmatprep.mubr.msk.f32.mxu1 %vm13063_vm3, %v31795_v13 }
 0xaf6   : > { %24472 = vmatmul.mubr.msk.f32.gmra.mrb[198].mxu1 %vm13063_vm3, %v31800_v34 }
 0xaf7   : > { %24474 = vmatprep.mubr.msk.f32.mxu1 %vm13063_vm3, %v31805_v1 }
 0xafa   : > { %24475 = vmatmul.mubr.msk.f32.gmra.mrb[200].mxu1 %vm13063_vm3, %v31810_v40 }
 0xafb   : > { %24477 = vmatprep.mubr.msk.f32.mxu1 %vm13063_vm3, %v31815_v10 }
 0xafe   : > { %24478 = vmatmul.mubr.msk.f32.gmra.mrb[202].mxu1 %vm13063_vm3, %v31820_v33 }
 0xaff   : > { %24480 = vmatprep.mubr.msk.f32.mxu1 %vm13063_vm3, %v32230_v11 }
 0xb02   : > { %24481 = vmatmul.mubr.msk.f32.gmra.mrb[204].mxu1 %vm13063_vm3, %v32234_v25 }
 0xb03   : > { %24487 = vmatprep.mubr.msk.f32.mxu1 %vm13063_vm3, %v31937_v24  ;;  %v33512_v24 = vld [vmem:[#allocation16_spill] sm:$0xff] }
 0xb06   : > { %24488 = vmatmul.mubr.msk.f32.vlgmr.msra.gmra.mrb[182].mxu1 %vm13063_vm3, %v31942_v63  ;;  %v33513_v63 = vld [vmem:[#allocation17_spill] sm:$0xff] }
 0xb07   : > { %24490 = vmatprep.mubr.msk.f32.mxu1 %vm13063_vm3, %v31946_v2  ;;  %25338 = vmatpush3.bf16.msra.mxu1 %v25335_v22  ;;  %v32288_v22 = vld [vmem:[#allocation2 + $0xc2] sm:$0xff] }
 0xb08   : > { %25340 = vmatprep.subr.bf16.mxu1 %v25339_v62  ;;  %33517 = vst [vmem:[#allocation39_spill] sm:$0xff] %v32288_v22 }
 0xb0a   : > { %24491 = vmatmul.mubr.msk.f32.gmra.mrb[184].mxu1 %vm13063_vm3, %v31950_v0 }
 0xb0b   : > { %24493 = vmatprep.mubr.msk.f32.mxu1 %vm13063_vm3, %v31954_v19 }
 0xb0e   : > { %24494 = vmatmul.mubr.msk.f32.gmra.mrb[186].mxu1 %vm13063_vm3, %v31958_v21 }
 0xb0f   : > { %24496 = vmatprep.mubr.msk.f32.mxu1 %vm13063_vm3, %v31962_v36 }
 0xb12   : > { %24497 = vmatmul.mubr.msk.f32.gmra.mrb[188].mxu1 %vm13063_vm3, %v31966_v44 }
 0xb13   : > { %24499 = vmatprep.mubr.msk.f32.mxu1 %vm13063_vm3, %v31970_v58 }
 0xb16   : > { %24500 = vmatmul.mubr.msk.f32.gmra.mrb[190].mxu1 %vm13063_vm3, %v31974_v20 }
 0xb17   : > { %24502 = vmatprep.mubr.msk.f32.mxu1 %vm13063_vm3, %v31978_v26 }
 0xb1a   : > { %24503 = vmatmul.mubr.msk.f32.gmra.mrb[192].mxu1 %vm13063_vm3, %v33506_v35 }
 0xb1b   : > { %24505 = vmatprep.mubr.msk.f32.mxu1 %vm13063_vm3, %v33507_v29 }
 0xb1e   : > { %24506 = vmatmul.mubr.msk.f32.gmra.mrb[194].mxu1 %vm13063_vm3, %v33508_v50 }
 0xb1f   : > { %24508 = vmatprep.mubr.msk.f32.mxu1 %vm13063_vm3, %v33509_v18 }
 0xb22   : > { %24509 = vmatmul.mubr.msk.f32.gmra.mrb[196].mxu1 %vm13063_vm3, %v33510_v45 }
 0xb23   : > { %24511 = vmatprep.mubr.msk.f32.mxu1 %vm13063_vm3, %v33511_v61 }
 0xb26   : > { %24512 = vmatmul.mubr.msk.f32.gmra.mrb[198].mxu1 %vm13063_vm3, %v33512_v24 }
 0xb27   : > { %24514 = vmatprep.mubr.msk.f32.mxu1 %vm13063_vm3, %v33513_v63  ;;  %v33521_v63 = vld [vmem:[#allocation23_spill] sm:$0xff] }
 0xb2a   : > { %24515 = vmatmul.mubr.msk.f32.gmra.mrb[200].mxu1 %vm13063_vm3, %v33514_v43  ;;  %v15835_v43 = vld [vmem:[%s33248_s4 + $0x98] sm:$0xff] }
 0xb2b   : > { %24517 = vmatprep.mubr.msk.f32.mxu1 %vm13063_vm3, %v33515_v32  ;;  %v33520_v32 = vld [vmem:[#allocation22_spill] sm:$0xff] }
 0xb2e   : > { %24518 = vmatmul.mubr.msk.f32.gmra.mrb[202].mxu1 %vm13063_vm3, %v33516_v46  ;;  %v25343_v46 = vpack.c.bf16 %v15835_v43, %v15834_v3  ;;  %v33526_v43 = vld [vmem:[#allocation28_spill] sm:$0xff]  ;;  %v33527_v3 = vld [vmem:[#allocation29_spill] sm:$0xff] }
 0xb2f   : > { %24520 = vmatprep.mubr.msk.f32.mxu1 %vm13063_vm3, %v32288_v22  ;;  %v33519_v22 = vld [vmem:[#allocation21_spill] sm:$0xff] }
 0xb32   : > { %24521 = vmatmul.mubr.msk.f32.gmra.mrb[204].mxu1 %vm13063_vm3, %v32292_v5  ;;  %v33522_v5 = vld [vmem:[#allocation24_spill] sm:$0xff] }
 0xb33   : > { %24527 = vmatprep.mubr.msk.f32.mxu1 %vm13063_vm3, %v32034_v27  ;;  %v33523_v27 = vld [vmem:[#allocation25_spill] sm:$0xff] }
 0xb36   : > { %24528 = vmatmul.mubr.msk.f32.vlgmr.msra.gmra.mrb[182].mxu1 %vm13063_vm3, %v32038_v38  ;;  %v33524_v38 = vld [vmem:[#allocation26_spill] sm:$0xff] }
 0xb37   : > { %24530 = vmatprep.mubr.msk.f32.mxu1 %vm13063_vm3, %v32042_v15  ;;  %25342 = vmatpush3.bf16.msra.mxu1 %v25339_v62  ;;  %v33525_v62 = vld [vmem:[#allocation27_spill] sm:$0xff] }
 0xb38   : > { %25344 = vmatprep.subr.bf16.mxu1 %v25343_v46 }
 0xb3a   : > { %24531 = vmatmul.mubr.msk.f32.gmra.mrb[184].mxu1 %vm13063_vm3, %v33519_v22 }
 0xb3b   : > { %24533 = vmatprep.mubr.msk.f32.mxu1 %vm13063_vm3, %v33520_v32  ;;  %v33528_v32 = vld [vmem:[#allocation30_spill] sm:$0xff] }
 0xb3e   : > { %24534 = vmatmul.mubr.msk.f32.gmra.mrb[186].mxu1 %vm13063_vm3, %v33521_v63  ;;  %v33529_v63 = vld [vmem:[#allocation31_spill] sm:$0xff] }
 0xb3f   : > { %24536 = vmatprep.mubr.msk.f32.mxu1 %vm13063_vm3, %v33522_v5  ;;  %v33530_v5 = vld [vmem:[#allocation32_spill] sm:$0xff] }
 0xb42   : > { %24537 = vmatmul.mubr.msk.f32.gmra.mrb[188].mxu1 %vm13063_vm3, %v33523_v27  ;;  %v33531_v27 = vld [vmem:[#allocation33_spill] sm:$0xff] }
 0xb43   : > { %24539 = vmatprep.mubr.msk.f32.mxu1 %vm13063_vm3, %v33524_v38  ;;  %v33532_v38 = vld [vmem:[#allocation34_spill] sm:$0xff] }
 0xb46   : > { %24540 = vmatmul.mubr.msk.f32.gmra.mrb[190].mxu1 %vm13063_vm3, %v33525_v62  ;;  %v33533_v62 = vld [vmem:[#allocation35_spill] sm:$0xff] }
 0xb47   : > { %24542 = vmatprep.mubr.msk.f32.mxu1 %vm13063_vm3, %v33526_v43  ;;  %v33534_v43 = vld [vmem:[#allocation36_spill] sm:$0xff] }
 0xb4a   : > { %24543 = vmatmul.mubr.msk.f32.gmra.mrb[192].mxu1 %vm13063_vm3, %v33527_v3  ;;  %v33535_v3 = vld [vmem:[#allocation37_spill] sm:$0xff] }
 0xb4b   : > { %24545 = vmatprep.mubr.msk.f32.mxu1 %vm13063_vm3, %v33528_v32 }
 0xb4e   : > { %24546 = vmatmul.mubr.msk.f32.gmra.mrb[194].mxu1 %vm13063_vm3, %v33529_v63 }
 0xb4f   : > { %24548 = vmatprep.mubr.msk.f32.mxu1 %vm13063_vm3, %v33530_v5  ;;  %v32346_v5 = vld [vmem:[#allocation2 + $0xc3] sm:$0xff] }
 0xb52   : > { %24549 = vmatmul.mubr.msk.f32.gmra.mrb[196].mxu1 %vm13063_vm3, %v33531_v27 }
 0xb53   : > { %24551 = vmatprep.mubr.msk.f32.mxu1 %vm13063_vm3, %v33532_v38  ;;  %v32350_v38 = vld [vmem:[#allocation2 + $0xcb] sm:$0xff] }
 0xb56   : > { %24552 = vmatmul.mubr.msk.f32.gmra.mrb[198].mxu1 %vm13063_vm3, %v33533_v62 }
 0xb57   : > { %24554 = vmatprep.mubr.msk.f32.mxu1 %vm13063_vm3, %v33534_v43  ;;  %v16141_v43 = vld [vmem:[%s33248_s4 + $0xa0] sm:$0xff] }
 0xb5a   : > { %24555 = vmatmul.mubr.msk.f32.gmra.mrb[200].mxu1 %vm13063_vm3, %v33535_v3  ;;  %v16142_v3 = vld [vmem:[%s33248_s4 + $0xa8] sm:$0xff] }
 0xb5b   : > { %24557 = vmatprep.mubr.msk.f32.mxu1 %vm13063_vm3, %v32114_v52 }
 0xb5e   : > { %24558 = vmatmul.mubr.msk.f32.gmra.mrb[202].mxu1 %vm13063_vm3, %v32118_v53  ;;  %v25347_v53 = vpack.c.bf16 %v16142_v3, %v16141_v43  ;;  %v16739_v43 = vld [vmem:[#allocation2 + $0x70] sm:$0xff]  ;;  %v16740_v3 = vld [vmem:[#allocation2 + $0x78] sm:$0xff] }
 0xb5f   : > { %24560 = vmatprep.mubr.msk.f32.mxu1 %vm13063_vm3, %v32346_v5 }
 0xb62   : > { %24561 = vmatmul.mubr.msk.f32.gmra.mrb[204].mxu1 %vm13063_vm3, %v32350_v38 }
 0xb63   : > { %24567 = vmatprep.mubr.msk.f32.mxu1 %vm13063_vm3, %v31847_v56  ;;  %v32404_v56 = vld [vmem:[#allocation2 + $0xd0] sm:$0xff] }
 0xb66   : > { %24568 = vmatmul.mubr.msk.f32.vlgmr.msra.gmra.mrb[182].mxu1 %vm13063_vm3, %v31851_v9  ;;  %v32408_v9 = vld [vmem:[#allocation2 + $0xd8] sm:$0xff] }
 0xb67   : > { %24570 = vmatprep.mubr.msk.f32.mxu1 %vm13063_vm3, %v31856_v41  ;;  %25346 = vmatpush3.bf16.msra.mxu1 %v25343_v46  ;;  %v16448_v41 = vld [vmem:[%s33248_s4 + $0xb0] sm:$0xff] }
 0xb68   : > { %25348 = vmatprep.subr.bf16.mxu1 %v25347_v53  ;;  %v16735_v46 = vld [vmem:[#allocation2 + $0x50] sm:$0xff] }
 0xb6a   : > { %24571 = vmatmul.mubr.msk.f32.gmra.mrb[184].mxu1 %vm13063_vm3, %v31860_v54  ;;  %v16449_v54 = vld [vmem:[%s33248_s4 + $0xb8] sm:$0xff] }
 0xb6b   : > { %24573 = vmatprep.mubr.msk.f32.mxu1 %vm13063_vm3, %v31865_v55  ;;  %v15810_v55 = vld [vmem:[#allocation2 + $0x21] sm:$0xff] }
 0xb6e   : > { %24574 = vmatmul.mubr.msk.f32.gmra.mrb[186].mxu1 %vm13063_vm3, %v31869_v23  ;;  %v25351_v23 = vpack.c.bf16 %v16449_v54, %v16448_v41  ;;  %v16741_v41 = vld [vmem:[#allocation2 + $0x80] sm:$0xff]  ;;  %v16742_v54 = vld [vmem:[#allocation2 + $0x88] sm:$0xff] }
 0xb6f   : > { %24576 = vmatprep.mubr.msk.f32.mxu1 %vm13063_vm3, %v31873_v8  ;;  %v15811_v8 = vld [vmem:[#allocation2 + $0x29] sm:$0xff] }
 0xb72   : > { %24577 = vmatmul.mubr.msk.f32.gmra.mrb[188].mxu1 %vm13063_vm3, %v31877_v12  ;;  %v32420_v12 = vld [vmem:[#allocation2 + $0x31] sm:$0xff] }
 0xb73   : > { %24579 = vmatprep.mubr.msk.f32.mxu1 %vm13063_vm3, %v31881_v17  ;;  %v32424_v17 = vld [vmem:[#allocation2 + $0x39] sm:$0xff] }
 0xb76   : > { %24580 = vmatmul.mubr.msk.f32.gmra.mrb[190].mxu1 %vm13063_vm3, %v31885_v14  ;;  %v32428_v14 = vld [vmem:[#allocation2 + $0x41] sm:$0xff] }
 0xb77   : > { %24582 = vmatprep.mubr.msk.f32.mxu1 %vm13063_vm3, %v31889_v7  ;;  %v32432_v7 = vld [vmem:[#allocation2 + $0x49] sm:$0xff] }
 0xb7a   : > { %24583 = vmatmul.mubr.msk.f32.gmra.mrb[192].mxu1 %vm13063_vm3, %v31893_v51  ;;  %v32436_v51 = vld [vmem:[#allocation2 + $0x51] sm:$0xff] }
 0xb7b   : > { %24585 = vmatprep.mubr.msk.f32.mxu1 %vm13063_vm3, %v31897_v39  ;;  %v32440_v39 = vld [vmem:[#allocation2 + $0x59] sm:$0xff] }
 0xb7e   : > { %24586 = vmatmul.mubr.msk.f32.gmra.mrb[194].mxu1 %vm13063_vm3, %v31901_v57  ;;  %v32444_v57 = vld [vmem:[#allocation2 + $0x61] sm:$0xff] }
 0xb7f   : > { %24588 = vmatprep.mubr.msk.f32.mxu1 %vm13063_vm3, %v31905_v6  ;;  %v32532_v6 = vld [vmem:[#allocation2 + $0xd2] sm:$0xff] }
 0xb82   : > { %24589 = vmatmul.mubr.msk.f32.gmra.mrb[196].mxu1 %vm13063_vm3, %v31909_v48  ;;  %v32536_v48 = vld [vmem:[#allocation2 + $0xda] sm:$0xff] }
 0xb83   : > { %24591 = vmatprep.mubr.msk.f32.mxu1 %vm13063_vm3, %v31913_v4  ;;  %v17062_v4 = vld [vmem:[%s33248_s4 + $0xd0] sm:$0xff] }
 0xb86   : > { %24592 = vmatmul.mubr.msk.f32.gmra.mrb[198].mxu1 %vm13063_vm3, %v31917_v49  ;;  %v17063_v49 = vld [vmem:[%s33248_s4 + $0xd8] sm:$0xff] }
 0xb87   : > { %24594 = vmatprep.mubr.msk.f32.mxu1 %vm13063_vm3, %v31921_v59  ;;  %v25359_v59 = vpack.c.bf16 %v17063_v49, %v17062_v4  ;;  %v17055_v4 = vld [vmem:[#allocation2 + $0xb9] sm:$0xff]  ;;  %v17060_v49 = vld [vmem:[#allocation2 + $0xe1] sm:$0xff] }
 0xb8a   : > { %24595 = vmatmul.mubr.msk.f32.gmra.mrb[200].mxu1 %vm13063_vm3, %v31925_v60  ;;  %v33542_v60 = vld [vmem:[#allocation22_spill] sm:$0xff] }
 0xb8b   : > { %24597 = vmatprep.mubr.msk.f32.mxu1 %vm13063_vm3, %v32172_v28 }
 0xb8e   : > { %24598 = vmatmul.mubr.msk.f32.gmra.mrb[202].mxu1 %vm13063_vm3, %v32176_v16 }
 0xb8f   : > { %24600 = vmatprep.mubr.msk.f32.mxu1 %vm13063_vm3, %v32404_v56 }
 0xb92   : > { %24601 = vmatmul.mubr.msk.f32.gmra.mrb[204].mxu1 %vm13063_vm3, %v32408_v9 }
 0xb93   : > { %24607 = vmatprep.mubr.msk.f32.mxu1 %vm13063_vm3, %v15810_v55  ;;  %v16743_v55 = vld [vmem:[#allocation2 + $0x90] sm:$0xff] }
 0xb96   : > { %24608 = vmatmul.mubr.msk.f32.vlgmr.msra.gmra.mrb[182].mxu1 %vm13063_vm3, %v15811_v8  ;;  %v16745_v8 = vld [vmem:[#allocation2 + $0xa0] sm:$0xff] }
 0xb97   : > { %24610 = vmatprep.mubr.msk.f32.mxu1 %vm13063_vm3, %v32420_v12  ;;  %25350 = vmatpush3.bf16.msra.mxu1 %v25347_v53  ;;  %v33553_v53 = vld [vmem:[#allocation37_spill] sm:$0xff] }
 0xb98   : > { %25352 = vmatprep.subr.bf16.mxu1 %v25351_v23 }
 0xb9a   : > { %24611 = vmatmul.mubr.msk.f32.gmra.mrb[184].mxu1 %vm13063_vm3, %v32424_v17 }
 0xb9b   : > { %24613 = vmatprep.mubr.msk.f32.mxu1 %vm13063_vm3, %v32428_v14 }
 0xb9e   : > { %24614 = vmatmul.mubr.msk.f32.gmra.mrb[186].mxu1 %vm13063_vm3, %v32432_v7 }
 0xb9f   : > { %24616 = vmatprep.mubr.msk.f32.mxu1 %vm13063_vm3, %v32436_v51 }
 0xba2   : > { %24617 = vmatmul.mubr.msk.f32.gmra.mrb[188].mxu1 %vm13063_vm3, %v32440_v39 }
 0xba3   : > { %24619 = vmatprep.mubr.msk.f32.mxu1 %vm13063_vm3, %v32444_v57 }
 0xba6   : > { %24620 = vmatmul.mubr.msk.f32.gmra.mrb[190].mxu1 %vm13063_vm3, %v31770_v37  ;;  %v32474_v37 = vld [vmem:[#allocation2 + $0xd1] sm:$0xff] }
 0xba7   : > { %24622 = vmatprep.mubr.msk.f32.mxu1 %vm13063_vm3, %v31775_v31  ;;  %v32478_v31 = vld [vmem:[#allocation2 + $0xd9] sm:$0xff] }
 0xbaa   : > { %24623 = vmatmul.mubr.msk.f32.gmra.mrb[192].mxu1 %vm13063_vm3, %v31780_v42  ;;  %v16755_v42 = vld [vmem:[%s33248_s4 + $0xc0] sm:$0xff] }
 0xbab   : > { %24625 = vmatprep.mubr.msk.f32.mxu1 %vm13063_vm3, %v31785_v30  ;;  %v16756_v30 = vld [vmem:[%s33248_s4 + $0xc8] sm:$0xff] }
 0xbae   : > { %24626 = vmatmul.mubr.msk.f32.gmra.mrb[194].mxu1 %vm13063_vm3, %v31790_v47  ;;  %v25355_v47 = vpack.c.bf16 %v16756_v30, %v16755_v42  ;;  %v16746_v42 = vld [vmem:[#allocation2 + $0xa8] sm:$0xff]  ;;  %v16747_v30 = vld [vmem:[#allocation2 + $0xb0] sm:$0xff] }
 0xbaf   : > { %24628 = vmatprep.mubr.msk.f32.mxu1 %vm13063_vm3, %v31795_v13  ;;  %v33536_v13 = vld [vmem:[#allocation17_spill] sm:$0xff] }
 0xbb2   : > { %24629 = vmatmul.mubr.msk.f32.gmra.mrb[196].mxu1 %vm13063_vm3, %v31800_v34  ;;  %v33537_v34 = vld [vmem:[#allocation18_spill] sm:$0xff] }
 0xbb3   : > { %24631 = vmatprep.mubr.msk.f32.mxu1 %vm13063_vm3, %v31805_v1  ;;  %v33538_v1 = vld [vmem:[#allocation19_spill] sm:$0xff] }
 0xbb6   : > { %24632 = vmatmul.mubr.msk.f32.gmra.mrb[198].mxu1 %vm13063_vm3, %v31810_v40  ;;  %v33539_v40 = vld [vmem:[#allocation20_spill] sm:$0xff] }
 0xbb7   : > { %24634 = vmatprep.mubr.msk.f32.mxu1 %vm13063_vm3, %v31815_v10  ;;  %v33540_v10 = vld [vmem:[#allocation39_spill] sm:$0xff] }
 0xbba   : > { %24635 = vmatmul.mubr.msk.f32.gmra.mrb[200].mxu1 %vm13063_vm3, %v31820_v33  ;;  %v33541_v33 = vld [vmem:[#allocation40_spill] sm:$0xff] }
 0xbbb   : > { %24637 = vmatprep.mubr.msk.f32.mxu1 %vm13063_vm3, %v32230_v11 }
 0xbbe   : > { %24638 = vmatmul.mubr.msk.f32.gmra.mrb[202].mxu1 %vm13063_vm3, %v32234_v25 }
 0xbbf   : > { %24640 = vmatprep.mubr.msk.f32.mxu1 %vm13063_vm3, %v32474_v37 }
 0xbc2   : > { %24641 = vmatmul.mubr.msk.f32.gmra.mrb[204].mxu1 %vm13063_vm3, %v32478_v31 }
 0xbc3   : > { %24647 = vmatprep.mubr.msk.f32.mxu1 %vm13063_vm3, %v31946_v2  ;;  %v33543_v2 = vld [vmem:[#allocation23_spill] sm:$0xff] }
 0xbc6   : > { %24648 = vmatmul.mubr.msk.f32.vlgmr.msra.gmra.mrb[182].mxu1 %vm13063_vm3, %v31950_v0  ;;  %v33544_v0 = vld [vmem:[#allocation24_spill] sm:$0xff] }
 0xbc7   : > { %24650 = vmatprep.mubr.msk.f32.mxu1 %vm13063_vm3, %v31954_v19  ;;  %25354 = vmatpush3.bf16.msra.mxu1 %v25351_v23  ;;  %v33545_v19 = vld [vmem:[#allocation25_spill] sm:$0xff]  ;;  %v16744_v23 = vld [vmem:[#allocation2 + $0x98] sm:$0xff] }
 0xbc8   : > { %25356 = vmatprep.subr.bf16.mxu1 %v25355_v47 }
 0xbca   : > { %24651 = vmatmul.mubr.msk.f32.gmra.mrb[184].mxu1 %vm13063_vm3, %v31958_v21  ;;  %v33546_v21 = vld [vmem:[#allocation26_spill] sm:$0xff] }
 0xbcb   : > { %24653 = vmatprep.mubr.msk.f32.mxu1 %vm13063_vm3, %v31962_v36  ;;  %v33547_v36 = vld [vmem:[#allocation27_spill] sm:$0xff] }
 0xbce   : > { %24654 = vmatmul.mubr.msk.f32.gmra.mrb[186].mxu1 %vm13063_vm3, %v31966_v44  ;;  %v33548_v44 = vld [vmem:[#allocation28_spill] sm:$0xff] }
 0xbcf   : > { %24656 = vmatprep.mubr.msk.f32.mxu1 %vm13063_vm3, %v31970_v58  ;;  %v33549_v58 = vld [vmem:[#allocation29_spill] sm:$0xff] }
 0xbd2   : > { %24657 = vmatmul.mubr.msk.f32.gmra.mrb[188].mxu1 %vm13063_vm3, %v31974_v20  ;;  %v33550_v20 = vld [vmem:[#allocation32_spill] sm:$0xff] }
 0xbd3   : > { %24659 = vmatprep.mubr.msk.f32.mxu1 %vm13063_vm3, %v31978_v26  ;;  %v33551_v26 = vld [vmem:[#allocation34_spill] sm:$0xff] }
 0xbd6   : > { %24660 = vmatmul.mubr.msk.f32.gmra.mrb[190].mxu1 %vm13063_vm3, %v33506_v35  ;;  %v33554_v35 = vld [vmem:[#allocation38_spill] sm:$0xff] }
 0xbd7   : > { %24662 = vmatprep.mubr.msk.f32.mxu1 %vm13063_vm3, %v33507_v29  ;;  %v32590_v29 = vld [vmem:[#allocation2 + $0xd3] sm:$0xff] }
 0xbda   : > { %24663 = vmatmul.mubr.msk.f32.gmra.mrb[192].mxu1 %vm13063_vm3, %v33508_v50  ;;  %v32594_v50 = vld [vmem:[#allocation2 + $0xdb] sm:$0xff] }
 0xbdb   : > { %24665 = vmatprep.mubr.msk.f32.mxu1 %vm13063_vm3, %v33509_v18  ;;  %v17370_v18 = vld [vmem:[%s33248_s4 + $0xe8] sm:$0xff] }
 0xbde   : > { %24666 = vmatmul.mubr.msk.f32.gmra.mrb[194].mxu1 %vm13063_vm3, %v33510_v45  ;;  %v16731_v45 = vld [vmem:[#allocation2 + $0x30] sm:$0xff] }
 0xbdf   : > { %24668 = vmatprep.mubr.msk.f32.mxu1 %vm13063_vm3, %v33511_v61 }
 0xbe2   : > { %24669 = vmatmul.mubr.msk.f32.gmra.mrb[196].mxu1 %vm13063_vm3, %v33512_v24  ;;  %v16732_v24 = vld [vmem:[#allocation2 + $0x38] sm:$0xff] }
 0xbe3   : > { %24671 = vmatprep.mubr.msk.f32.mxu1 %vm13063_vm3, %v33536_v13  ;;  %v16753_v13 = vld [vmem:[#allocation2 + $0xe0] sm:$0xff] }
 0xbe6   : > { %24672 = vmatmul.mubr.msk.f32.gmra.mrb[198].mxu1 %vm13063_vm3, %v33537_v34  ;;  %v16754_v34 = vld [vmem:[#allocation2 + $0xe8] sm:$0xff] }
 0xbe7   : > { %24674 = vmatprep.mubr.msk.f32.mxu1 %vm13063_vm3, %v33538_v1  ;;  %v17676_v1 = vld [vmem:[%s33248_s4 + $0xf0] sm:$0xff] }
 0xbea   : > { %24675 = vmatmul.mubr.msk.f32.gmra.mrb[200].mxu1 %vm13063_vm3, %v33539_v40  ;;  %v17054_v40 = vld [vmem:[#allocation2 + $0xb1] sm:$0xff] }
 0xbeb   : > { %24677 = vmatprep.mubr.msk.f32.mxu1 %vm13063_vm3, %v33540_v10 }
 0xbee   : > { %24678 = vmatmul.mubr.msk.f32.gmra.mrb[202].mxu1 %vm13063_vm3, %v33541_v33 }
 0xbef   : > { %24680 = vmatprep.mubr.msk.f32.mxu1 %vm13063_vm3, %v32532_v6 }
 0xbf2   : > { %24681 = vmatmul.mubr.msk.f32.gmra.mrb[204].mxu1 %vm13063_vm3, %v32536_v48 }
 0xbf3   : > { %24687 = vmatprep.mubr.msk.f32.mxu1 %vm13063_vm3, %v32042_v15  ;;  %v33552_v15 = vld [vmem:[#allocation36_spill] sm:$0xff] }
 0xbf6   : > { %24688 = vmatmul.mubr.msk.f32.vlgmr.msra.gmra.mrb[182].mxu1 %vm13063_vm3, %v33519_v22  ;;  %v16736_v22 = vld [vmem:[#allocation2 + $0x58] sm:$0xff] }
 0xbf7   : > { %24690 = vmatprep.mubr.msk.f32.mxu1 %vm13063_vm3, %v33542_v60  ;;  %25358 = vmatpush3.bf16.msra.mxu1 %v25355_v47  ;;  %v16748_v47 = vld [vmem:[#allocation2 + $0xb8] sm:$0xff] }
 0xbf8   : > { %25360 = vmatprep.subr.bf16.mxu1 %v25359_v59  ;;  %v17345_v60 = vld [vmem:[#allocation2 + $0x32] sm:$0xff] }
 0xbfa   : > { %24691 = vmatmul.mubr.msk.f32.gmra.mrb[184].mxu1 %vm13063_vm3, %v33543_v2  ;;  %v17346_v2 = vld [vmem:[#allocation2 + $0x3a] sm:$0xff] }
 0xbfb   : > { %24693 = vmatprep.mubr.msk.f32.mxu1 %vm13063_vm3, %v33544_v0  ;;  %v17350_v0 = vld [vmem:[#allocation2 + $0x5a] sm:$0xff] }
 0xbfe   : > { %24694 = vmatmul.mubr.msk.f32.gmra.mrb[186].mxu1 %vm13063_vm3, %v33545_v19  ;;  %v17351_v19 = vld [vmem:[#allocation2 + $0x62] sm:$0xff] }
 0xbff   : > { %24696 = vmatprep.mubr.msk.f32.mxu1 %vm13063_vm3, %v33546_v21  ;;  %v17352_v21 = vld [vmem:[#allocation2 + $0x6a] sm:$0xff] }
 0xc02   : > { %24697 = vmatmul.mubr.msk.f32.gmra.mrb[188].mxu1 %vm13063_vm3, %v33547_v36  ;;  %v17353_v36 = vld [vmem:[#allocation2 + $0x72] sm:$0xff] }
 0xc03   : > { %24699 = vmatprep.mubr.msk.f32.mxu1 %vm13063_vm3, %v33548_v44  ;;  %v17354_v44 = vld [vmem:[#allocation2 + $0x7a] sm:$0xff] }
 0xc06   : > { %24700 = vmatmul.mubr.msk.f32.gmra.mrb[190].mxu1 %vm13063_vm3, %v33549_v58  ;;  %v17355_v58 = vld [vmem:[#allocation2 + $0x82] sm:$0xff] }
 0xc07   : > { %24702 = vmatprep.mubr.msk.f32.mxu1 %vm13063_vm3, %v33528_v32  ;;  %v16734_v32 = vld [vmem:[#allocation2 + $0x48] sm:$0xff] }
 0xc0a   : > { %24703 = vmatmul.mubr.msk.f32.gmra.mrb[192].mxu1 %vm13063_vm3, %v33529_v63  ;;  %v16733_v63 = vld [vmem:[#allocation2 + $0x40] sm:$0xff] }
 0xc0b   : > { %24705 = vmatprep.mubr.msk.f32.mxu1 %vm13063_vm3, %v33550_v20  ;;  %v17356_v20 = vld [vmem:[#allocation2 + $0x8a] sm:$0xff] }
 0xc0e   : > { %24706 = vmatmul.mubr.msk.f32.gmra.mrb[194].mxu1 %vm13063_vm3, %v33531_v27  ;;  %v16737_v27 = vld [vmem:[#allocation2 + $0x60] sm:$0xff] }
 0xc0f   : > { %24708 = vmatprep.mubr.msk.f32.mxu1 %vm13063_vm3, %v33551_v26  ;;  %v17357_v26 = vld [vmem:[#allocation2 + $0x92] sm:$0xff] }
 0xc12   : > { %24709 = vmatmul.mubr.msk.f32.gmra.mrb[196].mxu1 %vm13063_vm3, %v33533_v62  ;;  %v16738_v62 = vld [vmem:[#allocation2 + $0x68] sm:$0xff] }
 0xc13   : > { %24711 = vmatprep.mubr.msk.f32.mxu1 %vm13063_vm3, %v33552_v15  ;;  %v17358_v15 = vld [vmem:[#allocation2 + $0x9a] sm:$0xff] }
 0xc16   : > { %24712 = vmatmul.mubr.msk.f32.gmra.mrb[198].mxu1 %vm13063_vm3, %v33553_v53  ;;  %v17359_v53 = vld [vmem:[#allocation2 + $0xa2] sm:$0xff] }
 0xc17   : > { %24714 = vmatprep.mubr.msk.f32.mxu1 %vm13063_vm3, %v32114_v52  ;;  %v17369_v52 = vld [vmem:[%s33248_s4 + $0xe0] sm:$0xff] }
 0xc18   : > { %v25363_v61 = vpack.c.bf16 %v17370_v18, %v17369_v52  ;;  %v17361_v52 = vld [vmem:[#allocation2 + $0xb2] sm:$0xff]  ;;  %v17362_v18 = vld [vmem:[#allocation2 + $0xba] sm:$0xff] }
 0xc1a   : > { %24715 = vmatmul.mubr.msk.f32.gmra.mrb[200].mxu1 %vm13063_vm3, %v33554_v35  ;;  %v17360_v35 = vld [vmem:[#allocation2 + $0xaa] sm:$0xff] }
 0xc1b   : > { %24717 = vmatprep.mubr.msk.f32.mxu1 %vm13063_vm3, %v32346_v5 }
 0xc1e   : > { %24718 = vmatmul.mubr.msk.f32.gmra.mrb[202].mxu1 %vm13063_vm3, %v32350_v38 }
 0xc1f   : > { %24720 = vmatprep.mubr.msk.f32.mxu1 %vm13063_vm3, %v32590_v29 }
 0xc22   : > { %24721 = vmatmul.mubr.msk.f32.gmra.mrb[204].mxu1 %vm13063_vm3, %v32594_v50 }
 0xc23   : > { %24727 = vmatprep.mubr.msk.f32.mxu1 %vm13063_vm3, %v16731_v45  ;;  %v17367_v45 = vld [vmem:[#allocation2 + $0xe2] sm:$0xff] }
 0xc26   : > { %24728 = vmatmul.mubr.msk.f32.vlgmr.msra.gmra.mrb[182].mxu1 %vm13063_vm3, %v16732_v24  ;;  %v17652_v24 = vld [vmem:[#allocation2 + $0x33] sm:$0xff] }
 0xc27   : > { %24730 = vmatprep.mubr.msk.f32.mxu1 %vm13063_vm3, %v16733_v63  ;;  %25362 = vmatpush3.bf16.msra.mxu1 %v25359_v59  ;;  %v17061_v59 = vld [vmem:[#allocation2 + $0xe9] sm:$0xff]  ;;  %v17653_v63 = vld [vmem:[#allocation2 + $0x3b] sm:$0xff] }
 0xc28   : > { %25364 = vmatprep.subr.bf16.mxu1 %v25363_v61 }
 0xc2a   : > { %24731 = vmatmul.mubr.msk.f32.gmra.mrb[184].mxu1 %vm13063_vm3, %v16734_v32  ;;  %v17658_v32 = vld [vmem:[#allocation2 + $0x63] sm:$0xff] }
 0xc2b   : > { %24733 = vmatprep.mubr.msk.f32.mxu1 %vm13063_vm3, %v16735_v46  ;;  %v17659_v46 = vld [vmem:[#allocation2 + $0x6b] sm:$0xff] }
 0xc2e   : > { %24734 = vmatmul.mubr.msk.f32.gmra.mrb[186].mxu1 %vm13063_vm3, %v16736_v22  ;;  %v17660_v22 = vld [vmem:[#allocation2 + $0x73] sm:$0xff] }
 0xc2f   : > { %24736 = vmatprep.mubr.msk.f32.mxu1 %vm13063_vm3, %v16737_v27  ;;  %v17661_v27 = vld [vmem:[#allocation2 + $0x7b] sm:$0xff] }
 0xc32   : > { %24737 = vmatmul.mubr.msk.f32.gmra.mrb[188].mxu1 %vm13063_vm3, %v16738_v62  ;;  %v17662_v62 = vld [vmem:[#allocation2 + $0x83] sm:$0xff] }
 0xc33   : > { %24739 = vmatprep.mubr.msk.f32.mxu1 %vm13063_vm3, %v16739_v43  ;;  %v17663_v43 = vld [vmem:[#allocation2 + $0x8b] sm:$0xff] }
 0xc36   : > { %24740 = vmatmul.mubr.msk.f32.gmra.mrb[190].mxu1 %vm13063_vm3, %v16740_v3  ;;  %v17664_v3 = vld [vmem:[#allocation2 + $0x93] sm:$0xff] }
 0xc37   : > { %24742 = vmatprep.mubr.msk.f32.mxu1 %vm13063_vm3, %v16741_v41  ;;  %v17665_v41 = vld [vmem:[#allocation2 + $0x9b] sm:$0xff] }
 0xc3a   : > { %24743 = vmatmul.mubr.msk.f32.gmra.mrb[192].mxu1 %vm13063_vm3, %v16742_v54  ;;  %v17666_v54 = vld [vmem:[#allocation2 + $0xa3] sm:$0xff] }
 0xc3b   : > { %24745 = vmatprep.mubr.msk.f32.mxu1 %vm13063_vm3, %v16743_v55  ;;  %v17667_v55 = vld [vmem:[#allocation2 + $0xab] sm:$0xff] }
 0xc3e   : > { %24746 = vmatmul.mubr.msk.f32.gmra.mrb[194].mxu1 %vm13063_vm3, %v16744_v23  ;;  %v17668_v23 = vld [vmem:[#allocation2 + $0xb3] sm:$0xff] }
 0xc3f   : > { %24748 = vmatprep.mubr.msk.f32.mxu1 %vm13063_vm3, %v16745_v8  ;;  %v17669_v8 = vld [vmem:[#allocation2 + $0xbb] sm:$0xff] }
 0xc42   : > { %24749 = vmatmul.mubr.msk.f32.gmra.mrb[196].mxu1 %vm13063_vm3, %v16746_v42  ;;  %v17674_v42 = vld [vmem:[#allocation2 + $0xe3] sm:$0xff] }
 0xc43   : > { %24751 = vmatprep.mubr.msk.f32.mxu1 %vm13063_vm3, %v16747_v30  ;;  %v17675_v30 = vld [vmem:[#allocation2 + $0xeb] sm:$0xff] }
 0xc46   : > { %24752 = vmatmul.mubr.msk.f32.gmra.mrb[198].mxu1 %vm13063_vm3, %v16748_v47  ;;  %v18015_v47 = vld [vmem:[%s33250_s6 + $0x8] sm:$0xff] }
 0xc47   : > { %24754 = vmatprep.mubr.msk.f32.mxu1 %vm13063_vm3, %v32172_v28  ;;  %v17677_v28 = vld [vmem:[%s33248_s4 + $0xf8] sm:$0xff] }
 0xc4a   : > { %24755 = vmatmul.mubr.msk.f32.gmra.mrb[200].mxu1 %vm13063_vm3, %v32176_v16  ;;  %v25367_v16 = vpack.c.bf16 %v17677_v28, %v17676_v1 }
 0xc4b   : > { %24757 = vmatprep.mubr.msk.f32.mxu1 %vm13063_vm3, %v32404_v56  ;;  %v17045_v56 = vld [vmem:[#allocation2 + $0x69] sm:$0xff] }
 0xc4e   : > { %24758 = vmatmul.mubr.msk.f32.gmra.mrb[202].mxu1 %vm13063_vm3, %v32408_v9  ;;  %v17046_v9 = vld [vmem:[#allocation2 + $0x71] sm:$0xff] }
 0xc4f   : > { %24760 = vmatprep.mubr.msk.f32.mxu1 %vm13063_vm3, %v16753_v13 }
 0xc52   : > { %24761 = vmatmul.mubr.msk.f32.gmra.mrb[204].mxu1 %vm13063_vm3, %v16754_v34 }
 0xc53   : > { %24767 = vmatprep.mubr.msk.f32.mxu1 %vm13063_vm3, %v32420_v12  ;;  %v17047_v12 = vld [vmem:[#allocation2 + $0x79] sm:$0xff] }
 0xc56   : > { %24768 = vmatmul.mubr.msk.f32.vlgmr.msra.gmra.mrb[182].mxu1 %vm13063_vm3, %v32424_v17  ;;  %v17048_v17 = vld [vmem:[#allocation2 + $0x81] sm:$0xff] }
 0xc57   : > { %24770 = vmatprep.mubr.msk.f32.mxu1 %vm13063_vm3, %v32428_v14  ;;  %25366 = vmatpush3.bf16.msra.mxu1 %v25363_v61  ;;  %v17049_v14 = vld [vmem:[#allocation2 + $0x89] sm:$0xff] }
 0xc58   : > { %25368 = vmatprep.subr.bf16.mxu1 %v25367_v16  ;;  %v17368_v61 = vld [vmem:[#allocation2 + $0xea] sm:$0xff] }
 0xc5a   : > { %24771 = vmatmul.mubr.msk.f32.gmra.mrb[184].mxu1 %vm13063_vm3, %v32432_v7  ;;  %v17050_v7 = vld [vmem:[#allocation2 + $0x91] sm:$0xff] }
 0xc5b   : > { %24773 = vmatprep.mubr.msk.f32.mxu1 %vm13063_vm3, %v32436_v51  ;;  %v17051_v51 = vld [vmem:[#allocation2 + $0x99] sm:$0xff] }
 0xc5e   : > { %24774 = vmatmul.mubr.msk.f32.gmra.mrb[186].mxu1 %vm13063_vm3, %v32440_v39  ;;  %v17052_v39 = vld [vmem:[#allocation2 + $0xa1] sm:$0xff] }
 0xc5f   : > { %24776 = vmatprep.mubr.msk.f32.mxu1 %vm13063_vm3, %v32444_v57  ;;  %v17053_v57 = vld [vmem:[#allocation2 + $0xa9] sm:$0xff] }
 0xc62   : > { %24777 = vmatmul.mubr.msk.f32.gmra.mrb[188].mxu1 %vm13063_vm3, %v17045_v56 }
 0xc63   : > { %24779 = vmatprep.mubr.msk.f32.mxu1 %vm13063_vm3, %v17046_v9 }
 0xc66   : > { %24780 = vmatmul.mubr.msk.f32.gmra.mrb[190].mxu1 %vm13063_vm3, %v17047_v12 }
 0xc67   : > { %24782 = vmatprep.mubr.msk.f32.mxu1 %vm13063_vm3, %v17048_v17 }
 0xc6a   : > { %24783 = vmatmul.mubr.msk.f32.gmra.mrb[192].mxu1 %vm13063_vm3, %v17049_v14 }
 0xc6b   : > { %24785 = vmatprep.mubr.msk.f32.mxu1 %vm13063_vm3, %v17050_v7 }
 0xc6e   : > { %24786 = vmatmul.mubr.msk.f32.gmra.mrb[194].mxu1 %vm13063_vm3, %v17051_v51 }
 0xc6f   : > { %24788 = vmatprep.mubr.msk.f32.mxu1 %vm13063_vm3, %v17052_v39 }
 0xc72   : > { %24789 = vmatmul.mubr.msk.f32.gmra.mrb[196].mxu1 %vm13063_vm3, %v17053_v57 }
 0xc73   : > { %24791 = vmatprep.mubr.msk.f32.mxu1 %vm13063_vm3, %v17054_v40 }
 0xc76   : > { %24792 = vmatmul.mubr.msk.f32.gmra.mrb[198].mxu1 %vm13063_vm3, %v17055_v4 }
 0xc77   : > { %24794 = vmatprep.mubr.msk.f32.mxu1 %vm13063_vm3, %v32230_v11  ;;  %v17347_v11 = vld [vmem:[#allocation2 + $0x42] sm:$0xff] }
 0xc7a   : > { %24795 = vmatmul.mubr.msk.f32.gmra.mrb[200].mxu1 %vm13063_vm3, %v32234_v25  ;;  %v33555_v25 = vmov 0.0|0.0  }
 0xc7b   : > { %24797 = vmatprep.mubr.msk.f32.mxu1 %vm13063_vm3, %v32474_v37  ;;  %v17348_v37 = vld [vmem:[#allocation2 + $0x4a] sm:$0xff] }
 0xc7e   : > { %24798 = vmatmul.mubr.msk.f32.gmra.mrb[202].mxu1 %vm13063_vm3, %v32478_v31  ;;  %v17349_v31 = vld [vmem:[#allocation2 + $0x52] sm:$0xff] }
 0xc7f   : > { %24800 = vmatprep.mubr.msk.f32.mxu1 %vm13063_vm3, %v17060_v49 }
 0xc82   : > { %24801 = vmatmul.mubr.msk.f32.gmra.mrb[204].mxu1 %vm13063_vm3, %v17061_v59 }
 0xc83   : > { %24807 = vmatprep.mubr.msk.f32.mxu1 %vm13063_vm3, %v17345_v60 }
 0xc86   : > { %24808 = vmatmul.mubr.msk.f32.vlgmr.msra.gmra.mrb[182].mxu1 %vm13063_vm3, %v17346_v2 }
 0xc87   : > { %24810 = vmatprep.mubr.msk.f32.mxu1 %vm13063_vm3, %v17347_v11  ;;  %25370 = vmatpush3.bf16.msra.mxu1 %v25367_v16 }
 0xc88   : > { %25371 = vmatprep.subr.bf16.mxu1 %v33555_v25 }
 0xc8a   : > { %24811 = vmatmul.mubr.msk.f32.gmra.mrb[184].mxu1 %vm13063_vm3, %v17348_v37 }
 0xc8b   : > { %24813 = vmatprep.mubr.msk.f32.mxu1 %vm13063_vm3, %v17349_v31 }
 0xc8e   : > { %24814 = vmatmul.mubr.msk.f32.gmra.mrb[186].mxu1 %vm13063_vm3, %v17350_v0 }
 0xc8f   : > { %24816 = vmatprep.mubr.msk.f32.mxu1 %vm13063_vm3, %v17351_v19 }
 0xc92   : > { %24817 = vmatmul.mubr.msk.f32.gmra.mrb[188].mxu1 %vm13063_vm3, %v17352_v21 }
 0xc93   : > { %24819 = vmatprep.mubr.msk.f32.mxu1 %vm13063_vm3, %v17353_v36 }
 0xc96   : > { %24820 = vmatmul.mubr.msk.f32.gmra.mrb[190].mxu1 %vm13063_vm3, %v17354_v44 }
 0xc97   : > { %24822 = vmatprep.mubr.msk.f32.mxu1 %vm13063_vm3, %v17355_v58 }
 0xc9a   : > { %24823 = vmatmul.mubr.msk.f32.gmra.mrb[192].mxu1 %vm13063_vm3, %v17356_v20 }
 0xc9b   : > { %24825 = vmatprep.mubr.msk.f32.mxu1 %vm13063_vm3, %v17357_v26 }
 0xc9e   : > { %24826 = vmatmul.mubr.msk.f32.gmra.mrb[194].mxu1 %vm13063_vm3, %v17358_v15 }
 0xc9f   : > { %24828 = vmatprep.mubr.msk.f32.mxu1 %vm13063_vm3, %v17359_v53 }
 0xca2   : > { %24829 = vmatmul.mubr.msk.f32.gmra.mrb[196].mxu1 %vm13063_vm3, %v17360_v35 }
 0xca3   : > { %24831 = vmatprep.mubr.msk.f32.mxu1 %vm13063_vm3, %v17361_v52 }
 0xca6   : > { %24832 = vmatmul.mubr.msk.f32.gmra.mrb[198].mxu1 %vm13063_vm3, %v17362_v18 }
 0xca7   : > { %24834 = vmatprep.mubr.msk.f32.mxu1 %vm13063_vm3, %v33540_v10  ;;  %v17654_v10 = vld [vmem:[#allocation2 + $0x43] sm:$0xff] }
 0xcaa   : > { %24835 = vmatmul.mubr.msk.f32.gmra.mrb[200].mxu1 %vm13063_vm3, %v33541_v33  ;;  %v17655_v33 = vld [vmem:[#allocation2 + $0x4b] sm:$0xff] }
 0xcab   : > { %24837 = vmatprep.mubr.msk.f32.mxu1 %vm13063_vm3, %v32532_v6  ;;  %v17656_v6 = vld [vmem:[#allocation2 + $0x53] sm:$0xff] }
 0xcae   : > { %24838 = vmatmul.mubr.msk.f32.gmra.mrb[202].mxu1 %vm13063_vm3, %v32536_v48  ;;  %v17657_v48 = vld [vmem:[#allocation2 + $0x5b] sm:$0xff] }
 0xcaf   : > { %24840 = vmatprep.mubr.msk.f32.mxu1 %vm13063_vm3, %v17367_v45 }
 0xcb2   : > { %24841 = vmatmul.mubr.msk.f32.gmra.mrb[204].mxu1 %vm13063_vm3, %v17368_v61 }
 0xcb3   : > { %24847 = vmatprep.mubr.msk.f32.mxu1 %vm13063_vm3, %v17652_v24 }
 0xcb6   : > { %24848 = vmatmul.mubr.msk.f32.vlgmr.msra.gmra.mrb[182].mxu1 %vm13063_vm3, %v17653_v63 }
 0xcb7   : > { %24850 = vmatprep.mubr.msk.f32.mxu1 %vm13063_vm3, %v17654_v10 }
 0xcba   : > { %24851 = vmatmul.mubr.msk.f32.gmra.mrb[184].mxu1 %vm13063_vm3, %v17655_v33 }
 0xcbb   : > { %24853 = vmatprep.mubr.msk.f32.mxu1 %vm13063_vm3, %v17656_v6 }
 0xcbe   : > { %24854 = vmatmul.mubr.msk.f32.gmra.mrb[186].mxu1 %vm13063_vm3, %v17657_v48 }
 0xcbf   : > { %24856 = vmatprep.mubr.msk.f32.mxu1 %vm13063_vm3, %v17658_v32 }
 0xcc2   : > { %24857 = vmatmul.mubr.msk.f32.gmra.mrb[188].mxu1 %vm13063_vm3, %v17659_v46 }
 0xcc3   : > { %24859 = vmatprep.mubr.msk.f32.mxu1 %vm13063_vm3, %v17660_v22 }
 0xcc6   : > { %24860 = vmatmul.mubr.msk.f32.gmra.mrb[190].mxu1 %vm13063_vm3, %v17661_v27 }
 0xcc7   : > { %24862 = vmatprep.mubr.msk.f32.mxu1 %vm13063_vm3, %v17662_v62 }
 0xcca   : > { %24863 = vmatmul.mubr.msk.f32.gmra.mrb[192].mxu1 %vm13063_vm3, %v17663_v43 }
 0xccb   : > { %24865 = vmatprep.mubr.msk.f32.mxu1 %vm13063_vm3, %v17664_v3 }
 0xcce   : > { %24866 = vmatmul.mubr.msk.f32.gmra.mrb[194].mxu1 %vm13063_vm3, %v17665_v41 }
 0xccf   : > { %24868 = vmatprep.mubr.msk.f32.mxu1 %vm13063_vm3, %v17666_v54 }
 0xcd2   : > { %24869 = vmatmul.mubr.msk.f32.gmra.mrb[196].mxu1 %vm13063_vm3, %v17667_v55 }
 0xcd3   : > { %24871 = vmatprep.mubr.msk.f32.mxu1 %vm13063_vm3, %v17668_v23 }
 0xcd6   : > { %24872 = vmatmul.mubr.msk.f32.gmra.mrb[198].mxu1 %vm13063_vm3, %v17669_v8 }
 0xcd7   : > { %24874 = vmatprep.mubr.msk.f32.mxu1 %vm13063_vm3, %v32346_v5  ;;  %v32737_v5 = vld [vmem:[%s33249_s5] ss:$0 sm:$0xff] }
 0xcda   : > { %24875 = vmatmul.mubr.msk.f32.gmra.mrb[200].mxu1 %vm13063_vm3, %v32350_v38 }
 0xcdb   : > { %24877 = vmatprep.mubr.msk.f32.mxu1 %vm13063_vm3, %v32590_v29 }
 0xcde   : > { %24878 = vmatmul.mubr.msk.f32.gmra.mrb[202].mxu1 %vm13063_vm3, %v32594_v50 }
 0xcdf   : > { %24880 = vmatprep.mubr.msk.f32.mxu1 %vm13063_vm3, %v17674_v42 }
 0xce2   : > { %24881 = vmatmul.mubr.msk.f32.gmra.mrb[204].mxu1 %vm13063_vm3, %v17675_v30 }
 0xce3   : > { %20922 = vmatprep.mubr.msk.f32.mxu1 %vm12089_vm2, %v18015_v47 }
 0xd89   : > { %v24849_v38 = vpop.f32.mrb[182].mxu1 }
 0xd8a   : > { %v17967_v29 = vadd.f32 %v24849_v38, %v32737_v5  ;;  %v17816_v50 = vpop.f32.mrb[183].mxu1 }
 0xd8b   : > { %v17966_v13 = vadd.f32 %v32737_v5, %v17816_v50 }
 0xd8c   : > { %v17991_v34 = vmul.f32 %v17967_v29, %v17967_v29 }
 0xd8d   : > { %v17990_v1 = vmul.f32 %v17966_v13, %v17966_v13  ;;  %v24852_v28 = vpop.f32.mrb[184].mxu1 }
 0xd8e   : > { %v17969_v16 = vadd.f32 %v24852_v28, %v32737_v5  ;;  %v17826_v56 = vpop.f32.mrb[185].mxu1 }
 0xd8f   : > { %v25372_v9 = vpack.c.bf16 %v17991_v34, %v17990_v1  ;;  %v17968_v12 = vadd.f32 %v32737_v5, %v17826_v56 }
 0xd90   : > { %v17993_v17 = vmul.f32 %v17969_v16, %v17969_v16 }
 0xd91   : > { %v17992_v14 = vmul.f32 %v17968_v12, %v17968_v12  ;;  %v24855_v7 = vpop.f32.mrb[186].mxu1  ;;  %25373 = vmatpush1.bf16.msra.mxu1 %v25372_v9 }
 0xd92   : > { %v17971_v51 = vadd.f32 %v24855_v7, %v32737_v5  ;;  %v17836_v39 = vpop.f32.mrb[187].mxu1  ;;  %25374 = vmatprep.subr.bf16.mxu1 %v33555_v25 }
 0xd93   : > { %v25375_v57 = vpack.c.bf16 %v17993_v17, %v17992_v14  ;;  %v17970_v40 = vadd.f32 %v32737_v5, %v17836_v39 }
 0xd94   : > { %v17995_v4 = vmul.f32 %v17971_v51, %v17971_v51 }
 0xd95   : > { %v17994_v49 = vmul.f32 %v17970_v40, %v17970_v40  ;;  %v24858_v59 = vpop.f32.mrb[188].mxu1  ;;  %25376 = vmatpush1.bf16.msra.mxu1 %v25375_v57 }
 0xd96   : > { %v17973_v60 = vadd.f32 %v24858_v59, %v32737_v5  ;;  %v17846_v2 = vpop.f32.mrb[189].mxu1  ;;  %25377 = vmatprep.subr.bf16.mxu1 %v33555_v25  ;;  %v18173_v59 = vld [vmem:[%s33251_s7 + $0x48] sm:$0xff] }
 0xd97   : > { %v25378_v11 = vpack.c.bf16 %v17995_v4, %v17994_v49  ;;  %v17972_v37 = vadd.f32 %v32737_v5, %v17846_v2  ;;  %v18172_v49 = vld [vmem:[%s33251_s7 + $0x40] sm:$0xff] }
 0xd98   : > { %v17997_v31 = vmul.f32 %v17973_v60, %v17973_v60 }
 0xd99   : > { %v17996_v0 = vmul.f32 %v17972_v37, %v17972_v37  ;;  %v24861_v19 = vpop.f32.mrb[190].mxu1  ;;  %25379 = vmatpush1.bf16.msra.mxu1 %v25378_v11  ;;  %v25407_v11 = vpack.c.bf16 %v18173_v59, %v18172_v49  ;;  %v18381_v49 = vld [vmem:[%s33251_s7 + $0x98] sm:$0xff] }
 0xd9a   : > { %v17975_v21 = vadd.f32 %v24861_v19, %v32737_v5  ;;  %v17856_v36 = vpop.f32.mrb[191].mxu1  ;;  %25380 = vmatprep.subr.bf16.mxu1 %v33555_v25  ;;  %v18019_v19 = vld [vmem:[%s33250_s6 + $0x28] sm:$0xff] }
 0xd9b   : > { %v25381_v44 = vpack.c.bf16 %v17997_v31, %v17996_v0  ;;  %v17974_v58 = vadd.f32 %v32737_v5, %v17856_v36  ;;  %v18017_v31 = vld [vmem:[%s33250_s6 + $0x18] sm:$0xff]  ;;  %v18016_v0 = vld [vmem:[%s33250_s6 + $0x10] sm:$0xff] }
 0xd9c   : > { %v17999_v20 = vmul.f32 %v17975_v21, %v17975_v21  ;;  %v18018_v21 = vld [vmem:[%s33250_s6 + $0x20] sm:$0xff]  ;;  %v18021_v36 = vld [vmem:[%s33250_s6 + $0x38] sm:$0xff] }
 0xd9d   : > { %v17998_v26 = vmul.f32 %v17974_v58, %v17974_v58  ;;  %v24864_v15 = vpop.f32.mrb[192].mxu1  ;;  %25382 = vmatpush1.bf16.msra.mxu1 %v25381_v44  ;;  %v18020_v44 = vld [vmem:[%s33250_s6 + $0x30] sm:$0xff]  ;;  %v18023_v58 = vld [vmem:[%s33250_s6 + $0x48] sm:$0xff] }
 0xd9e   : > { %v17977_v53 = vadd.f32 %v24864_v15, %v32737_v5  ;;  %v17866_v35 = vpop.f32.mrb[193].mxu1  ;;  %25383 = vmatprep.subr.bf16.mxu1 %v33555_v25  ;;  %v18024_v15 = vld [vmem:[%s33250_s6 + $0x50] sm:$0xff] }
 0xd9f   : > { %v25384_v52 = vpack.c.bf16 %v17999_v20, %v17998_v26  ;;  %v17976_v18 = vadd.f32 %v32737_v5, %v17866_v35  ;;  %v18022_v20 = vld [vmem:[%s33250_s6 + $0x40] sm:$0xff]  ;;  %v18025_v26 = vld [vmem:[%s33250_s6 + $0x58] sm:$0xff] }
 0xda0   : > { %v18001_v45 = vmul.f32 %v17977_v53, %v17977_v53  ;;  %v18027_v53 = vld [vmem:[%s33250_s6 + $0x68] sm:$0xff]  ;;  %v18026_v35 = vld [vmem:[%s33250_s6 + $0x60] sm:$0xff] }
 0xda1   : > { %v18000_v61 = vmul.f32 %v17976_v18, %v17976_v18  ;;  %v24867_v24 = vpop.f32.mrb[194].mxu1  ;;  %25385 = vmatpush1.bf16.msra.mxu1 %v25384_v52  ;;  %v18174_v52 = vld [vmem:[%s33251_s7 + $0x50] sm:$0xff]  ;;  %v18175_v18 = vld [vmem:[%s33251_s7 + $0x58] sm:$0xff] }
 0xda2   : > { %v17979_v63 = vadd.f32 %v24867_v24, %v32737_v5  ;;  %v17876_v10 = vpop.f32.mrb[195].mxu1  ;;  %25386 = vmatprep.subr.bf16.mxu1 %v33555_v25  ;;  %v18177_v24 = vld [vmem:[%s33251_s7 + $0x68] sm:$0xff] }
 0xda3   : > { %v25387_v33 = vpack.c.bf16 %v18001_v45, %v18000_v61  ;;  %v17978_v6 = vadd.f32 %v32737_v5, %v17876_v10  ;;  %v25411_v45 = vpack.c.bf16 %v18175_v18, %v18174_v52  ;;  %v18176_v61 = vld [vmem:[%s33251_s7 + $0x60] sm:$0xff]  ;;  %v18178_v10 = vld [vmem:[%s33251_s7 + $0x70] sm:$0xff]  ;;  %v18496_v18 = vld [vmem:[%s33251_s7 + $0xe8] sm:$0xff] }
 0xda4   : > { %v18003_v48 = vmul.f32 %v17979_v63, %v17979_v63  ;;  %v25415_v63 = vpack.c.bf16 %v18177_v24, %v18176_v61  ;;  %v18495_v52 = vld [vmem:[%s33251_s7 + $0xe0] sm:$0xff] }
 0xda5   : > { %v18002_v32 = vmul.f32 %v17978_v6, %v17978_v6  ;;  %v24870_v46 = vpop.f32.mrb[196].mxu1  ;;  %25388 = vmatpush1.bf16.msra.mxu1 %v25387_v33  ;;  %v18179_v33 = vld [vmem:[%s33251_s7 + $0x78] sm:$0xff]  ;;  %v25463_v61 = vpack.c.bf16 %v18496_v18, %v18495_v52  ;;  %v19057_v52 = vld [vmem:[%s33251_s7 + $0x208] sm:$0xff] }
 0xda6   : > { %v17981_v22 = vadd.f32 %v24870_v46, %v32737_v5  ;;  %v17886_v27 = vpop.f32.mrb[197].mxu1  ;;  %25389 = vmatprep.subr.bf16.mxu1 %v33555_v25  ;;  %v25419_v6 = vpack.c.bf16 %v18179_v33, %v18178_v10  ;;  %v18498_v10 = vld [vmem:[%s33251_s7 + $0xf8] sm:$0xff] }
 0xda7   : > { %v25390_v62 = vpack.c.bf16 %v18003_v48, %v18002_v32  ;;  %v17980_v43 = vadd.f32 %v32737_v5, %v17886_v27  ;;  %v18160_v48 = vld [vmem:[%s33251_s7] sm:$0xff]  ;;  %v18161_v32 = vld [vmem:[%s33251_s7 + $0x8] sm:$0xff] }
 0xda8   : > { %v18005_v3 = vmul.f32 %v17981_v22, %v17981_v22  ;;  %v25423_v46 = vpack.c.bf16 %v18161_v32, %v18160_v48  ;;  %v18605_v48 = vld [vmem:[%s33251_s7 + $0x108] sm:$0xff] }
 0xda9   : > { %v18004_v41 = vmul.f32 %v17980_v43, %v17980_v43  ;;  %v24873_v54 = vpop.f32.mrb[198].mxu1  ;;  %25391 = vmatpush1.bf16.msra.mxu1 %v25390_v62 }
 0xdaa   : > { %v17983_v55 = vadd.f32 %v24873_v54, %v32737_v5  ;;  %v17896_v23 = vpop.f32.mrb[199].mxu1  ;;  %25392 = vmatprep.subr.bf16.mxu1 %v33555_v25 }
 0xdab   : > { %v25393_v8 = vpack.c.bf16 %v18005_v3, %v18004_v41  ;;  %v17982_v42 = vadd.f32 %v32737_v5, %v17896_v23  ;;  %v18162_v23 = vld [vmem:[%s33251_s7 + $0x10] sm:$0xff] }
 0xdac   : > { %v18007_v30 = vmul.f32 %v17983_v55, %v17983_v55 }
 0xdad   : > { %v18006_v47 = vmul.f32 %v17982_v42, %v17982_v42  ;;  %v24876_v38 = vpop.f32.mrb[200].mxu1  ;;  %25394 = vmatpush1.bf16.msra.mxu1 %v25393_v8  ;;  %v18163_v8 = vld [vmem:[%s33251_s7 + $0x18] sm:$0xff] }
 0xdae   : > { %v17985_v29 = vadd.f32 %v24876_v38, %v32737_v5  ;;  %v17906_v50 = vpop.f32.mrb[201].mxu1  ;;  %25395 = vmatprep.subr.bf16.mxu1 %v33555_v25 }
 0xdaf   : > { %v25396_v13 = vpack.c.bf16 %v18007_v30, %v18006_v47  ;;  %v17984_v34 = vadd.f32 %v32737_v5, %v17906_v50  ;;  %v25427_v30 = vpack.c.bf16 %v18163_v8, %v18162_v23  ;;  %v18165_v50 = vld [vmem:[%s33251_s7 + $0x28] sm:$0xff]  ;;  %v18717_v8 = vld [vmem:[%s33251_s7 + $0x140] sm:$0xff] }
 0xdb0   : > { %v18009_v1 = vmul.f32 %v17985_v29, %v17985_v29  ;;  %v18164_v29 = vld [vmem:[%s33251_s7 + $0x20] sm:$0xff] }
 0xdb1   : > { %v18008_v28 = vmul.f32 %v17984_v34, %v17984_v34  ;;  %v24879_v16 = vpop.f32.mrb[202].mxu1  ;;  %25397 = vmatpush1.bf16.msra.mxu1 %v25396_v13  ;;  %v25431_v34 = vpack.c.bf16 %v18165_v50, %v18164_v29  ;;  %v18721_v50 = vld [vmem:[%s33251_s7 + $0x160] sm:$0xff] }
 0xdb2   : > { %v17987_v56 = vadd.f32 %v24879_v16, %v32737_v5  ;;  %v17916_v9 = vpop.f32.mrb[203].mxu1  ;;  %25398 = vmatprep.subr.bf16.mxu1 %v33555_v25  ;;  %v18167_v16 = vld [vmem:[%s33251_s7 + $0x38] sm:$0xff] }
 0xdb3   : > { %v25399_v12 = vpack.c.bf16 %v18009_v1, %v18008_v28  ;;  %v17986_v17 = vadd.f32 %v32737_v5, %v17916_v9  ;;  %v18166_v28 = vld [vmem:[%s33251_s7 + $0x30] sm:$0xff] }
 0xdb4   : > { %v18011_v14 = vmul.f32 %v17987_v56, %v17987_v56 }
 0xdb5   : > { %v18010_v7 = vmul.f32 %v17986_v17, %v17986_v17  ;;  %v24882_v51 = vpop.f32.mrb[204].mxu1  ;;  %25400 = vmatpush1.bf16.msra.mxu1 %v25399_v12  ;;  %v25435_v12 = vpack.c.bf16 %v18167_v16, %v18166_v28  ;;  %v18723_v16 = vld [vmem:[%s33251_s7 + $0x170] sm:$0xff] }
 0xdb6   : > { %v17989_v39 = vadd.f32 %v24882_v51, %v32737_v5  ;;  %v17926_v57 = vpop.f32.mrb[205].mxu1  ;;  %25401 = vmatprep.subr.bf16.mxu1 %v33555_v25 }
 0xdb7   : > { %v25402_v40 = vpack.c.bf16 %v18011_v14, %v18010_v7  ;;  %v17988_v4 = vadd.f32 %v32737_v5, %v17926_v57  ;;  %v18014_v5 = vld [vmem:[%s33250_s6] sm:$0xff]  ;;  %v18379_v7 = vld [vmem:[%s33251_s7 + $0x88] sm:$0xff] }
 0xdb8   : > { %v18013_v60 = vmul.f32 %v17989_v39, %v17989_v39  ;;  %v18378_v14 = vld [vmem:[%s33251_s7 + $0x80] sm:$0xff] }
 0xdb9   : > { %v18012_v2 = vmul.f32 %v17988_v4, %v17988_v4  ;;  %25403 = vmatpush1.bf16.msra.mxu1 %v25402_v40  ;;  %v25439_v40 = vpack.c.bf16 %v18379_v7, %v18378_v14  ;;  %v18380_v4 = vld [vmem:[%s33251_s7 + $0x90] sm:$0xff]  ;;  %v18831_v14 = vld [vmem:[%s33251_s7 + $0x188] sm:$0xff] }
 0xdba   : > { %25404 = vmatprep.subr.bf16.mxu1 %v33555_v25  ;;  %v25443_v59 = vpack.c.bf16 %v18381_v49, %v18380_v4  ;;  %v18835_v4 = vld [vmem:[%s33251_s7 + $0x1a8] sm:$0xff] }
 0xdbb   : > { %v25405_v37 = vpack.c.bf16 %v18013_v60, %v18012_v2  ;;  %v18382_v2 = vld [vmem:[%s33251_s7 + $0xa0] sm:$0xff] }
 0xdbd   : > { %25406 = vmatpush1.bf16.msra.mxu1 %v25405_v37 }
 0xdbe   : > { %25408 = vmatprep.subr.bf16.mxu1 %v25407_v11 }
 0xdc0   : > { %18114 = vmatmul.mubr.f32.vlgmr.msra.gmra.mrb[206].mxu1 %v18014_v5 }
 0xdc1   : > { %20923 = vmatprep.mubr.msk.f32.mxu1 %vm12089_vm2, %v18017_v31  ;;  %25410 = vmatpush3.bf16.msra.mxu1 %v25407_v11  ;;  %v18383_v11 = vld [vmem:[%s33251_s7 + $0xa8] sm:$0xff]  ;;  %v18384_v31 = vld [vmem:[%s33251_s7 + $0xb0] sm:$0xff] }
 0xdc2   : > { %25412 = vmatprep.subr.bf16.mxu1 %v25411_v45  ;;  %v25447_v5 = vpack.c.bf16 %v18383_v11, %v18382_v2  ;;  %v18837_v2 = vld [vmem:[%s33251_s7 + $0x1b8] sm:$0xff] }
 0xdc4   : > { %18119 = vmatmul.mubr.f32.gmra.mrb[208].mxu1 %v18016_v0  ;;  %v18385_v0 = vld [vmem:[%s33251_s7 + $0xb8] sm:$0xff] }
 0xdc5   : > { %20924 = vmatprep.mubr.msk.f32.mxu1 %vm12089_vm2, %v18019_v19  ;;  %25414 = vmatpush3.bf16.msra.mxu1 %v25411_v45 }
 0xdc6   : > { %25416 = vmatprep.subr.bf16.mxu1 %v25415_v63 }
 0xdc8   : > { %18124 = vmatmul.mubr.f32.gmra.mrb[210].mxu1 %v18018_v21 }
 0xdc9   : > { %20925 = vmatprep.mubr.msk.f32.mxu1 %vm12089_vm2, %v18021_v36  ;;  %25418 = vmatpush3.bf16.msra.mxu1 %v25415_v63  ;;  %v25451_v36 = vpack.c.bf16 %v18385_v0, %v18384_v31  ;;  %v18497_v63 = vld [vmem:[%s33251_s7 + $0xf0] sm:$0xff]  ;;  %v18944_v31 = vld [vmem:[%s33251_s7 + $0x1c8] sm:$0xff] }
 0xdca   : > { %25420 = vmatprep.subr.bf16.mxu1 %v25419_v6  ;;  %v25467_v33 = vpack.c.bf16 %v18498_v10, %v18497_v63  ;;  %v19060_v10 = vld [vmem:[%s33251_s7 + $0x220] sm:$0xff] }
 0xdcc   : > { %18129 = vmatmul.mubr.f32.gmra.mrb[212].mxu1 %v18020_v44  ;;  %v18491_v44 = vld [vmem:[%s33251_s7 + $0xc0] sm:$0xff] }
 0xdcd   : > { %20926 = vmatprep.mubr.msk.f32.mxu1 %vm12089_vm2, %v18023_v58  ;;  %25422 = vmatpush3.bf16.msra.mxu1 %v25419_v6  ;;  %v18492_v58 = vld [vmem:[%s33251_s7 + $0xc8] sm:$0xff]  ;;  %v18604_v6 = vld [vmem:[%s33251_s7 + $0x100] sm:$0xff] }
 0xdce   : > { %25424 = vmatprep.subr.bf16.mxu1 %v25423_v46  ;;  %v25471_v32 = vpack.c.bf16 %v18605_v48, %v18604_v6 }
 0xdd0   : > { %18134 = vmatmul.mubr.f32.gmra.mrb[214].mxu1 %v18022_v20  ;;  %v25455_v20 = vpack.c.bf16 %v18492_v58, %v18491_v44  ;;  %v18947_v44 = vld [vmem:[%s33251_s7 + $0x1e0] sm:$0xff]  ;;  %v18948_v58 = vld [vmem:[%s33251_s7 + $0x1e8] sm:$0xff] }
 0xdd1   : > { %20927 = vmatprep.mubr.msk.f32.mxu1 %vm12089_vm2, %v18025_v26  ;;  %v18493_v26 = vld [vmem:[%s33251_s7 + $0xd0] sm:$0xff] }
 0xdd4   : > { %18139 = vmatmul.mubr.f32.gmra.mrb[216].mxu1 %v18024_v15  ;;  %v18494_v15 = vld [vmem:[%s33251_s7 + $0xd8] sm:$0xff] }
 0xdd5   : > { %20928 = vmatprep.mubr.msk.f32.mxu1 %vm12089_vm2, %v18027_v53  ;;  %v25459_v53 = vpack.c.bf16 %v18494_v15, %v18493_v26  ;;  %v18949_v15 = vld [vmem:[%s33251_s7 + $0x1f0] sm:$0xff] }
 0xdd8   : > { %18144 = vmatmul.mubr.f32.gmra.mrb[218].mxu1 %v18026_v35 }
 0xe93   : > { %v18115_v22 = vpop.f32.mrb[206].mxu1 }
 0xe94   : > { %18149 = vst.msk [vmem:[#allocation3] sm:$0xff] %vm12089_vm2, %v18115_v22  ;;  %v18117_v27 = vpop.f32.mrb[207].mxu1  ;;  %v18607_v22 = vld [vmem:[%s33251_s7 + $0x118] sm:$0xff] }
 0xe97   : > { %v18120_v62 = vpop.f32.mrb[208].mxu1 }
 0xe98   : > { %18150 = vst.msk [vmem:[#allocation3 + $0x8] sm:$0xff] %vm12089_vm2, %v18120_v62  ;;  %v18122_v43 = vpop.f32.mrb[209].mxu1  ;;  %v18608_v62 = vld [vmem:[%s33251_s7 + $0x120] sm:$0xff] }
 0xe99   : > { %v18609_v43 = vld [vmem:[%s33251_s7 + $0x128] sm:$0xff] }
 0xe9b   : > { %v18125_v3 = vpop.f32.mrb[210].mxu1  ;;  %v18156_v39 = vld [vmem:[#allocation3] sm:$0xff] }
 0xe9c   : > { %18151 = vst.msk [vmem:[#allocation3 + $0x10] sm:$0xff] %vm12089_vm2, %v18125_v3  ;;  %v18127_v41 = vpop.f32.mrb[211].mxu1  ;;  %v25479_v3 = vpack.c.bf16 %v18609_v43, %v18608_v62 }
 0xe9f   : > { %v18168_v54 = vld [vmem:[#allocation3 + $0x1] sm:$0xff]  ;;  %v18130_v55 = vpop.f32.mrb[212].mxu1 }
 0xea0   : > { %24899 = vmatprep.mubr.msk.f32.mxu1 %vm12089_vm2, %v18168_v54  ;;  %18152 = vst.msk [vmem:[#allocation3 + $0x18] sm:$0xff] %vm12089_vm2, %v18130_v55  ;;  %v18132_v42 = vpop.f32.mrb[213].mxu1  ;;  %v18157_v60 = vld [vmem:[#allocation3 + $0x8] sm:$0xff]  ;;  %v18610_v54 = vld [vmem:[%s33251_s7 + $0x130] sm:$0xff]  ;;  %v18611_v55 = vld [vmem:[%s33251_s7 + $0x138] sm:$0xff] }
 0xea1   : > { %v18374_v21 = vld [vmem:[#allocation3 + $0x2] sm:$0xff]  ;;  %v25483_v23 = vpack.c.bf16 %v18611_v55, %v18610_v54  ;;  %v18718_v42 = vld [vmem:[%s33251_s7 + $0x148] sm:$0xff] }
 0xea3   : > { %v32860_v47 = vld [vmem:[#allocation3 + $0x9] sm:$0xff]  ;;  %v18135_v38 = vpop.f32.mrb[214].mxu1 }
 0xea4   : > { %24900 = vmatmul.mubr.msk.f32.vlgmr.msra.gmra.mrb[220].mxu1 %vm12089_vm2, %v32860_v47  ;;  %18153 = vst.msk [vmem:[#allocation3 + $0x20] sm:$0xff] %vm12089_vm2, %v18135_v38  ;;  %v18137_v13 = vpop.f32.mrb[215].mxu1  ;;  %v32907_v37 = vld [vmem:[#allocation3 + $0x10] sm:$0xff]  ;;  %v18719_v38 = vld [vmem:[%s33251_s7 + $0x150] sm:$0xff] }
 0xea5   : > { %25426 = vmatpush3.bf16.msra.mxu1 %v25423_v46  ;;  %v32934_v35 = vld [vmem:[#allocation3 + $0xa] sm:$0xff]  ;;  %v18606_v46 = vld [vmem:[%s33251_s7 + $0x110] sm:$0xff] }
 0xea6   : > { %25428 = vmatprep.subr.bf16.mxu1 %v25427_v30  ;;  %v25475_v27 = vpack.c.bf16 %v18607_v22, %v18606_v46  ;;  %v18722_v13 = vld [vmem:[%s33251_s7 + $0x168] sm:$0xff]  ;;  %v19063_v46 = vld [vmem:[%s33251_s7 + $0x238] sm:$0xff] }
 0xea7   : > { %v32871_v1 = vld [vmem:[#allocation3 + $0x11] sm:$0xff]  ;;  %v18140_v56 = vpop.f32.mrb[216].mxu1 }
 0xea8   : > { %24902 = vmatprep.mubr.msk.f32.mxu1 %vm12089_vm2, %v32871_v1  ;;  %18154 = vst.msk [vmem:[#allocation3 + $0x28] sm:$0xff] %vm12089_vm2, %v18140_v56  ;;  %v18142_v9 = vpop.f32.mrb[217].mxu1  ;;  %v32917_v19 = vld [vmem:[#allocation3 + $0x18] sm:$0xff]  ;;  %v18724_v56 = vld [vmem:[%s33251_s7 + $0x178] sm:$0xff] }
 0xea9   : > { %25430 = vmatpush3.bf16.msra.mxu1 %v25427_v30  ;;  %v32944_v45 = vld [vmem:[#allocation3 + $0x12] sm:$0xff]  ;;  %v25487_v30 = vpack.c.bf16 %v18718_v42, %v18717_v8  ;;  %v25499_v9 = vpack.c.bf16 %v18724_v56, %v18723_v16  ;;  %v19258_v56 = vld [vmem:[%s33254_s10 + $0x18] sm:$0xff] }
 0xeaa   : > { %25432 = vmatprep.subr.bf16.mxu1 %v25431_v34  ;;  %v19257_v16 = vld [vmem:[%s33254_s10 + $0x10] sm:$0xff] }
 0xeab   : > { %v32882_v17 = vld [vmem:[#allocation3 + $0x19] sm:$0xff]  ;;  %v18145_v51 = vpop.f32.mrb[218].mxu1 }
 0xeac   : > { %24903 = vmatmul.mubr.msk.f32.gmra.mrb[222].mxu1 %vm12089_vm2, %v32882_v17  ;;  %18155 = vst.msk [vmem:[#allocation3 + $0x30] sm:$0xff] %vm12089_vm2, %v18145_v51  ;;  %v18147_v57 = vpop.f32.mrb[219].mxu1  ;;  %v32948_v24 = vld [vmem:[#allocation3 + $0x1a] sm:$0xff] }
 0xead   : > { %25434 = vmatpush3.bf16.msra.mxu1 %v25431_v34  ;;  %24921 = vmatprep.mubr.msk.f32.mxu1 %vm12089_vm2, %v18156_v39  ;;  %v32981_v41 = vld [vmem:[#allocation3 + $0x20] sm:$0xff]  ;;  %v25495_v34 = vpack.c.bf16 %v18722_v13, %v18721_v50  ;;  %v18832_v51 = vld [vmem:[%s33251_s7 + $0x190] sm:$0xff]  ;;  %v19256_v50 = vld [vmem:[%s33254_s10 + $0x8] sm:$0xff] }
 0xeae   : > { %25436 = vmatprep.subr.bf16.mxu1 %v25435_v12  ;;  %v18833_v39 = vld [vmem:[%s33251_s7 + $0x198] sm:$0xff] }
 0xeaf   : > { %v33015_v28 = vld [vmem:[#allocation3 + $0x21] sm:$0xff]  ;;  %v25507_v57 = vpack.c.bf16 %v18833_v39, %v18832_v51  ;;  %v19261_v51 = vld [vmem:[%s33254_s10 + $0x30] sm:$0xff] }
 0xeb0   : > { %v18829_v26 = vld [vmem:[#allocation3 + $0x28] sm:$0xff]  ;;  %v19262_v39 = vld [vmem:[%s33254_s10 + $0x38] sm:$0xff] }
 0xeb1   : > { %25438 = vmatpush3.bf16.msra.mxu1 %v25435_v12  ;;  %v18830_v12 = vld [vmem:[%s33251_s7 + $0x180] sm:$0xff] }
 0xeb2   : > { %25440 = vmatprep.subr.bf16.mxu1 %v25439_v40  ;;  %v25503_v7 = vpack.c.bf16 %v18831_v14, %v18830_v12  ;;  %v19259_v12 = vld [vmem:[%s33254_s10 + $0x20] sm:$0xff]  ;;  %v19260_v14 = vld [vmem:[%s33254_s10 + $0x28] sm:$0xff] }
 0xeb3   : > { %v18942_v48 = vld [vmem:[#allocation3 + $0x29] sm:$0xff] }
 0xeb4   : > { %24922 = vmatmul.mubr.msk.f32.vlgmr.msra.gmra.mrb[220].mxu1 %vm12089_vm2, %v18157_v60  ;;  %v19055_v22 = vld [vmem:[#allocation3 + $0x2a] sm:$0xff] }
 0xeb5   : > { %25442 = vmatpush3.bf16.msra.mxu1 %v25439_v40  ;;  %24924 = vmatprep.mubr.msk.f32.mxu1 %vm12089_vm2, %v32907_v37  ;;  %v18834_v40 = vld [vmem:[%s33251_s7 + $0x1a0] sm:$0xff] }
 0xeb6   : > { %25444 = vmatprep.subr.bf16.mxu1 %v25443_v59  ;;  %v25511_v49 = vpack.c.bf16 %v18835_v4, %v18834_v40  ;;  %v19263_v40 = vld [vmem:[%s33254_s10 + $0x40] sm:$0xff]  ;;  %v19264_v4 = vld [vmem:[%s33254_s10 + $0x48] sm:$0xff] }
 0xeb8   : > { %24925 = vmatmul.mubr.msk.f32.gmra.mrb[222].mxu1 %vm12089_vm2, %v32917_v19 }
 0xeb9   : > { %25446 = vmatpush3.bf16.msra.mxu1 %v25443_v59  ;;  %24943 = vmatprep.mubr.msk.f32.mxu1 %vm12089_vm2, %v18374_v21  ;;  %v33049_v59 = vld [vmem:[#allocation3 + $0x22] sm:$0xff]  ;;  %v18945_v21 = vld [vmem:[%s33251_s7 + $0x1d0] sm:$0xff] }
 0xeba   : > { %25448 = vmatprep.subr.bf16.mxu1 %v25447_v5 }
 0xebd   : > { %25450 = vmatpush3.bf16.msra.mxu1 %v25447_v5  ;;  %v18943_v5 = vld [vmem:[%s33251_s7 + $0x1c0] sm:$0xff] }
 0xebe   : > { %25452 = vmatprep.subr.bf16.mxu1 %v25451_v36  ;;  %v25519_v0 = vpack.c.bf16 %v18944_v31, %v18943_v5  ;;  %v19268_v5 = vld [vmem:[%s33254_s10 + $0x68] sm:$0xff] }
 0xec1   : > { %25454 = vmatpush3.bf16.msra.mxu1 %v25451_v36 }
 0xec2   : > { %25456 = vmatprep.subr.bf16.mxu1 %v25455_v20 }
 0xec4   : > { %24944 = vmatmul.mubr.msk.f32.vlgmr.msra.gmra.mrb[220].mxu1 %vm12089_vm2, %v32934_v35 }
 0xec5   : > { %25458 = vmatpush3.bf16.msra.mxu1 %v25455_v20  ;;  %24946 = vmatprep.mubr.msk.f32.mxu1 %vm12089_vm2, %v32944_v45  ;;  %v25527_v20 = vpack.c.bf16 %v18948_v58, %v18947_v44  ;;  %v19271_v58 = vld [vmem:[%s33255_s11] sm:$0x1] }
 0xec6   : > { %25460 = vmatprep.subr.bf16.mxu1 %v25459_v53 }
 0xec8   : > { %24947 = vmatmul.mubr.msk.f32.gmra.mrb[222].mxu1 %vm12089_vm2, %v32948_v24 }
 0xec9   : > { %25462 = vmatpush3.bf16.msra.mxu1 %v25459_v53  ;;  %24965 = vmatprep.mubr.msk.f32.mxu1 %vm12089_vm2, %v18157_v60  ;;  %v18836_v60 = vld [vmem:[%s33251_s7 + $0x1b0] sm:$0xff]  ;;  %v18950_v53 = vld [vmem:[%s33251_s7 + $0x1f8] sm:$0xff] }
 0xeca   : > { %25464 = vmatprep.subr.bf16.mxu1 %v25463_v61  ;;  %v25515_v11 = vpack.c.bf16 %v18837_v2, %v18836_v60  ;;  %v19266_v60 = vld [vmem:[%s33254_s10 + $0x58] sm:$0xff] }
 0xecd   : > { %25466 = vmatpush3.bf16.msra.mxu1 %v25463_v61  ;;  %v19058_v61 = vld [vmem:[%s33251_s7 + $0x210] sm:$0xff] }
 0xece   : > { %25468 = vmatprep.subr.bf16.mxu1 %v25467_v33 }
 0xed1   : > { %25470 = vmatpush3.bf16.msra.mxu1 %v25467_v33  ;;  %v19061_v33 = vld [vmem:[%s33251_s7 + $0x228] sm:$0xff] }
 0xed2   : > { %25472 = vmatprep.subr.bf16.mxu1 %v25471_v32  ;;  %v25543_v6 = vpack.c.bf16 %v19061_v33, %v19060_v10 }
 0xed4   : > { %24966 = vmatmul.mubr.msk.f32.vlgmr.msra.gmra.mrb[220].mxu1 %vm12089_vm2, %v32907_v37 }
 0xed5   : > { %25474 = vmatpush3.bf16.msra.mxu1 %v25471_v32  ;;  %24968 = vmatprep.mubr.msk.f32.mxu1 %vm12089_vm2, %v32917_v19  ;;  %v19062_v32 = vld [vmem:[%s33251_s7 + $0x230] sm:$0xff] }
 0xed6   : > { %25476 = vmatprep.subr.bf16.mxu1 %v25475_v27 }
 0xed8   : > { %24969 = vmatmul.mubr.msk.f32.gmra.mrb[222].mxu1 %vm12089_vm2, %v32981_v41 }
 0xed9   : > { %25478 = vmatpush3.bf16.msra.mxu1 %v25475_v27  ;;  %24987 = vmatprep.mubr.msk.f32.mxu1 %vm12089_vm2, %v32860_v47  ;;  %v18720_v47 = vld [vmem:[%s33251_s7 + $0x158] sm:$0xff]  ;;  %v27232_v27 = vmov 0.0  }
 0xeda   : > { %25480 = vmatprep.subr.bf16.mxu1 %v25479_v3  ;;  %v25491_v29 = vpack.c.bf16 %v18720_v47, %v18719_v38 }
 0xedd   : > { %25482 = vmatpush3.bf16.msra.mxu1 %v25479_v3 }
 0xede   : > { %25484 = vmatprep.subr.bf16.mxu1 %v25483_v23 }
 0xee1   : > { %25486 = vmatpush3.bf16.msra.mxu1 %v25483_v23 }
 0xee2   : > { %25488 = vmatprep.subr.bf16.mxu1 %v25487_v30 }
 0xee4   : > { %24988 = vmatmul.mubr.msk.f32.vlgmr.msra.gmra.mrb[220].mxu1 %vm12089_vm2, %v32871_v1 }
 0xee5   : > { %24990 = vmatprep.mubr.msk.f32.mxu1 %vm12089_vm2, %v32882_v17  ;;  %25490 = vmatpush3.bf16.msra.mxu1 %v25487_v30 }
 0xee6   : > { %25492 = vmatprep.subr.bf16.mxu1 %v25491_v29 }
 0xee8   : > { %24991 = vmatmul.mubr.msk.f32.gmra.mrb[222].mxu1 %vm12089_vm2, %v33015_v28 }
 0xee9   : > { %25494 = vmatpush3.bf16.msra.mxu1 %v25491_v29  ;;  %25009 = vmatprep.mubr.msk.f32.mxu1 %vm12089_vm2, %v32934_v35  ;;  %v19056_v35 = vld [vmem:[%s33251_s7 + $0x200] sm:$0xff] }
 0xeea   : > { %25496 = vmatprep.subr.bf16.mxu1 %v25495_v34  ;;  %v25535_v18 = vpack.c.bf16 %v19057_v52, %v19056_v35  ;;  %v19255_v29 = vld [vmem:[%s33254_s10] sm:$0xff] }
 0xeed   : > { %25498 = vmatpush3.bf16.msra.mxu1 %v25495_v34  ;;  %v19180_v34 = vld [vmem:[%s33253_s9] sm:$0x1] }
 0xeee   : > { %25500 = vmatprep.subr.bf16.mxu1 %v25499_v9 }
 0xef1   : > { %25502 = vmatpush3.bf16.msra.mxu1 %v25499_v9  ;;  %v25561_v9 = vpack.c.bf16 %v19258_v56, %v19257_v16 }
 0xef2   : > { %25504 = vmatprep.subr.bf16.mxu1 %v25503_v7 }
 0xef4   : > { %25010 = vmatmul.mubr.msk.f32.vlgmr.msra.gmra.mrb[220].mxu1 %vm12089_vm2, %v32944_v45 }
 0xef5   : > { %25012 = vmatprep.mubr.msk.f32.mxu1 %vm12089_vm2, %v32948_v24  ;;  %25506 = vmatpush3.bf16.msra.mxu1 %v25503_v7  ;;  %v25564_v7 = vpack.c.bf16 %v19260_v14, %v19259_v12 }
 0xef6   : > { %25508 = vmatprep.subr.bf16.mxu1 %v25507_v57 }
 0xef8   : > { %25013 = vmatmul.mubr.msk.f32.gmra.mrb[222].mxu1 %vm12089_vm2, %v33049_v59 }
 0xef9   : > { %25510 = vmatpush3.bf16.msra.mxu1 %v25507_v57  ;;  %25031 = vmatprep.mubr.msk.f32.mxu1 %vm12089_vm2, %v32907_v37  ;;  %v18946_v37 = vld [vmem:[%s33251_s7 + $0x1d8] sm:$0xff]  ;;  %v25567_v57 = vpack.c.bf16 %v19262_v39, %v19261_v51 }
 0xefa   : > { %25512 = vmatprep.subr.bf16.mxu1 %v25511_v49  ;;  %v25523_v36 = vpack.c.bf16 %v18946_v37, %v18945_v21  ;;  %v19270_v21 = vld [vmem:[%s33254_s10 + $0x78] sm:$0xff] }
 0xefd   : > { %25514 = vmatpush3.bf16.msra.mxu1 %v25511_v49  ;;  %v25570_v49 = vpack.c.bf16 %v19264_v4, %v19263_v40 }
 0xefe   : > { %25516 = vmatprep.subr.bf16.mxu1 %v25515_v11 }
 0xf01   : > { %25518 = vmatpush3.bf16.msra.mxu1 %v25515_v11  ;;  %v19267_v11 = vld [vmem:[%s33254_s10 + $0x60] sm:$0xff] }
 0xf02   : > { %25520 = vmatprep.subr.bf16.mxu1 %v25519_v0  ;;  %v25576_v31 = vpack.c.bf16 %v19268_v5, %v19267_v11 }
 0xf04   : > { %25032 = vmatmul.mubr.msk.f32.vlgmr.msra.gmra.mrb[220].mxu1 %vm12089_vm2, %v32917_v19  ;;  %v25531_v19 = vpack.c.bf16 %v18950_v53, %v18949_v15 }
 0xf05   : > { %25034 = vmatprep.mubr.msk.f32.mxu1 %vm12089_vm2, %v32981_v41  ;;  %25522 = vmatpush3.bf16.msra.mxu1 %v25519_v0  ;;  %v19269_v0 = vld [vmem:[%s33254_s10 + $0x70] sm:$0xff] }
 0xf06   : > { %25524 = vmatprep.subr.bf16.mxu1 %v25523_v36  ;;  %v25579_v37 = vpack.c.bf16 %v19270_v21, %v19269_v0 }
 0xf08   : > { %25035 = vmatmul.mubr.msk.f32.gmra.mrb[222].mxu1 %vm12089_vm2, %v18829_v26 }
 0xf09   : > { %25526 = vmatpush3.bf16.msra.mxu1 %v25523_v36  ;;  %25053 = vmatprep.mubr.msk.f32.mxu1 %vm12089_vm2, %v32871_v1  ;;  %v19059_v1 = vld [vmem:[%s33251_s7 + $0x218] sm:$0xff] }
 0xf0a   : > { %25528 = vmatprep.subr.bf16.mxu1 %v25527_v20  ;;  %v25539_v63 = vpack.c.bf16 %v19059_v1, %v19058_v61 }
 0xf0d   : > { %25530 = vmatpush3.bf16.msra.mxu1 %v25527_v20 }
 0xf0e   : > { %25532 = vmatprep.subr.bf16.mxu1 %v25531_v19 }
 0xf11   : > { %25534 = vmatpush3.bf16.msra.mxu1 %v25531_v19 }
 0xf12   : > { %25536 = vmatprep.subr.bf16.mxu1 %v25535_v18 }
 0xf14   : > { %25054 = vmatmul.mubr.msk.f32.vlgmr.msra.gmra.mrb[220].mxu1 %vm12089_vm2, %v32882_v17  ;;  %v25547_v17 = vpack.c.bf16 %v19063_v46, %v19062_v32 }
 0xf15   : > { %25056 = vmatprep.mubr.msk.f32.mxu1 %vm12089_vm2, %v33015_v28  ;;  %25538 = vmatpush3.bf16.msra.mxu1 %v25535_v18  ;;  %v25558_v28 = vpack.c.bf16 %v19256_v50, %v19255_v29 }
 0xf16   : > { %25540 = vmatprep.subr.bf16.mxu1 %v25539_v63 }
 0xf18   : > { %25057 = vmatmul.mubr.msk.f32.gmra.mrb[222].mxu1 %vm12089_vm2, %v18942_v48 }
 0xf19   : > { %25542 = vmatpush3.bf16.msra.mxu1 %v25539_v63  ;;  %25075 = vmatprep.mubr.msk.f32.mxu1 %vm12089_vm2, %v32944_v45  ;;  %v20965_v45 = vld [vmem:[%s33252_s8] ss:$0 sm:$0xff] }
 0xf1a   : > { %25544 = vmatprep.subr.bf16.mxu1 %v25543_v6 }
 0xf1d   : > { %25546 = vmatpush3.bf16.msra.mxu1 %v25543_v6 }
 0xf1e   : > { %25548 = vmatprep.subr.bf16.mxu1 %v25547_v17 }
 0xf21   : > { %25550 = vmatpush3.bf16.msra.mxu1 %v25547_v17 }
 0xf22   : > { %25551 = vmatprep.subr.bf16.mxu1 %v33555_v25 }
 0xf24   : > { %25076 = vmatmul.mubr.msk.f32.vlgmr.msra.gmra.mrb[220].mxu1 %vm12089_vm2, %v32948_v24 }
 0xf25   : > { %25078 = vmatprep.mubr.msk.f32.mxu1 %vm12089_vm2, %v33049_v59  ;;  %v19265_v59 = vld [vmem:[%s33254_s10 + $0x50] sm:$0xff] }
 0xf26   : > { %v25573_v2 = vpack.c.bf16 %v19266_v60, %v19265_v59 }
 0xf28   : > { %25079 = vmatmul.mubr.msk.f32.gmra.mrb[222].mxu1 %vm12089_vm2, %v19055_v22 }
 0xf29   : > { %25089 = vmatprep.mubr.msk.f32.mxu1 %vm27231_vm4, %v27232_v27 }
 0xff7   : > { %v25077_v62 = vpop.f32.mrb[220].mxu1 }
 0xff8   : > { %v19173_v43 = vadd.f32 %v25077_v62, %v20965_v45  ;;  %v19142_v3 = vpop.f32.mrb[221].mxu1 }
 0xff9   : > { %v19172_v41 = vadd.f32 %v20965_v45, %v19142_v3 }
 0xffa   : > { %v19177_v54 = vmul.f32 %v19173_v43, %v19173_v43 }
 0xffb   : > { %v19176_v24 = vmul.f32 %v19172_v41, %v19172_v41  ;;  %v25080_v55 = vpop.f32.mrb[222].mxu1 }
 0xffc   : > { %v19175_v23 = vadd.f32 %v25080_v55, %v20965_v45  ;;  %v19152_v8 = vpop.f32.mrb[223].mxu1 }
 0xffd   : > { %v25552_v42 = vpack.c.bf16 %v19177_v54, %v19176_v24  ;;  %v19174_v30 = vadd.f32 %v20965_v45, %v19152_v8 }
 0xffe   : > { %v19179_v38 = vmul.f32 %v19175_v23, %v19175_v23 }
 0xfff   : > { %v19178_v47 = vmul.f32 %v19174_v30, %v19174_v30  ;;  %25553 = vmatpush3.bf16.msra.mxu1 %v25552_v42 }
0x1000   : > { %25554 = vmatprep.subr.bf16.mxu1 %v33555_v25 }
0x1001   : > { %v25555_v13 = vpack.c.bf16 %v19179_v38, %v19178_v47 }
0x1003   : > { %25556 = vmatpush3.bf16.msra.mxu1 %v25555_v13 }
0x1004   : > { %25557 = vmatprep.subr.bf16.mxu1 %v33555_v25 }
0x1006   : > { %25090 = vmatmul.mubr.msk.f32.vlgmr.msra.gmra.mrb[224].mxu1 %vm19181_vm5, %v19180_v34 }
0x1007   : > { %25559 = vmatpush3.bf16.msra.mxu1 %v25558_v28  ;;  %25124 = vmatprep.mubr.msk.f32.mxu1 %vm27231_vm4, %v27232_v27 }
0x1008   : > { %25560 = vmatprep.subr.bf16.mxu1 %v33555_v25 }
0x100b   : > { %25562 = vmatpush3.bf16.msra.mxu1 %v25561_v9 }
0x100c   : > { %25563 = vmatprep.subr.bf16.mxu1 %v33555_v25 }
0x100f   : > { %25565 = vmatpush3.bf16.msra.mxu1 %v25564_v7 }
0x1010   : > { %25566 = vmatprep.subr.bf16.mxu1 %v33555_v25 }
0x1013   : > { %25568 = vmatpush3.bf16.msra.mxu1 %v25567_v57 }
0x1014   : > { %25569 = vmatprep.subr.bf16.mxu1 %v33555_v25 }
0x1017   : > { %25571 = vmatpush3.bf16.msra.mxu1 %v25570_v49 }
0x1018   : > { %25572 = vmatprep.subr.bf16.mxu1 %v33555_v25 }
0x101b   : > { %25574 = vmatpush3.bf16.msra.mxu1 %v25573_v2 }
0x101c   : > { %25575 = vmatprep.subr.bf16.mxu1 %v33555_v25 }
0x101f   : > { %25577 = vmatpush3.bf16.msra.mxu1 %v25576_v31 }
0x1020   : > { %25578 = vmatprep.subr.bf16.mxu1 %v33555_v25 }
0x1023   : > { %25580 = vmatpush3.bf16.msra.mxu1 %v25579_v37 }
0x10d9   : > { %v19251_v36 = vpop.f32.mrb[224].mxu1 }
0x10da   : > { %v25091_v44 = vpop.f32.mrb[225].mxu1  ;;  %25125 = vmatmul.mubr.f32.vlgmr.msra.gmra.mrb[226].mxu1 %v19251_v36 }
0x11ad   : > { %v19338_v20 = vpop.f32.mrb[226].mxu1 }
0x11ae   : > { %v19339_v26 = vadd.f32 %v19338_v20, %v19271_v58  ;;  %v25126_v15 = vpop.f32.mrb[227].mxu1 }
0x11b0   : > { %19342 = vst [vmem:[%s405_s15] sm:$0x1] %v19339_v26 }
0x11b1   : > { %27179 = shalt.err (!%p27176_p3)
}
0x11b2   : > { %s27180_s20 = scalar_lea.hbm %s33202_s29, 16  ;;  %s27184_s17 = scalar_lea.hbm %s33256_s12, 32 }
0x11b3   : > { %p27181_p4 = scmp.ne.s32.totalorder %s33202_s29, %s27180_s20  ;;  %p27185_p9 = scmp.lt.u32.totalorder %s33202_s29, %s33256_s12 }
0x11b4   : > { %p27186_p10 = scmp.lt.u32.totalorder %s27184_s17, %s27180_s20  ;;  %p27188_p12 = scmp.lt.u32.totalorder %s27180_s20, %s33202_s29 }
0x11b5   : > { %p27182_p7 = pnand %p27181_p4, %p27337_p5 }
0x11b6   : > { %p27187_p11 = por %p27186_p10, %p27185_p9 }
0x11b7   : > { %p27183_p8 = pneg %p27182_p7 }
0x11b8   : > { %p27189_p13 = por %p27188_p12, %p27187_p11 }
0x11ba   : > { %p27190_p0 = pnand %p27189_p13, %p27183_p8 }
0x11bc   : > { %27193 = shalt.err (!%p27190_p0)
}
0x11bd   : > { %27122 = dma.vmem_to_hbm [thread:$0]  (%p27337_p5), %s33204_s16, 16, %s33202_s29, %s19344_s19  }
0x11be PF: > { %p27128_p1 = scmp.ge.s32.totalorder %s27228_s24, 2  ;;  %s19368_s1 = sand.u32 1, %s27216_s21  }
0x11bf   : > { %s19369_s26 = scalar_lea.sflag [#allocation5], %s19368_s1 }
0x11c0   : > { %p27125_p2 = pnand %p27128_p1, %p27341_p6 }
0x11c2   : > { %27211 = dma.done.wait (!%p27125_p2), %s19369_s26, 16  }
0x11c3   : > { %27213 = vsyncadd (!%p27125_p2), %s19369_s26, 4294967280  ;;  %p22_p3 = scmp.ge.s32.totalorder %s27324_s27, 4   ;;  %s33556_s21 = smov %s27220_s22 }
0x11c4   : > { %s33557_s22 = smov %s27224_s23  ;;  %s33558_s23 = smov %s27335_s30 }
0x11c5   : > { %s33559_s24 = smov %s27324_s27  ;;  %24 = sbr.rel (!%p22_p3) target bundleno = 6 (0x6), region = 103 }
0x11cc   :  { %19373 = vsyncpa [#allocation5], 1 }
0x11cd   :  { %19375 = vsyncpa [#allocation5 + $0x1], 1 }

</bundles_post_ra>
